<compile_context>
chip_gen: v7x
topology: tpu7x:2x2x1
jax: 0.10.0
libtpu: 0.0.40
codegen_flags: <defaults>
</compile_context>

<pallas_src>
from functools import partial

import jax
import jax.numpy as jnp
import numpy as np
from jax.experimental import pallas as pl
from jax.experimental.pallas import tpu as pltpu

KH = KW = 3          # conv kernel size
EPS = 1e-5           # BatchNorm2d default eps


def conv_bn_relu_kernel(w_ref, b_ref, g_ref, beta_ref, x_ref, o_ref,
                        *, cout, h_out, w_out):
    """Single grid step: all `cout` channels of conv3x3 + BN(train) + ReLU.

    w_ref:    SMEM (cout*9,)   flattened 3x3 conv weights (Cin = 1)
    b_ref:    SMEM (cout,)     conv bias
    g_ref:    SMEM (cout,)     BN gamma
    beta_ref: SMEM (cout,)     BN beta
    x_ref:    VMEM (1, 1, H, W)
    o_ref:    VMEM (1, cout, h_out, w_out)
    """
    x = x_ref[0, 0]                                          # (H, W) plane

    # Hoist the shifted-slice views once and reuse them for every channel
    # (JAX does not CSE these if they are re-expressed inside the loop):
    # 3 lane-shifted copies (dx), then cheap sublane slices per dy.
    xcols = [x[:, dx:dx + w_out] for dx in range(KW)]        # 3 lane shifts
    taps = [xcols[dx][dy:dy + h_out, :]                      # 9 (h_out, w_out) views
            for dy in range(KH) for dx in range(KW)]

    inv_n = 1.0 / float(h_out * w_out)

    # Fully unrolled channel loop inside ONE pipeline step: no per-channel
    # grid overhead, one writeback DMA for the whole output slab.
    for c in range(cout):
        acc = b_ref[c] + w_ref[c * KH * KW] * taps[0]
        for k in range(1, KH * KW):
            acc = acc + w_ref[c * KH * KW + k] * taps[k]

        # BatchNorm2d in training mode: per-channel batch stats over (N,H,W);
        # N == 1 here, biased variance (as PyTorch uses for normalization).
        mean = jnp.sum(acc) * inv_n
        centered = acc - mean
        var = jnp.sum(centered * centered) * inv_n
        y = centered * jax.lax.rsqrt(var + EPS) * g_ref[c] + beta_ref[c]

        # ReLU
        o_ref[0, c] = jnp.maximum(y, 0.0)


def fused_conv_bn_relu(x, w, b, gamma, beta):
    """x: (1, 1, H, W) f32; w: (Cout, 1, 3, 3); b/gamma/beta: (Cout,)."""
    n, cin, h, wd = x.shape
    assert n == 1 and cin == 1
    cout = w.shape[0]
    h_out, w_out = h - KH + 1, wd - KW + 1
    w_flat = w.reshape(cout * KH * KW).astype(jnp.float32)   # 1-D SMEM, no 2-D padding

    kernel = partial(conv_bn_relu_kernel, cout=cout, h_out=h_out, w_out=w_out)
    return pl.pallas_call(
        kernel,
        out_shape=jax.ShapeDtypeStruct((n, cout, h_out, w_out), jnp.float32),
        grid=(1,),                                           # single pipeline step
        in_specs=[
            pl.BlockSpec(memory_space=pltpu.MemorySpace.SMEM),   # w_flat (144,)
            pl.BlockSpec(memory_space=pltpu.MemorySpace.SMEM),   # bias
            pl.BlockSpec(memory_space=pltpu.MemorySpace.SMEM),   # gamma
            pl.BlockSpec(memory_space=pltpu.MemorySpace.SMEM),   # beta
            pl.BlockSpec((1, 1, h, wd), lambda i: (0, 0, 0, 0)),  # x (whole plane)
        ],
        out_specs=pl.BlockSpec((n, cout, h_out, w_out), lambda i: (0, 0, 0, 0)),
        compiler_params=pltpu.CompilerParams(
            dimension_semantics=("arbitrary",)),
    )(w_flat, b.astype(jnp.float32), gamma.astype(jnp.float32),
      beta.astype(jnp.float32), x.astype(jnp.float32))


def reference(x, w, b, gamma, beta):
    """Pure-JAX reference: conv2d (valid) -> training-mode BN -> relu."""
    y = jax.lax.conv_general_dilated(
        x, w, window_strides=(1, 1), padding="VALID",
        dimension_numbers=("NCHW", "OIHW", "NCHW"))
    y = y + b[None, :, None, None]
    mean = jnp.mean(y, axis=(0, 2, 3), keepdims=True)
    var = jnp.mean((y - mean) ** 2, axis=(0, 2, 3), keepdims=True)
    yn = (y - mean) * jax.lax.rsqrt(var + EPS)
    yn = yn * gamma[None, :, None, None] + beta[None, :, None, None]
    return jnp.maximum(yn, 0.0)


if __name__ == "__main__":
    key = jax.random.PRNGKey(0)
    kx, kw, kb = jax.random.split(key, 3)

    # Small shapes consistent with the module: N=1, Cin=1, spatial plane.
    H, W = 24, 40
    COUT = 16
    x = jax.random.normal(kx, (1, 1, H, W), dtype=jnp.float32)

    # Deterministic synthetic parameters (Conv2d(1,16,3) + BatchNorm2d(16)).
    w = 0.1 * jax.random.normal(kw, (COUT, 1, KH, KW), dtype=jnp.float32)
    b = 0.1 * jax.random.normal(kb, (COUT,), dtype=jnp.float32)
    gamma = jnp.ones((COUT,), jnp.float32)    # BN default init
    beta = jnp.zeros((COUT,), jnp.float32)

    out = fused_conv_bn_relu(x, w, b, gamma, beta)
    out = jax.block_until_ready(out)

    ref = reference(x, w, b, gamma, beta)
    np.testing.assert_allclose(np.asarray(out), np.asarray(ref), atol=1e-4, rtol=1e-4)

    print("KERNEL_OK")
</pallas_src>

<mosaic_0001>
module attributes {stable_mosaic.version = 11 : i64} {
  func.func @conv_bn_relu_kernel(%arg0: i32, %arg1: memref<144xf32, #tpu.memory_space<smem>>, %arg2: memref<16xf32, #tpu.memory_space<smem>>, %arg3: memref<16xf32, #tpu.memory_space<smem>>, %arg4: memref<16xf32, #tpu.memory_space<smem>>, %arg5: memref<1x1x24x40xf32, #tpu.memory_space<vmem>>, %arg6: memref<1x16x22x38xf32, #tpu.memory_space<vmem>>) attributes {dimension_semantics = [#tpu.dimension_semantics<arbitrary>], iteration_bounds = array<i64: 1>, scalar_prefetch = 0 : i64, scratch_operands = 0 : i64, tpu.core_type = #tpu.core_type<tc>, window_params = [{transform_indices = @transform_0, window_bounds = array<i64: 144>}, {transform_indices = @transform_1, window_bounds = array<i64: 16>}, {transform_indices = @transform_2, window_bounds = array<i64: 16>}, {transform_indices = @transform_3, window_bounds = array<i64: 16>}, {pipeline_mode = #tpu.pipeline_mode<synchronous>, transform_indices = @transform_4, window_bounds = array<i64: 1, 1, 24, 40>}, {pipeline_mode = #tpu.pipeline_mode<synchronous>, transform_indices = @transform_5, window_bounds = array<i64: 1, 16, 22, 38>}]} {
    %c0 = arith.constant 0 : index
    %c0_0 = arith.constant 0 : index
    %c0_1 = arith.constant 0 : index
    %c0_2 = arith.constant 0 : index
    %0 = vector.load %arg5[%c0, %c0_0, %c0_1, %c0_2] : memref<1x1x24x40xf32, #tpu.memory_space<vmem>>, vector<1x1x24x40xf32>
    %1 = vector.shape_cast %0 : vector<1x1x24x40xf32> to vector<24x40xf32>
    %2 = vector.extract_strided_slice %1 {offsets = [0, 0], sizes = [24, 38], strides = [1, 1]} : vector<24x40xf32> to vector<24x38xf32>
    %3 = vector.extract_strided_slice %1 {offsets = [0, 1], sizes = [24, 38], strides = [1, 1]} : vector<24x40xf32> to vector<24x38xf32>
    %4 = vector.extract_strided_slice %1 {offsets = [0, 2], sizes = [24, 38], strides = [1, 1]} : vector<24x40xf32> to vector<24x38xf32>
    %5 = vector.extract_strided_slice %2 {offsets = [0, 0], sizes = [22, 38], strides = [1, 1]} : vector<24x38xf32> to vector<22x38xf32>
    %6 = vector.extract_strided_slice %3 {offsets = [0, 0], sizes = [22, 38], strides = [1, 1]} : vector<24x38xf32> to vector<22x38xf32>
    %7 = vector.extract_strided_slice %4 {offsets = [0, 0], sizes = [22, 38], strides = [1, 1]} : vector<24x38xf32> to vector<22x38xf32>
    %8 = vector.extract_strided_slice %2 {offsets = [1, 0], sizes = [22, 38], strides = [1, 1]} : vector<24x38xf32> to vector<22x38xf32>
    %9 = vector.extract_strided_slice %3 {offsets = [1, 0], sizes = [22, 38], strides = [1, 1]} : vector<24x38xf32> to vector<22x38xf32>
    %10 = vector.extract_strided_slice %4 {offsets = [1, 0], sizes = [22, 38], strides = [1, 1]} : vector<24x38xf32> to vector<22x38xf32>
    %11 = vector.extract_strided_slice %2 {offsets = [2, 0], sizes = [22, 38], strides = [1, 1]} : vector<24x38xf32> to vector<22x38xf32>
    %12 = vector.extract_strided_slice %3 {offsets = [2, 0], sizes = [22, 38], strides = [1, 1]} : vector<24x38xf32> to vector<22x38xf32>
    %13 = vector.extract_strided_slice %4 {offsets = [2, 0], sizes = [22, 38], strides = [1, 1]} : vector<24x38xf32> to vector<22x38xf32>
    %c0_3 = arith.constant 0 : index
    %14 = memref.load %arg2[%c0_3] : memref<16xf32, #tpu.memory_space<smem>>
    %c0_4 = arith.constant 0 : index
    %15 = memref.load %arg1[%c0_4] : memref<144xf32, #tpu.memory_space<smem>>
    %16 = vector.broadcast %15 : f32 to vector<22x38xf32>
    %17 = arith.mulf %16, %5 : vector<22x38xf32>
    %18 = vector.broadcast %14 : f32 to vector<22x38xf32>
    %19 = arith.addf %18, %17 : vector<22x38xf32>
    %c1 = arith.constant 1 : index
    %20 = memref.load %arg1[%c1] : memref<144xf32, #tpu.memory_space<smem>>
    %21 = vector.broadcast %20 : f32 to vector<22x38xf32>
    %22 = arith.mulf %21, %6 : vector<22x38xf32>
    %23 = arith.addf %19, %22 : vector<22x38xf32>
    %c2 = arith.constant 2 : index
    %24 = memref.load %arg1[%c2] : memref<144xf32, #tpu.memory_space<smem>>
    %25 = vector.broadcast %24 : f32 to vector<22x38xf32>
    %26 = arith.mulf %25, %7 : vector<22x38xf32>
    %27 = arith.addf %23, %26 : vector<22x38xf32>
    %c3 = arith.constant 3 : index
    %28 = memref.load %arg1[%c3] : memref<144xf32, #tpu.memory_space<smem>>
    %29 = vector.broadcast %28 : f32 to vector<22x38xf32>
    %30 = arith.mulf %29, %8 : vector<22x38xf32>
    %31 = arith.addf %27, %30 : vector<22x38xf32>
    %c4 = arith.constant 4 : index
    %32 = memref.load %arg1[%c4] : memref<144xf32, #tpu.memory_space<smem>>
    %33 = vector.broadcast %32 : f32 to vector<22x38xf32>
    %34 = arith.mulf %33, %9 : vector<22x38xf32>
    %35 = arith.addf %31, %34 : vector<22x38xf32>
    %c5 = arith.constant 5 : index
    %36 = memref.load %arg1[%c5] : memref<144xf32, #tpu.memory_space<smem>>
    %37 = vector.broadcast %36 : f32 to vector<22x38xf32>
    %38 = arith.mulf %37, %10 : vector<22x38xf32>
    %39 = arith.addf %35, %38 : vector<22x38xf32>
    %c6 = arith.constant 6 : index
    %40 = memref.load %arg1[%c6] : memref<144xf32, #tpu.memory_space<smem>>
    %41 = vector.broadcast %40 : f32 to vector<22x38xf32>
    %42 = arith.mulf %41, %11 : vector<22x38xf32>
    %43 = arith.addf %39, %42 : vector<22x38xf32>
    %c7 = arith.constant 7 : index
    %44 = memref.load %arg1[%c7] : memref<144xf32, #tpu.memory_space<smem>>
    %45 = vector.broadcast %44 : f32 to vector<22x38xf32>
    %46 = arith.mulf %45, %12 : vector<22x38xf32>
    %47 = arith.addf %43, %46 : vector<22x38xf32>
    %c8 = arith.constant 8 : index
    %48 = memref.load %arg1[%c8] : memref<144xf32, #tpu.memory_space<smem>>
    %49 = vector.broadcast %48 : f32 to vector<22x38xf32>
    %50 = arith.mulf %49, %13 : vector<22x38xf32>
    %51 = arith.addf %47, %50 : vector<22x38xf32>
    %52 = vector.shape_cast %51 : vector<22x38xf32> to vector<1x22x38xf32>
    %cst = arith.constant dense<0.000000e+00> : vector<1xf32>
    %53 = vector.multi_reduction <add>, %52, %cst [1, 2] : vector<1x22x38xf32> to vector<1xf32>
    %54 = vector.shape_cast %53 : vector<1xf32> to vector<1x1x1xf32>
    %55 = vector.extract %54[0, 0, 0] : f32 from vector<1x1x1xf32>
    %cst_5 = arith.constant 0.0011961722 : f32
    %56 = arith.mulf %55, %cst_5 : f32
    %57 = vector.broadcast %56 : f32 to vector<22x38xf32>
    %58 = arith.subf %51, %57 : vector<22x38xf32>
    %59 = arith.mulf %58, %58 : vector<22x38xf32>
    %60 = vector.shape_cast %59 : vector<22x38xf32> to vector<1x22x38xf32>
    %cst_6 = arith.constant dense<0.000000e+00> : vector<1xf32>
    %61 = vector.multi_reduction <add>, %60, %cst_6 [1, 2] : vector<1x22x38xf32> to vector<1xf32>
    %62 = vector.shape_cast %61 : vector<1xf32> to vector<1x1x1xf32>
    %63 = vector.extract %62[0, 0, 0] : f32 from vector<1x1x1xf32>
    %cst_7 = arith.constant 0.0011961722 : f32
    %64 = arith.mulf %63, %cst_7 : f32
    %cst_8 = arith.constant 9.99999974E-6 : f32
    %65 = arith.addf %64, %cst_8 : f32
    %66 = math.rsqrt %65 : f32
    %67 = vector.broadcast %66 : f32 to vector<22x38xf32>
    %68 = arith.mulf %58, %67 : vector<22x38xf32>
    %c0_9 = arith.constant 0 : index
    %69 = memref.load %arg3[%c0_9] : memref<16xf32, #tpu.memory_space<smem>>
    %70 = vector.broadcast %69 : f32 to vector<22x38xf32>
    %71 = arith.mulf %68, %70 : vector<22x38xf32>
    %c0_10 = arith.constant 0 : index
    %72 = memref.load %arg4[%c0_10] : memref<16xf32, #tpu.memory_space<smem>>
    %73 = vector.broadcast %72 : f32 to vector<22x38xf32>
    %74 = arith.addf %71, %73 : vector<22x38xf32>
    %cst_11 = arith.constant 0.000000e+00 : f32
    %75 = vector.broadcast %cst_11 : f32 to vector<22x38xf32>
    %76 = arith.maximumf %74, %75 : vector<22x38xf32>
    %c0_12 = arith.constant 0 : index
    %c0_13 = arith.constant 0 : index
    %c0_14 = arith.constant 0 : index
    %c0_15 = arith.constant 0 : index
    %77 = vector.load %arg6[%c0_12, %c0_13, %c0_14, %c0_15] : memref<1x16x22x38xf32, #tpu.memory_space<vmem>>, vector<1x1x22x38xf32>
    %78 = vector.shape_cast %77 : vector<1x1x22x38xf32> to vector<22x38xf32>
    %79 = vector.shape_cast %76 : vector<22x38xf32> to vector<1x1x22x38xf32>
    tpu.vector_store %arg6[%c0_12, %c0_13, %c0_14, %c0_15], %79 {strides = array<i32>} : memref<1x16x22x38xf32, #tpu.memory_space<vmem>>, vector<1x1x22x38xf32>,
    %c1_16 = arith.constant 1 : index
    %80 = memref.load %arg2[%c1_16] : memref<16xf32, #tpu.memory_space<smem>>
    %c9 = arith.constant 9 : index
    %81 = memref.load %arg1[%c9] : memref<144xf32, #tpu.memory_space<smem>>
    %82 = vector.broadcast %81 : f32 to vector<22x38xf32>
    %83 = arith.mulf %82, %5 : vector<22x38xf32>
    %84 = vector.broadcast %80 : f32 to vector<22x38xf32>
    %85 = arith.addf %84, %83 : vector<22x38xf32>
    %c10 = arith.constant 10 : index
    %86 = memref.load %arg1[%c10] : memref<144xf32, #tpu.memory_space<smem>>
    %87 = vector.broadcast %86 : f32 to vector<22x38xf32>
    %88 = arith.mulf %87, %6 : vector<22x38xf32>
    %89 = arith.addf %85, %88 : vector<22x38xf32>
    %c11 = arith.constant 11 : index
    %90 = memref.load %arg1[%c11] : memref<144xf32, #tpu.memory_space<smem>>
    %91 = vector.broadcast %90 : f32 to vector<22x38xf32>
    %92 = arith.mulf %91, %7 : vector<22x38xf32>
    %93 = arith.addf %89, %92 : vector<22x38xf32>
    %c12 = arith.constant 12 : index
    %94 = memref.load %arg1[%c12] : memref<144xf32, #tpu.memory_space<smem>>
    %95 = vector.broadcast %94 : f32 to vector<22x38xf32>
    %96 = arith.mulf %95, %8 : vector<22x38xf32>
    %97 = arith.addf %93, %96 : vector<22x38xf32>
    %c13 = arith.constant 13 : index
    %98 = memref.load %arg1[%c13] : memref<144xf32, #tpu.memory_space<smem>>
    %99 = vector.broadcast %98 : f32 to vector<22x38xf32>
    %100 = arith.mulf %99, %9 : vector<22x38xf32>
    %101 = arith.addf %97, %100 : vector<22x38xf32>
    %c14 = arith.constant 14 : index
    %102 = memref.load %arg1[%c14] : memref<144xf32, #tpu.memory_space<smem>>
    %103 = vector.broadcast %102 : f32 to vector<22x38xf32>
    %104 = arith.mulf %103, %10 : vector<22x38xf32>
    %105 = arith.addf %101, %104 : vector<22x38xf32>
    %c15 = arith.constant 15 : index
    %106 = memref.load %arg1[%c15] : memref<144xf32, #tpu.memory_space<smem>>
    %107 = vector.broadcast %106 : f32 to vector<22x38xf32>
    %108 = arith.mulf %107, %11 : vector<22x38xf32>
    %109 = arith.addf %105, %108 : vector<22x38xf32>
    %c16 = arith.constant 16 : index
    %110 = memref.load %arg1[%c16] : memref<144xf32, #tpu.memory_space<smem>>
    %111 = vector.broadcast %110 : f32 to vector<22x38xf32>
    %112 = arith.mulf %111, %12 : vector<22x38xf32>
    %113 = arith.addf %109, %112 : vector<22x38xf32>
    %c17 = arith.constant 17 : index
    %114 = memref.load %arg1[%c17] : memref<144xf32, #tpu.memory_space<smem>>
    %115 = vector.broadcast %114 : f32 to vector<22x38xf32>
    %116 = arith.mulf %115, %13 : vector<22x38xf32>
    %117 = arith.addf %113, %116 : vector<22x38xf32>
    %118 = vector.shape_cast %117 : vector<22x38xf32> to vector<1x22x38xf32>
    %cst_17 = arith.constant dense<0.000000e+00> : vector<1xf32>
    %119 = vector.multi_reduction <add>, %118, %cst_17 [1, 2] : vector<1x22x38xf32> to vector<1xf32>
    %120 = vector.shape_cast %119 : vector<1xf32> to vector<1x1x1xf32>
    %121 = vector.extract %120[0, 0, 0] : f32 from vector<1x1x1xf32>
    %cst_18 = arith.constant 0.0011961722 : f32
    %122 = arith.mulf %121, %cst_18 : f32
    %123 = vector.broadcast %122 : f32 to vector<22x38xf32>
    %124 = arith.subf %117, %123 : vector<22x38xf32>
    %125 = arith.mulf %124, %124 : vector<22x38xf32>
    %126 = vector.shape_cast %125 : vector<22x38xf32> to vector<1x22x38xf32>
    %cst_19 = arith.constant dense<0.000000e+00> : vector<1xf32>
    %127 = vector.multi_reduction <add>, %126, %cst_19 [1, 2] : vector<1x22x38xf32> to vector<1xf32>
    %128 = vector.shape_cast %127 : vector<1xf32> to vector<1x1x1xf32>
    %129 = vector.extract %128[0, 0, 0] : f32 from vector<1x1x1xf32>
    %cst_20 = arith.constant 0.0011961722 : f32
    %130 = arith.mulf %129, %cst_20 : f32
    %cst_21 = arith.constant 9.99999974E-6 : f32
    %131 = arith.addf %130, %cst_21 : f32
    %132 = math.rsqrt %131 : f32
    %133 = vector.broadcast %132 : f32 to vector<22x38xf32>
    %134 = arith.mulf %124, %133 : vector<22x38xf32>
    %c1_22 = arith.constant 1 : index
    %135 = memref.load %arg3[%c1_22] : memref<16xf32, #tpu.memory_space<smem>>
    %136 = vector.broadcast %135 : f32 to vector<22x38xf32>
    %137 = arith.mulf %134, %136 : vector<22x38xf32>
    %c1_23 = arith.constant 1 : index
    %138 = memref.load %arg4[%c1_23] : memref<16xf32, #tpu.memory_space<smem>>
    %139 = vector.broadcast %138 : f32 to vector<22x38xf32>
    %140 = arith.addf %137, %139 : vector<22x38xf32>
    %cst_24 = arith.constant 0.000000e+00 : f32
    %141 = vector.broadcast %cst_24 : f32 to vector<22x38xf32>
    %142 = arith.maximumf %140, %141 : vector<22x38xf32>
    %c0_25 = arith.constant 0 : index
    %c1_26 = arith.constant 1 : index
    %c0_27 = arith.constant 0 : index
    %c0_28 = arith.constant 0 : index
    %143 = vector.load %arg6[%c0_25, %c1_26, %c0_27, %c0_28] : memref<1x16x22x38xf32, #tpu.memory_space<vmem>>, vector<1x1x22x38xf32>
    %144 = vector.shape_cast %143 : vector<1x1x22x38xf32> to vector<22x38xf32>
    %145 = vector.shape_cast %142 : vector<22x38xf32> to vector<1x1x22x38xf32>
    tpu.vector_store %arg6[%c0_25, %c1_26, %c0_27, %c0_28], %145 {strides = array<i32>} : memref<1x16x22x38xf32, #tpu.memory_space<vmem>>, vector<1x1x22x38xf32>,
    %c2_29 = arith.constant 2 : index
    %146 = memref.load %arg2[%c2_29] : memref<16xf32, #tpu.memory_space<smem>>
    %c18 = arith.constant 18 : index
    %147 = memref.load %arg1[%c18] : memref<144xf32, #tpu.memory_space<smem>>
    %148 = vector.broadcast %147 : f32 to vector<22x38xf32>
    %149 = arith.mulf %148, %5 : vector<22x38xf32>
    %150 = vector.broadcast %146 : f32 to vector<22x38xf32>
    %151 = arith.addf %150, %149 : vector<22x38xf32>
    %c19 = arith.constant 19 : index
    %152 = memref.load %arg1[%c19] : memref<144xf32, #tpu.memory_space<smem>>
    %153 = vector.broadcast %152 : f32 to vector<22x38xf32>
    %154 = arith.mulf %153, %6 : vector<22x38xf32>
    %155 = arith.addf %151, %154 : vector<22x38xf32>
    %c20 = arith.constant 20 : index
    %156 = memref.load %arg1[%c20] : memref<144xf32, #tpu.memory_space<smem>>
    %157 = vector.broadcast %156 : f32 to vector<22x38xf32>
    %158 = arith.mulf %157, %7 : vector<22x38xf32>
    %159 = arith.addf %155, %158 : vector<22x38xf32>
    %c21 = arith.constant 21 : index
    %160 = memref.load %arg1[%c21] : memref<144xf32, #tpu.memory_space<smem>>
    %161 = vector.broadcast %160 : f32 to vector<22x38xf32>
    %162 = arith.mulf %161, %8 : vector<22x38xf32>
    %163 = arith.addf %159, %162 : vector<22x38xf32>
    %c22 = arith.constant 22 : index
    %164 = memref.load %arg1[%c22] : memref<144xf32, #tpu.memory_space<smem>>
    %165 = vector.broadcast %164 : f32 to vector<22x38xf32>
    %166 = arith.mulf %165, %9 : vector<22x38xf32>
    %167 = arith.addf %163, %166 : vector<22x38xf32>
    %c23 = arith.constant 23 : index
    %168 = memref.load %arg1[%c23] : memref<144xf32, #tpu.memory_space<smem>>
    %169 = vector.broadcast %168 : f32 to vector<22x38xf32>
    %170 = arith.mulf %169, %10 : vector<22x38xf32>
    %171 = arith.addf %167, %170 : vector<22x38xf32>
    %c24 = arith.constant 24 : index
    %172 = memref.load %arg1[%c24] : memref<144xf32, #tpu.memory_space<smem>>
    %173 = vector.broadcast %172 : f32 to vector<22x38xf32>
    %174 = arith.mulf %173, %11 : vector<22x38xf32>
    %175 = arith.addf %171, %174 : vector<22x38xf32>
    %c25 = arith.constant 25 : index
    %176 = memref.load %arg1[%c25] : memref<144xf32, #tpu.memory_space<smem>>
    %177 = vector.broadcast %176 : f32 to vector<22x38xf32>
    %178 = arith.mulf %177, %12 : vector<22x38xf32>
    %179 = arith.addf %175, %178 : vector<22x38xf32>
    %c26 = arith.constant 26 : index
    %180 = memref.load %arg1[%c26] : memref<144xf32, #tpu.memory_space<smem>>
    %181 = vector.broadcast %180 : f32 to vector<22x38xf32>
    %182 = arith.mulf %181, %13 : vector<22x38xf32>
    %183 = arith.addf %179, %182 : vector<22x38xf32>
    %184 = vector.shape_cast %183 : vector<22x38xf32> to vector<1x22x38xf32>
    %cst_30 = arith.constant dense<0.000000e+00> : vector<1xf32>
    %185 = vector.multi_reduction <add>, %184, %cst_30 [1, 2] : vector<1x22x38xf32> to vector<1xf32>
    %186 = vector.shape_cast %185 : vector<1xf32> to vector<1x1x1xf32>
    %187 = vector.extract %186[0, 0, 0] : f32 from vector<1x1x1xf32>
    %cst_31 = arith.constant 0.0011961722 : f32
    %188 = arith.mulf %187, %cst_31 : f32
    %189 = vector.broadcast %188 : f32 to vector<22x38xf32>
    %190 = arith.subf %183, %189 : vector<22x38xf32>
    %191 = arith.mulf %190, %190 : vector<22x38xf32>
    %192 = vector.shape_cast %191 : vector<22x38xf32> to vector<1x22x38xf32>
    %cst_32 = arith.constant dense<0.000000e+00> : vector<1xf32>
    %193 = vector.multi_reduction <add>, %192, %cst_32 [1, 2] : vector<1x22x38xf32> to vector<1xf32>
    %194 = vector.shape_cast %193 : vector<1xf32> to vector<1x1x1xf32>
    %195 = vector.extract %194[0, 0, 0] : f32 from vector<1x1x1xf32>
    %cst_33 = arith.constant 0.0011961722 : f32
    %196 = arith.mulf %195, %cst_33 : f32
    %cst_34 = arith.constant 9.99999974E-6 : f32
    %197 = arith.addf %196, %cst_34 : f32
    %198 = math.rsqrt %197 : f32
    %199 = vector.broadcast %198 : f32 to vector<22x38xf32>
    %200 = arith.mulf %190, %199 : vector<22x38xf32>
    %c2_35 = arith.constant 2 : index
    %201 = memref.load %arg3[%c2_35] : memref<16xf32, #tpu.memory_space<smem>>
    %202 = vector.broadcast %201 : f32 to vector<22x38xf32>
    %203 = arith.mulf %200, %202 : vector<22x38xf32>
    %c2_36 = arith.constant 2 : index
    %204 = memref.load %arg4[%c2_36] : memref<16xf32, #tpu.memory_space<smem>>
    %205 = vector.broadcast %204 : f32 to vector<22x38xf32>
    %206 = arith.addf %203, %205 : vector<22x38xf32>
    %cst_37 = arith.constant 0.000000e+00 : f32
    %207 = vector.broadcast %cst_37 : f32 to vector<22x38xf32>
    %208 = arith.maximumf %206, %207 : vector<22x38xf32>
    %c0_38 = arith.constant 0 : index
    %c2_39 = arith.constant 2 : index
    %c0_40 = arith.constant 0 : index
    %c0_41 = arith.constant 0 : index
    %209 = vector.load %arg6[%c0_38, %c2_39, %c0_40, %c0_41] : memref<1x16x22x38xf32, #tpu.memory_space<vmem>>, vector<1x1x22x38xf32>
    %210 = vector.shape_cast %209 : vector<1x1x22x38xf32> to vector<22x38xf32>
    %211 = vector.shape_cast %208 : vector<22x38xf32> to vector<1x1x22x38xf32>
    tpu.vector_store %arg6[%c0_38, %c2_39, %c0_40, %c0_41], %211 {strides = array<i32>} : memref<1x16x22x38xf32, #tpu.memory_space<vmem>>, vector<1x1x22x38xf32>,
    %c3_42 = arith.constant 3 : index
    %212 = memref.load %arg2[%c3_42] : memref<16xf32, #tpu.memory_space<smem>>
    %c27 = arith.constant 27 : index
    %213 = memref.load %arg1[%c27] : memref<144xf32, #tpu.memory_space<smem>>
    %214 = vector.broadcast %213 : f32 to vector<22x38xf32>
    %215 = arith.mulf %214, %5 : vector<22x38xf32>
    %216 = vector.broadcast %212 : f32 to vector<22x38xf32>
    %217 = arith.addf %216, %215 : vector<22x38xf32>
    %c28 = arith.constant 28 : index
    %218 = memref.load %arg1[%c28] : memref<144xf32, #tpu.memory_space<smem>>
    %219 = vector.broadcast %218 : f32 to vector<22x38xf32>
    %220 = arith.mulf %219, %6 : vector<22x38xf32>
    %221 = arith.addf %217, %220 : vector<22x38xf32>
    %c29 = arith.constant 29 : index
    %222 = memref.load %arg1[%c29] : memref<144xf32, #tpu.memory_space<smem>>
    %223 = vector.broadcast %222 : f32 to vector<22x38xf32>
    %224 = arith.mulf %223, %7 : vector<22x38xf32>
    %225 = arith.addf %221, %224 : vector<22x38xf32>
    %c30 = arith.constant 30 : index
    %226 = memref.load %arg1[%c30] : memref<144xf32, #tpu.memory_space<smem>>
    %227 = vector.broadcast %226 : f32 to vector<22x38xf32>
    %228 = arith.mulf %227, %8 : vector<22x38xf32>
    %229 = arith.addf %225, %228 : vector<22x38xf32>
    %c31 = arith.constant 31 : index
    %230 = memref.load %arg1[%c31] : memref<144xf32, #tpu.memory_space<smem>>
    %231 = vector.broadcast %230 : f32 to vector<22x38xf32>
    %232 = arith.mulf %231, %9 : vector<22x38xf32>
    %233 = arith.addf %229, %232 : vector<22x38xf32>
    %c32 = arith.constant 32 : index
    %234 = memref.load %arg1[%c32] : memref<144xf32, #tpu.memory_space<smem>>
    %235 = vector.broadcast %234 : f32 to vector<22x38xf32>
    %236 = arith.mulf %235, %10 : vector<22x38xf32>
    %237 = arith.addf %233, %236 : vector<22x38xf32>
    %c33 = arith.constant 33 : index
    %238 = memref.load %arg1[%c33] : memref<144xf32, #tpu.memory_space<smem>>
    %239 = vector.broadcast %238 : f32 to vector<22x38xf32>
    %240 = arith.mulf %239, %11 : vector<22x38xf32>
    %241 = arith.addf %237, %240 : vector<22x38xf32>
    %c34 = arith.constant 34 : index
    %242 = memref.load %arg1[%c34] : memref<144xf32, #tpu.memory_space<smem>>
    %243 = vector.broadcast %242 : f32 to vector<22x38xf32>
    %244 = arith.mulf %243, %12 : vector<22x38xf32>
    %245 = arith.addf %241, %244 : vector<22x38xf32>
    %c35 = arith.constant 35 : index
    %246 = memref.load %arg1[%c35] : memref<144xf32, #tpu.memory_space<smem>>
    %247 = vector.broadcast %246 : f32 to vector<22x38xf32>
    %248 = arith.mulf %247, %13 : vector<22x38xf32>
    %249 = arith.addf %245, %248 : vector<22x38xf32>
    %250 = vector.shape_cast %249 : vector<22x38xf32> to vector<1x22x38xf32>
    %cst_43 = arith.constant dense<0.000000e+00> : vector<1xf32>
    %251 = vector.multi_reduction <add>, %250, %cst_43 [1, 2] : vector<1x22x38xf32> to vector<1xf32>
    %252 = vector.shape_cast %251 : vector<1xf32> to vector<1x1x1xf32>
    %253 = vector.extract %252[0, 0, 0] : f32 from vector<1x1x1xf32>
    %cst_44 = arith.constant 0.0011961722 : f32
    %254 = arith.mulf %253, %cst_44 : f32
    %255 = vector.broadcast %254 : f32 to vector<22x38xf32>
    %256 = arith.subf %249, %255 : vector<22x38xf32>
    %257 = arith.mulf %256, %256 : vector<22x38xf32>
    %258 = vector.shape_cast %257 : vector<22x38xf32> to vector<1x22x38xf32>
    %cst_45 = arith.constant dense<0.000000e+00> : vector<1xf32>
    %259 = vector.multi_reduction <add>, %258, %cst_45 [1, 2] : vector<1x22x38xf32> to vector<1xf32>
    %260 = vector.shape_cast %259 : vector<1xf32> to vector<1x1x1xf32>
    %261 = vector.extract %260[0, 0, 0] : f32 from vector<1x1x1xf32>
    %cst_46 = arith.constant 0.0011961722 : f32
    %262 = arith.mulf %261, %cst_46 : f32
    %cst_47 = arith.constant 9.99999974E-6 : f32
    %263 = arith.addf %262, %cst_47 : f32
    %264 = math.rsqrt %263 : f32
    %265 = vector.broadcast %264 : f32 to vector<22x38xf32>
    %266 = arith.mulf %256, %265 : vector<22x38xf32>
    %c3_48 = arith.constant 3 : index
    %267 = memref.load %arg3[%c3_48] : memref<16xf32, #tpu.memory_space<smem>>
    %268 = vector.broadcast %267 : f32 to vector<22x38xf32>
    %269 = arith.mulf %266, %268 : vector<22x38xf32>
    %c3_49 = arith.constant 3 : index
    %270 = memref.load %arg4[%c3_49] : memref<16xf32, #tpu.memory_space<smem>>
    %271 = vector.broadcast %270 : f32 to vector<22x38xf32>
    %272 = arith.addf %269, %271 : vector<22x38xf32>
    %cst_50 = arith.constant 0.000000e+00 : f32
    %273 = vector.broadcast %cst_50 : f32 to vector<22x38xf32>
    %274 = arith.maximumf %272, %273 : vector<22x38xf32>
    %c0_51 = arith.constant 0 : index
    %c3_52 = arith.constant 3 : index
    %c0_53 = arith.constant 0 : index
    %c0_54 = arith.constant 0 : index
    %275 = vector.load %arg6[%c0_51, %c3_52, %c0_53, %c0_54] : memref<1x16x22x38xf32, #tpu.memory_space<vmem>>, vector<1x1x22x38xf32>
    %276 = vector.shape_cast %275 : vector<1x1x22x38xf32> to vector<22x38xf32>
    %277 = vector.shape_cast %274 : vector<22x38xf32> to vector<1x1x22x38xf32>
    tpu.vector_store %arg6[%c0_51, %c3_52, %c0_53, %c0_54], %277 {strides = array<i32>} : memref<1x16x22x38xf32, #tpu.memory_space<vmem>>, vector<1x1x22x38xf32>,
    %c4_55 = arith.constant 4 : index
    %278 = memref.load %arg2[%c4_55] : memref<16xf32, #tpu.memory_space<smem>>
    %c36 = arith.constant 36 : index
    %279 = memref.load %arg1[%c36] : memref<144xf32, #tpu.memory_space<smem>>
    %280 = vector.broadcast %279 : f32 to vector<22x38xf32>
    %281 = arith.mulf %280, %5 : vector<22x38xf32>
    %282 = vector.broadcast %278 : f32 to vector<22x38xf32>
    %283 = arith.addf %282, %281 : vector<22x38xf32>
    %c37 = arith.constant 37 : index
    %284 = memref.load %arg1[%c37] : memref<144xf32, #tpu.memory_space<smem>>
    %285 = vector.broadcast %284 : f32 to vector<22x38xf32>
    %286 = arith.mulf %285, %6 : vector<22x38xf32>
    %287 = arith.addf %283, %286 : vector<22x38xf32>
    %c38 = arith.constant 38 : index
    %288 = memref.load %arg1[%c38] : memref<144xf32, #tpu.memory_space<smem>>
    %289 = vector.broadcast %288 : f32 to vector<22x38xf32>
    %290 = arith.mulf %289, %7 : vector<22x38xf32>
    %291 = arith.addf %287, %290 : vector<22x38xf32>
    %c39 = arith.constant 39 : index
    %292 = memref.load %arg1[%c39] : memref<144xf32, #tpu.memory_space<smem>>
    %293 = vector.broadcast %292 : f32 to vector<22x38xf32>
    %294 = arith.mulf %293, %8 : vector<22x38xf32>
    %295 = arith.addf %291, %294 : vector<22x38xf32>
    %c40 = arith.constant 40 : index
    %296 = memref.load %arg1[%c40] : memref<144xf32, #tpu.memory_space<smem>>
    %297 = vector.broadcast %296 : f32 to vector<22x38xf32>
    %298 = arith.mulf %297, %9 : vector<22x38xf32>
    %299 = arith.addf %295, %298 : vector<22x38xf32>
    %c41 = arith.constant 41 : index
    %300 = memref.load %arg1[%c41] : memref<144xf32, #tpu.memory_space<smem>>
    %301 = vector.broadcast %300 : f32 to vector<22x38xf32>
    %302 = arith.mulf %301, %10 : vector<22x38xf32>
    %303 = arith.addf %299, %302 : vector<22x38xf32>
    %c42 = arith.constant 42 : index
    %304 = memref.load %arg1[%c42] : memref<144xf32, #tpu.memory_space<smem>>
    %305 = vector.broadcast %304 : f32 to vector<22x38xf32>
    %306 = arith.mulf %305, %11 : vector<22x38xf32>
    %307 = arith.addf %303, %306 : vector<22x38xf32>
    %c43 = arith.constant 43 : index
    %308 = memref.load %arg1[%c43] : memref<144xf32, #tpu.memory_space<smem>>
    %309 = vector.broadcast %308 : f32 to vector<22x38xf32>
    %310 = arith.mulf %309, %12 : vector<22x38xf32>
    %311 = arith.addf %307, %310 : vector<22x38xf32>
    %c44 = arith.constant 44 : index
    %312 = memref.load %arg1[%c44] : memref<144xf32, #tpu.memory_space<smem>>
    %313 = vector.broadcast %312 : f32 to vector<22x38xf32>
    %314 = arith.mulf %313, %13 : vector<22x38xf32>
    %315 = arith.addf %311, %314 : vector<22x38xf32>
    %316 = vector.shape_cast %315 : vector<22x38xf32> to vector<1x22x38xf32>
    %cst_56 = arith.constant dense<0.000000e+00> : vector<1xf32>
    %317 = vector.multi_reduction <add>, %316, %cst_56 [1, 2] : vector<1x22x38xf32> to vector<1xf32>
    %318 = vector.shape_cast %317 : vector<1xf32> to vector<1x1x1xf32>
    %319 = vector.extract %318[0, 0, 0] : f32 from vector<1x1x1xf32>
    %cst_57 = arith.constant 0.0011961722 : f32
    %320 = arith.mulf %319, %cst_57 : f32
    %321 = vector.broadcast %320 : f32 to vector<22x38xf32>
    %322 = arith.subf %315, %321 : vector<22x38xf32>
    %323 = arith.mulf %322, %322 : vector<22x38xf32>
    %324 = vector.shape_cast %323 : vector<22x38xf32> to vector<1x22x38xf32>
    %cst_58 = arith.constant dense<0.000000e+00> : vector<1xf32>
    %325 = vector.multi_reduction <add>, %324, %cst_58 [1, 2] : vector<1x22x38xf32> to vector<1xf32>
    %326 = vector.shape_cast %325 : vector<1xf32> to vector<1x1x1xf32>
    %327 = vector.extract %326[0, 0, 0] : f32 from vector<1x1x1xf32>
    %cst_59 = arith.constant 0.0011961722 : f32
    %328 = arith.mulf %327, %cst_59 : f32
    %cst_60 = arith.constant 9.99999974E-6 : f32
    %329 = arith.addf %328, %cst_60 : f32
    %330 = math.rsqrt %329 : f32
    %331 = vector.broadcast %330 : f32 to vector<22x38xf32>
    %332 = arith.mulf %322, %331 : vector<22x38xf32>
    %c4_61 = arith.constant 4 : index
    %333 = memref.load %arg3[%c4_61] : memref<16xf32, #tpu.memory_space<smem>>
    %334 = vector.broadcast %333 : f32 to vector<22x38xf32>
    %335 = arith.mulf %332, %334 : vector<22x38xf32>
    %c4_62 = arith.constant 4 : index
    %336 = memref.load %arg4[%c4_62] : memref<16xf32, #tpu.memory_space<smem>>
    %337 = vector.broadcast %336 : f32 to vector<22x38xf32>
    %338 = arith.addf %335, %337 : vector<22x38xf32>
    %cst_63 = arith.constant 0.000000e+00 : f32
    %339 = vector.broadcast %cst_63 : f32 to vector<22x38xf32>
    %340 = arith.maximumf %338, %339 : vector<22x38xf32>
    %c0_64 = arith.constant 0 : index
    %c4_65 = arith.constant 4 : index
    %c0_66 = arith.constant 0 : index
    %c0_67 = arith.constant 0 : index
    %341 = vector.load %arg6[%c0_64, %c4_65, %c0_66, %c0_67] : memref<1x16x22x38xf32, #tpu.memory_space<vmem>>, vector<1x1x22x38xf32>
    %342 = vector.shape_cast %341 : vector<1x1x22x38xf32> to vector<22x38xf32>
    %343 = vector.shape_cast %340 : vector<22x38xf32> to vector<1x1x22x38xf32>
    tpu.vector_store %arg6[%c0_64, %c4_65, %c0_66, %c0_67], %343 {strides = array<i32>} : memref<1x16x22x38xf32, #tpu.memory_space<vmem>>, vector<1x1x22x38xf32>,
    %c5_68 = arith.constant 5 : index
    %344 = memref.load %arg2[%c5_68] : memref<16xf32, #tpu.memory_space<smem>>
    %c45 = arith.constant 45 : index
    %345 = memref.load %arg1[%c45] : memref<144xf32, #tpu.memory_space<smem>>
    %346 = vector.broadcast %345 : f32 to vector<22x38xf32>
    %347 = arith.mulf %346, %5 : vector<22x38xf32>
    %348 = vector.broadcast %344 : f32 to vector<22x38xf32>
    %349 = arith.addf %348, %347 : vector<22x38xf32>
    %c46 = arith.constant 46 : index
    %350 = memref.load %arg1[%c46] : memref<144xf32, #tpu.memory_space<smem>>
    %351 = vector.broadcast %350 : f32 to vector<22x38xf32>
    %352 = arith.mulf %351, %6 : vector<22x38xf32>
    %353 = arith.addf %349, %352 : vector<22x38xf32>
    %c47 = arith.constant 47 : index
    %354 = memref.load %arg1[%c47] : memref<144xf32, #tpu.memory_space<smem>>
    %355 = vector.broadcast %354 : f32 to vector<22x38xf32>
    %356 = arith.mulf %355, %7 : vector<22x38xf32>
    %357 = arith.addf %353, %356 : vector<22x38xf32>
    %c48 = arith.constant 48 : index
    %358 = memref.load %arg1[%c48] : memref<144xf32, #tpu.memory_space<smem>>
    %359 = vector.broadcast %358 : f32 to vector<22x38xf32>
    %360 = arith.mulf %359, %8 : vector<22x38xf32>
    %361 = arith.addf %357, %360 : vector<22x38xf32>
    %c49 = arith.constant 49 : index
    %362 = memref.load %arg1[%c49] : memref<144xf32, #tpu.memory_space<smem>>
    %363 = vector.broadcast %362 : f32 to vector<22x38xf32>
    %364 = arith.mulf %363, %9 : vector<22x38xf32>
    %365 = arith.addf %361, %364 : vector<22x38xf32>
    %c50 = arith.constant 50 : index
    %366 = memref.load %arg1[%c50] : memref<144xf32, #tpu.memory_space<smem>>
    %367 = vector.broadcast %366 : f32 to vector<22x38xf32>
    %368 = arith.mulf %367, %10 : vector<22x38xf32>
    %369 = arith.addf %365, %368 : vector<22x38xf32>
    %c51 = arith.constant 51 : index
    %370 = memref.load %arg1[%c51] : memref<144xf32, #tpu.memory_space<smem>>
    %371 = vector.broadcast %370 : f32 to vector<22x38xf32>
    %372 = arith.mulf %371, %11 : vector<22x38xf32>
    %373 = arith.addf %369, %372 : vector<22x38xf32>
    %c52 = arith.constant 52 : index
    %374 = memref.load %arg1[%c52] : memref<144xf32, #tpu.memory_space<smem>>
    %375 = vector.broadcast %374 : f32 to vector<22x38xf32>
    %376 = arith.mulf %375, %12 : vector<22x38xf32>
    %377 = arith.addf %373, %376 : vector<22x38xf32>
    %c53 = arith.constant 53 : index
    %378 = memref.load %arg1[%c53] : memref<144xf32, #tpu.memory_space<smem>>
    %379 = vector.broadcast %378 : f32 to vector<22x38xf32>
    %380 = arith.mulf %379, %13 : vector<22x38xf32>
    %381 = arith.addf %377, %380 : vector<22x38xf32>
    %382 = vector.shape_cast %381 : vector<22x38xf32> to vector<1x22x38xf32>
    %cst_69 = arith.constant dense<0.000000e+00> : vector<1xf32>
    %383 = vector.multi_reduction <add>, %382, %cst_69 [1, 2] : vector<1x22x38xf32> to vector<1xf32>
    %384 = vector.shape_cast %383 : vector<1xf32> to vector<1x1x1xf32>
    %385 = vector.extract %384[0, 0, 0] : f32 from vector<1x1x1xf32>
    %cst_70 = arith.constant 0.0011961722 : f32
    %386 = arith.mulf %385, %cst_70 : f32
    %387 = vector.broadcast %386 : f32 to vector<22x38xf32>
    %388 = arith.subf %381, %387 : vector<22x38xf32>
    %389 = arith.mulf %388, %388 : vector<22x38xf32>
    %390 = vector.shape_cast %389 : vector<22x38xf32> to vector<1x22x38xf32>
    %cst_71 = arith.constant dense<0.000000e+00> : vector<1xf32>
    %391 = vector.multi_reduction <add>, %390, %cst_71 [1, 2] : vector<1x22x38xf32> to vector<1xf32>
    %392 = vector.shape_cast %391 : vector<1xf32> to vector<1x1x1xf32>
    %393 = vector.extract %392[0, 0, 0] : f32 from vector<1x1x1xf32>
    %cst_72 = arith.constant 0.0011961722 : f32
    %394 = arith.mulf %393, %cst_72 : f32
    %cst_73 = arith.constant 9.99999974E-6 : f32
    %395 = arith.addf %394, %cst_73 : f32
    %396 = math.rsqrt %395 : f32
    %397 = vector.broadcast %396 : f32 to vector<22x38xf32>
    %398 = arith.mulf %388, %397 : vector<22x38xf32>
    %c5_74 = arith.constant 5 : index
    %399 = memref.load %arg3[%c5_74] : memref<16xf32, #tpu.memory_space<smem>>
    %400 = vector.broadcast %399 : f32 to vector<22x38xf32>
    %401 = arith.mulf %398, %400 : vector<22x38xf32>
    %c5_75 = arith.constant 5 : index
    %402 = memref.load %arg4[%c5_75] : memref<16xf32, #tpu.memory_space<smem>>
    %403 = vector.broadcast %402 : f32 to vector<22x38xf32>
    %404 = arith.addf %401, %403 : vector<22x38xf32>
    %cst_76 = arith.constant 0.000000e+00 : f32
    %405 = vector.broadcast %cst_76 : f32 to vector<22x38xf32>
    %406 = arith.maximumf %404, %405 : vector<22x38xf32>
    %c0_77 = arith.constant 0 : index
    %c5_78 = arith.constant 5 : index
    %c0_79 = arith.constant 0 : index
    %c0_80 = arith.constant 0 : index
    %407 = vector.load %arg6[%c0_77, %c5_78, %c0_79, %c0_80] : memref<1x16x22x38xf32, #tpu.memory_space<vmem>>, vector<1x1x22x38xf32>
    %408 = vector.shape_cast %407 : vector<1x1x22x38xf32> to vector<22x38xf32>
    %409 = vector.shape_cast %406 : vector<22x38xf32> to vector<1x1x22x38xf32>
    tpu.vector_store %arg6[%c0_77, %c5_78, %c0_79, %c0_80], %409 {strides = array<i32>} : memref<1x16x22x38xf32, #tpu.memory_space<vmem>>, vector<1x1x22x38xf32>,
    %c6_81 = arith.constant 6 : index
    %410 = memref.load %arg2[%c6_81] : memref<16xf32, #tpu.memory_space<smem>>
    %c54 = arith.constant 54 : index
    %411 = memref.load %arg1[%c54] : memref<144xf32, #tpu.memory_space<smem>>
    %412 = vector.broadcast %411 : f32 to vector<22x38xf32>
    %413 = arith.mulf %412, %5 : vector<22x38xf32>
    %414 = vector.broadcast %410 : f32 to vector<22x38xf32>
    %415 = arith.addf %414, %413 : vector<22x38xf32>
    %c55 = arith.constant 55 : index
    %416 = memref.load %arg1[%c55] : memref<144xf32, #tpu.memory_space<smem>>
    %417 = vector.broadcast %416 : f32 to vector<22x38xf32>
    %418 = arith.mulf %417, %6 : vector<22x38xf32>
    %419 = arith.addf %415, %418 : vector<22x38xf32>
    %c56 = arith.constant 56 : index
    %420 = memref.load %arg1[%c56] : memref<144xf32, #tpu.memory_space<smem>>
    %421 = vector.broadcast %420 : f32 to vector<22x38xf32>
    %422 = arith.mulf %421, %7 : vector<22x38xf32>
    %423 = arith.addf %419, %422 : vector<22x38xf32>
    %c57 = arith.constant 57 : index
    %424 = memref.load %arg1[%c57] : memref<144xf32, #tpu.memory_space<smem>>
    %425 = vector.broadcast %424 : f32 to vector<22x38xf32>
    %426 = arith.mulf %425, %8 : vector<22x38xf32>
    %427 = arith.addf %423, %426 : vector<22x38xf32>
    %c58 = arith.constant 58 : index
    %428 = memref.load %arg1[%c58] : memref<144xf32, #tpu.memory_space<smem>>
    %429 = vector.broadcast %428 : f32 to vector<22x38xf32>
    %430 = arith.mulf %429, %9 : vector<22x38xf32>
    %431 = arith.addf %427, %430 : vector<22x38xf32>
    %c59 = arith.constant 59 : index
    %432 = memref.load %arg1[%c59] : memref<144xf32, #tpu.memory_space<smem>>
    %433 = vector.broadcast %432 : f32 to vector<22x38xf32>
    %434 = arith.mulf %433, %10 : vector<22x38xf32>
    %435 = arith.addf %431, %434 : vector<22x38xf32>
    %c60 = arith.constant 60 : index
    %436 = memref.load %arg1[%c60] : memref<144xf32, #tpu.memory_space<smem>>
    %437 = vector.broadcast %436 : f32 to vector<22x38xf32>
    %438 = arith.mulf %437, %11 : vector<22x38xf32>
    %439 = arith.addf %435, %438 : vector<22x38xf32>
    %c61 = arith.constant 61 : index
    %440 = memref.load %arg1[%c61] : memref<144xf32, #tpu.memory_space<smem>>
    %441 = vector.broadcast %440 : f32 to vector<22x38xf32>
    %442 = arith.mulf %441, %12 : vector<22x38xf32>
    %443 = arith.addf %439, %442 : vector<22x38xf32>
    %c62 = arith.constant 62 : index
    %444 = memref.load %arg1[%c62] : memref<144xf32, #tpu.memory_space<smem>>
    %445 = vector.broadcast %444 : f32 to vector<22x38xf32>
    %446 = arith.mulf %445, %13 : vector<22x38xf32>
    %447 = arith.addf %443, %446 : vector<22x38xf32>
    %448 = vector.shape_cast %447 : vector<22x38xf32> to vector<1x22x38xf32>
    %cst_82 = arith.constant dense<0.000000e+00> : vector<1xf32>
    %449 = vector.multi_reduction <add>, %448, %cst_82 [1, 2] : vector<1x22x38xf32> to vector<1xf32>
    %450 = vector.shape_cast %449 : vector<1xf32> to vector<1x1x1xf32>
    %451 = vector.extract %450[0, 0, 0] : f32 from vector<1x1x1xf32>
    %cst_83 = arith.constant 0.0011961722 : f32
    %452 = arith.mulf %451, %cst_83 : f32
    %453 = vector.broadcast %452 : f32 to vector<22x38xf32>
    %454 = arith.subf %447, %453 : vector<22x38xf32>
    %455 = arith.mulf %454, %454 : vector<22x38xf32>
    %456 = vector.shape_cast %455 : vector<22x38xf32> to vector<1x22x38xf32>
    %cst_84 = arith.constant dense<0.000000e+00> : vector<1xf32>
    %457 = vector.multi_reduction <add>, %456, %cst_84 [1, 2] : vector<1x22x38xf32> to vector<1xf32>
    %458 = vector.shape_cast %457 : vector<1xf32> to vector<1x1x1xf32>
    %459 = vector.extract %458[0, 0, 0] : f32 from vector<1x1x1xf32>
    %cst_85 = arith.constant 0.0011961722 : f32
    %460 = arith.mulf %459, %cst_85 : f32
    %cst_86 = arith.constant 9.99999974E-6 : f32
    %461 = arith.addf %460, %cst_86 : f32
    %462 = math.rsqrt %461 : f32
    %463 = vector.broadcast %462 : f32 to vector<22x38xf32>
    %464 = arith.mulf %454, %463 : vector<22x38xf32>
    %c6_87 = arith.constant 6 : index
    %465 = memref.load %arg3[%c6_87] : memref<16xf32, #tpu.memory_space<smem>>
    %466 = vector.broadcast %465 : f32 to vector<22x38xf32>
    %467 = arith.mulf %464, %466 : vector<22x38xf32>
    %c6_88 = arith.constant 6 : index
    %468 = memref.load %arg4[%c6_88] : memref<16xf32, #tpu.memory_space<smem>>
    %469 = vector.broadcast %468 : f32 to vector<22x38xf32>
    %470 = arith.addf %467, %469 : vector<22x38xf32>
    %cst_89 = arith.constant 0.000000e+00 : f32
    %471 = vector.broadcast %cst_89 : f32 to vector<22x38xf32>
    %472 = arith.maximumf %470, %471 : vector<22x38xf32>
    %c0_90 = arith.constant 0 : index
    %c6_91 = arith.constant 6 : index
    %c0_92 = arith.constant 0 : index
    %c0_93 = arith.constant 0 : index
    %473 = vector.load %arg6[%c0_90, %c6_91, %c0_92, %c0_93] : memref<1x16x22x38xf32, #tpu.memory_space<vmem>>, vector<1x1x22x38xf32>
    %474 = vector.shape_cast %473 : vector<1x1x22x38xf32> to vector<22x38xf32>
    %475 = vector.shape_cast %472 : vector<22x38xf32> to vector<1x1x22x38xf32>
    tpu.vector_store %arg6[%c0_90, %c6_91, %c0_92, %c0_93], %475 {strides = array<i32>} : memref<1x16x22x38xf32, #tpu.memory_space<vmem>>, vector<1x1x22x38xf32>,
    %c7_94 = arith.constant 7 : index
    %476 = memref.load %arg2[%c7_94] : memref<16xf32, #tpu.memory_space<smem>>
    %c63 = arith.constant 63 : index
    %477 = memref.load %arg1[%c63] : memref<144xf32, #tpu.memory_space<smem>>
    %478 = vector.broadcast %477 : f32 to vector<22x38xf32>
    %479 = arith.mulf %478, %5 : vector<22x38xf32>
    %480 = vector.broadcast %476 : f32 to vector<22x38xf32>
    %481 = arith.addf %480, %479 : vector<22x38xf32>
    %c64 = arith.constant 64 : index
    %482 = memref.load %arg1[%c64] : memref<144xf32, #tpu.memory_space<smem>>
    %483 = vector.broadcast %482 : f32 to vector<22x38xf32>
    %484 = arith.mulf %483, %6 : vector<22x38xf32>
    %485 = arith.addf %481, %484 : vector<22x38xf32>
    %c65 = arith.constant 65 : index
    %486 = memref.load %arg1[%c65] : memref<144xf32, #tpu.memory_space<smem>>
    %487 = vector.broadcast %486 : f32 to vector<22x38xf32>
    %488 = arith.mulf %487, %7 : vector<22x38xf32>
    %489 = arith.addf %485, %488 : vector<22x38xf32>
    %c66 = arith.constant 66 : index
    %490 = memref.load %arg1[%c66] : memref<144xf32, #tpu.memory_space<smem>>
    %491 = vector.broadcast %490 : f32 to vector<22x38xf32>
    %492 = arith.mulf %491, %8 : vector<22x38xf32>
    %493 = arith.addf %489, %492 : vector<22x38xf32>
    %c67 = arith.constant 67 : index
    %494 = memref.load %arg1[%c67] : memref<144xf32, #tpu.memory_space<smem>>
    %495 = vector.broadcast %494 : f32 to vector<22x38xf32>
    %496 = arith.mulf %495, %9 : vector<22x38xf32>
    %497 = arith.addf %493, %496 : vector<22x38xf32>
    %c68 = arith.constant 68 : index
    %498 = memref.load %arg1[%c68] : memref<144xf32, #tpu.memory_space<smem>>
    %499 = vector.broadcast %498 : f32 to vector<22x38xf32>
    %500 = arith.mulf %499, %10 : vector<22x38xf32>
    %501 = arith.addf %497, %500 : vector<22x38xf32>
    %c69 = arith.constant 69 : index
    %502 = memref.load %arg1[%c69] : memref<144xf32, #tpu.memory_space<smem>>
    %503 = vector.broadcast %502 : f32 to vector<22x38xf32>
    %504 = arith.mulf %503, %11 : vector<22x38xf32>
    %505 = arith.addf %501, %504 : vector<22x38xf32>
    %c70 = arith.constant 70 : index
    %506 = memref.load %arg1[%c70] : memref<144xf32, #tpu.memory_space<smem>>
    %507 = vector.broadcast %506 : f32 to vector<22x38xf32>
    %508 = arith.mulf %507, %12 : vector<22x38xf32>
    %509 = arith.addf %505, %508 : vector<22x38xf32>
    %c71 = arith.constant 71 : index
    %510 = memref.load %arg1[%c71] : memref<144xf32, #tpu.memory_space<smem>>
    %511 = vector.broadcast %510 : f32 to vector<22x38xf32>
    %512 = arith.mulf %511, %13 : vector<22x38xf32>
    %513 = arith.addf %509, %512 : vector<22x38xf32>
    %514 = vector.shape_cast %513 : vector<22x38xf32> to vector<1x22x38xf32>
    %cst_95 = arith.constant dense<0.000000e+00> : vector<1xf32>
    %515 = vector.multi_reduction <add>, %514, %cst_95 [1, 2] : vector<1x22x38xf32> to vector<1xf32>
    %516 = vector.shape_cast %515 : vector<1xf32> to vector<1x1x1xf32>
    %517 = vector.extract %516[0, 0, 0] : f32 from vector<1x1x1xf32>
    %cst_96 = arith.constant 0.0011961722 : f32
    %518 = arith.mulf %517, %cst_96 : f32
    %519 = vector.broadcast %518 : f32 to vector<22x38xf32>
    %520 = arith.subf %513, %519 : vector<22x38xf32>
    %521 = arith.mulf %520, %520 : vector<22x38xf32>
    %522 = vector.shape_cast %521 : vector<22x38xf32> to vector<1x22x38xf32>
    %cst_97 = arith.constant dense<0.000000e+00> : vector<1xf32>
    %523 = vector.multi_reduction <add>, %522, %cst_97 [1, 2] : vector<1x22x38xf32> to vector<1xf32>
    %524 = vector.shape_cast %523 : vector<1xf32> to vector<1x1x1xf32>
    %525 = vector.extract %524[0, 0, 0] : f32 from vector<1x1x1xf32>
    %cst_98 = arith.constant 0.0011961722 : f32
    %526 = arith.mulf %525, %cst_98 : f32
    %cst_99 = arith.constant 9.99999974E-6 : f32
    %527 = arith.addf %526, %cst_99 : f32
    %528 = math.rsqrt %527 : f32
    %529 = vector.broadcast %528 : f32 to vector<22x38xf32>
    %530 = arith.mulf %520, %529 : vector<22x38xf32>
    %c7_100 = arith.constant 7 : index
    %531 = memref.load %arg3[%c7_100] : memref<16xf32, #tpu.memory_space<smem>>
    %532 = vector.broadcast %531 : f32 to vector<22x38xf32>
    %533 = arith.mulf %530, %532 : vector<22x38xf32>
    %c7_101 = arith.constant 7 : index
    %534 = memref.load %arg4[%c7_101] : memref<16xf32, #tpu.memory_space<smem>>
    %535 = vector.broadcast %534 : f32 to vector<22x38xf32>
    %536 = arith.addf %533, %535 : vector<22x38xf32>
    %cst_102 = arith.constant 0.000000e+00 : f32
    %537 = vector.broadcast %cst_102 : f32 to vector<22x38xf32>
    %538 = arith.maximumf %536, %537 : vector<22x38xf32>
    %c0_103 = arith.constant 0 : index
    %c7_104 = arith.constant 7 : index
    %c0_105 = arith.constant 0 : index
    %c0_106 = arith.constant 0 : index
    %539 = vector.load %arg6[%c0_103, %c7_104, %c0_105, %c0_106] : memref<1x16x22x38xf32, #tpu.memory_space<vmem>>, vector<1x1x22x38xf32>
    %540 = vector.shape_cast %539 : vector<1x1x22x38xf32> to vector<22x38xf32>
    %541 = vector.shape_cast %538 : vector<22x38xf32> to vector<1x1x22x38xf32>
    tpu.vector_store %arg6[%c0_103, %c7_104, %c0_105, %c0_106], %541 {strides = array<i32>} : memref<1x16x22x38xf32, #tpu.memory_space<vmem>>, vector<1x1x22x38xf32>,
    %c8_107 = arith.constant 8 : index
    %542 = memref.load %arg2[%c8_107] : memref<16xf32, #tpu.memory_space<smem>>
    %c72 = arith.constant 72 : index
    %543 = memref.load %arg1[%c72] : memref<144xf32, #tpu.memory_space<smem>>
    %544 = vector.broadcast %543 : f32 to vector<22x38xf32>
    %545 = arith.mulf %544, %5 : vector<22x38xf32>
    %546 = vector.broadcast %542 : f32 to vector<22x38xf32>
    %547 = arith.addf %546, %545 : vector<22x38xf32>
    %c73 = arith.constant 73 : index
    %548 = memref.load %arg1[%c73] : memref<144xf32, #tpu.memory_space<smem>>
    %549 = vector.broadcast %548 : f32 to vector<22x38xf32>
    %550 = arith.mulf %549, %6 : vector<22x38xf32>
    %551 = arith.addf %547, %550 : vector<22x38xf32>
    %c74 = arith.constant 74 : index
    %552 = memref.load %arg1[%c74] : memref<144xf32, #tpu.memory_space<smem>>
    %553 = vector.broadcast %552 : f32 to vector<22x38xf32>
    %554 = arith.mulf %553, %7 : vector<22x38xf32>
    %555 = arith.addf %551, %554 : vector<22x38xf32>
    %c75 = arith.constant 75 : index
    %556 = memref.load %arg1[%c75] : memref<144xf32, #tpu.memory_space<smem>>
    %557 = vector.broadcast %556 : f32 to vector<22x38xf32>
    %558 = arith.mulf %557, %8 : vector<22x38xf32>
    %559 = arith.addf %555, %558 : vector<22x38xf32>
    %c76 = arith.constant 76 : index
    %560 = memref.load %arg1[%c76] : memref<144xf32, #tpu.memory_space<smem>>
    %561 = vector.broadcast %560 : f32 to vector<22x38xf32>
    %562 = arith.mulf %561, %9 : vector<22x38xf32>
    %563 = arith.addf %559, %562 : vector<22x38xf32>
    %c77 = arith.constant 77 : index
    %564 = memref.load %arg1[%c77] : memref<144xf32, #tpu.memory_space<smem>>
    %565 = vector.broadcast %564 : f32 to vector<22x38xf32>
    %566 = arith.mulf %565, %10 : vector<22x38xf32>
    %567 = arith.addf %563, %566 : vector<22x38xf32>
    %c78 = arith.constant 78 : index
    %568 = memref.load %arg1[%c78] : memref<144xf32, #tpu.memory_space<smem>>
    %569 = vector.broadcast %568 : f32 to vector<22x38xf32>
    %570 = arith.mulf %569, %11 : vector<22x38xf32>
    %571 = arith.addf %567, %570 : vector<22x38xf32>
    %c79 = arith.constant 79 : index
    %572 = memref.load %arg1[%c79] : memref<144xf32, #tpu.memory_space<smem>>
    %573 = vector.broadcast %572 : f32 to vector<22x38xf32>
    %574 = arith.mulf %573, %12 : vector<22x38xf32>
    %575 = arith.addf %571, %574 : vector<22x38xf32>
    %c80 = arith.constant 80 : index
    %576 = memref.load %arg1[%c80] : memref<144xf32, #tpu.memory_space<smem>>
    %577 = vector.broadcast %576 : f32 to vector<22x38xf32>
    %578 = arith.mulf %577, %13 : vector<22x38xf32>
    %579 = arith.addf %575, %578 : vector<22x38xf32>
    %580 = vector.shape_cast %579 : vector<22x38xf32> to vector<1x22x38xf32>
    %cst_108 = arith.constant dense<0.000000e+00> : vector<1xf32>
    %581 = vector.multi_reduction <add>, %580, %cst_108 [1, 2] : vector<1x22x38xf32> to vector<1xf32>
    %582 = vector.shape_cast %581 : vector<1xf32> to vector<1x1x1xf32>
    %583 = vector.extract %582[0, 0, 0] : f32 from vector<1x1x1xf32>
    %cst_109 = arith.constant 0.0011961722 : f32
    %584 = arith.mulf %583, %cst_109 : f32
    %585 = vector.broadcast %584 : f32 to vector<22x38xf32>
    %586 = arith.subf %579, %585 : vector<22x38xf32>
    %587 = arith.mulf %586, %586 : vector<22x38xf32>
    %588 = vector.shape_cast %587 : vector<22x38xf32> to vector<1x22x38xf32>
    %cst_110 = arith.constant dense<0.000000e+00> : vector<1xf32>
    %589 = vector.multi_reduction <add>, %588, %cst_110 [1, 2] : vector<1x22x38xf32> to vector<1xf32>
    %590 = vector.shape_cast %589 : vector<1xf32> to vector<1x1x1xf32>
    %591 = vector.extract %590[0, 0, 0] : f32 from vector<1x1x1xf32>
    %cst_111 = arith.constant 0.0011961722 : f32
    %592 = arith.mulf %591, %cst_111 : f32
    %cst_112 = arith.constant 9.99999974E-6 : f32
    %593 = arith.addf %592, %cst_112 : f32
    %594 = math.rsqrt %593 : f32
    %595 = vector.broadcast %594 : f32 to vector<22x38xf32>
    %596 = arith.mulf %586, %595 : vector<22x38xf32>
    %c8_113 = arith.constant 8 : index
    %597 = memref.load %arg3[%c8_113] : memref<16xf32, #tpu.memory_space<smem>>
    %598 = vector.broadcast %597 : f32 to vector<22x38xf32>
    %599 = arith.mulf %596, %598 : vector<22x38xf32>
    %c8_114 = arith.constant 8 : index
    %600 = memref.load %arg4[%c8_114] : memref<16xf32, #tpu.memory_space<smem>>
    %601 = vector.broadcast %600 : f32 to vector<22x38xf32>
    %602 = arith.addf %599, %601 : vector<22x38xf32>
    %cst_115 = arith.constant 0.000000e+00 : f32
    %603 = vector.broadcast %cst_115 : f32 to vector<22x38xf32>
    %604 = arith.maximumf %602, %603 : vector<22x38xf32>
    %c0_116 = arith.constant 0 : index
    %c8_117 = arith.constant 8 : index
    %c0_118 = arith.constant 0 : index
    %c0_119 = arith.constant 0 : index
    %605 = vector.load %arg6[%c0_116, %c8_117, %c0_118, %c0_119] : memref<1x16x22x38xf32, #tpu.memory_space<vmem>>, vector<1x1x22x38xf32>
    %606 = vector.shape_cast %605 : vector<1x1x22x38xf32> to vector<22x38xf32>
    %607 = vector.shape_cast %604 : vector<22x38xf32> to vector<1x1x22x38xf32>
    tpu.vector_store %arg6[%c0_116, %c8_117, %c0_118, %c0_119], %607 {strides = array<i32>} : memref<1x16x22x38xf32, #tpu.memory_space<vmem>>, vector<1x1x22x38xf32>,
    %c9_120 = arith.constant 9 : index
    %608 = memref.load %arg2[%c9_120] : memref<16xf32, #tpu.memory_space<smem>>
    %c81 = arith.constant 81 : index
    %609 = memref.load %arg1[%c81] : memref<144xf32, #tpu.memory_space<smem>>
    %610 = vector.broadcast %609 : f32 to vector<22x38xf32>
    %611 = arith.mulf %610, %5 : vector<22x38xf32>
    %612 = vector.broadcast %608 : f32 to vector<22x38xf32>
    %613 = arith.addf %612, %611 : vector<22x38xf32>
    %c82 = arith.constant 82 : index
    %614 = memref.load %arg1[%c82] : memref<144xf32, #tpu.memory_space<smem>>
    %615 = vector.broadcast %614 : f32 to vector<22x38xf32>
    %616 = arith.mulf %615, %6 : vector<22x38xf32>
    %617 = arith.addf %613, %616 : vector<22x38xf32>
    %c83 = arith.constant 83 : index
    %618 = memref.load %arg1[%c83] : memref<144xf32, #tpu.memory_space<smem>>
    %619 = vector.broadcast %618 : f32 to vector<22x38xf32>
    %620 = arith.mulf %619, %7 : vector<22x38xf32>
    %621 = arith.addf %617, %620 : vector<22x38xf32>
    %c84 = arith.constant 84 : index
    %622 = memref.load %arg1[%c84] : memref<144xf32, #tpu.memory_space<smem>>
    %623 = vector.broadcast %622 : f32 to vector<22x38xf32>
    %624 = arith.mulf %623, %8 : vector<22x38xf32>
    %625 = arith.addf %621, %624 : vector<22x38xf32>
    %c85 = arith.constant 85 : index
    %626 = memref.load %arg1[%c85] : memref<144xf32, #tpu.memory_space<smem>>
    %627 = vector.broadcast %626 : f32 to vector<22x38xf32>
    %628 = arith.mulf %627, %9 : vector<22x38xf32>
    %629 = arith.addf %625, %628 : vector<22x38xf32>
    %c86 = arith.constant 86 : index
    %630 = memref.load %arg1[%c86] : memref<144xf32, #tpu.memory_space<smem>>
    %631 = vector.broadcast %630 : f32 to vector<22x38xf32>
    %632 = arith.mulf %631, %10 : vector<22x38xf32>
    %633 = arith.addf %629, %632 : vector<22x38xf32>
    %c87 = arith.constant 87 : index
    %634 = memref.load %arg1[%c87] : memref<144xf32, #tpu.memory_space<smem>>
    %635 = vector.broadcast %634 : f32 to vector<22x38xf32>
    %636 = arith.mulf %635, %11 : vector<22x38xf32>
    %637 = arith.addf %633, %636 : vector<22x38xf32>
    %c88 = arith.constant 88 : index
    %638 = memref.load %arg1[%c88] : memref<144xf32, #tpu.memory_space<smem>>
    %639 = vector.broadcast %638 : f32 to vector<22x38xf32>
    %640 = arith.mulf %639, %12 : vector<22x38xf32>
    %641 = arith.addf %637, %640 : vector<22x38xf32>
    %c89 = arith.constant 89 : index
    %642 = memref.load %arg1[%c89] : memref<144xf32, #tpu.memory_space<smem>>
    %643 = vector.broadcast %642 : f32 to vector<22x38xf32>
    %644 = arith.mulf %643, %13 : vector<22x38xf32>
    %645 = arith.addf %641, %644 : vector<22x38xf32>
    %646 = vector.shape_cast %645 : vector<22x38xf32> to vector<1x22x38xf32>
    %cst_121 = arith.constant dense<0.000000e+00> : vector<1xf32>
    %647 = vector.multi_reduction <add>, %646, %cst_121 [1, 2] : vector<1x22x38xf32> to vector<1xf32>
    %648 = vector.shape_cast %647 : vector<1xf32> to vector<1x1x1xf32>
    %649 = vector.extract %648[0, 0, 0] : f32 from vector<1x1x1xf32>
    %cst_122 = arith.constant 0.0011961722 : f32
    %650 = arith.mulf %649, %cst_122 : f32
    %651 = vector.broadcast %650 : f32 to vector<22x38xf32>
    %652 = arith.subf %645, %651 : vector<22x38xf32>
    %653 = arith.mulf %652, %652 : vector<22x38xf32>
    %654 = vector.shape_cast %653 : vector<22x38xf32> to vector<1x22x38xf32>
    %cst_123 = arith.constant dense<0.000000e+00> : vector<1xf32>
    %655 = vector.multi_reduction <add>, %654, %cst_123 [1, 2] : vector<1x22x38xf32> to vector<1xf32>
    %656 = vector.shape_cast %655 : vector<1xf32> to vector<1x1x1xf32>
    %657 = vector.extract %656[0, 0, 0] : f32 from vector<1x1x1xf32>
    %cst_124 = arith.constant 0.0011961722 : f32
    %658 = arith.mulf %657, %cst_124 : f32
    %cst_125 = arith.constant 9.99999974E-6 : f32
    %659 = arith.addf %658, %cst_125 : f32
    %660 = math.rsqrt %659 : f32
    %661 = vector.broadcast %660 : f32 to vector<22x38xf32>
    %662 = arith.mulf %652, %661 : vector<22x38xf32>
    %c9_126 = arith.constant 9 : index
    %663 = memref.load %arg3[%c9_126] : memref<16xf32, #tpu.memory_space<smem>>
    %664 = vector.broadcast %663 : f32 to vector<22x38xf32>
    %665 = arith.mulf %662, %664 : vector<22x38xf32>
    %c9_127 = arith.constant 9 : index
    %666 = memref.load %arg4[%c9_127] : memref<16xf32, #tpu.memory_space<smem>>
    %667 = vector.broadcast %666 : f32 to vector<22x38xf32>
    %668 = arith.addf %665, %667 : vector<22x38xf32>
    %cst_128 = arith.constant 0.000000e+00 : f32
    %669 = vector.broadcast %cst_128 : f32 to vector<22x38xf32>
    %670 = arith.maximumf %668, %669 : vector<22x38xf32>
    %c0_129 = arith.constant 0 : index
    %c9_130 = arith.constant 9 : index
    %c0_131 = arith.constant 0 : index
    %c0_132 = arith.constant 0 : index
    %671 = vector.load %arg6[%c0_129, %c9_130, %c0_131, %c0_132] : memref<1x16x22x38xf32, #tpu.memory_space<vmem>>, vector<1x1x22x38xf32>
    %672 = vector.shape_cast %671 : vector<1x1x22x38xf32> to vector<22x38xf32>
    %673 = vector.shape_cast %670 : vector<22x38xf32> to vector<1x1x22x38xf32>
    tpu.vector_store %arg6[%c0_129, %c9_130, %c0_131, %c0_132], %673 {strides = array<i32>} : memref<1x16x22x38xf32, #tpu.memory_space<vmem>>, vector<1x1x22x38xf32>,
    %c10_133 = arith.constant 10 : index
    %674 = memref.load %arg2[%c10_133] : memref<16xf32, #tpu.memory_space<smem>>
    %c90 = arith.constant 90 : index
    %675 = memref.load %arg1[%c90] : memref<144xf32, #tpu.memory_space<smem>>
    %676 = vector.broadcast %675 : f32 to vector<22x38xf32>
    %677 = arith.mulf %676, %5 : vector<22x38xf32>
    %678 = vector.broadcast %674 : f32 to vector<22x38xf32>
    %679 = arith.addf %678, %677 : vector<22x38xf32>
    %c91 = arith.constant 91 : index
    %680 = memref.load %arg1[%c91] : memref<144xf32, #tpu.memory_space<smem>>
    %681 = vector.broadcast %680 : f32 to vector<22x38xf32>
    %682 = arith.mulf %681, %6 : vector<22x38xf32>
    %683 = arith.addf %679, %682 : vector<22x38xf32>
    %c92 = arith.constant 92 : index
    %684 = memref.load %arg1[%c92] : memref<144xf32, #tpu.memory_space<smem>>
    %685 = vector.broadcast %684 : f32 to vector<22x38xf32>
    %686 = arith.mulf %685, %7 : vector<22x38xf32>
    %687 = arith.addf %683, %686 : vector<22x38xf32>
    %c93 = arith.constant 93 : index
    %688 = memref.load %arg1[%c93] : memref<144xf32, #tpu.memory_space<smem>>
    %689 = vector.broadcast %688 : f32 to vector<22x38xf32>
    %690 = arith.mulf %689, %8 : vector<22x38xf32>
    %691 = arith.addf %687, %690 : vector<22x38xf32>
    %c94 = arith.constant 94 : index
    %692 = memref.load %arg1[%c94] : memref<144xf32, #tpu.memory_space<smem>>
    %693 = vector.broadcast %692 : f32 to vector<22x38xf32>
    %694 = arith.mulf %693, %9 : vector<22x38xf32>
    %695 = arith.addf %691, %694 : vector<22x38xf32>
    %c95 = arith.constant 95 : index
    %696 = memref.load %arg1[%c95] : memref<144xf32, #tpu.memory_space<smem>>
    %697 = vector.broadcast %696 : f32 to vector<22x38xf32>
    %698 = arith.mulf %697, %10 : vector<22x38xf32>
    %699 = arith.addf %695, %698 : vector<22x38xf32>
    %c96 = arith.constant 96 : index
    %700 = memref.load %arg1[%c96] : memref<144xf32, #tpu.memory_space<smem>>
    %701 = vector.broadcast %700 : f32 to vector<22x38xf32>
    %702 = arith.mulf %701, %11 : vector<22x38xf32>
    %703 = arith.addf %699, %702 : vector<22x38xf32>
    %c97 = arith.constant 97 : index
    %704 = memref.load %arg1[%c97] : memref<144xf32, #tpu.memory_space<smem>>
    %705 = vector.broadcast %704 : f32 to vector<22x38xf32>
    %706 = arith.mulf %705, %12 : vector<22x38xf32>
    %707 = arith.addf %703, %706 : vector<22x38xf32>
    %c98 = arith.constant 98 : index
    %708 = memref.load %arg1[%c98] : memref<144xf32, #tpu.memory_space<smem>>
    %709 = vector.broadcast %708 : f32 to vector<22x38xf32>
    %710 = arith.mulf %709, %13 : vector<22x38xf32>
    %711 = arith.addf %707, %710 : vector<22x38xf32>
    %712 = vector.shape_cast %711 : vector<22x38xf32> to vector<1x22x38xf32>
    %cst_134 = arith.constant dense<0.000000e+00> : vector<1xf32>
    %713 = vector.multi_reduction <add>, %712, %cst_134 [1, 2] : vector<1x22x38xf32> to vector<1xf32>
    %714 = vector.shape_cast %713 : vector<1xf32> to vector<1x1x1xf32>
    %715 = vector.extract %714[0, 0, 0] : f32 from vector<1x1x1xf32>
    %cst_135 = arith.constant 0.0011961722 : f32
    %716 = arith.mulf %715, %cst_135 : f32
    %717 = vector.broadcast %716 : f32 to vector<22x38xf32>
    %718 = arith.subf %711, %717 : vector<22x38xf32>
    %719 = arith.mulf %718, %718 : vector<22x38xf32>
    %720 = vector.shape_cast %719 : vector<22x38xf32> to vector<1x22x38xf32>
    %cst_136 = arith.constant dense<0.000000e+00> : vector<1xf32>
    %721 = vector.multi_reduction <add>, %720, %cst_136 [1, 2] : vector<1x22x38xf32> to vector<1xf32>
    %722 = vector.shape_cast %721 : vector<1xf32> to vector<1x1x1xf32>
    %723 = vector.extract %722[0, 0, 0] : f32 from vector<1x1x1xf32>
    %cst_137 = arith.constant 0.0011961722 : f32
    %724 = arith.mulf %723, %cst_137 : f32
    %cst_138 = arith.constant 9.99999974E-6 : f32
    %725 = arith.addf %724, %cst_138 : f32
    %726 = math.rsqrt %725 : f32
    %727 = vector.broadcast %726 : f32 to vector<22x38xf32>
    %728 = arith.mulf %718, %727 : vector<22x38xf32>
    %c10_139 = arith.constant 10 : index
    %729 = memref.load %arg3[%c10_139] : memref<16xf32, #tpu.memory_space<smem>>
    %730 = vector.broadcast %729 : f32 to vector<22x38xf32>
    %731 = arith.mulf %728, %730 : vector<22x38xf32>
    %c10_140 = arith.constant 10 : index
    %732 = memref.load %arg4[%c10_140] : memref<16xf32, #tpu.memory_space<smem>>
    %733 = vector.broadcast %732 : f32 to vector<22x38xf32>
    %734 = arith.addf %731, %733 : vector<22x38xf32>
    %cst_141 = arith.constant 0.000000e+00 : f32
    %735 = vector.broadcast %cst_141 : f32 to vector<22x38xf32>
    %736 = arith.maximumf %734, %735 : vector<22x38xf32>
    %c0_142 = arith.constant 0 : index
    %c10_143 = arith.constant 10 : index
    %c0_144 = arith.constant 0 : index
    %c0_145 = arith.constant 0 : index
    %737 = vector.load %arg6[%c0_142, %c10_143, %c0_144, %c0_145] : memref<1x16x22x38xf32, #tpu.memory_space<vmem>>, vector<1x1x22x38xf32>
    %738 = vector.shape_cast %737 : vector<1x1x22x38xf32> to vector<22x38xf32>
    %739 = vector.shape_cast %736 : vector<22x38xf32> to vector<1x1x22x38xf32>
    tpu.vector_store %arg6[%c0_142, %c10_143, %c0_144, %c0_145], %739 {strides = array<i32>} : memref<1x16x22x38xf32, #tpu.memory_space<vmem>>, vector<1x1x22x38xf32>,
    %c11_146 = arith.constant 11 : index
    %740 = memref.load %arg2[%c11_146] : memref<16xf32, #tpu.memory_space<smem>>
    %c99 = arith.constant 99 : index
    %741 = memref.load %arg1[%c99] : memref<144xf32, #tpu.memory_space<smem>>
    %742 = vector.broadcast %741 : f32 to vector<22x38xf32>
    %743 = arith.mulf %742, %5 : vector<22x38xf32>
    %744 = vector.broadcast %740 : f32 to vector<22x38xf32>
    %745 = arith.addf %744, %743 : vector<22x38xf32>
    %c100 = arith.constant 100 : index
    %746 = memref.load %arg1[%c100] : memref<144xf32, #tpu.memory_space<smem>>
    %747 = vector.broadcast %746 : f32 to vector<22x38xf32>
    %748 = arith.mulf %747, %6 : vector<22x38xf32>
    %749 = arith.addf %745, %748 : vector<22x38xf32>
    %c101 = arith.constant 101 : index
    %750 = memref.load %arg1[%c101] : memref<144xf32, #tpu.memory_space<smem>>
    %751 = vector.broadcast %750 : f32 to vector<22x38xf32>
    %752 = arith.mulf %751, %7 : vector<22x38xf32>
    %753 = arith.addf %749, %752 : vector<22x38xf32>
    %c102 = arith.constant 102 : index
    %754 = memref.load %arg1[%c102] : memref<144xf32, #tpu.memory_space<smem>>
    %755 = vector.broadcast %754 : f32 to vector<22x38xf32>
    %756 = arith.mulf %755, %8 : vector<22x38xf32>
    %757 = arith.addf %753, %756 : vector<22x38xf32>
    %c103 = arith.constant 103 : index
    %758 = memref.load %arg1[%c103] : memref<144xf32, #tpu.memory_space<smem>>
    %759 = vector.broadcast %758 : f32 to vector<22x38xf32>
    %760 = arith.mulf %759, %9 : vector<22x38xf32>
    %761 = arith.addf %757, %760 : vector<22x38xf32>
    %c104 = arith.constant 104 : index
    %762 = memref.load %arg1[%c104] : memref<144xf32, #tpu.memory_space<smem>>
    %763 = vector.broadcast %762 : f32 to vector<22x38xf32>
    %764 = arith.mulf %763, %10 : vector<22x38xf32>
    %765 = arith.addf %761, %764 : vector<22x38xf32>
    %c105 = arith.constant 105 : index
    %766 = memref.load %arg1[%c105] : memref<144xf32, #tpu.memory_space<smem>>
    %767 = vector.broadcast %766 : f32 to vector<22x38xf32>
    %768 = arith.mulf %767, %11 : vector<22x38xf32>
    %769 = arith.addf %765, %768 : vector<22x38xf32>
    %c106 = arith.constant 106 : index
    %770 = memref.load %arg1[%c106] : memref<144xf32, #tpu.memory_space<smem>>
    %771 = vector.broadcast %770 : f32 to vector<22x38xf32>
    %772 = arith.mulf %771, %12 : vector<22x38xf32>
    %773 = arith.addf %769, %772 : vector<22x38xf32>
    %c107 = arith.constant 107 : index
    %774 = memref.load %arg1[%c107] : memref<144xf32, #tpu.memory_space<smem>>
    %775 = vector.broadcast %774 : f32 to vector<22x38xf32>
    %776 = arith.mulf %775, %13 : vector<22x38xf32>
    %777 = arith.addf %773, %776 : vector<22x38xf32>
    %778 = vector.shape_cast %777 : vector<22x38xf32> to vector<1x22x38xf32>
    %cst_147 = arith.constant dense<0.000000e+00> : vector<1xf32>
    %779 = vector.multi_reduction <add>, %778, %cst_147 [1, 2] : vector<1x22x38xf32> to vector<1xf32>
    %780 = vector.shape_cast %779 : vector<1xf32> to vector<1x1x1xf32>
    %781 = vector.extract %780[0, 0, 0] : f32 from vector<1x1x1xf32>
    %cst_148 = arith.constant 0.0011961722 : f32
    %782 = arith.mulf %781, %cst_148 : f32
    %783 = vector.broadcast %782 : f32 to vector<22x38xf32>
    %784 = arith.subf %777, %783 : vector<22x38xf32>
    %785 = arith.mulf %784, %784 : vector<22x38xf32>
    %786 = vector.shape_cast %785 : vector<22x38xf32> to vector<1x22x38xf32>
    %cst_149 = arith.constant dense<0.000000e+00> : vector<1xf32>
    %787 = vector.multi_reduction <add>, %786, %cst_149 [1, 2] : vector<1x22x38xf32> to vector<1xf32>
    %788 = vector.shape_cast %787 : vector<1xf32> to vector<1x1x1xf32>
    %789 = vector.extract %788[0, 0, 0] : f32 from vector<1x1x1xf32>
    %cst_150 = arith.constant 0.0011961722 : f32
    %790 = arith.mulf %789, %cst_150 : f32
    %cst_151 = arith.constant 9.99999974E-6 : f32
    %791 = arith.addf %790, %cst_151 : f32
    %792 = math.rsqrt %791 : f32
    %793 = vector.broadcast %792 : f32 to vector<22x38xf32>
    %794 = arith.mulf %784, %793 : vector<22x38xf32>
    %c11_152 = arith.constant 11 : index
    %795 = memref.load %arg3[%c11_152] : memref<16xf32, #tpu.memory_space<smem>>
    %796 = vector.broadcast %795 : f32 to vector<22x38xf32>
    %797 = arith.mulf %794, %796 : vector<22x38xf32>
    %c11_153 = arith.constant 11 : index
    %798 = memref.load %arg4[%c11_153] : memref<16xf32, #tpu.memory_space<smem>>
    %799 = vector.broadcast %798 : f32 to vector<22x38xf32>
    %800 = arith.addf %797, %799 : vector<22x38xf32>
    %cst_154 = arith.constant 0.000000e+00 : f32
    %801 = vector.broadcast %cst_154 : f32 to vector<22x38xf32>
    %802 = arith.maximumf %800, %801 : vector<22x38xf32>
    %c0_155 = arith.constant 0 : index
    %c11_156 = arith.constant 11 : index
    %c0_157 = arith.constant 0 : index
    %c0_158 = arith.constant 0 : index
    %803 = vector.load %arg6[%c0_155, %c11_156, %c0_157, %c0_158] : memref<1x16x22x38xf32, #tpu.memory_space<vmem>>, vector<1x1x22x38xf32>
    %804 = vector.shape_cast %803 : vector<1x1x22x38xf32> to vector<22x38xf32>
    %805 = vector.shape_cast %802 : vector<22x38xf32> to vector<1x1x22x38xf32>
    tpu.vector_store %arg6[%c0_155, %c11_156, %c0_157, %c0_158], %805 {strides = array<i32>} : memref<1x16x22x38xf32, #tpu.memory_space<vmem>>, vector<1x1x22x38xf32>,
    %c12_159 = arith.constant 12 : index
    %806 = memref.load %arg2[%c12_159] : memref<16xf32, #tpu.memory_space<smem>>
    %c108 = arith.constant 108 : index
    %807 = memref.load %arg1[%c108] : memref<144xf32, #tpu.memory_space<smem>>
    %808 = vector.broadcast %807 : f32 to vector<22x38xf32>
    %809 = arith.mulf %808, %5 : vector<22x38xf32>
    %810 = vector.broadcast %806 : f32 to vector<22x38xf32>
    %811 = arith.addf %810, %809 : vector<22x38xf32>
    %c109 = arith.constant 109 : index
    %812 = memref.load %arg1[%c109] : memref<144xf32, #tpu.memory_space<smem>>
    %813 = vector.broadcast %812 : f32 to vector<22x38xf32>
    %814 = arith.mulf %813, %6 : vector<22x38xf32>
    %815 = arith.addf %811, %814 : vector<22x38xf32>
    %c110 = arith.constant 110 : index
    %816 = memref.load %arg1[%c110] : memref<144xf32, #tpu.memory_space<smem>>
    %817 = vector.broadcast %816 : f32 to vector<22x38xf32>
    %818 = arith.mulf %817, %7 : vector<22x38xf32>
    %819 = arith.addf %815, %818 : vector<22x38xf32>
    %c111 = arith.constant 111 : index
    %820 = memref.load %arg1[%c111] : memref<144xf32, #tpu.memory_space<smem>>
    %821 = vector.broadcast %820 : f32 to vector<22x38xf32>
    %822 = arith.mulf %821, %8 : vector<22x38xf32>
    %823 = arith.addf %819, %822 : vector<22x38xf32>
    %c112 = arith.constant 112 : index
    %824 = memref.load %arg1[%c112] : memref<144xf32, #tpu.memory_space<smem>>
    %825 = vector.broadcast %824 : f32 to vector<22x38xf32>
    %826 = arith.mulf %825, %9 : vector<22x38xf32>
    %827 = arith.addf %823, %826 : vector<22x38xf32>
    %c113 = arith.constant 113 : index
    %828 = memref.load %arg1[%c113] : memref<144xf32, #tpu.memory_space<smem>>
    %829 = vector.broadcast %828 : f32 to vector<22x38xf32>
    %830 = arith.mulf %829, %10 : vector<22x38xf32>
    %831 = arith.addf %827, %830 : vector<22x38xf32>
    %c114 = arith.constant 114 : index
    %832 = memref.load %arg1[%c114] : memref<144xf32, #tpu.memory_space<smem>>
    %833 = vector.broadcast %832 : f32 to vector<22x38xf32>
    %834 = arith.mulf %833, %11 : vector<22x38xf32>
    %835 = arith.addf %831, %834 : vector<22x38xf32>
    %c115 = arith.constant 115 : index
    %836 = memref.load %arg1[%c115] : memref<144xf32, #tpu.memory_space<smem>>
    %837 = vector.broadcast %836 : f32 to vector<22x38xf32>
    %838 = arith.mulf %837, %12 : vector<22x38xf32>
    %839 = arith.addf %835, %838 : vector<22x38xf32>
    %c116 = arith.constant 116 : index
    %840 = memref.load %arg1[%c116] : memref<144xf32, #tpu.memory_space<smem>>
    %841 = vector.broadcast %840 : f32 to vector<22x38xf32>
    %842 = arith.mulf %841, %13 : vector<22x38xf32>
    %843 = arith.addf %839, %842 : vector<22x38xf32>
    %844 = vector.shape_cast %843 : vector<22x38xf32> to vector<1x22x38xf32>
    %cst_160 = arith.constant dense<0.000000e+00> : vector<1xf32>
    %845 = vector.multi_reduction <add>, %844, %cst_160 [1, 2] : vector<1x22x38xf32> to vector<1xf32>
    %846 = vector.shape_cast %845 : vector<1xf32> to vector<1x1x1xf32>
    %847 = vector.extract %846[0, 0, 0] : f32 from vector<1x1x1xf32>
    %cst_161 = arith.constant 0.0011961722 : f32
    %848 = arith.mulf %847, %cst_161 : f32
    %849 = vector.broadcast %848 : f32 to vector<22x38xf32>
    %850 = arith.subf %843, %849 : vector<22x38xf32>
    %851 = arith.mulf %850, %850 : vector<22x38xf32>
    %852 = vector.shape_cast %851 : vector<22x38xf32> to vector<1x22x38xf32>
    %cst_162 = arith.constant dense<0.000000e+00> : vector<1xf32>
    %853 = vector.multi_reduction <add>, %852, %cst_162 [1, 2] : vector<1x22x38xf32> to vector<1xf32>
    %854 = vector.shape_cast %853 : vector<1xf32> to vector<1x1x1xf32>
    %855 = vector.extract %854[0, 0, 0] : f32 from vector<1x1x1xf32>
    %cst_163 = arith.constant 0.0011961722 : f32
    %856 = arith.mulf %855, %cst_163 : f32
    %cst_164 = arith.constant 9.99999974E-6 : f32
    %857 = arith.addf %856, %cst_164 : f32
    %858 = math.rsqrt %857 : f32
    %859 = vector.broadcast %858 : f32 to vector<22x38xf32>
    %860 = arith.mulf %850, %859 : vector<22x38xf32>
    %c12_165 = arith.constant 12 : index
    %861 = memref.load %arg3[%c12_165] : memref<16xf32, #tpu.memory_space<smem>>
    %862 = vector.broadcast %861 : f32 to vector<22x38xf32>
    %863 = arith.mulf %860, %862 : vector<22x38xf32>
    %c12_166 = arith.constant 12 : index
    %864 = memref.load %arg4[%c12_166] : memref<16xf32, #tpu.memory_space<smem>>
    %865 = vector.broadcast %864 : f32 to vector<22x38xf32>
    %866 = arith.addf %863, %865 : vector<22x38xf32>
    %cst_167 = arith.constant 0.000000e+00 : f32
    %867 = vector.broadcast %cst_167 : f32 to vector<22x38xf32>
    %868 = arith.maximumf %866, %867 : vector<22x38xf32>
    %c0_168 = arith.constant 0 : index
    %c12_169 = arith.constant 12 : index
    %c0_170 = arith.constant 0 : index
    %c0_171 = arith.constant 0 : index
    %869 = vector.load %arg6[%c0_168, %c12_169, %c0_170, %c0_171] : memref<1x16x22x38xf32, #tpu.memory_space<vmem>>, vector<1x1x22x38xf32>
    %870 = vector.shape_cast %869 : vector<1x1x22x38xf32> to vector<22x38xf32>
    %871 = vector.shape_cast %868 : vector<22x38xf32> to vector<1x1x22x38xf32>
    tpu.vector_store %arg6[%c0_168, %c12_169, %c0_170, %c0_171], %871 {strides = array<i32>} : memref<1x16x22x38xf32, #tpu.memory_space<vmem>>, vector<1x1x22x38xf32>,
    %c13_172 = arith.constant 13 : index
    %872 = memref.load %arg2[%c13_172] : memref<16xf32, #tpu.memory_space<smem>>
    %c117 = arith.constant 117 : index
    %873 = memref.load %arg1[%c117] : memref<144xf32, #tpu.memory_space<smem>>
    %874 = vector.broadcast %873 : f32 to vector<22x38xf32>
    %875 = arith.mulf %874, %5 : vector<22x38xf32>
    %876 = vector.broadcast %872 : f32 to vector<22x38xf32>
    %877 = arith.addf %876, %875 : vector<22x38xf32>
    %c118 = arith.constant 118 : index
    %878 = memref.load %arg1[%c118] : memref<144xf32, #tpu.memory_space<smem>>
    %879 = vector.broadcast %878 : f32 to vector<22x38xf32>
    %880 = arith.mulf %879, %6 : vector<22x38xf32>
    %881 = arith.addf %877, %880 : vector<22x38xf32>
    %c119 = arith.constant 119 : index
    %882 = memref.load %arg1[%c119] : memref<144xf32, #tpu.memory_space<smem>>
    %883 = vector.broadcast %882 : f32 to vector<22x38xf32>
    %884 = arith.mulf %883, %7 : vector<22x38xf32>
    %885 = arith.addf %881, %884 : vector<22x38xf32>
    %c120 = arith.constant 120 : index
    %886 = memref.load %arg1[%c120] : memref<144xf32, #tpu.memory_space<smem>>
    %887 = vector.broadcast %886 : f32 to vector<22x38xf32>
    %888 = arith.mulf %887, %8 : vector<22x38xf32>
    %889 = arith.addf %885, %888 : vector<22x38xf32>
    %c121 = arith.constant 121 : index
    %890 = memref.load %arg1[%c121] : memref<144xf32, #tpu.memory_space<smem>>
    %891 = vector.broadcast %890 : f32 to vector<22x38xf32>
    %892 = arith.mulf %891, %9 : vector<22x38xf32>
    %893 = arith.addf %889, %892 : vector<22x38xf32>
    %c122 = arith.constant 122 : index
    %894 = memref.load %arg1[%c122] : memref<144xf32, #tpu.memory_space<smem>>
    %895 = vector.broadcast %894 : f32 to vector<22x38xf32>
    %896 = arith.mulf %895, %10 : vector<22x38xf32>
    %897 = arith.addf %893, %896 : vector<22x38xf32>
    %c123 = arith.constant 123 : index
    %898 = memref.load %arg1[%c123] : memref<144xf32, #tpu.memory_space<smem>>
    %899 = vector.broadcast %898 : f32 to vector<22x38xf32>
    %900 = arith.mulf %899, %11 : vector<22x38xf32>
    %901 = arith.addf %897, %900 : vector<22x38xf32>
    %c124 = arith.constant 124 : index
    %902 = memref.load %arg1[%c124] : memref<144xf32, #tpu.memory_space<smem>>
    %903 = vector.broadcast %902 : f32 to vector<22x38xf32>
    %904 = arith.mulf %903, %12 : vector<22x38xf32>
    %905 = arith.addf %901, %904 : vector<22x38xf32>
    %c125 = arith.constant 125 : index
    %906 = memref.load %arg1[%c125] : memref<144xf32, #tpu.memory_space<smem>>
    %907 = vector.broadcast %906 : f32 to vector<22x38xf32>
    %908 = arith.mulf %907, %13 : vector<22x38xf32>
    %909 = arith.addf %905, %908 : vector<22x38xf32>
    %910 = vector.shape_cast %909 : vector<22x38xf32> to vector<1x22x38xf32>
    %cst_173 = arith.constant dense<0.000000e+00> : vector<1xf32>
    %911 = vector.multi_reduction <add>, %910, %cst_173 [1, 2] : vector<1x22x38xf32> to vector<1xf32>
    %912 = vector.shape_cast %911 : vector<1xf32> to vector<1x1x1xf32>
    %913 = vector.extract %912[0, 0, 0] : f32 from vector<1x1x1xf32>
    %cst_174 = arith.constant 0.0011961722 : f32
    %914 = arith.mulf %913, %cst_174 : f32
    %915 = vector.broadcast %914 : f32 to vector<22x38xf32>
    %916 = arith.subf %909, %915 : vector<22x38xf32>
    %917 = arith.mulf %916, %916 : vector<22x38xf32>
    %918 = vector.shape_cast %917 : vector<22x38xf32> to vector<1x22x38xf32>
    %cst_175 = arith.constant dense<0.000000e+00> : vector<1xf32>
    %919 = vector.multi_reduction <add>, %918, %cst_175 [1, 2] : vector<1x22x38xf32> to vector<1xf32>
    %920 = vector.shape_cast %919 : vector<1xf32> to vector<1x1x1xf32>
    %921 = vector.extract %920[0, 0, 0] : f32 from vector<1x1x1xf32>
    %cst_176 = arith.constant 0.0011961722 : f32
    %922 = arith.mulf %921, %cst_176 : f32
    %cst_177 = arith.constant 9.99999974E-6 : f32
    %923 = arith.addf %922, %cst_177 : f32
    %924 = math.rsqrt %923 : f32
    %925 = vector.broadcast %924 : f32 to vector<22x38xf32>
    %926 = arith.mulf %916, %925 : vector<22x38xf32>
    %c13_178 = arith.constant 13 : index
    %927 = memref.load %arg3[%c13_178] : memref<16xf32, #tpu.memory_space<smem>>
    %928 = vector.broadcast %927 : f32 to vector<22x38xf32>
    %929 = arith.mulf %926, %928 : vector<22x38xf32>
    %c13_179 = arith.constant 13 : index
    %930 = memref.load %arg4[%c13_179] : memref<16xf32, #tpu.memory_space<smem>>
    %931 = vector.broadcast %930 : f32 to vector<22x38xf32>
    %932 = arith.addf %929, %931 : vector<22x38xf32>
    %cst_180 = arith.constant 0.000000e+00 : f32
    %933 = vector.broadcast %cst_180 : f32 to vector<22x38xf32>
    %934 = arith.maximumf %932, %933 : vector<22x38xf32>
    %c0_181 = arith.constant 0 : index
    %c13_182 = arith.constant 13 : index
    %c0_183 = arith.constant 0 : index
    %c0_184 = arith.constant 0 : index
    %935 = vector.load %arg6[%c0_181, %c13_182, %c0_183, %c0_184] : memref<1x16x22x38xf32, #tpu.memory_space<vmem>>, vector<1x1x22x38xf32>
    %936 = vector.shape_cast %935 : vector<1x1x22x38xf32> to vector<22x38xf32>
    %937 = vector.shape_cast %934 : vector<22x38xf32> to vector<1x1x22x38xf32>
    tpu.vector_store %arg6[%c0_181, %c13_182, %c0_183, %c0_184], %937 {strides = array<i32>} : memref<1x16x22x38xf32, #tpu.memory_space<vmem>>, vector<1x1x22x38xf32>,
    %c14_185 = arith.constant 14 : index
    %938 = memref.load %arg2[%c14_185] : memref<16xf32, #tpu.memory_space<smem>>
    %c126 = arith.constant 126 : index
    %939 = memref.load %arg1[%c126] : memref<144xf32, #tpu.memory_space<smem>>
    %940 = vector.broadcast %939 : f32 to vector<22x38xf32>
    %941 = arith.mulf %940, %5 : vector<22x38xf32>
    %942 = vector.broadcast %938 : f32 to vector<22x38xf32>
    %943 = arith.addf %942, %941 : vector<22x38xf32>
    %c127 = arith.constant 127 : index
    %944 = memref.load %arg1[%c127] : memref<144xf32, #tpu.memory_space<smem>>
    %945 = vector.broadcast %944 : f32 to vector<22x38xf32>
    %946 = arith.mulf %945, %6 : vector<22x38xf32>
    %947 = arith.addf %943, %946 : vector<22x38xf32>
    %c128 = arith.constant 128 : index
    %948 = memref.load %arg1[%c128] : memref<144xf32, #tpu.memory_space<smem>>
    %949 = vector.broadcast %948 : f32 to vector<22x38xf32>
    %950 = arith.mulf %949, %7 : vector<22x38xf32>
    %951 = arith.addf %947, %950 : vector<22x38xf32>
    %c129 = arith.constant 129 : index
    %952 = memref.load %arg1[%c129] : memref<144xf32, #tpu.memory_space<smem>>
    %953 = vector.broadcast %952 : f32 to vector<22x38xf32>
    %954 = arith.mulf %953, %8 : vector<22x38xf32>
    %955 = arith.addf %951, %954 : vector<22x38xf32>
    %c130 = arith.constant 130 : index
    %956 = memref.load %arg1[%c130] : memref<144xf32, #tpu.memory_space<smem>>
    %957 = vector.broadcast %956 : f32 to vector<22x38xf32>
    %958 = arith.mulf %957, %9 : vector<22x38xf32>
    %959 = arith.addf %955, %958 : vector<22x38xf32>
    %c131 = arith.constant 131 : index
    %960 = memref.load %arg1[%c131] : memref<144xf32, #tpu.memory_space<smem>>
    %961 = vector.broadcast %960 : f32 to vector<22x38xf32>
    %962 = arith.mulf %961, %10 : vector<22x38xf32>
    %963 = arith.addf %959, %962 : vector<22x38xf32>
    %c132 = arith.constant 132 : index
    %964 = memref.load %arg1[%c132] : memref<144xf32, #tpu.memory_space<smem>>
    %965 = vector.broadcast %964 : f32 to vector<22x38xf32>
    %966 = arith.mulf %965, %11 : vector<22x38xf32>
    %967 = arith.addf %963, %966 : vector<22x38xf32>
    %c133 = arith.constant 133 : index
    %968 = memref.load %arg1[%c133] : memref<144xf32, #tpu.memory_space<smem>>
    %969 = vector.broadcast %968 : f32 to vector<22x38xf32>
    %970 = arith.mulf %969, %12 : vector<22x38xf32>
    %971 = arith.addf %967, %970 : vector<22x38xf32>
    %c134 = arith.constant 134 : index
    %972 = memref.load %arg1[%c134] : memref<144xf32, #tpu.memory_space<smem>>
    %973 = vector.broadcast %972 : f32 to vector<22x38xf32>
    %974 = arith.mulf %973, %13 : vector<22x38xf32>
    %975 = arith.addf %971, %974 : vector<22x38xf32>
    %976 = vector.shape_cast %975 : vector<22x38xf32> to vector<1x22x38xf32>
    %cst_186 = arith.constant dense<0.000000e+00> : vector<1xf32>
    %977 = vector.multi_reduction <add>, %976, %cst_186 [1, 2] : vector<1x22x38xf32> to vector<1xf32>
    %978 = vector.shape_cast %977 : vector<1xf32> to vector<1x1x1xf32>
    %979 = vector.extract %978[0, 0, 0] : f32 from vector<1x1x1xf32>
    %cst_187 = arith.constant 0.0011961722 : f32
    %980 = arith.mulf %979, %cst_187 : f32
    %981 = vector.broadcast %980 : f32 to vector<22x38xf32>
    %982 = arith.subf %975, %981 : vector<22x38xf32>
    %983 = arith.mulf %982, %982 : vector<22x38xf32>
    %984 = vector.shape_cast %983 : vector<22x38xf32> to vector<1x22x38xf32>
    %cst_188 = arith.constant dense<0.000000e+00> : vector<1xf32>
    %985 = vector.multi_reduction <add>, %984, %cst_188 [1, 2] : vector<1x22x38xf32> to vector<1xf32>
    %986 = vector.shape_cast %985 : vector<1xf32> to vector<1x1x1xf32>
    %987 = vector.extract %986[0, 0, 0] : f32 from vector<1x1x1xf32>
    %cst_189 = arith.constant 0.0011961722 : f32
    %988 = arith.mulf %987, %cst_189 : f32
    %cst_190 = arith.constant 9.99999974E-6 : f32
    %989 = arith.addf %988, %cst_190 : f32
    %990 = math.rsqrt %989 : f32
    %991 = vector.broadcast %990 : f32 to vector<22x38xf32>
    %992 = arith.mulf %982, %991 : vector<22x38xf32>
    %c14_191 = arith.constant 14 : index
    %993 = memref.load %arg3[%c14_191] : memref<16xf32, #tpu.memory_space<smem>>
    %994 = vector.broadcast %993 : f32 to vector<22x38xf32>
    %995 = arith.mulf %992, %994 : vector<22x38xf32>
    %c14_192 = arith.constant 14 : index
    %996 = memref.load %arg4[%c14_192] : memref<16xf32, #tpu.memory_space<smem>>
    %997 = vector.broadcast %996 : f32 to vector<22x38xf32>
    %998 = arith.addf %995, %997 : vector<22x38xf32>
    %cst_193 = arith.constant 0.000000e+00 : f32
    %999 = vector.broadcast %cst_193 : f32 to vector<22x38xf32>
    %1000 = arith.maximumf %998, %999 : vector<22x38xf32>
    %c0_194 = arith.constant 0 : index
    %c14_195 = arith.constant 14 : index
    %c0_196 = arith.constant 0 : index
    %c0_197 = arith.constant 0 : index
    %1001 = vector.load %arg6[%c0_194, %c14_195, %c0_196, %c0_197] : memref<1x16x22x38xf32, #tpu.memory_space<vmem>>, vector<1x1x22x38xf32>
    %1002 = vector.shape_cast %1001 : vector<1x1x22x38xf32> to vector<22x38xf32>
    %1003 = vector.shape_cast %1000 : vector<22x38xf32> to vector<1x1x22x38xf32>
    tpu.vector_store %arg6[%c0_194, %c14_195, %c0_196, %c0_197], %1003 {strides = array<i32>} : memref<1x16x22x38xf32, #tpu.memory_space<vmem>>, vector<1x1x22x38xf32>,
    %c15_198 = arith.constant 15 : index
    %1004 = memref.load %arg2[%c15_198] : memref<16xf32, #tpu.memory_space<smem>>
    %c135 = arith.constant 135 : index
    %1005 = memref.load %arg1[%c135] : memref<144xf32, #tpu.memory_space<smem>>
    %1006 = vector.broadcast %1005 : f32 to vector<22x38xf32>
    %1007 = arith.mulf %1006, %5 : vector<22x38xf32>
    %1008 = vector.broadcast %1004 : f32 to vector<22x38xf32>
    %1009 = arith.addf %1008, %1007 : vector<22x38xf32>
    %c136 = arith.constant 136 : index
    %1010 = memref.load %arg1[%c136] : memref<144xf32, #tpu.memory_space<smem>>
    %1011 = vector.broadcast %1010 : f32 to vector<22x38xf32>
    %1012 = arith.mulf %1011, %6 : vector<22x38xf32>
    %1013 = arith.addf %1009, %1012 : vector<22x38xf32>
    %c137 = arith.constant 137 : index
    %1014 = memref.load %arg1[%c137] : memref<144xf32, #tpu.memory_space<smem>>
    %1015 = vector.broadcast %1014 : f32 to vector<22x38xf32>
    %1016 = arith.mulf %1015, %7 : vector<22x38xf32>
    %1017 = arith.addf %1013, %1016 : vector<22x38xf32>
    %c138 = arith.constant 138 : index
    %1018 = memref.load %arg1[%c138] : memref<144xf32, #tpu.memory_space<smem>>
    %1019 = vector.broadcast %1018 : f32 to vector<22x38xf32>
    %1020 = arith.mulf %1019, %8 : vector<22x38xf32>
    %1021 = arith.addf %1017, %1020 : vector<22x38xf32>
    %c139 = arith.constant 139 : index
    %1022 = memref.load %arg1[%c139] : memref<144xf32, #tpu.memory_space<smem>>
    %1023 = vector.broadcast %1022 : f32 to vector<22x38xf32>
    %1024 = arith.mulf %1023, %9 : vector<22x38xf32>
    %1025 = arith.addf %1021, %1024 : vector<22x38xf32>
    %c140 = arith.constant 140 : index
    %1026 = memref.load %arg1[%c140] : memref<144xf32, #tpu.memory_space<smem>>
    %1027 = vector.broadcast %1026 : f32 to vector<22x38xf32>
    %1028 = arith.mulf %1027, %10 : vector<22x38xf32>
    %1029 = arith.addf %1025, %1028 : vector<22x38xf32>
    %c141 = arith.constant 141 : index
    %1030 = memref.load %arg1[%c141] : memref<144xf32, #tpu.memory_space<smem>>
    %1031 = vector.broadcast %1030 : f32 to vector<22x38xf32>
    %1032 = arith.mulf %1031, %11 : vector<22x38xf32>
    %1033 = arith.addf %1029, %1032 : vector<22x38xf32>
    %c142 = arith.constant 142 : index
    %1034 = memref.load %arg1[%c142] : memref<144xf32, #tpu.memory_space<smem>>
    %1035 = vector.broadcast %1034 : f32 to vector<22x38xf32>
    %1036 = arith.mulf %1035, %12 : vector<22x38xf32>
    %1037 = arith.addf %1033, %1036 : vector<22x38xf32>
    %c143 = arith.constant 143 : index
    %1038 = memref.load %arg1[%c143] : memref<144xf32, #tpu.memory_space<smem>>
    %1039 = vector.broadcast %1038 : f32 to vector<22x38xf32>
    %1040 = arith.mulf %1039, %13 : vector<22x38xf32>
    %1041 = arith.addf %1037, %1040 : vector<22x38xf32>
    %1042 = vector.shape_cast %1041 : vector<22x38xf32> to vector<1x22x38xf32>
    %cst_199 = arith.constant dense<0.000000e+00> : vector<1xf32>
    %1043 = vector.multi_reduction <add>, %1042, %cst_199 [1, 2] : vector<1x22x38xf32> to vector<1xf32>
    %1044 = vector.shape_cast %1043 : vector<1xf32> to vector<1x1x1xf32>
    %1045 = vector.extract %1044[0, 0, 0] : f32 from vector<1x1x1xf32>
    %cst_200 = arith.constant 0.0011961722 : f32
    %1046 = arith.mulf %1045, %cst_200 : f32
    %1047 = vector.broadcast %1046 : f32 to vector<22x38xf32>
    %1048 = arith.subf %1041, %1047 : vector<22x38xf32>
    %1049 = arith.mulf %1048, %1048 : vector<22x38xf32>
    %1050 = vector.shape_cast %1049 : vector<22x38xf32> to vector<1x22x38xf32>
    %cst_201 = arith.constant dense<0.000000e+00> : vector<1xf32>
    %1051 = vector.multi_reduction <add>, %1050, %cst_201 [1, 2] : vector<1x22x38xf32> to vector<1xf32>
    %1052 = vector.shape_cast %1051 : vector<1xf32> to vector<1x1x1xf32>
    %1053 = vector.extract %1052[0, 0, 0] : f32 from vector<1x1x1xf32>
    %cst_202 = arith.constant 0.0011961722 : f32
    %1054 = arith.mulf %1053, %cst_202 : f32
    %cst_203 = arith.constant 9.99999974E-6 : f32
    %1055 = arith.addf %1054, %cst_203 : f32
    %1056 = math.rsqrt %1055 : f32
    %1057 = vector.broadcast %1056 : f32 to vector<22x38xf32>
    %1058 = arith.mulf %1048, %1057 : vector<22x38xf32>
    %c15_204 = arith.constant 15 : index
    %1059 = memref.load %arg3[%c15_204] : memref<16xf32, #tpu.memory_space<smem>>
    %1060 = vector.broadcast %1059 : f32 to vector<22x38xf32>
    %1061 = arith.mulf %1058, %1060 : vector<22x38xf32>
    %c15_205 = arith.constant 15 : index
    %1062 = memref.load %arg4[%c15_205] : memref<16xf32, #tpu.memory_space<smem>>
    %1063 = vector.broadcast %1062 : f32 to vector<22x38xf32>
    %1064 = arith.addf %1061, %1063 : vector<22x38xf32>
    %cst_206 = arith.constant 0.000000e+00 : f32
    %1065 = vector.broadcast %cst_206 : f32 to vector<22x38xf32>
    %1066 = arith.maximumf %1064, %1065 : vector<22x38xf32>
    %c0_207 = arith.constant 0 : index
    %c15_208 = arith.constant 15 : index
    %c0_209 = arith.constant 0 : index
    %c0_210 = arith.constant 0 : index
    %1067 = vector.load %arg6[%c0_207, %c15_208, %c0_209, %c0_210] : memref<1x16x22x38xf32, #tpu.memory_space<vmem>>, vector<1x1x22x38xf32>
    %1068 = vector.shape_cast %1067 : vector<1x1x22x38xf32> to vector<22x38xf32>
    %1069 = vector.shape_cast %1066 : vector<22x38xf32> to vector<1x1x22x38xf32>
    tpu.vector_store %arg6[%c0_207, %c15_208, %c0_209, %c0_210], %1069 {strides = array<i32>} : memref<1x16x22x38xf32, #tpu.memory_space<vmem>>, vector<1x1x22x38xf32>,
    return
  }
  func.func @transform_0(%arg0: i32) -> i32 {
    %c0_i32 = arith.constant 0 : i32
    %c0_i32_0 = arith.constant 0 : i32
    return %c0_i32 : i32
  }
  func.func @transform_1(%arg0: i32) -> i32 {
    %c0_i32 = arith.constant 0 : i32
    %c0_i32_0 = arith.constant 0 : i32
    return %c0_i32 : i32
  }
  func.func @transform_2(%arg0: i32) -> i32 {
    %c0_i32 = arith.constant 0 : i32
    %c0_i32_0 = arith.constant 0 : i32
    return %c0_i32 : i32
  }
  func.func @transform_3(%arg0: i32) -> i32 {
    %c0_i32 = arith.constant 0 : i32
    %c0_i32_0 = arith.constant 0 : i32
    return %c0_i32 : i32
  }
  func.func @transform_4(%arg0: i32) -> (i32, i32, i32, i32) {
    %c0_i32 = arith.constant 0 : i32
    %c0_i32_0 = arith.constant 0 : i32
    %c0_i32_1 = arith.constant 0 : i32
    %c0_i32_2 = arith.constant 0 : i32
    %c0_i32_3 = arith.constant 0 : i32
    return %c0_i32, %c0_i32_0, %c0_i32_1, %c0_i32_2 : i32, i32, i32, i32
  }
  func.func @transform_5(%arg0: i32) -> (i32, i32, i32, i32) {
    %c0_i32 = arith.constant 0 : i32
    %c0_i32_0 = arith.constant 0 : i32
    %c0_i32_1 = arith.constant 0 : i32
    %c0_i32_2 = arith.constant 0 : i32
    %c0_i32_3 = arith.constant 0 : i32
    return %c0_i32, %c0_i32_0, %c0_i32_1, %c0_i32_2 : i32, i32, i32, i32
  }
}

</mosaic_0001>

<bundles_post_ra>
// kernel: tpu_custom_call.1
= control target key start
LH: loop header
LB: loop body
LE: loop exit
PB: predicated region body
PF: predicated region fallthrough
CT: control target
= control target key end

     0   :  { %10 = vsyncpa [#allocation4], 0  ;;  %s6335_s0 = inlined_call_operand.hbm [shape: f32[144], index: 0, kind: input, shape index: {}]   ;;  %s6336_s1 = inlined_call_operand.vmem [shape: f32[16], index: 1, kind: input, shape index: {}]   ;;  %s6337_s2 = inlined_call_operand.vmem [shape: f32[16], index: 2, kind: input, shape index: {}]   ;;  %s6338_s3 = inlined_call_operand.vmem [shape: f32[16], index: 3, kind: input, shape index: {}]   ;;  %s6339_s4 = inlined_call_operand.hbm [shape: f32[1,1,24,40], index: 4, kind: input, shape index: {}]   ;;  %s6340_s5 = inlined_call_operand.vmem [shape: f32[1,16,22,38], index: 5, kind: output, shape index: {}]  }
   0x1   :  { %11 = vsyncpa [#allocation5], 0 }
   0x2   :  { %12 = vsyncpa [#allocation8], 0  ;;  %s38_s20 = sshll.u32 %s6337_s2, 4  ;;  %s39_s20 = int_to_ptr.vmem [resolvable:$true] %s38_s20 }
   0x3   :  { %13 = vsyncpa [#allocation3], 0  ;;  %s4480_s21 = scalar_lea.vmem %s39_s20, 16  ;;  %p4485_p1 = scmp.lt.s32.totalorder %s39_s20, %s39_s20 }
   0x4   :  { %p4481_p0 = scmp.ne.s32.totalorder %s39_s20, %s4480_s21  ;;  %p4486_p2 = scmp.lt.s32.totalorder %s4480_s21, %s4480_s21 }
   0x6   :  { %p4487_p3 = por %p4486_p2, %p4485_p1 }
   0x8   :  { %p4488_p4 = pnand %p4487_p3, %p4481_p0 }
   0xa   :  { %4491 = shalt.err (!%p4488_p4)
}
   0xb   :  { %s4556_s22 = smov [#allocation7]   ;;  %s4492_s25 = scalar_lea.hbm %s6335_s0, 32 }
   0xc   :  { %41 = dma.vmem_to_smem %s39_s20, 16, %s4556_s22, [#allocation8]  }
   0xd   :  { %p4493_p5 = scmp.ne.s32.totalorder %s6335_s0, %s4492_s25  ;;  %p4496_p6 = scmp.lt.u32.totalorder %s4492_s25, %s6335_s0 }
   0xf   :  { %p4498_p7 = pnand %p4496_p6, %p4493_p5 }
  0x11   :  { %4501 = shalt.err (!%p4498_p7)
}
  0x12   :  { %s4557_s29 = smov [#allocation2]   ;;  %s28_s9 = sshll.u32 %s6336_s1, 4  ;;  %s29_s9 = int_to_ptr.vmem [resolvable:$true] %s28_s9 }
  0x13   :  { %21 = dma.hbm_to_smem %s6335_s0, 32, %s4557_s29, [#allocation4]  }
  0x14   :  { %s48_s12 = sshll.u32 %s6338_s3, 4  ;;  %s4502_s13 = scalar_lea.vmem %s29_s9, 16  ;;  %s49_s12 = int_to_ptr.vmem [resolvable:$true] %s48_s12 }
  0x15   :  { %p4503_p8 = scmp.ne.s32.totalorder %s29_s9, %s4502_s13  ;;  %p4507_p9 = scmp.lt.s32.totalorder %s29_s9, %s29_s9 }
  0x16   :  { %p4508_p10 = scmp.lt.s32.totalorder %s4502_s13, %s4502_s13 }
  0x18   :  { %p4509_p11 = por %p4508_p10, %p4507_p9 }
  0x1a   :  { %p4510_p12 = pnand %p4509_p11, %p4503_p8 }
  0x1c   :  { %4513 = shalt.err (!%p4510_p12)
}
  0x1d   :  { %s4558_s14 = smov [#allocation6]   ;;  %s4514_s0 = scalar_lea.vmem %s49_s12, 16 }
  0x1e   :  { %31 = dma.vmem_to_smem %s29_s9, 16, %s4558_s14, [#allocation5]  }
  0x1f   :  { %p4515_p13 = scmp.ne.s32.totalorder %s49_s12, %s4514_s0  ;;  %p4519_p0 = scmp.lt.s32.totalorder %s49_s12, %s49_s12 }
  0x20   :  { %p4520_p1 = scmp.lt.s32.totalorder %s4514_s0, %s4514_s0 }
  0x22   :  { %p4521_p2 = por %p4520_p1, %p4519_p0 }
  0x24   :  { %p4522_p3 = pnand %p4521_p2, %p4515_p13 }
  0x26   :  { %4525 = shalt.err (!%p4522_p3)
}
  0x27   :  { %s4559_s1 = smov [#allocation9]   ;;  %s4560_s3 = smov [#allocation10]  }
  0x28   :  { %51 = dma.vmem_to_smem %s49_s12, 16, %s4559_s1, [#allocation8]  }
  0x29   :  { %s57_s15 = sshll.u32 %s4560_s3, 4  ;;  %s4526_s18 = scalar_lea.hbm %s6339_s4, 384  ;;  %s58_s15 = int_to_ptr.vmem [resolvable:$true] %s57_s15 }
  0x2a   :  { %p4527_p4 = scmp.ne.s32.totalorder %s6339_s4, %s4526_s18  ;;  %p4530_p5 = scmp.lt.u32.totalorder %s4526_s18, %s6339_s4 }
  0x2c   :  { %p4532_p6 = pnand %p4530_p5, %p4527_p4 }
  0x2e   :  { %4535 = shalt.err (!%p4532_p6)
}
  0x2f   :  { %s4536_s23 = scalar_lea.vmem %s58_s15, 384  ;;  %p4541_p8 = scmp.lt.s32.totalorder %s58_s15, %s58_s15 }
  0x30   :  { %p4537_p7 = scmp.ne.s32.totalorder %s58_s15, %s4536_s23  ;;  %p4542_p9 = scmp.lt.s32.totalorder %s4536_s23, %s4536_s23 }
  0x32   :  { %p4543_p10 = por %p4542_p9, %p4541_p8 }
  0x34   :  { %p4544_p11 = pnand %p4543_p10, %p4537_p7 }
  0x36   :  { %4547 = shalt.err (!%p4544_p11)
}
  0x37   :  { %s4561_s24 = smov 128   ;;  %s4562_s25 = smov 8  }
  0x38   :  { %63 = dma.hbm_to_vmem [thread:$0]  %s6339_s4, 384, %s58_s15, [#allocation3], %s4561_s24, %s4561_s24, %s4562_s25  }
  0x39   :  { %4548 = dma.done.wait [#allocation4], 32  }
  0x3a   :  { %4549 = vsyncadd [#allocation4], 4294967264 }
  0x3b   :  { %4550 = dma.done.wait [#allocation5], 16  }
  0x3c   :  { %4551 = vsyncadd [#allocation5], 4294967280 }
  0x3d   :  { %4552 = dma.done.wait [#allocation8], 32  }
  0x3e   :  { %4553 = vsyncadd [#allocation8], 4294967264 }
  0x3f   :  { %4554 = dma.done.wait [#allocation3], 384  }
  0x40   :  { %4555 = vsyncadd [#allocation3], 4294966912 }
  0x41   :  { %79 = sfence }
  0x42   :  { %s4094_s2 = sld [smem:[#allocation2 + $0x1]]  ;;  %s4095_s28 = sld [smem:[#allocation2 + $0x2]]  ;;  %v4628_v0 = vld [vmem:[#allocation10 + $0x10] sm:$0xff]  ;;  %v4630_v1 = vld [vmem:[#allocation10] sm:$0xff]  ;;  %v4632_v3 = vld [vmem:[#allocation10 + $0x8] sm:$0xff]  ;;  %vm141_vm0 = vcmask 1046528  }
  0x43   :  { %s4097_s29 = sld [smem:[#allocation2 + $0x4]]  ;;  %s4098_s30 = sld [smem:[#allocation2 + $0x5]]  ;;  %vm211_vm1 = vcmask 1045504   ;;  %vm273_vm2 = vcmask 310272   ;;  %vm277_vm3 = vcmask 308224  }
  0x44   :  { %s4563_s4 = smov 127   ;;  %s4100_s6 = sld [smem:[#allocation2 + $0x7]] }
  0x45   :  { %s4564_s7 = smov 126   ;;  %s4101_s8 = sld [smem:[#allocation2 + $0x8]] }
  0x46   :  { %s4104_s9 = sld [smem:[#allocation2 + $0xa]]  ;;  %s4105_s10 = sld [smem:[#allocation2 + $0xb]] }
  0x47   :  { %s4107_s11 = sld [smem:[#allocation2 + $0xd]]  ;;  %s4108_s12 = sld [smem:[#allocation2 + $0xe]] }
  0x48   :  { %v94_v2 = vstv %s4094_s2  ;;  %v114_v6 = vstv %s4095_s28  ;;  %s4110_s13 = sld [smem:[#allocation2 + $0x10]]  ;;  %s4096_s0 = sld [smem:[#allocation2 + $0x3]] }
  0x49   :  { %v97_v4 = vmul.f32 %v94_v2, %v4628_v0  ;;  %v95_v5 = vmul.f32 %v94_v2, %v4630_v1  ;;  %v154_v7 = vstv %s4097_s29  ;;  %v115_v8 = vmul.f32 %v114_v6, %v4630_v1  ;;  %s84_s14 = sld [smem:[#allocation2]]  ;;  %s4099_s3 = sld [smem:[#allocation2 + $0x6]] }
  0x4a   :  { %v96_v9 = vmul.f32 %v94_v2, %v4632_v3  ;;  %v156_v10 = vmul.f32 %v154_v7, %v4632_v3  ;;  %v157_v11 = vmul.f32 %v154_v7, %v4628_v0  ;;  %v155_v12 = vmul.f32 %v154_v7, %v4630_v1  ;;  %s83_s1 = sld [smem:[#allocation6]]  ;;  %s4111_s15 = sld [smem:[#allocation2 + $0x11]] }
  0x4b   :  { %105 = vrot.lane.b32.xlu1 %v97_v4, %s4563_s4  ;;  %101 = vrot.lane.b32.xlu0 %v95_v5, %s4563_s4  ;;  %v179_v13 = vstv %s4098_s30  ;;  %v117_v14 = vmul.f32 %v114_v6, %v4628_v0  ;;  %v116_v15 = vmul.f32 %v114_v6, %v4632_v3  ;;  %v224_v22 = vstv %s4100_s6  ;;  %s4103_s16 = sld [smem:[#allocation2 + $0x9]]  ;;  %s4106_s18 = sld [smem:[#allocation2 + $0xc]] }
  0x4c   :  { %v180_v16 = vmul.f32 %v179_v13, %v4630_v1  ;;  %v162_v17 = vrot.slane %v156_v10, 1  ;;  %v164_v18 = vrot.slane %v157_v11, 1  ;;  %v161_v19 = vrot.slane %v155_v12, 1  ;;  %s4102_s17 = sld [smem:[#allocation6 + $0x1]]  ;;  %s4109_s19 = sld [smem:[#allocation2 + $0xf]] }
  0x4d   :  { %v181_v20 = vmul.f32 %v179_v13, %v4632_v3  ;;  %v182_v21 = vmul.f32 %v179_v13, %v4628_v0  ;;  %v226_v28 = vmul.f32 %v224_v22, %v4632_v3  ;;  %v227_v30 = vmul.f32 %v224_v22, %v4628_v0  ;;  %s4119_s22 = sld [smem:[#allocation2 + $0x13]]  ;;  %s4122_s23 = sld [smem:[#allocation2 + $0x16]] }
  0x4e   :  { %v165_v23 = vsel %vm141_vm0, %v162_v17, %v164_v18  ;;  %v163_v24 = vsel %vm141_vm0, %v161_v19, %v162_v17  ;;  %v186_v25 = vrot.slane %v180_v16, 1  ;;  %v225_v31 = vmul.f32 %v224_v22, %v4630_v1  ;;  %s4123_s24 = sld [smem:[#allocation2 + $0x17]]  ;;  %s4120_s25 = sld [smem:[#allocation2 + $0x14]] }
  0x4f   :  { %121 = vrot.lane.b32.xlu1 %v115_v8, %s4564_s7  ;;  %103 = vrot.lane.b32.xlu0 %v96_v9, %s4563_s4  ;;  %v187_v26 = vrot.slane %v181_v20, 1  ;;  %v189_v27 = vrot.slane %v182_v21, 1  ;;  %v249_v32 = vstv %s4101_s8  ;;  %v232_v34 = vrot.slane %v226_v28, 2  ;;  %s4125_s26 = sld [smem:[#allocation2 + $0x19]]  ;;  %s4126_s27 = sld [smem:[#allocation2 + $0x1a]] }
  0x50   :  { %v234_v35 = vrot.slane %v227_v30, 2  ;;  %v231_v36 = vrot.slane %v225_v31, 2  ;;  %v250_v37 = vmul.f32 %v249_v32, %v4630_v1  ;;  %v251_v38 = vmul.f32 %v249_v32, %v4632_v3  ;;  %s4117_s2 = sld [smem:[#allocation6 + $0x2]]  ;;  %s4121_s29 = sld [smem:[#allocation2 + $0x15]] }
  0x51   :  { %v188_v29 = vsel %vm141_vm0, %v186_v25, %v187_v26  ;;  %v190_v33 = vsel %vm141_vm0, %v187_v26, %v189_v27  ;;  %v252_v39 = vmul.f32 %v249_v32, %v4628_v0  ;;  %v347_v47 = vstv %s4104_s9  ;;  %s4118_s28 = sld [smem:[#allocation2 + $0x12]]  ;;  %s4124_s30 = sld [smem:[#allocation2 + $0x18]] }
  0x52   :  { %v235_v40 = vsel %vm211_vm1, %v232_v34, %v234_v35  ;;  %v233_v41 = vsel %vm211_vm1, %v231_v36, %v232_v34  ;;  %v256_v42 = vrot.slane %v250_v37, 2  ;;  %v257_v43 = vrot.slane %v251_v38, 2 }
  0x53   :  { %125 = vrot.lane.b32.xlu1 %v117_v14, %s4564_s7  ;;  %123 = vrot.lane.b32.xlu0 %v116_v15, %s4564_s7  ;;  %v259_v45 = vrot.slane %v252_v39, 2  ;;  %v348_v48 = vmul.f32 %v347_v47, %v4630_v1  ;;  %v349_v49 = vmul.f32 %v347_v47, %v4632_v3  ;;  %v350_v50 = vmul.f32 %v347_v47, %v4628_v0 }
  0x54   :  { %v258_v44 = vsel %vm211_vm1, %v256_v42, %v257_v43  ;;  %v367_v51 = vstv %s4105_s10  ;;  %v406_v53 = vstv %s4107_s11  ;;  %v431_v61 = vstv %s4108_s12  ;;  %s320_s10 = sld [smem:[#allocation7]] }
  0x55   :  { %v260_v46 = vsel %vm211_vm1, %v257_v43, %v259_v45  ;;  %v368_v52 = vmul.f32 %v367_v51, %v4630_v1  ;;  %v369_v54 = vmul.f32 %v367_v51, %v4632_v3  ;;  %v407_v55 = vmul.f32 %v406_v53, %v4630_v1  ;;  %s325_s11 = sld [smem:[#allocation9]] }
  0x56   :  { %v408_v56 = vmul.f32 %v406_v53, %v4632_v3  ;;  %v370_v57 = vmul.f32 %v367_v51, %v4628_v0  ;;  %v4692_v60 = vmul.f32 %v406_v53, %v4628_v0  ;;  %v432_v2 = vmul.f32 %v431_v61, %v4630_v1 }
  0x57   :  { %168 = vrot.lane.b32.xlu1 %v165_v23, %s4563_s4  ;;  %166 = vrot.lane.b32.xlu0 %v163_v24, %s4563_s4  ;;  %v413_v58 = vrot.slane %v407_v55, 1  ;;  %v433_v4 = vmul.f32 %v431_v61, %v4632_v3  ;;  %v434_v8 = vmul.f32 %v431_v61, %v4628_v0  ;;  %v475_v11 = vstv %s4110_s13 }
  0x58   :  { %v414_v59 = vrot.slane %v408_v56, 1  ;;  %v416_v63 = vrot.slane %v4692_v60, 1  ;;  %v438_v6 = vrot.slane %v432_v2, 1  ;;  %v476_v13 = vmul.f32 %v475_v11, %v4630_v1 }
  0x59   :  { %v439_v7 = vrot.slane %v433_v4, 1  ;;  %v441_v10 = vrot.slane %v434_v8, 1  ;;  %v477_v14 = vmul.f32 %v475_v11, %v4632_v3  ;;  %v4712_v17 = vmul.f32 %v475_v11, %v4628_v0 }
  0x5a   :  { %v415_v62 = vsel %vm141_vm0, %v413_v58, %v414_v59  ;;  %v417_v5 = vsel %vm141_vm0, %v414_v59, %v416_v63  ;;  %v482_v15 = vrot.slane %v476_v13, 2  ;;  %v85_v23 = vstv %s84_s14 }
  0x5b   :  { %191 = vrot.lane.b32.xlu1 %v188_v29, %s4564_s7  ;;  %170 = vrot.lane.b32.xlu0 %v164_v18, %s4563_s4  ;;  %v440_v9 = vsel %vm141_vm0, %v438_v6, %v439_v7  ;;  %v442_v12 = vsel %vm141_vm0, %v439_v7, %v441_v10  ;;  %v483_v16 = vrot.slane %v477_v14, 2  ;;  %v485_v19 = vrot.slane %v4712_v17, 2 }
  0x5c   :  { %v87_v24 = vmul.f32 %v85_v23, %v4632_v3  ;;  %v134_v28 = vstv %s4096_s0  ;;  %v89_v29 = vstv %s83_s1  ;;  %v88_v31 = vmul.f32 %v85_v23, %v4628_v0  ;;  %s4168_s0 = sld [smem:[#allocation2 + $0x32]]  ;;  %s4165_s1 = sld [smem:[#allocation2 + $0x2f]] }
  0x5d   :  { %v484_v18 = vsel %vm211_vm1, %v482_v15, %v483_v16  ;;  %v486_v20 = vsel %vm211_vm1, %v483_v16, %v485_v19  ;;  %v137_v30 = vmul.f32 %v134_v28, %v4628_v0  ;;  %v135_v36 = vmul.f32 %v134_v28, %v4630_v1 }
  0x5e   :  { %v91_v32 = vadd.f32 %v89_v29, %v87_v24  ;;  %v92_v39 = vadd.f32 %v89_v29, %v88_v31  ;;  %v204_v47 = vstv %s4099_s3  ;;  %v338_v17 = vstv %s4103_s16  ;;  %s4149_s3 = sld [smem:[#allocation2 + $0x25]]  ;;  %s4153_s16 = sld [smem:[#allocation2 + $0x29]] }
  0x5f   :  { %195 = vrot.lane.b32.xlu1 %v189_v27, %s4564_s7  ;;  %193 = vrot.lane.b32.xlu0 %v190_v33, %s4564_s7  ;;  %v86_v27 = vmul.f32 %v85_v23, %v4630_v1  ;;  %v145_v38 = vrot.slane %v137_v30, 1  ;;  %v142_v43 = vrot.slane %v135_v36, 1  ;;  %v207_v55 = vmul.f32 %v204_v47, %v4628_v0 }
  0x60   :  { %v205_v56 = vmul.f32 %v204_v47, %v4630_v1 }
  0x61   :  { %v90_v37 = vadd.f32 %v89_v29, %v86_v27  ;;  %v215_v4 = vrot.slane %v207_v55, 2  ;;  %v340_v55 = vmul.f32 %v338_v17, %v4632_v3 }
  0x63   :  { %238 = vrot.lane.b32.xlu1 %v235_v40, %s4563_s4  ;;  %236 = vrot.lane.b32.xlu0 %v233_v41, %s4563_s4 }
  0x67   :  { %261 = vrot.lane.b32.xlu1 %v258_v44, %s4564_s7  ;;  %240 = vrot.lane.b32.xlu0 %v234_v35, %s4563_s4  ;;  %v136_v35 = vmul.f32 %v134_v28, %v4632_v3 }
  0x69   :  { %v143_v41 = vrot.slane %v136_v35, 1 }
  0x6b   :  { %265 = vrot.lane.b32.xlu1 %v259_v45, %s4564_s7  ;;  %263 = vrot.lane.b32.xlu0 %v260_v46, %s4564_s7  ;;  %v144_v51 = vsel %vm141_vm0, %v142_v43, %v143_v41 }
  0x6f   :  { %354 = vrot.lane.b32.xlu1 %v348_v48, %s4563_s4  ;;  %v146_v48 = vsel %vm141_vm0, %v143_v41, %v145_v38 }
  0x73   :  { %356 = vrot.lane.b32.xlu1 %v349_v49, %s4563_s4 }
  0x77   :  { %358 = vrot.lane.b32.xlu1 %v350_v50, %s4563_s4 }
  0x7b   :  { %374 = vrot.lane.b32.xlu1 %v368_v52, %s4564_s7 }
  0x7f   :  { %376 = vrot.lane.b32.xlu1 %v369_v54, %s4564_s7  ;;  %v206_v54 = vmul.f32 %v204_v47, %v4632_v3 }
  0x81   :  { %v213_v2 = vrot.slane %v206_v54, 2 }
  0x83   :  { %378 = vrot.lane.b32.xlu1 %v370_v57, %s4564_s7 }
  0x87   :  { %418 = vrot.lane.b32.xlu1 %v415_v62, %s4563_s4 }
  0x8b   :  { %420 = vrot.lane.b32.xlu1 %v417_v5, %s4563_s4  ;;  %v212_v5 = vrot.slane %v205_v56, 2 }
  0x8d   :  { %v214_v14 = vsel %vm211_vm1, %v212_v5, %v213_v2 }
  0x8f   :  { %443 = vrot.lane.b32.xlu1 %v440_v9, %s4564_s7 }
  0x93   :  { %445 = vrot.lane.b32.xlu1 %v442_v12, %s4564_s7  ;;  %v216_v12 = vsel %vm211_vm1, %v213_v2, %v215_v4 }
  0x97   :  { %447 = vrot.lane.b32.xlu1 %v441_v10, %s4564_s7 }
  0x9b   :  { %487 = vrot.lane.b32.xlu1 %v484_v18, %s4563_s4 }
  0x9f   :  { %489 = vrot.lane.b32.xlu1 %v486_v20, %s4563_s4 }
  0xbd   :  { %v106_v21 = vpop.permute.xlu1 %105  ;;  %v102_v22 = vpop.permute.xlu0 %101 }
  0xbe   :  { %v110_v45 = vadd.f32 %v102_v22, %v90_v37  ;;  %v112_v49 = vadd.f32 %v106_v21, %v92_v39  ;;  %v500_v37 = vstv %s4111_s15  ;;  %s4152_s15 = sld [smem:[#allocation2 + $0x28]] }
  0xbf   :  { %v502_v39 = vmul.f32 %v500_v37, %v4632_v3 }
  0xc1   :  { %v122_v25 = vpop.permute.xlu1 %121  ;;  %v104_v26 = vpop.permute.xlu0 %103  ;;  %v508_v41 = vrot.slane %v502_v39, 2 }
  0xc2   :  { %v111_v40 = vadd.f32 %v104_v26, %v91_v32  ;;  %v130_v50 = vadd.f32 %v122_v25, %v110_v45 }
  0xc4   :  { %v150_v59 = vadd.f32 %v144_v51, %v130_v50  ;;  %v339_v50 = vmul.f32 %v338_v17, %v4630_v1  ;;  %v342_v51 = vstv %s4102_s17  ;;  %s4150_s17 = sld [smem:[#allocation2 + $0x26]] }
  0xc5   :  { %v126_v33 = vpop.permute.xlu1 %125  ;;  %v124_v34 = vpop.permute.xlu0 %123 }
  0xc6   :  { %v131_v46 = vadd.f32 %v124_v34, %v111_v40  ;;  %v132_v57 = vadd.f32 %v126_v33, %v112_v49  ;;  %v343_v54 = vadd.f32 %v342_v51, %v339_v50 }
  0xc8   :  { %v151_v58 = vadd.f32 %v146_v48, %v131_v46  ;;  %v152_v8 = vadd.f32 %v145_v38, %v132_v57  ;;  %v501_v38 = vmul.f32 %v500_v37, %v4630_v1 }
  0xc9   :  { %v169_v42 = vpop.permute.xlu1 %168  ;;  %v167_v44 = vpop.permute.xlu0 %166 }
  0xca   :  { %v176_v6 = vadd.f32 %v169_v42, %v151_v58  ;;  %v175_v7 = vadd.f32 %v167_v44, %v150_v59  ;;  %v507_v40 = vrot.slane %v501_v38, 2  ;;  %v503_v42 = vmul.f32 %v500_v37, %v4628_v0 }
  0xcb   :  { %v344_v59 = vadd.f32 %v342_v51, %v340_v55 }
  0xcc   :  { %v509_v43 = vsel %vm211_vm1, %v507_v40, %v508_v41  ;;  %v510_v44 = vrot.slane %v503_v42, 2 }
  0xcd   :  { %v192_v52 = vpop.permute.xlu1 %191  ;;  %v171_v53 = vpop.permute.xlu0 %170 }
  0xce   :  { %v200_v9 = vadd.f32 %v192_v52, %v175_v7  ;;  %v177_v10 = vadd.f32 %v171_v53, %v152_v8  ;;  %v511_v45 = vsel %vm211_vm1, %v508_v41, %v510_v44  ;;  %v387_v52 = vstv %s4106_s18  ;;  %s4134_s18 = sld [smem:[#allocation2 + $0x1c]] }
  0xcf   :  { %v388_v56 = vmul.f32 %v387_v52, %v4630_v1  ;;  %v389_v57 = vmul.f32 %v387_v52, %v4632_v3 }
  0xd0   :  { %v220_v20 = vadd.f32 %v214_v14, %v200_v9 }
  0xd1   :  { %v196_v61 = vpop.permute.xlu1 %195  ;;  %v194_v62 = vpop.permute.xlu0 %193  ;;  %v395_v2 = vrot.slane %v389_v57, 1 }
  0xd2   :  { %v201_v11 = vadd.f32 %v194_v62, %v176_v6  ;;  %v202_v16 = vadd.f32 %v196_v61, %v177_v10  ;;  %v341_v61 = vmul.f32 %v338_v17, %v4628_v0  ;;  %v394_v62 = vrot.slane %v388_v56, 1 }
  0xd4   :  { %v221_v18 = vadd.f32 %v216_v12, %v201_v11  ;;  %v222_v24 = vadd.f32 %v215_v4, %v202_v16  ;;  %v390_v4 = vmul.f32 %v387_v52, %v4628_v0  ;;  %v345_v7 = vadd.f32 %v342_v51, %v341_v61 }
  0xd5   :  { %v239_v13 = vpop.permute.xlu1 %238  ;;  %v237_v15 = vpop.permute.xlu0 %236  ;;  %v396_v9 = vsel %vm141_vm0, %v394_v62, %v395_v2  ;;  %v456_v11 = vstv %s4109_s19  ;;  %s4137_s19 = sld [smem:[#allocation2 + $0x1f]] }
  0xd6   :  { %v245_v23 = vadd.f32 %v237_v15, %v220_v20  ;;  %v246_v25 = vadd.f32 %v239_v13, %v221_v18  ;;  %v397_v10 = vrot.slane %v390_v4, 1  ;;  %v457_v18 = vmul.f32 %v456_v11, %v4630_v1 }
  0xd7   :  { %v458_v20 = vmul.f32 %v456_v11, %v4632_v3 }
  0xd8   :  { %v398_v16 = vsel %vm141_vm0, %v395_v2, %v397_v10 }
  0xd9   :  { %v262_v21 = vpop.permute.xlu1 %261  ;;  %v241_v22 = vpop.permute.xlu0 %240 }
  0xda   :  { %v4735_v26 = vadd.f32 %v262_v21, %v245_v23  ;;  %v247_v27 = vadd.f32 %v241_v22, %v222_v24 }
  0xdc   :  { %v274_v32 = vsel %vm273_vm2, %v4735_v26, 0.0 }
  0xdd   :  { %v266_v28 = vpop.permute.xlu1 %265  ;;  %v264_v29 = vpop.permute.xlu0 %263 }
  0xde   :  { %v4737_v30 = vadd.f32 %v266_v28, %v247_v27  ;;  %v4739_v31 = vadd.f32 %v264_v29, %v246_v25  ;;  %v459_v25 = vmul.f32 %v456_v11, %v4628_v0  ;;  %v463_v27 = vrot.slane %v457_v18, 2 }
  0xdf   :  { %v464_v28 = vrot.slane %v458_v20, 2  ;;  %v656_v20 = vstv %s4122_s23  ;;  %s4141_s23 = sld [smem:[#allocation2 + $0x23]] }
  0xe0   :  { %v275_v33 = vsel %vm273_vm2, %v4739_v31, 0.0  ;;  %v278_v35 = vsel %vm277_vm3, %v4737_v30, 0.0 }
  0xe1   :  { %v276_v34 = vadd.f32 %v275_v33, %v274_v32  ;;  %v355_v60 = vpop.permute.xlu1 %354  ;;  %v465_v37 = vsel %vm211_vm1, %v463_v27, %v464_v28 }
  0xe2   :  { %v363_v58 = vadd.f32 %v355_v60, %v343_v54 }
  0xe3   :  { %v279_v36 = vadd.f32 %v278_v35, %v276_v34 }
  0xe5   :  { %280 = vadd.xlane.f32.xlu0 %v279_v36  ;;  %v466_v36 = vrot.slane %v459_v25, 2  ;;  %v617_v25 = vstv %s4120_s25  ;;  %s4133_s25 = sld [smem:[#allocation2 + $0x1b]] }
  0xfb   :  { %422 = vrot.lane.b32.xlu0 %v416_v63, %s4563_s4  ;;  %v357_v63 = vpop.permute.xlu1 %356 }
  0xfc   :  { %v364_v6 = vadd.f32 %v357_v63, %v344_v59 }
  0xff   :  { %491 = vrot.lane.b32.xlu0 %v485_v19, %s4563_s4  ;;  %v359_v46 = vpop.permute.xlu1 %358 }
 0x100   :  { %v365_v13 = vadd.f32 %v359_v46, %v345_v7 }
 0x103   :  { %512 = vrot.lane.b32.xlu0 %v509_v43, %s4564_s7  ;;  %v375_v47 = vpop.permute.xlu1 %374 }
 0x104   :  { %v383_v8 = vadd.f32 %v375_v47, %v363_v58 }
 0x106   :  { %v402_v15 = vadd.f32 %v396_v9, %v383_v8 }
 0x107   :  { %514 = vrot.lane.b32.xlu0 %v511_v45, %s4564_s7  ;;  %v377_v48 = vpop.permute.xlu1 %376  ;;  %v467_v45 = vsel %vm211_vm1, %v464_v28, %v466_v36 }
 0x108   :  { %v384_v14 = vadd.f32 %v377_v48, %v364_v6 }
 0x10a   :  { %v403_v23 = vadd.f32 %v398_v16, %v384_v14 }
 0x10b   :  { %516 = vrot.lane.b32.xlu0 %v510_v44, %s4564_s7  ;;  %v379_v49 = vpop.permute.xlu1 %378 }
 0x10c   :  { %v385_v21 = vadd.f32 %v379_v49, %v365_v13 }
 0x10e   :  { %v404_v35 = vadd.f32 %v397_v10, %v385_v21  ;;  %v681_v21 = vstv %s4123_s24  ;;  %s4132_s24 = sld [smem:[#allocation6 + $0x3]] }
 0x10f   :  { %v419_v19 = vpop.permute.xlu1 %418  ;;  %v683_v27 = vmul.f32 %v681_v21, %v4632_v3 }
 0x110   :  { %v427_v22 = vadd.f32 %v419_v19, %v402_v15 }
 0x113   :  { %v421_v53 = vpop.permute.xlu1 %420 }
 0x114   :  { %v428_v33 = vadd.f32 %v421_v53, %v403_v23  ;;  %v659_v23 = vmul.f32 %v656_v20, %v4628_v0 }
 0x117   :  { %v444_v5 = vpop.permute.xlu1 %443 }
 0x118   :  { %v452_v34 = vadd.f32 %v444_v5, %v427_v22  ;;  %v658_v22 = vmul.f32 %v656_v20, %v4632_v3 }
 0x11a   :  { %v471_v44 = vadd.f32 %v465_v37, %v452_v34  ;;  %v664_v28 = vrot.slane %v658_v22, 1  ;;  %v725_v34 = vstv %s4125_s26  ;;  %v684_v37 = vmul.f32 %v681_v21, %v4628_v0  ;;  %s4136_s26 = sld [smem:[#allocation2 + $0x1e]] }
 0x11b   :  { %v446_v12 = vpop.permute.xlu1 %445 }
 0x11c   :  { %v453_v42 = vadd.f32 %v446_v12, %v428_v33  ;;  %v689_v33 = vrot.slane %v683_v27, 1  ;;  %v637_v27 = vstv %s4121_s29 }
 0x11e   :  { %v472_v49 = vadd.f32 %v467_v45, %v453_v42  ;;  %v691_v42 = vrot.slane %v684_v37, 1 }
 0x11f   :  { %v448_v24 = vpop.permute.xlu1 %447 }
 0x123   :  { %v488_v40 = vpop.permute.xlu1 %487 }
 0x124   :  { %v496_v48 = vadd.f32 %v488_v40, %v471_v44  ;;  %v728_v40 = vmul.f32 %v725_v34, %v4628_v0 }
 0x126   :  { %v735_v45 = vrot.slane %v728_v40, 2 }
 0x127   :  { %v490_v17 = vpop.permute.xlu1 %489 }
 0x128   :  { %v497_v53 = vadd.f32 %v490_v17, %v472_v49 }
 0x172   :  { %v281_v29 = vpop.xlane.xlu0 %280 }
 0x173   :  { %v282_v32 = vrot.slane %v281_v29, 4 }
 0x175   :  { %v283_v38 = vadd.f32 %v282_v32, %v281_v29  ;;  %v666_v29 = vrot.slane %v659_v23, 1 }
 0x176   :  { %v423_v39 = vpop.permute.xlu0 %422 }
 0x177   :  { %v284_v41 = vrot.slane %v283_v38, 2  ;;  %v429_v43 = vadd.f32 %v423_v39, %v404_v35  ;;  %v618_v35 = vmul.f32 %v617_v25, %v4630_v1  ;;  %v727_v39 = vmul.f32 %v725_v34, %v4632_v3 }
 0x179   :  { %v285_v60 = vadd.f32 %v284_v41, %v283_v38  ;;  %v454_v47 = vadd.f32 %v448_v24, %v429_v43  ;;  %v682_v24 = vmul.f32 %v681_v21, %v4630_v1  ;;  %v619_v41 = vmul.f32 %v617_v25, %v4632_v3 }
 0x17a   :  { %v492_v63 = vpop.permute.xlu0 %491  ;;  %v657_v43 = vmul.f32 %v656_v20, %v4630_v1  ;;  %v733_v44 = vrot.slane %v727_v39, 2 }
 0x17b   :  { %v286_v46 = vrot.slane %v285_v60, 1  ;;  %v473_v51 = vadd.f32 %v466_v36, %v454_v47  ;;  %v688_v32 = vrot.slane %v682_v24, 1  ;;  %v667_v36 = vsel %vm141_vm0, %v664_v28, %v666_v29 }
 0x17c   :  { %v736_v47 = vsel %vm211_vm1, %v733_v44, %v735_v45 }
 0x17d   :  { %v287_v19 = vadd.f32 %v286_v46, %v285_v60  ;;  %v498_v55 = vadd.f32 %v492_v63, %v473_v51  ;;  %v690_v38 = vsel %vm141_vm0, %v688_v32, %v689_v33  ;;  %v750_v60 = vstv %s4126_s27  ;;  %s4139_s27 = sld [smem:[#allocation2 + $0x21]] }
 0x17e   :  { %v513_v50 = vpop.permute.xlu0 %512  ;;  %v620_v63 = vmul.f32 %v617_v25, %v4628_v0  ;;  %v663_v46 = vrot.slane %v657_v43, 1  ;;  %v752_v49 = vmul.f32 %v750_v60, %v4632_v3  ;;  %v753_v51 = vmul.f32 %v750_v60, %v4628_v0 }
 0x17f   :  { %4327 = vpush %v287_v19  ;;  %v4774_v52 = vadd.f32 %v513_v50, %v496_v48  ;;  %v751_v48 = vmul.f32 %v750_v60, %v4630_v1  ;;  %v640_v32 = vmul.f32 %v637_v27, %v4628_v0 }
 0x180   :  { %v665_v17 = vsel %vm141_vm0, %v663_v46, %v664_v28  ;;  %v758_v50 = vrot.slane %v752_v49, 2 }
 0x181   :  { %v524_v56 = vsel %vm273_vm2, %v4774_v52, 0.0  ;;  %v757_v19 = vrot.slane %v751_v48, 2  ;;  %v647_v40 = vrot.slane %v640_v32, 1 }
 0x182   :  { %v515_v54 = vpop.permute.xlu0 %514 }
 0x183   :  { %v4778_v57 = vadd.f32 %v515_v54, %v497_v53  ;;  %v726_v53 = vmul.f32 %v725_v34, %v4630_v1  ;;  %v759_v54 = vsel %vm211_vm1, %v757_v19, %v758_v50 }
 0x185   :  { %v525_v58 = vsel %vm273_vm2, %v4778_v57, 0.0 }
 0x186   :  { %v517_v59 = vpop.permute.xlu0 %516  ;;  %v526_v61 = vadd.f32 %v525_v58, %v524_v56  ;;  %v692_v56 = vsel %vm141_vm0, %v689_v33, %v691_v42  ;;  %v732_v58 = vrot.slane %v726_v53, 2 }
 0x187   :  { %v4782_v62 = vadd.f32 %v517_v59, %v498_v55  ;;  %v760_v55 = vrot.slane %v753_v51, 2 }
 0x189   :  { %v527_v2 = vsel %vm277_vm3, %v4782_v62, 0.0  ;;  %v761_v59 = vsel %vm211_vm1, %v758_v50, %v760_v55 }
 0x18a   :  { %v528_v4 = vadd.f32 %v527_v2, %v526_v61  ;;  %v734_v61 = vsel %vm211_vm1, %v732_v58, %v733_v44 }
 0x18c   :  { %529 = vadd.xlane.f32.xlu0 %v528_v4 }
 0x1b0   :  { %s4328_s20 = spop %4327 }
 0x1b1   :  { %s289_s21 = smul.f32 0.0011961722, %s4328_s20  ;;  %s4138_s20 = sld [smem:[#allocation2 + $0x20]] }
 0x1b3   :  { %v290_v5 = vstv %s289_s21  ;;  %s4135_s21 = sld [smem:[#allocation2 + $0x1d]] }
 0x1b4   :  { %v4787_v6 = vsub.f32 %v4735_v26, %v290_v5  ;;  %v4790_v7 = vsub.f32 %v4739_v31, %v290_v5  ;;  %v4793_v8 = vsub.f32 %v4737_v30, %v290_v5  ;;  %v597_v30 = vstv %s4119_s22  ;;  %s4140_s22 = sld [smem:[#allocation2 + $0x22]] }
 0x1b5   :  { %v598_v15 = vmul.f32 %v597_v30, %v4630_v1  ;;  %v599_v16 = vmul.f32 %v597_v30, %v4632_v3  ;;  %v600_v18 = vmul.f32 %v597_v30, %v4628_v0  ;;  %v588_v30 = vstv %s4118_s28 }
 0x1b6   :  { %v294_v9 = vmul.f32 %v4787_v6, %v4787_v6  ;;  %v295_v10 = vmul.f32 %v4790_v7, %v4790_v7  ;;  %v296_v11 = vmul.f32 %v4793_v8, %v4793_v8  ;;  %v590_v20 = vmul.f32 %v588_v30, %v4632_v3 }
 0x1b7   :  { %606 = vrot.lane.b32.xlu0 %v599_v16, %s4563_s4  ;;  %v589_v16 = vmul.f32 %v588_v30, %v4630_v1 }
 0x1b8   :  { %v297_v12 = vsel %vm273_vm2, %v294_v9, 0.0  ;;  %v298_v26 = vsel %vm273_vm2, %v295_v10, 0.0  ;;  %v300_v31 = vsel %vm277_vm3, %v296_v11, 0.0 }
 0x1b9   :  { %v299_v13 = vadd.f32 %v298_v26, %v297_v12 }
 0x1bb   :  { %v301_v14 = vadd.f32 %v300_v31, %v299_v13  ;;  %670 = vrot.lane.b32.xlu0 %v667_v36, %s4563_s4 }
 0x1bd   :  { %302 = vadd.xlane.f32.xlu1 %v301_v14 }
 0x1bf   :  { %693 = vrot.lane.b32.xlu0 %v690_v38, %s4564_s7 }
 0x1c3   :  { %697 = vrot.lane.b32.xlu0 %v691_v42, %s4564_s7  ;;  %v706_v42 = vstv %s4124_s30  ;;  %s4112_s30 = sld [smem:[#allocation7 + $0x1]] }
 0x1c4   :  { %v708_v48 = vmul.f32 %v706_v42, %v4632_v3  ;;  %v707_v49 = vmul.f32 %v706_v42, %v4630_v1  ;;  %v709_v50 = vmul.f32 %v706_v42, %v4628_v0 }
 0x1c7   :  { %739 = vrot.lane.b32.xlu0 %v736_v47, %s4563_s4 }
 0x1cb   :  { %741 = vrot.lane.b32.xlu0 %v735_v45, %s4563_s4 }
 0x1ce   :  { %604 = vrot.lane.b32.xlu1 %v598_v15, %s4563_s4  ;;  %v592_v15 = vstv %s4117_s2 }
 0x1cf   :  { %762 = vrot.lane.b32.xlu0 %v759_v54, %s4564_s7  ;;  %v593_v23 = vadd.f32 %v592_v15, %v589_v16  ;;  %v594_v25 = vadd.f32 %v592_v15, %v590_v20 }
 0x1d2   :  { %608 = vrot.lane.b32.xlu1 %v600_v18, %s4563_s4  ;;  %v591_v18 = vmul.f32 %v588_v30, %v4628_v0 }
 0x1d3   :  { %764 = vrot.lane.b32.xlu0 %v761_v59, %s4564_s7  ;;  %v716_v59 = vrot.slane %v709_v50, 2 }
 0x1d4   :  { %v595_v24 = vadd.f32 %v592_v15, %v591_v18 }
 0x1d6   :  { %624 = vrot.lane.b32.xlu1 %v618_v35, %s4564_s7  ;;  %v638_v35 = vmul.f32 %v637_v27, %v4630_v1 }
 0x1d7   :  { %766 = vrot.lane.b32.xlu0 %v760_v55, %s4564_s7  ;;  %v714_v55 = vrot.slane %v708_v48, 2 }
 0x1d9   :  { %v717_v1 = vsel %vm211_vm1, %v714_v55, %v716_v59 }
 0x1da   :  { %626 = vrot.lane.b32.xlu1 %v619_v41, %s4564_s7  ;;  %v644_v41 = vrot.slane %v638_v35, 1 }
 0x1de   :  { %628 = vrot.lane.b32.xlu1 %v620_v63, %s4564_s7 }
 0x1e2   :  { %668 = vrot.lane.b32.xlu1 %v665_v17, %s4563_s4 }
 0x1e6   :  { %672 = vrot.lane.b32.xlu1 %v666_v29, %s4563_s4  ;;  %v639_v29 = vmul.f32 %v637_v27, %v4632_v3 }
 0x1e8   :  { %v645_v39 = vrot.slane %v639_v29, 1 }
 0x1ea   :  { %695 = vrot.lane.b32.xlu1 %v692_v56, %s4564_s7  ;;  %v646_v45 = vsel %vm141_vm0, %v644_v41, %v645_v39  ;;  %v648_v47 = vsel %vm141_vm0, %v645_v39, %v647_v40  ;;  %v713_v56 = vrot.slane %v707_v49, 2  ;;  %v321_v41 = vstv %s320_s10 }
 0x1ee   :  { %737 = vrot.lane.b32.xlu1 %v734_v61, %s4563_s4 }
 0x219   :  { %v4848_v12 = vpop.xlane.xlu0 %529 }
 0x21a   :  { %v531_v32 = vrot.slane %v4848_v12, 4 }
 0x229   :  { %v607_v14 = vpop.permute.xlu0 %606 }
 0x22a   :  { %v614_v37 = vadd.f32 %v607_v14, %v594_v25 }
 0x22d   :  { %v671_v22 = vpop.permute.xlu0 %670 }
 0x231   :  { %v694_v34 = vpop.permute.xlu0 %693 }
 0x235   :  { %v698_v44 = vpop.permute.xlu0 %697 }
 0x239   :  { %v740_v19 = vpop.permute.xlu0 %739 }
 0x23d   :  { %v742_v61 = vpop.permute.xlu0 %741 }
 0x24a   :  { %v303_v2 = vpop.xlane.xlu1 %302 }
 0x24b   :  { %v304_v4 = vrot.slane %v303_v2, 4 }
 0x24d   :  { %v305_v5 = vadd.f32 %v304_v4, %v303_v2 }
 0x24e   :  { %v605_v26 = vpop.permute.xlu1 %604 }
 0x24f   :  { %v306_v9 = vrot.slane %v305_v5, 2  ;;  %v613_v28 = vadd.f32 %v605_v26, %v593_v23 }
 0x251   :  { %v307_v10 = vadd.f32 %v306_v9, %v305_v5  ;;  %v715_v9 = vsel %vm211_vm1, %v713_v56, %v714_v55 }
 0x252   :  { %v609_v31 = vpop.permute.xlu1 %608 }
 0x253   :  { %v308_v11 = vrot.slane %v307_v10, 1  ;;  %v615_v36 = vadd.f32 %v609_v31, %v595_v24 }
 0x255   :  { %v309_v13 = vadd.f32 %v308_v11, %v307_v10  ;;  %v763_v11 = vpop.permute.xlu0 %762 }
 0x256   :  { %v625_v21 = vpop.permute.xlu1 %624 }
 0x257   :  { %4329 = vpush %v309_v13  ;;  %v633_v38 = vadd.f32 %v625_v21, %v613_v28 }
 0x259   :  { %v652_v46 = vadd.f32 %v646_v45, %v633_v38  ;;  %v765_v30 = vpop.permute.xlu0 %764 }
 0x25a   :  { %v627_v33 = vpop.permute.xlu1 %626 }
 0x25b   :  { %v634_v60 = vadd.f32 %v627_v33, %v614_v37  ;;  %v532_v33 = vadd.f32 %v531_v32, %v4848_v12 }
 0x25d   :  { %v653_v51 = vadd.f32 %v648_v47, %v634_v60 }
 0x25e   :  { %v629_v43 = vpop.permute.xlu1 %628 }
 0x25f   :  { %v635_v63 = vadd.f32 %v629_v43, %v615_v36  ;;  %v678_v5 = vadd.f32 %v671_v22, %v653_v51  ;;  %v767_v22 = vpop.permute.xlu0 %766 }
 0x261   :  { %v654_v54 = vadd.f32 %v647_v40, %v635_v63 }
 0x262   :  { %v669_v17 = vpop.permute.xlu1 %668 }
 0x263   :  { %v677_v53 = vadd.f32 %v669_v17, %v652_v46 }
 0x265   :  { %v702_v2 = vadd.f32 %v694_v34, %v677_v53  ;;  %v533_v34 = vrot.slane %v532_v33, 2 }
 0x266   :  { %v673_v58 = vpop.permute.xlu1 %672 }
 0x267   :  { %v679_v4 = vadd.f32 %v673_v58, %v654_v54  ;;  %v721_v13 = vadd.f32 %v715_v9, %v702_v2  ;;  %v534_v36 = vadd.f32 %v533_v34, %v532_v33  ;;  %v847_v58 = vstv %s4134_s18  ;;  %v4913_v2 = vld [vmem:[#allocation10 + $0x8] sm:$0xff]  ;;  %s4155_s18 = sld [smem:[#allocation2 + $0x2b]] }
 0x269   :  { %v704_v3 = vadd.f32 %v698_v44, %v679_v4  ;;  %v535_v37 = vrot.slane %v534_v36, 1  ;;  %v326_v44 = vstv %s325_s11  ;;  %v849_v4 = vmul.f32 %v4913_v2, %v847_v58  ;;  %s4183_s11 = sld [smem:[#allocation2 + $0x3b]] }
 0x26a   :  { %v696_v10 = vpop.permute.xlu1 %695 }
 0x26b   :  { %v723_v26 = vadd.f32 %v716_v59, %v704_v3  ;;  %v703_v0 = vadd.f32 %v696_v10, %v678_v5  ;;  %v536_v39 = vadd.f32 %v535_v37, %v534_v36  ;;  %v4910_v59 = vld [vmem:[#allocation10] sm:$0xff]  ;;  %v4916_v5 = vld [vmem:[#allocation10 + $0x10] sm:$0xff]  ;;  %v906_v3 = vstv %s4137_s19  ;;  %s4156_s19 = sld [smem:[#allocation2 + $0x2c]] }
 0x26c   :  { %v850_v9 = vmul.f32 %v4916_v5, %v847_v58  ;;  %v908_v10 = vmul.f32 %v4913_v2, %v906_v3  ;;  %v907_v33 = vmul.f32 %v4910_v59, %v906_v3  ;;  %v1000_v36 = vstv %s4141_s23  ;;  %s4154_s23 = sld [smem:[#allocation2 + $0x2a]] }
 0x26d   :  { %v722_v31 = vadd.f32 %v717_v1, %v703_v0  ;;  %v748_v15 = vadd.f32 %v742_v61, %v723_v26  ;;  %v848_v61 = vmul.f32 %v4910_v59, %v847_v58  ;;  %v931_v1 = vstv %s4138_s20  ;;  %s4147_s20 = sld [smem:[#allocation6 + $0x4]] }
 0x26e   :  { %v738_v14 = vpop.permute.xlu1 %737  ;;  %v932_v26 = vmul.f32 %v4910_v59, %v931_v1  ;;  %v867_v0 = vstv %s4135_s21  ;;  %v838_v58 = vstv %s4133_s25  ;;  %s4148_s21 = sld [smem:[#allocation2 + $0x24]] }
 0x26f   :  { %v746_v16 = vadd.f32 %v738_v14, %v721_v13  ;;  %v747_v18 = vadd.f32 %v740_v19, %v722_v31  ;;  %v4869_v24 = vadd.f32 %v767_v22, %v748_v15  ;;  %v933_v13 = vmul.f32 %v4913_v2, %v931_v1 }
 0x270   :  { %v914_v31 = vrot.slane %v908_v10, 1  ;;  %v870_v37 = vmul.f32 %v4916_v5, %v867_v0 }
 0x271   :  { %v4863_v20 = vadd.f32 %v763_v11, %v746_v16  ;;  %v4865_v21 = vadd.f32 %v765_v30, %v747_v18  ;;  %v777_v28 = vsel %vm277_vm3, %v4869_v24, 0.0  ;;  %v909_v11 = vmul.f32 %v4916_v5, %v906_v3 }
 0x272   :  { %v938_v30 = vrot.slane %v932_v26, 1  ;;  %v939_v15 = vrot.slane %v933_v13, 1  ;;  %v975_v16 = vstv %s4140_s22  ;;  %v868_v18 = vmul.f32 %v4910_v59, %v867_v0  ;;  %s4151_s22 = sld [smem:[#allocation2 + $0x27]] }
 0x273   :  { %v775_v23 = vsel %vm273_vm2, %v4865_v21, 0.0  ;;  %v774_v25 = vsel %vm273_vm2, %v4863_v20, 0.0  ;;  %v916_v14 = vrot.slane %v909_v11, 1  ;;  %v840_v3 = vmul.f32 %v4913_v2, %v838_v58 }
 0x274   :  { %v776_v27 = vadd.f32 %v775_v23, %v774_v25  ;;  %v934_v23 = vmul.f32 %v4916_v5, %v931_v1  ;;  %v940_v25 = vsel %vm141_vm0, %v938_v30, %v939_v15  ;;  %v887_v13 = vstv %s4136_s26 }
 0x275   :  { %v917_v22 = vsel %vm141_vm0, %v914_v31, %v916_v14  ;;  %v890_v30 = vmul.f32 %v4916_v5, %v887_v13 }
 0x276   :  { %v778_v29 = vadd.f32 %v777_v28, %v776_v27  ;;  %v977_v27 = vmul.f32 %v4913_v2, %v975_v16  ;;  %v978_v28 = vmul.f32 %v4916_v5, %v975_v16  ;;  %v941_v32 = vrot.slane %v934_v23, 1 }
 0x278   :  { %779 = vadd.xlane.f32.xlu0 %v778_v29  ;;  %v869_v29 = vmul.f32 %v4913_v2, %v867_v0  ;;  %v983_v34 = vrot.slane %v977_v27, 2 }
 0x288   :  { %s4330_s6 = spop %4329 }
 0x289   :  { %s311_s8 = smul.f32 0.0011961722, %s4330_s6  ;;  %s4113_s6 = sld [smem:[#allocation9 + $0x1]] }
 0x28b   :  { %s312_s9 = sadd.f32 1e-05, %s311_s8 }
 0x28d   :  { %v313_v35 = vstv %s312_s9 }
 0x28e   :  { %4432 = vrsqrt.f32 %v313_v35  ;;  %856 = vrot.lane.b32.xlu0 %v849_v4, %s4563_s4  ;;  %v985_v35 = vrot.slane %v978_v28, 2  ;;  %v839_v4 = vmul.f32 %v4910_v59, %v838_v58  ;;  %v897_v28 = vrot.slane %v890_v30, 1 }
 0x292   :  { %920 = vrot.lane.b32.xlu0 %v917_v22, %s4563_s4 }
 0x296   :  { %943 = vrot.lane.b32.xlu0 %v940_v25, %s4564_s7 }
 0x298   :  { %v4433_v38 = vpop.eup %4432 }
 0x299   :  { %4331 = vpush %v4433_v38  ;;  %v913_v38 = vrot.slane %v907_v33, 1 }
 0x29a   :  { %4333 = vpush %v536_v39  ;;  %947 = vrot.lane.b32.xlu0 %v941_v32, %s4564_s7  ;;  %v986_v39 = vsel %vm211_vm1, %v983_v34, %v985_v35 }
 0x29e   :  { %989 = vrot.lane.b32.xlu0 %v986_v39, %s4563_s4 }
 0x2a2   :  { %991 = vrot.lane.b32.xlu0 %v985_v35, %s4563_s4 }
 0x2ca   :  { %s4332_s12 = spop %4331 }
 0x2cb   :  { %v316_v40 = vstv %s4332_s12  ;;  %s4334_s13 = spop %4333  ;;  %s4180_s12 = sld [smem:[#allocation2 + $0x38]] }
 0x2cc   :  { %v317_v12 = vmul.f32 %v316_v40, %v4787_v6  ;;  %v318_v42 = vmul.f32 %v316_v40, %v4790_v7  ;;  %v319_v43 = vmul.f32 %v316_v40, %v4793_v8  ;;  %s538_s14 = smul.f32 0.0011961722, %s4334_s13  ;;  %v1001_v40 = vmul.f32 %v4910_v59, %v1000_v36  ;;  %s4164_s13 = sld [smem:[#allocation2 + $0x2e]] }
 0x2ce   :  { %v322_v45 = vmul.f32 %v321_v41, %v317_v12  ;;  %v323_v60 = vmul.f32 %v321_v41, %v318_v42  ;;  %v324_v63 = vmul.f32 %v321_v41, %v319_v43  ;;  %v539_v46 = vstv %s538_s14  ;;  %s4167_s14 = sld [smem:[#allocation2 + $0x31]] }
 0x2cf   :  { %v4881_v47 = vsub.f32 %v4774_v52, %v539_v46  ;;  %v4884_v48 = vsub.f32 %v4778_v57, %v539_v46  ;;  %v4887_v49 = vsub.f32 %v4782_v62, %v539_v46  ;;  %v1002_v41 = vmul.f32 %v4913_v2, %v1000_v36 }
 0x2d0   :  { %v327_v6 = vadd.f32 %v326_v44, %v322_v45  ;;  %v328_v17 = vadd.f32 %v326_v44, %v323_v60  ;;  %v329_v7 = vadd.f32 %v326_v44, %v324_v63  ;;  %v915_v12 = vsel %vm141_vm0, %v913_v38, %v914_v31 }
 0x2d1   :  { %v543_v8 = vmul.f32 %v4881_v47, %v4881_v47  ;;  %v544_v19 = vmul.f32 %v4884_v48, %v4884_v48  ;;  %v545_v50 = vmul.f32 %v4887_v49, %v4887_v49  ;;  %v1007_v42 = vrot.slane %v1001_v40, 2 }
 0x2d2   :  { %v330_v52 = vmax.f32 %v327_v6, 0.0  ;;  %v331_v51 = vmax.f32 %v328_v17, 0.0  ;;  %v332_v53 = vmax.f32 %v329_v7, 0.0  ;;  %v1008_v43 = vrot.slane %v1002_v41, 2 }
 0x2d3   :  { %v546_v57 = vsel %vm273_vm2, %v543_v8, 0.0  ;;  %v547_v62 = vsel %vm273_vm2, %v544_v19, 0.0  ;;  %v549_v55 = vsel %vm277_vm3, %v545_v50, 0.0  ;;  %v1003_v44 = vmul.f32 %v4916_v5, %v1000_v36 }
 0x2d4   :  { %333 = vst.msk [vmem:[%s6340_s5] sm:$0xff] %vm273_vm2, %v330_v52  ;;  %334 = vst.msk [vmem:[%s6340_s5 + $0x8] sm:$0xff] %vm273_vm2, %v331_v51  ;;  %v548_v54 = vadd.f32 %v547_v62, %v546_v57  ;;  %v976_v45 = vmul.f32 %v4910_v59, %v975_v16  ;;  %v1009_v60 = vsel %vm211_vm1, %v1007_v42, %v1008_v43 }
 0x2d5   :  { %335 = vst.msk [vmem:[%s6340_s5 + $0x10] sm:$0x3f] %vm277_vm3, %v332_v53  ;;  %v1010_v63 = vrot.slane %v1003_v44, 2  ;;  %v942_v46 = vsel %vm141_vm0, %v939_v15, %v941_v32  ;;  %1012 = vrot.lane.b32.xlu0 %v1009_v60, %s4564_s7  ;;  %v956_v32 = vstv %s4139_s27  ;;  %s4127_s27 = sld [smem:[#allocation7 + $0x2]] }
 0x2d6   :  { %v550_v56 = vadd.f32 %v549_v55, %v548_v54  ;;  %v982_v6 = vrot.slane %v976_v45, 2  ;;  %v958_v40 = vmul.f32 %v4913_v2, %v956_v32  ;;  %v957_v41 = vmul.f32 %v4910_v59, %v956_v32 }
 0x2d7   :  { %v1011_v17 = vsel %vm211_vm1, %v1008_v43, %v1010_v63  ;;  %v959_v43 = vmul.f32 %v4916_v5, %v956_v32 }
 0x2d8   :  { %551 = vadd.xlane.f32.xlu1 %v550_v56  ;;  %v984_v7 = vsel %vm211_vm1, %v982_v6, %v983_v34 }
 0x2d9   :  { %1014 = vrot.lane.b32.xlu0 %v1011_v17, %s4564_s7  ;;  %v966_v17 = vrot.slane %v959_v43, 2 }
 0x2dd   :  { %1016 = vrot.lane.b32.xlu0 %v1010_v63, %s4564_s7  ;;  %v964_v63 = vrot.slane %v958_v40, 2 }
 0x2e9   :  { %854 = vrot.lane.b32.xlu1 %v848_v61, %s4563_s4  ;;  %v842_v61 = vstv %s4132_s24 }
 0x2ea   :  { %v843_v11 = vadd.f32 %v842_v61, %v839_v4  ;;  %v844_v0 = vadd.f32 %v842_v61, %v840_v3 }
 0x2ed   :  { %858 = vrot.lane.b32.xlu1 %v850_v9, %s4563_s4  ;;  %v841_v9 = vmul.f32 %v4916_v5, %v838_v58 }
 0x2ef   :  { %v845_v26 = vadd.f32 %v842_v61, %v841_v9 }
 0x2f1   :  { %874 = vrot.lane.b32.xlu1 %v868_v18, %s4564_s7  ;;  %v888_v18 = vmul.f32 %v4910_v59, %v887_v13 }
 0x2f5   :  { %876 = vrot.lane.b32.xlu1 %v869_v29, %s4564_s7  ;;  %v894_v29 = vrot.slane %v888_v18, 1 }
 0x2f9   :  { %878 = vrot.lane.b32.xlu1 %v870_v37, %s4564_s7 }
 0x2fd   :  { %918 = vrot.lane.b32.xlu1 %v915_v12, %s4563_s4 }
 0x301   :  { %922 = vrot.lane.b32.xlu1 %v916_v14, %s4563_s4  ;;  %v889_v14 = vmul.f32 %v4913_v2, %v887_v13 }
 0x303   :  { %v895_v27 = vrot.slane %v889_v14, 1 }
 0x305   :  { %945 = vrot.lane.b32.xlu1 %v942_v46, %s4564_s7  ;;  %v4960_v57 = vpop.xlane.xlu0 %779  ;;  %v896_v35 = vsel %vm141_vm0, %v894_v29, %v895_v27  ;;  %v898_v39 = vsel %vm141_vm0, %v895_v27, %v897_v28  ;;  %v963_v46 = vrot.slane %v957_v41, 2 }
 0x306   :  { %v781_v18 = vrot.slane %v4960_v57, 4 }
 0x309   :  { %987 = vrot.lane.b32.xlu1 %v984_v7, %s4563_s4  ;;  %v857_v56 = vpop.permute.xlu0 %856 }
 0x30a   :  { %v864_v23 = vadd.f32 %v857_v56, %v844_v0 }
 0x30d   :  { %v921_v10 = vpop.permute.xlu0 %920 }
 0x311   :  { %v944_v16 = vpop.permute.xlu0 %943 }
 0x315   :  { %v948_v34 = vpop.permute.xlu0 %947 }
 0x319   :  { %v990_v42 = vpop.permute.xlu0 %989 }
 0x31d   :  { %v992_v7 = vpop.permute.xlu0 %991 }
 0x365   :  { %v552_v8 = vpop.xlane.xlu1 %551 }
 0x366   :  { %v553_v19 = vrot.slane %v552_v8, 4 }
 0x368   :  { %v554_v50 = vadd.f32 %v553_v19, %v552_v8 }
 0x369   :  { %v855_v62 = vpop.permute.xlu1 %854 }
 0x36a   :  { %v555_v52 = vrot.slane %v554_v50, 2  ;;  %v863_v31 = vadd.f32 %v855_v62, %v843_v11 }
 0x36c   :  { %v556_v51 = vadd.f32 %v555_v52, %v554_v50  ;;  %v965_v52 = vsel %vm211_vm1, %v963_v46, %v964_v63 }
 0x36d   :  { %v859_v55 = vpop.permute.xlu1 %858 }
 0x36e   :  { %v557_v53 = vrot.slane %v556_v51, 1  ;;  %v865_v22 = vadd.f32 %v859_v55, %v845_v26 }
 0x370   :  { %v558_v54 = vadd.f32 %v557_v53, %v556_v51  ;;  %v967_v53 = vsel %vm211_vm1, %v964_v63, %v966_v17 }
 0x371   :  { %v875_v1 = vpop.permute.xlu1 %874 }
 0x372   :  { %4335 = vpush %v558_v54  ;;  %v883_v25 = vadd.f32 %v875_v1, %v863_v31  ;;  %v1013_v54 = vpop.permute.xlu0 %1012 }
 0x374   :  { %v902_v38 = vadd.f32 %v896_v35, %v883_v25 }
 0x375   :  { %v877_v15 = vpop.permute.xlu1 %876 }
 0x376   :  { %v884_v36 = vadd.f32 %v877_v15, %v864_v23  ;;  %v1015_v9 = vpop.permute.xlu0 %1014 }
 0x378   :  { %v903_v44 = vadd.f32 %v898_v39, %v884_v36 }
 0x379   :  { %v879_v33 = vpop.permute.xlu1 %878 }
 0x37a   :  { %v885_v37 = vadd.f32 %v879_v33, %v865_v22  ;;  %v928_v50 = vadd.f32 %v921_v10, %v903_v44  ;;  %v1017_v10 = vpop.permute.xlu0 %1016  ;;  %v782_v22 = vadd.f32 %v781_v18, %v4960_v57 }
 0x37c   :  { %v904_v60 = vadd.f32 %v897_v28, %v885_v37  ;;  %v783_v23 = vrot.slane %v782_v22, 2  ;;  %v575_v37 = vstv %s4113_s6  ;;  %s4198_s6 = sld [smem:[#allocation2 + $0x44]] }
 0x37d   :  { %v919_v12 = vpop.permute.xlu1 %918 }
 0x37e   :  { %v927_v45 = vadd.f32 %v919_v12, %v902_v38  ;;  %v784_v27 = vadd.f32 %v783_v23, %v782_v22 }
 0x380   :  { %v952_v8 = vadd.f32 %v944_v16, %v927_v45  ;;  %v785_v28 = vrot.slane %v784_v27, 1 }
 0x381   :  { %v923_v6 = vpop.permute.xlu1 %922 }
 0x382   :  { %v929_v19 = vadd.f32 %v923_v6, %v904_v60  ;;  %v971_v58 = vadd.f32 %v965_v52, %v952_v8  ;;  %v786_v32 = vadd.f32 %v785_v28, %v784_v27  ;;  %v1097_v8 = vstv %s4149_s3  ;;  %s4170_s3 = sld [smem:[#allocation2 + $0x34]] }
 0x383   :  { %v1100_v52 = vmul.f32 %v4916_v5, %v1097_v8  ;;  %v1250_v27 = vstv %s4156_s19  ;;  %s4169_s19 = sld [smem:[#allocation2 + $0x33]] }
 0x384   :  { %v954_v51 = vadd.f32 %v948_v34, %v929_v19  ;;  %v570_v34 = vstv %s4112_s30  ;;  %v1098_v19 = vmul.f32 %v4910_v59, %v1097_v8 }
 0x385   :  { %v946_v62 = vpop.permute.xlu1 %945 }
 0x386   :  { %v973_v55 = vadd.f32 %v966_v17, %v954_v51  ;;  %v953_v56 = vadd.f32 %v946_v62, %v928_v50  ;;  %v1099_v50 = vmul.f32 %v4913_v2, %v1097_v8  ;;  %v1156_v51 = vstv %s4152_s15  ;;  %s4171_s15 = sld [smem:[#allocation2 + $0x35]] }
 0x387   :  { %v1158_v62 = vmul.f32 %v4913_v2, %v1156_v51  ;;  %v1157_v22 = vmul.f32 %v4910_v59, %v1156_v51  ;;  %v1088_v8 = vstv %s4148_s21 }
 0x388   :  { %v972_v61 = vadd.f32 %v967_v53, %v953_v56  ;;  %v998_v3 = vadd.f32 %v992_v7, %v973_v55  ;;  %v1181_v53 = vstv %s4153_s16  ;;  %v1117_v56 = vstv %s4150_s17  ;;  %s4162_s16 = sld [smem:[#allocation6 + $0x5]] }
 0x389   :  { %v988_v4 = vpop.permute.xlu1 %987  ;;  %v1182_v55 = vmul.f32 %v4910_v59, %v1181_v53  ;;  %v1120_v28 = vmul.f32 %v4916_v5, %v1117_v56  ;;  %s4163_s17 = sld [smem:[#allocation2 + $0x2d]] }
 0x38a   :  { %v996_v1 = vadd.f32 %v988_v4, %v971_v58  ;;  %v997_v11 = vadd.f32 %v990_v42, %v972_v61  ;;  %v4981_v31 = vadd.f32 %v1017_v10, %v998_v3  ;;  %v1183_v58 = vmul.f32 %v4913_v2, %v1181_v53 }
 0x38b   :  { %v1164_v61 = vrot.slane %v1158_v62, 1 }
 0x38c   :  { %v4975_v26 = vadd.f32 %v1013_v54, %v996_v1  ;;  %v4977_v0 = vadd.f32 %v1015_v9, %v997_v11  ;;  %v1027_v15 = vsel %vm277_vm3, %v4981_v31, 0.0  ;;  %v1159_v54 = vmul.f32 %v4916_v5, %v1156_v51 }
 0x38d   :  { %v1188_v9 = vrot.slane %v1182_v55, 1  ;;  %v1189_v3 = vrot.slane %v1183_v58, 1  ;;  %v1225_v1 = vstv %s4155_s18  ;;  %v1118_v11 = vmul.f32 %v4910_v59, %v1117_v56  ;;  %s4166_s18 = sld [smem:[#allocation2 + $0x30]] }
 0x38e   :  { %v1025_v13 = vsel %vm273_vm2, %v4977_v0, 0.0  ;;  %v1024_v14 = vsel %vm273_vm2, %v4975_v26, 0.0  ;;  %v1166_v4 = vrot.slane %v1159_v54, 1  ;;  %v1090_v51 = vmul.f32 %v4913_v2, %v1088_v8 }
 0x38f   :  { %v1026_v30 = vadd.f32 %v1025_v13, %v1024_v14  ;;  %v1184_v13 = vmul.f32 %v4916_v5, %v1181_v53  ;;  %v1190_v14 = vsel %vm141_vm0, %v1188_v9, %v1189_v3  ;;  %v1137_v58 = vstv %s4151_s22 }
 0x390   :  { %v1167_v10 = vsel %vm141_vm0, %v1164_v61, %v1166_v4  ;;  %v1140_v9 = vmul.f32 %v4916_v5, %v1137_v58 }
 0x391   :  { %v1028_v16 = vadd.f32 %v1027_v15, %v1026_v30  ;;  %v1227_v30 = vmul.f32 %v4913_v2, %v1225_v1  ;;  %v1228_v15 = vmul.f32 %v4916_v5, %v1225_v1  ;;  %v1191_v18 = vrot.slane %v1184_v13, 1 }
 0x393   :  { %1029 = vadd.xlane.f32.xlu0 %v1028_v16  ;;  %v1119_v16 = vmul.f32 %v4913_v2, %v1117_v56  ;;  %v1233_v23 = vrot.slane %v1227_v30, 2 }
 0x3a3   :  { %s4336_s2 = spop %4335 }
 0x3a4   :  { %s560_s28 = smul.f32 0.0011961722, %s4336_s2  ;;  %s4128_s2 = sld [smem:[#allocation9 + $0x2]] }
 0x3a6   :  { %s561_s29 = sadd.f32 1e-05, %s560_s28 }
 0x3a8   :  { %v562_v25 = vstv %s561_s29 }
 0x3a9   :  { %4434 = vrsqrt.f32 %v562_v25  ;;  %1106 = vrot.lane.b32.xlu0 %v1099_v50, %s4563_s4  ;;  %v1235_v25 = vrot.slane %v1228_v15, 2  ;;  %v1089_v50 = vmul.f32 %v4910_v59, %v1088_v8  ;;  %v1147_v15 = vrot.slane %v1140_v9, 1 }
 0x3ad   :  { %1170 = vrot.lane.b32.xlu0 %v1167_v10, %s4563_s4 }
 0x3b1   :  { %1193 = vrot.lane.b32.xlu0 %v1190_v14, %s4564_s7 }
 0x3b3   :  { %v4435_v29 = vpop.eup %4434 }
 0x3b4   :  { %4337 = vpush %v4435_v29  ;;  %v1163_v29 = vrot.slane %v1157_v22, 1 }
 0x3b5   :  { %4339 = vpush %v786_v32  ;;  %1197 = vrot.lane.b32.xlu0 %v1191_v18, %s4564_s7  ;;  %v1236_v32 = vsel %vm211_vm1, %v1233_v23, %v1235_v25 }
 0x3b9   :  { %1239 = vrot.lane.b32.xlu0 %v1236_v32, %s4563_s4 }
 0x3bd   :  { %1241 = vrot.lane.b32.xlu0 %v1235_v25, %s4563_s4 }
 0x3e5   :  { %s4338_s8 = spop %4337 }
 0x3e6   :  { %v565_v33 = vstv %s4338_s8  ;;  %s4340_s9 = spop %4339  ;;  %s4195_s8 = sld [smem:[#allocation2 + $0x41]] }
 0x3e7   :  { %v566_v57 = vmul.f32 %v565_v33, %v4881_v47  ;;  %v567_v35 = vmul.f32 %v565_v33, %v4884_v48  ;;  %v568_v36 = vmul.f32 %v565_v33, %v4887_v49  ;;  %s788_s10 = smul.f32 0.0011961722, %s4340_s9  ;;  %v1251_v33 = vmul.f32 %v4910_v59, %v1250_v27  ;;  %s4179_s9 = sld [smem:[#allocation2 + $0x37]] }
 0x3e9   :  { %v571_v38 = vmul.f32 %v570_v34, %v566_v57  ;;  %v572_v39 = vmul.f32 %v570_v34, %v567_v35  ;;  %v573_v40 = vmul.f32 %v570_v34, %v568_v36  ;;  %v789_v41 = vstv %s788_s10  ;;  %s4182_s10 = sld [smem:[#allocation2 + $0x3a]] }
 0x3ea   :  { %v4993_v12 = vsub.f32 %v4863_v20, %v789_v41  ;;  %v4996_v42 = vsub.f32 %v4865_v21, %v789_v41  ;;  %v4999_v43 = vsub.f32 %v4869_v24, %v789_v41  ;;  %v1252_v34 = vmul.f32 %v4913_v2, %v1250_v27 }
 0x3eb   :  { %v576_v47 = vadd.f32 %v575_v37, %v571_v38  ;;  %v577_v44 = vadd.f32 %v575_v37, %v572_v39  ;;  %v578_v48 = vadd.f32 %v575_v37, %v573_v40  ;;  %v1165_v57 = vsel %vm141_vm0, %v1163_v29, %v1164_v61 }
 0x3ec   :  { %v793_v49 = vmul.f32 %v4993_v12, %v4993_v12  ;;  %v794_v45 = vmul.f32 %v4996_v42, %v4996_v42  ;;  %v795_v60 = vmul.f32 %v4999_v43, %v4999_v43  ;;  %v1257_v35 = vrot.slane %v1251_v33, 2 }
 0x3ed   :  { %v579_v20 = vmax.f32 %v576_v47, 0.0  ;;  %v580_v63 = vmax.f32 %v577_v44, 0.0  ;;  %v581_v46 = vmax.f32 %v578_v48, 0.0  ;;  %v1258_v36 = vrot.slane %v1252_v34, 2 }
 0x3ee   :  { %v796_v21 = vsel %vm273_vm2, %v793_v49, 0.0  ;;  %v797_v24 = vsel %vm273_vm2, %v794_v45, 0.0  ;;  %v799_v17 = vsel %vm277_vm3, %v795_v60, 0.0  ;;  %v1253_v37 = vmul.f32 %v4916_v5, %v1250_v27 }
 0x3ef   :  { %4114 = vst.msk [vmem:[%s6340_s5 + $0x18] sm:$0xff] %vm273_vm2, %v579_v20  ;;  %4115 = vst.msk [vmem:[%s6340_s5 + $0x20] sm:$0xff] %vm273_vm2, %v580_v63  ;;  %v798_v6 = vadd.f32 %v797_v24, %v796_v21  ;;  %v1226_v38 = vmul.f32 %v4910_v59, %v1225_v1  ;;  %v1259_v39 = vsel %vm211_vm1, %v1257_v35, %v1258_v36 }
 0x3f0   :  { %4116 = vst.msk [vmem:[%s6340_s5 + $0x28] sm:$0x3f] %vm277_vm3, %v581_v46  ;;  %v1260_v40 = vrot.slane %v1253_v37, 2  ;;  %v1192_v41 = vsel %vm141_vm0, %v1189_v3, %v1191_v18  ;;  %1262 = vrot.lane.b32.xlu0 %v1259_v39, %s4564_s7  ;;  %v1206_v18 = vstv %s4154_s23  ;;  %s4142_s23 = sld [smem:[#allocation7 + $0x3]] }
 0x3f1   :  { %v800_v7 = vadd.f32 %v799_v17, %v798_v6  ;;  %v1232_v47 = vrot.slane %v1226_v38, 2  ;;  %v1208_v33 = vmul.f32 %v4913_v2, %v1206_v18  ;;  %v1207_v34 = vmul.f32 %v4910_v59, %v1206_v18 }
 0x3f2   :  { %v1261_v44 = vsel %vm211_vm1, %v1258_v36, %v1260_v40  ;;  %v1209_v36 = vmul.f32 %v4916_v5, %v1206_v18 }
 0x3f3   :  { %801 = vadd.xlane.f32.xlu1 %v800_v7  ;;  %v1234_v48 = vsel %vm211_vm1, %v1232_v47, %v1233_v23 }
 0x3f4   :  { %1264 = vrot.lane.b32.xlu0 %v1261_v44, %s4564_s7  ;;  %v1216_v44 = vrot.slane %v1209_v36, 2 }
 0x3f8   :  { %1266 = vrot.lane.b32.xlu0 %v1260_v40, %s4564_s7  ;;  %v1214_v40 = vrot.slane %v1208_v33, 2 }
 0x404   :  { %1104 = vrot.lane.b32.xlu1 %v1098_v19, %s4563_s4  ;;  %v1092_v19 = vstv %s4147_s20 }
 0x405   :  { %v1093_v54 = vadd.f32 %v1092_v19, %v1089_v50  ;;  %v1094_v56 = vadd.f32 %v1092_v19, %v1090_v51 }
 0x408   :  { %1108 = vrot.lane.b32.xlu1 %v1100_v52, %s4563_s4  ;;  %v1091_v52 = vmul.f32 %v4916_v5, %v1088_v8 }
 0x40a   :  { %v1095_v55 = vadd.f32 %v1092_v19, %v1091_v52 }
 0x40c   :  { %1124 = vrot.lane.b32.xlu1 %v1118_v11, %s4564_s7  ;;  %v1138_v11 = vmul.f32 %v4910_v59, %v1137_v58 }
 0x410   :  { %1126 = vrot.lane.b32.xlu1 %v1119_v16, %s4564_s7  ;;  %v1144_v16 = vrot.slane %v1138_v11, 1 }
 0x414   :  { %1128 = vrot.lane.b32.xlu1 %v1120_v28, %s4564_s7 }
 0x418   :  { %1168 = vrot.lane.b32.xlu1 %v1165_v57, %s4563_s4 }
 0x41c   :  { %1172 = vrot.lane.b32.xlu1 %v1166_v4, %s4563_s4  ;;  %v1139_v4 = vmul.f32 %v4913_v2, %v1137_v58 }
 0x41e   :  { %v1145_v30 = vrot.slane %v1139_v4, 1 }
 0x420   :  { %1195 = vrot.lane.b32.xlu1 %v1192_v41, %s4564_s7  ;;  %v5066_v21 = vpop.xlane.xlu0 %1029  ;;  %v1146_v25 = vsel %vm141_vm0, %v1144_v16, %v1145_v30  ;;  %v1148_v32 = vsel %vm141_vm0, %v1145_v30, %v1147_v15  ;;  %v1213_v41 = vrot.slane %v1207_v34, 2 }
 0x421   :  { %v1031_v11 = vrot.slane %v5066_v21, 4 }
 0x424   :  { %1237 = vrot.lane.b32.xlu1 %v1234_v48, %s4563_s4  ;;  %v1107_v7 = vpop.permute.xlu0 %1106 }
 0x425   :  { %v1114_v13 = vadd.f32 %v1107_v7, %v1094_v56 }
 0x428   :  { %v1171_v62 = vpop.permute.xlu0 %1170 }
 0x42c   :  { %v1194_v1 = vpop.permute.xlu0 %1193 }
 0x430   :  { %v1198_v23 = vpop.permute.xlu0 %1197 }
 0x434   :  { %v1240_v35 = vpop.permute.xlu0 %1239 }
 0x438   :  { %v1242_v48 = vpop.permute.xlu0 %1241 }
 0x480   :  { %v802_v49 = vpop.xlane.xlu1 %801 }
 0x481   :  { %v803_v45 = vrot.slane %v802_v49, 4 }
 0x483   :  { %v804_v60 = vadd.f32 %v803_v45, %v802_v49 }
 0x484   :  { %v1105_v24 = vpop.permute.xlu1 %1104 }
 0x485   :  { %v805_v20 = vrot.slane %v804_v60, 2  ;;  %v1113_v61 = vadd.f32 %v1105_v24, %v1093_v54 }
 0x487   :  { %v806_v63 = vadd.f32 %v805_v20, %v804_v60  ;;  %v1215_v20 = vsel %vm211_vm1, %v1213_v41, %v1214_v40 }
 0x488   :  { %v1109_v17 = vpop.permute.xlu1 %1108 }
 0x489   :  { %v807_v46 = vrot.slane %v806_v63, 1  ;;  %v1115_v10 = vadd.f32 %v1109_v17, %v1095_v55 }
 0x48b   :  { %v808_v6 = vadd.f32 %v807_v46, %v806_v63  ;;  %v1217_v46 = vsel %vm211_vm1, %v1214_v40, %v1216_v44 }
 0x48c   :  { %v1125_v53 = vpop.permute.xlu1 %1124 }
 0x48d   :  { %4341 = vpush %v808_v6  ;;  %v1133_v14 = vadd.f32 %v1125_v53, %v1113_v61  ;;  %v1263_v6 = vpop.permute.xlu0 %1262 }
 0x48f   :  { %v1152_v29 = vadd.f32 %v1146_v25, %v1133_v14 }
 0x490   :  { %v1127_v3 = vpop.permute.xlu1 %1126 }
 0x491   :  { %v1134_v27 = vadd.f32 %v1127_v3, %v1114_v13  ;;  %v1265_v52 = vpop.permute.xlu0 %1264 }
 0x493   :  { %v1153_v37 = vadd.f32 %v1148_v32, %v1134_v27 }
 0x494   :  { %v1129_v22 = vpop.permute.xlu1 %1128 }
 0x495   :  { %v1135_v28 = vadd.f32 %v1129_v22, %v1115_v10  ;;  %v1178_v60 = vadd.f32 %v1171_v62, %v1153_v37  ;;  %v1267_v62 = vpop.permute.xlu0 %1266  ;;  %v1032_v10 = vadd.f32 %v1031_v11, %v5066_v21 }
 0x497   :  { %v1154_v39 = vadd.f32 %v1147_v15, %v1135_v28  ;;  %v1033_v13 = vrot.slane %v1032_v10, 2  ;;  %v825_v28 = vstv %s4128_s2  ;;  %s4213_s2 = sld [smem:[#allocation2 + $0x4d]] }
 0x498   :  { %v1169_v57 = vpop.permute.xlu1 %1168 }
 0x499   :  { %v1177_v38 = vadd.f32 %v1169_v57, %v1152_v29  ;;  %v1034_v30 = vadd.f32 %v1033_v13, %v1032_v10 }
 0x49b   :  { %v1202_v49 = vadd.f32 %v1194_v1, %v1177_v38  ;;  %v1035_v15 = vrot.slane %v1034_v30, 1 }
 0x49c   :  { %v1173_v47 = vpop.permute.xlu1 %1172 }
 0x49d   :  { %v1179_v45 = vadd.f32 %v1173_v47, %v1154_v39  ;;  %v1221_v8 = vadd.f32 %v1215_v20, %v1202_v49  ;;  %v1036_v18 = vadd.f32 %v1035_v15, %v1034_v30  ;;  %v1347_v49 = vstv %s4164_s13  ;;  %s4185_s13 = sld [smem:[#allocation2 + $0x3d]] }
 0x49e   :  { %v1350_v20 = vmul.f32 %v4916_v5, %v1347_v49  ;;  %v1500_v30 = vstv %s4171_s15  ;;  %s4184_s15 = sld [smem:[#allocation2 + $0x3c]] }
 0x49f   :  { %v1204_v63 = vadd.f32 %v1198_v23, %v1179_v45  ;;  %v820_v23 = vstv %s4127_s27  ;;  %v1348_v45 = vmul.f32 %v4910_v59, %v1347_v49 }
 0x4a0   :  { %v1196_v24 = vpop.permute.xlu1 %1195 }
 0x4a1   :  { %v1223_v17 = vadd.f32 %v1216_v44, %v1204_v63  ;;  %v1203_v7 = vadd.f32 %v1196_v24, %v1178_v60  ;;  %v1349_v60 = vmul.f32 %v4913_v2, %v1347_v49  ;;  %v1406_v63 = vstv %s4167_s14  ;;  %s4186_s14 = sld [smem:[#allocation2 + $0x3e]] }
 0x4a2   :  { %v1408_v24 = vmul.f32 %v4913_v2, %v1406_v63  ;;  %v1407_v10 = vmul.f32 %v4910_v59, %v1406_v63  ;;  %v1338_v49 = vstv %s4163_s17 }
 0x4a3   :  { %v1222_v19 = vadd.f32 %v1217_v46, %v1203_v7  ;;  %v1248_v51 = vadd.f32 %v1242_v48, %v1223_v17  ;;  %v1431_v46 = vstv %s4168_s0  ;;  %v1367_v7 = vstv %s4165_s1  ;;  %s4177_s0 = sld [smem:[#allocation6 + $0x6]] }
 0x4a4   :  { %v1238_v50 = vpop.permute.xlu1 %1237  ;;  %v1432_v17 = vmul.f32 %v4910_v59, %v1431_v46  ;;  %v1370_v15 = vmul.f32 %v4916_v5, %v1367_v7  ;;  %s4178_s1 = sld [smem:[#allocation2 + $0x36]] }
 0x4a5   :  { %v1246_v53 = vadd.f32 %v1238_v50, %v1221_v8  ;;  %v1247_v54 = vadd.f32 %v1240_v35, %v1222_v19  ;;  %v5087_v61 = vadd.f32 %v1267_v62, %v1248_v51  ;;  %v1433_v8 = vmul.f32 %v4913_v2, %v1431_v46 }
 0x4a6   :  { %v1414_v19 = vrot.slane %v1408_v24, 1 }
 0x4a7   :  { %v5081_v55 = vadd.f32 %v1263_v6, %v1246_v53  ;;  %v5083_v56 = vadd.f32 %v1265_v52, %v1247_v54  ;;  %v1277_v3 = vsel %vm277_vm3, %v5087_v61, 0.0  ;;  %v1409_v6 = vmul.f32 %v4916_v5, %v1406_v63 }
 0x4a8   :  { %v1438_v52 = vrot.slane %v1432_v17, 1  ;;  %v1439_v51 = vrot.slane %v1433_v8, 1  ;;  %v1475_v53 = vstv %s4170_s3  ;;  %v1368_v54 = vmul.f32 %v4910_v59, %v1367_v7  ;;  %s4181_s3 = sld [smem:[#allocation2 + $0x39]] }
 0x4a9   :  { %v1275_v58 = vsel %vm273_vm2, %v5083_v56, 0.0  ;;  %v1274_v4 = vsel %vm273_vm2, %v5081_v55, 0.0  ;;  %v1416_v50 = vrot.slane %v1409_v6, 1  ;;  %v1340_v63 = vmul.f32 %v4913_v2, %v1338_v49 }
 0x4aa   :  { %v1276_v9 = vadd.f32 %v1275_v58, %v1274_v4  ;;  %v1434_v58 = vmul.f32 %v4916_v5, %v1431_v46  ;;  %v1440_v4 = vsel %vm141_vm0, %v1438_v52, %v1439_v51  ;;  %v1387_v8 = vstv %s4166_s18 }
 0x4ab   :  { %v1417_v62 = vsel %vm141_vm0, %v1414_v19, %v1416_v50  ;;  %v1390_v52 = vmul.f32 %v4916_v5, %v1387_v8 }
 0x4ac   :  { %v1278_v1 = vadd.f32 %v1277_v3, %v1276_v9  ;;  %v1477_v9 = vmul.f32 %v4913_v2, %v1475_v53  ;;  %v1478_v3 = vmul.f32 %v4916_v5, %v1475_v53  ;;  %v1441_v11 = vrot.slane %v1434_v58, 1 }
 0x4ae   :  { %1279 = vadd.xlane.f32.xlu0 %v1278_v1  ;;  %v1369_v1 = vmul.f32 %v4913_v2, %v1367_v7  ;;  %v1483_v13 = vrot.slane %v1477_v9, 2 }
 0x4be   :  { %s4342_s24 = spop %4341 }
 0x4bf   :  { %s810_s25 = smul.f32 0.0011961722, %s4342_s24  ;;  %s4143_s24 = sld [smem:[#allocation9 + $0x3]] }
 0x4c1   :  { %s811_s26 = sadd.f32 1e-05, %s810_s25 }
 0x4c3   :  { %v812_v14 = vstv %s811_s26 }
 0x4c4   :  { %4436 = vrsqrt.f32 %v812_v14  ;;  %1356 = vrot.lane.b32.xlu0 %v1349_v60, %s4563_s4  ;;  %v1485_v14 = vrot.slane %v1478_v3, 2  ;;  %v1339_v60 = vmul.f32 %v4910_v59, %v1338_v49  ;;  %v1397_v3 = vrot.slane %v1390_v52, 1 }
 0x4c8   :  { %1420 = vrot.lane.b32.xlu0 %v1417_v62, %s4563_s4 }
 0x4cc   :  { %1443 = vrot.lane.b32.xlu0 %v1440_v4, %s4564_s7 }
 0x4ce   :  { %v4437_v16 = vpop.eup %4436 }
 0x4cf   :  { %4343 = vpush %v4437_v16  ;;  %v1413_v16 = vrot.slane %v1407_v10, 1 }
 0x4d0   :  { %4345 = vpush %v1036_v18  ;;  %1447 = vrot.lane.b32.xlu0 %v1441_v11, %s4564_s7  ;;  %v1486_v18 = vsel %vm211_vm1, %v1483_v13, %v1485_v14 }
 0x4d4   :  { %1489 = vrot.lane.b32.xlu0 %v1486_v18, %s4563_s4  ;;  %v5185_v18 = vld [vmem:[#allocation10] sm:$0xff] }
 0x4d8   :  { %1491 = vrot.lane.b32.xlu0 %v1485_v14, %s4563_s4 }
 0x500   :  { %s4344_s28 = spop %4343 }
 0x501   :  { %v815_v22 = vstv %s4344_s28  ;;  %s4346_s29 = spop %4345  ;;  %s4210_s28 = sld [smem:[#allocation2 + $0x4a]] }
 0x502   :  { %v816_v21 = vmul.f32 %v815_v22, %v4993_v12  ;;  %v817_v25 = vmul.f32 %v815_v22, %v4996_v42  ;;  %v818_v27 = vmul.f32 %v815_v22, %v4999_v43  ;;  %s1038_s30 = smul.f32 0.0011961722, %s4346_s29  ;;  %v1501_v22 = vmul.f32 %v4910_v59, %v1500_v30  ;;  %s4194_s29 = sld [smem:[#allocation2 + $0x40]] }
 0x504   :  { %v821_v29 = vmul.f32 %v820_v23, %v816_v21  ;;  %v822_v32 = vmul.f32 %v820_v23, %v817_v25  ;;  %v823_v33 = vmul.f32 %v820_v23, %v818_v27  ;;  %v1039_v34 = vstv %s1038_s30  ;;  %s4197_s30 = sld [smem:[#allocation2 + $0x43]] }
 0x505   :  { %v5099_v57 = vsub.f32 %v4975_v26, %v1039_v34  ;;  %v5102_v35 = vsub.f32 %v4977_v0, %v1039_v34  ;;  %v5105_v36 = vsub.f32 %v4981_v31, %v1039_v34  ;;  %v1502_v23 = vmul.f32 %v4913_v2, %v1500_v30 }
 0x506   :  { %v826_v12 = vadd.f32 %v825_v28, %v821_v29  ;;  %v827_v37 = vadd.f32 %v825_v28, %v822_v32  ;;  %v828_v42 = vadd.f32 %v825_v28, %v823_v33  ;;  %v1415_v21 = vsel %vm141_vm0, %v1413_v16, %v1414_v19  ;;  %v5182_v16 = vld [vmem:[#allocation10 + $0x8] sm:$0xff] }
 0x507   :  { %v1043_v43 = vmul.f32 %v5099_v57, %v5099_v57  ;;  %v1044_v38 = vmul.f32 %v5102_v35, %v5102_v35  ;;  %v1045_v39 = vmul.f32 %v5105_v36, %v5105_v36  ;;  %v1507_v25 = vrot.slane %v1501_v22, 2 }
 0x508   :  { %v829_v26 = vmax.f32 %v826_v12, 0.0  ;;  %v830_v40 = vmax.f32 %v827_v37, 0.0  ;;  %v831_v41 = vmax.f32 %v828_v42, 0.0  ;;  %v1508_v27 = vrot.slane %v1502_v23, 2 }
 0x509   :  { %v1046_v0 = vsel %vm273_vm2, %v1043_v43, 0.0  ;;  %v1047_v31 = vsel %vm273_vm2, %v1044_v38, 0.0  ;;  %v1049_v44 = vsel %vm277_vm3, %v1045_v39, 0.0  ;;  %v1503_v28 = vmul.f32 %v4916_v5, %v1500_v30 }
 0x50a   :  { %4129 = vst.msk [vmem:[%s6340_s5 + $0x30] sm:$0xff] %vm273_vm2, %v829_v26  ;;  %4130 = vst.msk [vmem:[%s6340_s5 + $0x38] sm:$0xff] %vm273_vm2, %v830_v40  ;;  %v1048_v47 = vadd.f32 %v1047_v31, %v1046_v0  ;;  %v1476_v29 = vmul.f32 %v4910_v59, %v1475_v53  ;;  %v1509_v32 = vsel %vm211_vm1, %v1507_v25, %v1508_v27  ;;  %v5188_v25 = vld [vmem:[#allocation10 + $0x10] sm:$0xff] }
 0x50b   :  { %4131 = vst.msk [vmem:[%s6340_s5 + $0x40] sm:$0x3f] %vm277_vm3, %v831_v41  ;;  %v1510_v33 = vrot.slane %v1503_v28, 2  ;;  %v1442_v34 = vsel %vm141_vm0, %v1439_v51, %v1441_v11  ;;  %1512 = vrot.lane.b32.xlu0 %v1509_v32, %s4564_s7  ;;  %v1456_v11 = vstv %s4169_s19  ;;  %s4157_s19 = sld [smem:[#allocation7 + $0x4]] }
 0x50c   :  { %v1050_v48 = vadd.f32 %v1049_v44, %v1048_v47  ;;  %v1482_v12 = vrot.slane %v1476_v29, 2  ;;  %v1457_v22 = vmul.f32 %v5185_v18, %v1456_v11 }
 0x50d   :  { %v1511_v37 = vsel %vm211_vm1, %v1508_v27, %v1510_v33  ;;  %v1459_v27 = vmul.f32 %v5188_v25, %v1456_v11 }
 0x50e   :  { %1051 = vadd.xlane.f32.xlu1 %v1050_v48  ;;  %v1484_v42 = vsel %vm211_vm1, %v1482_v12, %v1483_v13 }
 0x50f   :  { %1514 = vrot.lane.b32.xlu0 %v1511_v37, %s4564_s7  ;;  %v1466_v37 = vrot.slane %v1459_v27, 2 }
 0x513   :  { %1516 = vrot.lane.b32.xlu0 %v1510_v33, %s4564_s7 }
 0x51f   :  { %1354 = vrot.lane.b32.xlu1 %v1348_v45, %s4563_s4  ;;  %v1342_v45 = vstv %s4162_s16 }
 0x520   :  { %v1343_v6 = vadd.f32 %v1342_v45, %v1339_v60  ;;  %v1344_v7 = vadd.f32 %v1342_v45, %v1340_v63 }
 0x523   :  { %1358 = vrot.lane.b32.xlu1 %v1350_v20, %s4563_s4  ;;  %v1341_v20 = vmul.f32 %v4916_v5, %v1338_v49 }
 0x525   :  { %v1345_v17 = vadd.f32 %v1342_v45, %v1341_v20 }
 0x527   :  { %1374 = vrot.lane.b32.xlu1 %v1368_v54, %s4564_s7  ;;  %v1388_v54 = vmul.f32 %v4910_v59, %v1387_v8  ;;  %v1458_v59 = vmul.f32 %v5182_v16, %v1456_v11 }
 0x529   :  { %v1464_v33 = vrot.slane %v1458_v59, 2 }
 0x52b   :  { %1376 = vrot.lane.b32.xlu1 %v1369_v1, %s4564_s7  ;;  %v1394_v1 = vrot.slane %v1388_v54, 1 }
 0x52f   :  { %1378 = vrot.lane.b32.xlu1 %v1370_v15, %s4564_s7 }
 0x533   :  { %1418 = vrot.lane.b32.xlu1 %v1415_v21, %s4563_s4 }
 0x537   :  { %1422 = vrot.lane.b32.xlu1 %v1416_v50, %s4563_s4  ;;  %v1389_v50 = vmul.f32 %v4913_v2, %v1387_v8 }
 0x539   :  { %v1395_v9 = vrot.slane %v1389_v50, 1 }
 0x53b   :  { %1445 = vrot.lane.b32.xlu1 %v1442_v34, %s4564_s7  ;;  %v5172_v0 = vpop.xlane.xlu0 %1279  ;;  %v1396_v14 = vsel %vm141_vm0, %v1394_v1, %v1395_v9  ;;  %v1398_v5 = vsel %vm141_vm0, %v1395_v9, %v1397_v3  ;;  %v1463_v34 = vrot.slane %v1457_v22, 2 }
 0x53c   :  { %v1281_v54 = vrot.slane %v5172_v0, 4 }
 0x53f   :  { %1487 = vrot.lane.b32.xlu1 %v1484_v42, %s4563_s4  ;;  %v1357_v48 = vpop.permute.xlu0 %1356 }
 0x540   :  { %v1364_v58 = vadd.f32 %v1357_v48, %v1344_v7 }
 0x543   :  { %v1421_v24 = vpop.permute.xlu0 %1420 }
 0x547   :  { %v1444_v53 = vpop.permute.xlu0 %1443 }
 0x54b   :  { %v1448_v13 = vpop.permute.xlu0 %1447 }
 0x54f   :  { %v1490_v21 = vpop.permute.xlu0 %1489 }
 0x553   :  { %v1492_v42 = vpop.permute.xlu0 %1491 }
 0x59b   :  { %v1052_v43 = vpop.xlane.xlu1 %1051 }
 0x59c   :  { %v1053_v38 = vrot.slane %v1052_v43, 4 }
 0x59e   :  { %v1054_v39 = vadd.f32 %v1053_v38, %v1052_v43 }
 0x59f   :  { %v1355_v31 = vpop.permute.xlu1 %1354 }
 0x5a0   :  { %v1055_v26 = vrot.slane %v1054_v39, 2  ;;  %v1363_v19 = vadd.f32 %v1355_v31, %v1343_v6 }
 0x5a2   :  { %v1056_v40 = vadd.f32 %v1055_v26, %v1054_v39  ;;  %v1465_v26 = vsel %vm211_vm1, %v1463_v34, %v1464_v33 }
 0x5a3   :  { %v1359_v44 = vpop.permute.xlu1 %1358 }
 0x5a4   :  { %v1057_v41 = vrot.slane %v1056_v40, 1  ;;  %v1365_v62 = vadd.f32 %v1359_v44, %v1345_v17 }
 0x5a6   :  { %v1058_v47 = vadd.f32 %v1057_v41, %v1056_v40  ;;  %v1467_v41 = vsel %vm211_vm1, %v1464_v33, %v1466_v37 }
 0x5a7   :  { %v1375_v46 = vpop.permute.xlu1 %1374 }
 0x5a8   :  { %4347 = vpush %v1058_v47  ;;  %v1383_v4 = vadd.f32 %v1375_v46, %v1363_v19  ;;  %v1513_v47 = vpop.permute.xlu0 %1512 }
 0x5aa   :  { %v1402_v2 = vadd.f32 %v1396_v14, %v1383_v4 }
 0x5ab   :  { %v1377_v51 = vpop.permute.xlu1 %1376 }
 0x5ac   :  { %v1384_v30 = vadd.f32 %v1377_v51, %v1364_v58  ;;  %v1515_v20 = vpop.permute.xlu0 %1514 }
 0x5ae   :  { %v1403_v28 = vadd.f32 %v1398_v5, %v1384_v30 }
 0x5af   :  { %v1379_v10 = vpop.permute.xlu1 %1378 }
 0x5b0   :  { %v1385_v15 = vadd.f32 %v1379_v10, %v1365_v62  ;;  %v1428_v39 = vadd.f32 %v1421_v24, %v1403_v28  ;;  %v1517_v24 = vpop.permute.xlu0 %1516  ;;  %v1282_v62 = vadd.f32 %v1281_v54, %v5172_v0 }
 0x5b2   :  { %v1404_v32 = vadd.f32 %v1397_v3, %v1385_v15  ;;  %v1283_v58 = vrot.slane %v1282_v62, 2  ;;  %v1075_v15 = vstv %s4143_s24  ;;  %s4228_s24 = sld [smem:[#allocation2 + $0x56]] }
 0x5b3   :  { %v1419_v23 = vpop.permute.xlu1 %1418 }
 0x5b4   :  { %v1427_v29 = vadd.f32 %v1419_v23, %v1402_v2  ;;  %v1284_v9 = vadd.f32 %v1283_v58, %v1282_v62 }
 0x5b6   :  { %v1452_v43 = vadd.f32 %v1444_v53, %v1427_v29  ;;  %v1285_v3 = vrot.slane %v1284_v9, 1 }
 0x5b7   :  { %v1423_v12 = vpop.permute.xlu1 %1422 }
 0x5b8   :  { %v1429_v38 = vadd.f32 %v1423_v12, %v1404_v32  ;;  %v1471_v49 = vadd.f32 %v1465_v26, %v1452_v43  ;;  %v1286_v11 = vadd.f32 %v1285_v3, %v1284_v9  ;;  %v1597_v43 = vstv %s4179_s9  ;;  %s4200_s9 = sld [smem:[#allocation2 + $0x46]] }
 0x5b9   :  { %v1600_v26 = vmul.f32 %v5188_v25, %v1597_v43  ;;  %v1750_v9 = vstv %s4186_s14  ;;  %s4199_s14 = sld [smem:[#allocation2 + $0x45]] }
 0x5ba   :  { %v1454_v40 = vadd.f32 %v1448_v13, %v1429_v38  ;;  %v1070_v13 = vstv %s4142_s23  ;;  %v1598_v38 = vmul.f32 %v5185_v18, %v1597_v43 }
 0x5bb   :  { %v1446_v31 = vpop.permute.xlu1 %1445 }
 0x5bc   :  { %v1473_v44 = vadd.f32 %v1466_v37, %v1454_v40  ;;  %v1453_v48 = vadd.f32 %v1446_v31, %v1428_v39  ;;  %v1599_v39 = vmul.f32 %v5182_v16, %v1597_v43  ;;  %v1656_v40 = vstv %s4182_s10  ;;  %s4201_s10 = sld [smem:[#allocation2 + $0x47]] }
 0x5bd   :  { %v1658_v31 = vmul.f32 %v5182_v16, %v1656_v40  ;;  %v1657_v62 = vmul.f32 %v5185_v18, %v1656_v40  ;;  %v1588_v43 = vstv %s4178_s1 }
 0x5be   :  { %v1472_v45 = vadd.f32 %v1467_v41, %v1453_v48  ;;  %v1498_v63 = vadd.f32 %v1492_v42, %v1473_v44  ;;  %v1681_v41 = vstv %s4183_s11  ;;  %v1617_v48 = vstv %s4180_s12  ;;  %s4192_s11 = sld [smem:[#allocation6 + $0x7]] }
 0x5bf   :  { %v1488_v60 = vpop.permute.xlu1 %1487  ;;  %v1682_v44 = vmul.f32 %v5185_v18, %v1681_v41  ;;  %v1620_v3 = vmul.f32 %v5188_v25, %v1617_v48  ;;  %s4193_s12 = sld [smem:[#allocation2 + $0x3f]] }
 0x5c0   :  { %v1496_v46 = vadd.f32 %v1488_v60, %v1471_v49  ;;  %v1497_v6 = vadd.f32 %v1490_v21, %v1472_v45  ;;  %v5201_v50 = vadd.f32 %v1517_v24, %v1498_v63  ;;  %v1683_v49 = vmul.f32 %v5182_v16, %v1681_v41 }
 0x5c1   :  { %v1664_v45 = vrot.slane %v1658_v31, 1 }
 0x5c2   :  { %v5193_v17 = vadd.f32 %v1513_v47, %v1496_v46  ;;  %v5195_v7 = vadd.f32 %v1515_v20, %v1497_v6  ;;  %v1527_v51 = vsel %vm277_vm3, %v5201_v50, 0.0  ;;  %v1659_v47 = vmul.f32 %v5188_v25, %v1656_v40 }
 0x5c3   :  { %v1688_v20 = vrot.slane %v1682_v44, 1  ;;  %v1689_v63 = vrot.slane %v1683_v49, 1  ;;  %v1725_v46 = vstv %s4185_s13  ;;  %v1618_v6 = vmul.f32 %v5185_v18, %v1617_v48  ;;  %s4196_s13 = sld [smem:[#allocation2 + $0x42]] }
 0x5c4   :  { %v1524_v8 = vsel %vm273_vm2, %v5193_v17, 0.0  ;;  %v1525_v19 = vsel %vm273_vm2, %v5195_v7, 0.0  ;;  %v1666_v60 = vrot.slane %v1659_v47, 1  ;;  %v1590_v40 = vmul.f32 %v5182_v16, %v1588_v43 }
 0x5c5   :  { %v1526_v52 = vadd.f32 %v1525_v19, %v1524_v8  ;;  %v1684_v8 = vmul.f32 %v5188_v25, %v1681_v41  ;;  %v1690_v19 = vsel %vm141_vm0, %v1688_v20, %v1689_v63  ;;  %v1637_v49 = vstv %s4181_s3 }
 0x5c6   :  { %v1667_v24 = vsel %vm141_vm0, %v1664_v45, %v1666_v60  ;;  %v1640_v20 = vmul.f32 %v5188_v25, %v1637_v49 }
 0x5c7   :  { %v1528_v53 = vadd.f32 %v1527_v51, %v1526_v52  ;;  %v1727_v52 = vmul.f32 %v5182_v16, %v1725_v46  ;;  %v1728_v51 = vmul.f32 %v5188_v25, %v1725_v46  ;;  %v1691_v54 = vrot.slane %v1684_v8, 1 }
 0x5c9   :  { %1529 = vadd.xlane.f32.xlu0 %v1528_v53  ;;  %v1619_v53 = vmul.f32 %v5182_v16, %v1617_v48  ;;  %v1733_v58 = vrot.slane %v1727_v52, 2 }
 0x5d9   :  { %s4348_s20 = spop %4347 }
 0x5da   :  { %s1060_s21 = smul.f32 0.0011961722, %s4348_s20  ;;  %s4158_s20 = sld [smem:[#allocation9 + $0x4]] }
 0x5dc   :  { %s1061_s22 = sadd.f32 1e-05, %s1060_s21 }
 0x5de   :  { %v1062_v4 = vstv %s1061_s22 }
 0x5df   :  { %4438 = vrsqrt.f32 %v1062_v4  ;;  %1606 = vrot.lane.b32.xlu0 %v1599_v39, %s4563_s4  ;;  %v1735_v4 = vrot.slane %v1728_v51, 2  ;;  %v1589_v39 = vmul.f32 %v5185_v18, %v1588_v43  ;;  %v1647_v51 = vrot.slane %v1640_v20, 1 }
 0x5e3   :  { %1670 = vrot.lane.b32.xlu0 %v1667_v24, %s4563_s4 }
 0x5e7   :  { %1693 = vrot.lane.b32.xlu0 %v1690_v19, %s4564_s7 }
 0x5e9   :  { %v4439_v1 = vpop.eup %4438 }
 0x5ea   :  { %4349 = vpush %v4439_v1  ;;  %v1663_v1 = vrot.slane %v1657_v62, 1 }
 0x5eb   :  { %4351 = vpush %v1286_v11  ;;  %1697 = vrot.lane.b32.xlu0 %v1691_v54, %s4564_s7  ;;  %v1736_v11 = vsel %vm211_vm1, %v1733_v58, %v1735_v4 }
 0x5ef   :  { %1739 = vrot.lane.b32.xlu0 %v1736_v11, %s4563_s4 }
 0x5f3   :  { %1741 = vrot.lane.b32.xlu0 %v1735_v4, %s4563_s4 }
 0x61b   :  { %s4350_s25 = spop %4349 }
 0x61c   :  { %v1065_v10 = vstv %s4350_s25  ;;  %s4352_s26 = spop %4351  ;;  %s4225_s25 = sld [smem:[#allocation2 + $0x53]] }
 0x61d   :  { %v1066_v0 = vmul.f32 %v1065_v10, %v5099_v57  ;;  %v1067_v14 = vmul.f32 %v1065_v10, %v5102_v35  ;;  %v1068_v30 = vmul.f32 %v1065_v10, %v5105_v36  ;;  %s1288_s27 = smul.f32 0.0011961722, %s4352_s26  ;;  %v1751_v10 = vmul.f32 %v5185_v18, %v1750_v9  ;;  %s4209_s26 = sld [smem:[#allocation2 + $0x49]] }
 0x61f   :  { %v1071_v2 = vmul.f32 %v1070_v13, %v1066_v0  ;;  %v1072_v5 = vmul.f32 %v1070_v13, %v1067_v14  ;;  %v1073_v59 = vmul.f32 %v1070_v13, %v1068_v30  ;;  %v1289_v22 = vstv %s1288_s27  ;;  %s4212_s27 = sld [smem:[#allocation2 + $0x4c]] }
 0x620   :  { %v5211_v23 = vsub.f32 %v5081_v55, %v1289_v22  ;;  %v5214_v21 = vsub.f32 %v5083_v56, %v1289_v22  ;;  %v5217_v27 = vsub.f32 %v5087_v61, %v1289_v22  ;;  %v1752_v13 = vmul.f32 %v5182_v16, %v1750_v9 }
 0x621   :  { %v1076_v57 = vadd.f32 %v1075_v15, %v1071_v2  ;;  %v1077_v28 = vadd.f32 %v1075_v15, %v1072_v5  ;;  %v1078_v35 = vadd.f32 %v1075_v15, %v1073_v59  ;;  %v1665_v0 = vsel %vm141_vm0, %v1663_v1, %v1664_v45 }
 0x622   :  { %v1293_v36 = vmul.f32 %v5211_v23, %v5211_v23  ;;  %v1294_v29 = vmul.f32 %v5214_v21, %v5214_v21  ;;  %v1295_v32 = vmul.f32 %v5217_v27, %v5217_v27  ;;  %v1757_v14 = vrot.slane %v1751_v10, 2 }
 0x623   :  { %v1079_v55 = vmax.f32 %v1076_v57, 0.0  ;;  %v1080_v33 = vmax.f32 %v1077_v28, 0.0  ;;  %v1081_v34 = vmax.f32 %v1078_v35, 0.0  ;;  %v1758_v30 = vrot.slane %v1752_v13, 2 }
 0x624   :  { %v1296_v56 = vsel %vm273_vm2, %v1293_v36, 0.0  ;;  %v1297_v61 = vsel %vm273_vm2, %v1294_v29, 0.0  ;;  %v1299_v37 = vsel %vm277_vm3, %v1295_v32, 0.0  ;;  %v1753_v15 = vmul.f32 %v5188_v25, %v1750_v9 }
 0x625   :  { %4144 = vst.msk [vmem:[%s6340_s5 + $0x48] sm:$0xff] %vm273_vm2, %v1079_v55  ;;  %4145 = vst.msk [vmem:[%s6340_s5 + $0x50] sm:$0xff] %vm273_vm2, %v1080_v33  ;;  %v1298_v12 = vadd.f32 %v1297_v61, %v1296_v56  ;;  %v1726_v2 = vmul.f32 %v5185_v18, %v1725_v46  ;;  %v1759_v5 = vsel %vm211_vm1, %v1757_v14, %v1758_v30 }
 0x626   :  { %4146 = vst.msk [vmem:[%s6340_s5 + $0x58] sm:$0x3f] %vm277_vm3, %v1081_v34  ;;  %v1760_v59 = vrot.slane %v1753_v15, 2  ;;  %v1692_v22 = vsel %vm141_vm0, %v1689_v63, %v1691_v54  ;;  %1762 = vrot.lane.b32.xlu0 %v1759_v5, %s4564_s7  ;;  %v1706_v54 = vstv %s4184_s15  ;;  %s4172_s15 = sld [smem:[#allocation7 + $0x5]] }
 0x627   :  { %v1300_v42 = vadd.f32 %v1299_v37, %v1298_v12  ;;  %v1732_v57 = vrot.slane %v1726_v2, 2  ;;  %v1708_v10 = vmul.f32 %v5182_v16, %v1706_v54  ;;  %v1707_v13 = vmul.f32 %v5185_v18, %v1706_v54 }
 0x628   :  { %v1761_v28 = vsel %vm211_vm1, %v1758_v30, %v1760_v59  ;;  %v1709_v30 = vmul.f32 %v5188_v25, %v1706_v54 }
 0x629   :  { %1301 = vadd.xlane.f32.xlu1 %v1300_v42  ;;  %v1734_v35 = vsel %vm211_vm1, %v1732_v57, %v1733_v58 }
 0x62a   :  { %1764 = vrot.lane.b32.xlu0 %v1761_v28, %s4564_s7  ;;  %v1716_v28 = vrot.slane %v1709_v30, 2 }
 0x62e   :  { %1766 = vrot.lane.b32.xlu0 %v1760_v59, %s4564_s7  ;;  %v1714_v59 = vrot.slane %v1708_v10, 2 }
 0x63a   :  { %1604 = vrot.lane.b32.xlu1 %v1598_v38, %s4563_s4  ;;  %v1592_v38 = vstv %s4177_s0 }
 0x63b   :  { %v1593_v47 = vadd.f32 %v1592_v38, %v1589_v39  ;;  %v1594_v48 = vadd.f32 %v1592_v38, %v1590_v40 }
 0x63e   :  { %1608 = vrot.lane.b32.xlu1 %v1600_v26, %s4563_s4  ;;  %v1591_v26 = vmul.f32 %v5188_v25, %v1588_v43 }
 0x640   :  { %v1595_v44 = vadd.f32 %v1592_v38, %v1591_v26 }
 0x642   :  { %1624 = vrot.lane.b32.xlu1 %v1618_v6, %s4564_s7  ;;  %v1638_v6 = vmul.f32 %v5185_v18, %v1637_v49 }
 0x646   :  { %1626 = vrot.lane.b32.xlu1 %v1619_v53, %s4564_s7  ;;  %v1644_v53 = vrot.slane %v1638_v6, 1 }
 0x64a   :  { %1628 = vrot.lane.b32.xlu1 %v1620_v3, %s4564_s7 }
 0x64e   :  { %1668 = vrot.lane.b32.xlu1 %v1665_v0, %s4563_s4 }
 0x652   :  { %1672 = vrot.lane.b32.xlu1 %v1666_v60, %s4563_s4  ;;  %v1639_v60 = vmul.f32 %v5182_v16, %v1637_v49 }
 0x654   :  { %v1645_v52 = vrot.slane %v1639_v60, 1 }
 0x656   :  { %1695 = vrot.lane.b32.xlu1 %v1692_v22, %s4564_s7  ;;  %v5284_v56 = vpop.xlane.xlu0 %1529  ;;  %v1646_v4 = vsel %vm141_vm0, %v1644_v53, %v1645_v52  ;;  %v1648_v11 = vsel %vm141_vm0, %v1645_v52, %v1647_v51  ;;  %v1713_v22 = vrot.slane %v1707_v13, 2 }
 0x657   :  { %v1531_v6 = vrot.slane %v5284_v56, 4 }
 0x65a   :  { %1737 = vrot.lane.b32.xlu1 %v1734_v35, %s4563_s4  ;;  %v1607_v42 = vpop.permute.xlu0 %1606 }
 0x65b   :  { %v1614_v8 = vadd.f32 %v1607_v42, %v1594_v48 }
 0x65e   :  { %v1671_v31 = vpop.permute.xlu0 %1670 }
 0x662   :  { %v1694_v46 = vpop.permute.xlu0 %1693 }
 0x666   :  { %v1698_v58 = vpop.permute.xlu0 %1697 }
 0x66a   :  { %v1740_v14 = vpop.permute.xlu0 %1739 }
 0x66e   :  { %v1742_v35 = vpop.permute.xlu0 %1741 }
 0x6b6   :  { %v1302_v36 = vpop.xlane.xlu1 %1301 }
 0x6b7   :  { %v1303_v29 = vrot.slane %v1302_v36, 4 }
 0x6b9   :  { %v1304_v32 = vadd.f32 %v1303_v29, %v1302_v36 }
 0x6ba   :  { %v1605_v61 = vpop.permute.xlu1 %1604 }
 0x6bb   :  { %v1305_v55 = vrot.slane %v1304_v32, 2  ;;  %v1613_v45 = vadd.f32 %v1605_v61, %v1593_v47 }
 0x6bd   :  { %v1306_v33 = vadd.f32 %v1305_v55, %v1304_v32  ;;  %v1715_v55 = vsel %vm211_vm1, %v1713_v22, %v1714_v59 }
 0x6be   :  { %v1609_v37 = vpop.permute.xlu1 %1608 }
 0x6bf   :  { %v1307_v34 = vrot.slane %v1306_v33, 1  ;;  %v1615_v24 = vadd.f32 %v1609_v37, %v1595_v44 }
 0x6c1   :  { %v1308_v12 = vadd.f32 %v1307_v34, %v1306_v33  ;;  %v1717_v34 = vsel %vm211_vm1, %v1714_v59, %v1716_v28 }
 0x6c2   :  { %v1625_v41 = vpop.permute.xlu1 %1624 }
 0x6c3   :  { %4353 = vpush %v1308_v12  ;;  %v1633_v19 = vadd.f32 %v1625_v41, %v1613_v45  ;;  %v1763_v12 = vpop.permute.xlu0 %1762 }
 0x6c5   :  { %v1652_v1 = vadd.f32 %v1646_v4, %v1633_v19 }
 0x6c6   :  { %v1627_v63 = vpop.permute.xlu1 %1626 }
 0x6c7   :  { %v1634_v9 = vadd.f32 %v1627_v63, %v1614_v8  ;;  %v1765_v26 = vpop.permute.xlu0 %1764 }
 0x6c9   :  { %v1653_v15 = vadd.f32 %v1648_v11, %v1634_v9 }
 0x6ca   :  { %v1629_v62 = vpop.permute.xlu1 %1628 }
 0x6cb   :  { %v1635_v3 = vadd.f32 %v1629_v62, %v1615_v24  ;;  %v1678_v32 = vadd.f32 %v1671_v31, %v1653_v15  ;;  %v1767_v31 = vpop.permute.xlu0 %1766  ;;  %v1532_v24 = vadd.f32 %v1531_v6, %v5284_v56 }
 0x6cd   :  { %v1654_v5 = vadd.f32 %v1647_v51, %v1635_v3  ;;  %v1533_v8 = vrot.slane %v1532_v24, 2  ;;  %v1325_v3 = vstv %s4158_s20  ;;  %s4243_s20 = sld [smem:[#allocation2 + $0x5f]] }
 0x6ce   :  { %v1669_v0 = vpop.permute.xlu1 %1668 }
 0x6cf   :  { %v1677_v2 = vadd.f32 %v1669_v0, %v1652_v1  ;;  %v1534_v52 = vadd.f32 %v1533_v8, %v1532_v24 }
 0x6d1   :  { %v1702_v36 = vadd.f32 %v1694_v46, %v1677_v2  ;;  %v1535_v51 = vrot.slane %v1534_v52, 1 }
 0x6d2   :  { %v1673_v57 = vpop.permute.xlu1 %1672 }
 0x6d3   :  { %v1679_v29 = vadd.f32 %v1673_v57, %v1654_v5  ;;  %v1721_v43 = vadd.f32 %v1715_v55, %v1702_v36  ;;  %v1536_v54 = vadd.f32 %v1535_v51, %v1534_v52  ;;  %v1847_v36 = vstv %s4194_s29  ;;  %s4215_s29 = sld [smem:[#allocation2 + $0x4f]] }
 0x6d4   :  { %v1850_v55 = vmul.f32 %v5188_v25, %v1847_v36  ;;  %v2000_v52 = vstv %s4201_s10  ;;  %s4214_s10 = sld [smem:[#allocation2 + $0x4e]] }
 0x6d5   :  { %v1704_v33 = vadd.f32 %v1698_v58, %v1679_v29  ;;  %v1320_v58 = vstv %s4157_s19  ;;  %v1848_v29 = vmul.f32 %v5185_v18, %v1847_v36 }
 0x6d6   :  { %v1696_v61 = vpop.permute.xlu1 %1695 }
 0x6d7   :  { %v1723_v37 = vadd.f32 %v1716_v28, %v1704_v33  ;;  %v1703_v42 = vadd.f32 %v1696_v61, %v1678_v32  ;;  %v1849_v32 = vmul.f32 %v5182_v16, %v1847_v36  ;;  %v1906_v33 = vstv %s4197_s30  ;;  %s4216_s30 = sld [smem:[#allocation2 + $0x50]] }
 0x6d8   :  { %v1908_v61 = vmul.f32 %v5182_v16, %v1906_v33  ;;  %v1907_v24 = vmul.f32 %v5185_v18, %v1906_v33  ;;  %v1838_v36 = vstv %s4193_s12 }
 0x6d9   :  { %v1722_v38 = vadd.f32 %v1717_v34, %v1703_v42  ;;  %v1748_v40 = vadd.f32 %v1742_v35, %v1723_v37  ;;  %v1931_v34 = vstv %s4198_s6  ;;  %v1867_v42 = vstv %s4195_s8  ;;  %s4207_s6 = sld [smem:[#allocation6 + $0x8]] }
 0x6da   :  { %v1738_v39 = vpop.permute.xlu1 %1737  ;;  %v1932_v37 = vmul.f32 %v5185_v18, %v1931_v34  ;;  %v1870_v51 = vmul.f32 %v5188_v25, %v1867_v42  ;;  %s4208_s8 = sld [smem:[#allocation2 + $0x48]] }
 0x6db   :  { %v1746_v41 = vadd.f32 %v1738_v39, %v1721_v43  ;;  %v1747_v47 = vadd.f32 %v1740_v14, %v1722_v38  ;;  %v5307_v60 = vadd.f32 %v1767_v31, %v1748_v40  ;;  %v1933_v43 = vmul.f32 %v5182_v16, %v1931_v34 }
 0x6dc   :  { %v1914_v38 = vrot.slane %v1908_v61, 1 }
 0x6dd   :  { %v5299_v44 = vadd.f32 %v1763_v12, %v1746_v41  ;;  %v5301_v48 = vadd.f32 %v1765_v26, %v1747_v47  ;;  %v1777_v63 = vsel %vm277_vm3, %v5307_v60, 0.0  ;;  %v1909_v12 = vmul.f32 %v5188_v25, %v1906_v33 }
 0x6de   :  { %v1938_v26 = vrot.slane %v1932_v37, 1  ;;  %v1939_v40 = vrot.slane %v1933_v43, 1  ;;  %v1975_v41 = vstv %s4200_s9  ;;  %v1868_v47 = vmul.f32 %v5185_v18, %v1867_v42  ;;  %s4211_s9 = sld [smem:[#allocation2 + $0x4b]] }
 0x6df   :  { %v1774_v49 = vsel %vm273_vm2, %v5299_v44, 0.0  ;;  %v1775_v45 = vsel %vm273_vm2, %v5301_v48, 0.0  ;;  %v1916_v39 = vrot.slane %v1909_v12, 1  ;;  %v1840_v33 = vmul.f32 %v5182_v16, %v1838_v36 }
 0x6e0   :  { %v1776_v20 = vadd.f32 %v1775_v45, %v1774_v49  ;;  %v1934_v49 = vmul.f32 %v5188_v25, %v1931_v34  ;;  %v1940_v45 = vsel %vm141_vm0, %v1938_v26, %v1939_v40  ;;  %v1887_v43 = vstv %s4196_s13 }
 0x6e1   :  { %v1917_v31 = vsel %vm141_vm0, %v1914_v38, %v1916_v39  ;;  %v1890_v26 = vmul.f32 %v5188_v25, %v1887_v43 }
 0x6e2   :  { %v1778_v46 = vadd.f32 %v1777_v63, %v1776_v20  ;;  %v1977_v20 = vmul.f32 %v5182_v16, %v1975_v41  ;;  %v1978_v63 = vmul.f32 %v5188_v25, %v1975_v41  ;;  %v1941_v6 = vrot.slane %v1934_v49, 1 }
 0x6e4   :  { %1779 = vadd.xlane.f32.xlu0 %v1778_v46  ;;  %v1869_v46 = vmul.f32 %v5182_v16, %v1867_v42  ;;  %v1983_v8 = vrot.slane %v1977_v20, 2 }
 0x6f4   :  { %s4354_s16 = spop %4353 }
 0x6f5   :  { %s1310_s17 = smul.f32 0.0011961722, %s4354_s16  ;;  %s4173_s16 = sld [smem:[#allocation9 + $0x5]] }
 0x6f7   :  { %s1311_s18 = sadd.f32 1e-05, %s1310_s17 }
 0x6f9   :  { %v1312_v19 = vstv %s1311_s18 }
 0x6fa   :  { %4440 = vrsqrt.f32 %v1312_v19  ;;  %1856 = vrot.lane.b32.xlu0 %v1849_v32, %s4563_s4  ;;  %v1985_v19 = vrot.slane %v1978_v63, 2  ;;  %v1839_v32 = vmul.f32 %v5185_v18, %v1838_v36  ;;  %v1897_v63 = vrot.slane %v1890_v26, 1 }
 0x6fe   :  { %1920 = vrot.lane.b32.xlu0 %v1917_v31, %s4563_s4 }
 0x702   :  { %1943 = vrot.lane.b32.xlu0 %v1940_v45, %s4564_s7 }
 0x704   :  { %v4441_v53 = vpop.eup %4440 }
 0x705   :  { %4355 = vpush %v4441_v53  ;;  %v1913_v53 = vrot.slane %v1907_v24, 1 }
 0x706   :  { %4357 = vpush %v1536_v54  ;;  %1947 = vrot.lane.b32.xlu0 %v1941_v6, %s4564_s7  ;;  %v1986_v54 = vsel %vm211_vm1, %v1983_v8, %v1985_v19 }
 0x70a   :  { %1989 = vrot.lane.b32.xlu0 %v1986_v54, %s4563_s4 }
 0x70e   :  { %1991 = vrot.lane.b32.xlu0 %v1985_v19, %s4563_s4 }
 0x736   :  { %s4356_s21 = spop %4355 }
 0x737   :  { %v1315_v62 = vstv %s4356_s21  ;;  %s4358_s22 = spop %4357  ;;  %s4240_s21 = sld [smem:[#allocation2 + $0x5c]] }
 0x738   :  { %v1316_v56 = vmul.f32 %v1315_v62, %v5211_v23  ;;  %v1317_v4 = vmul.f32 %v1315_v62, %v5214_v21  ;;  %v1318_v9 = vmul.f32 %v1315_v62, %v5217_v27  ;;  %s1538_s23 = smul.f32 0.0011961722, %s4358_s22  ;;  %v2001_v62 = vmul.f32 %v5185_v18, %v2000_v52  ;;  %s4224_s22 = sld [smem:[#allocation2 + $0x52]] }
 0x73a   :  { %v1321_v1 = vmul.f32 %v1320_v58, %v1316_v56  ;;  %v1322_v11 = vmul.f32 %v1320_v58, %v1317_v4  ;;  %v1323_v10 = vmul.f32 %v1320_v58, %v1318_v9  ;;  %v1539_v13 = vstv %s1538_s23  ;;  %s4227_s23 = sld [smem:[#allocation2 + $0x55]] }
 0x73b   :  { %v5317_v0 = vsub.f32 %v5193_v17, %v1539_v13  ;;  %v5320_v14 = vsub.f32 %v5195_v7, %v1539_v13  ;;  %v5323_v30 = vsub.f32 %v5201_v50, %v1539_v13  ;;  %v2002_v58 = vmul.f32 %v5182_v16, %v2000_v52 }
 0x73c   :  { %v1326_v23 = vadd.f32 %v1325_v3, %v1321_v1  ;;  %v1327_v15 = vadd.f32 %v1325_v3, %v1322_v11  ;;  %v1328_v21 = vadd.f32 %v1325_v3, %v1323_v10  ;;  %v1915_v56 = vsel %vm141_vm0, %v1913_v53, %v1914_v38 }
 0x73d   :  { %v1543_v27 = vmul.f32 %v5317_v0, %v5317_v0  ;;  %v1544_v2 = vmul.f32 %v5320_v14, %v5320_v14  ;;  %v1545_v5 = vmul.f32 %v5323_v30, %v5323_v30  ;;  %v2007_v4 = vrot.slane %v2001_v62, 2 }
 0x73e   :  { %v1329_v17 = vmax.f32 %v1326_v23, 0.0  ;;  %v1330_v59 = vmax.f32 %v1327_v15, 0.0  ;;  %v1331_v22 = vmax.f32 %v1328_v21, 0.0  ;;  %v2008_v9 = vrot.slane %v2002_v58, 2 }
 0x73f   :  { %v1546_v7 = vsel %vm273_vm2, %v1543_v27, 0.0  ;;  %v1547_v50 = vsel %vm273_vm2, %v1544_v2, 0.0  ;;  %v1549_v28 = vsel %vm277_vm3, %v1545_v5, 0.0  ;;  %v2003_v3 = vmul.f32 %v5188_v25, %v2000_v52 }
 0x740   :  { %4159 = vst.msk [vmem:[%s6340_s5 + $0x60] sm:$0xff] %vm273_vm2, %v1329_v17  ;;  %4160 = vst.msk [vmem:[%s6340_s5 + $0x68] sm:$0xff] %vm273_vm2, %v1330_v59  ;;  %v1548_v57 = vadd.f32 %v1547_v50, %v1546_v7  ;;  %v1976_v1 = vmul.f32 %v5185_v18, %v1975_v41  ;;  %v2009_v11 = vsel %vm211_vm1, %v2007_v4, %v2008_v9 }
 0x741   :  { %4161 = vst.msk [vmem:[%s6340_s5 + $0x70] sm:$0x3f] %vm277_vm3, %v1331_v22  ;;  %v2010_v10 = vrot.slane %v2003_v3, 2  ;;  %v1942_v13 = vsel %vm141_vm0, %v1939_v40, %v1941_v6  ;;  %2012 = vrot.lane.b32.xlu0 %v2009_v11, %s4564_s7  ;;  %v1956_v6 = vstv %s4199_s14  ;;  %s4187_s14 = sld [smem:[#allocation7 + $0x6]] }
 0x742   :  { %v1550_v35 = vadd.f32 %v1549_v28, %v1548_v57  ;;  %v1982_v23 = vrot.slane %v1976_v1, 2  ;;  %v1958_v62 = vmul.f32 %v5182_v16, %v1956_v6  ;;  %v1957_v58 = vmul.f32 %v5185_v18, %v1956_v6 }
 0x743   :  { %v2011_v15 = vsel %vm211_vm1, %v2008_v9, %v2010_v10  ;;  %v1959_v9 = vmul.f32 %v5188_v25, %v1956_v6 }
 0x744   :  { %1551 = vadd.xlane.f32.xlu1 %v1550_v35  ;;  %v1984_v21 = vsel %vm211_vm1, %v1982_v23, %v1983_v8 }
 0x745   :  { %2014 = vrot.lane.b32.xlu0 %v2011_v15, %s4564_s7  ;;  %v1966_v15 = vrot.slane %v1959_v9, 2 }
 0x749   :  { %2016 = vrot.lane.b32.xlu0 %v2010_v10, %s4564_s7  ;;  %v1964_v10 = vrot.slane %v1958_v62, 2 }
 0x755   :  { %1854 = vrot.lane.b32.xlu1 %v1848_v29, %s4563_s4  ;;  %v1842_v29 = vstv %s4192_s11 }
 0x756   :  { %v1843_v12 = vadd.f32 %v1842_v29, %v1839_v32  ;;  %v1844_v42 = vadd.f32 %v1842_v29, %v1840_v33 }
 0x759   :  { %1858 = vrot.lane.b32.xlu1 %v1850_v55, %s4563_s4  ;;  %v1841_v55 = vmul.f32 %v5188_v25, %v1838_v36 }
 0x75b   :  { %v1845_v37 = vadd.f32 %v1842_v29, %v1841_v55 }
 0x75d   :  { %1874 = vrot.lane.b32.xlu1 %v1868_v47, %s4564_s7  ;;  %v1888_v47 = vmul.f32 %v5185_v18, %v1887_v43 }
 0x761   :  { %1876 = vrot.lane.b32.xlu1 %v1869_v46, %s4564_s7  ;;  %v1894_v46 = vrot.slane %v1888_v47, 1 }
 0x765   :  { %1878 = vrot.lane.b32.xlu1 %v1870_v51, %s4564_s7 }
 0x769   :  { %1918 = vrot.lane.b32.xlu1 %v1915_v56, %s4563_s4 }
 0x76d   :  { %1922 = vrot.lane.b32.xlu1 %v1916_v39, %s4563_s4  ;;  %v1889_v39 = vmul.f32 %v5182_v16, %v1887_v43 }
 0x76f   :  { %v1895_v20 = vrot.slane %v1889_v39, 1 }
 0x771   :  { %1945 = vrot.lane.b32.xlu1 %v1942_v13, %s4564_s7  ;;  %v5390_v7 = vpop.xlane.xlu0 %1779  ;;  %v1896_v19 = vsel %vm141_vm0, %v1894_v46, %v1895_v20  ;;  %v1898_v54 = vsel %vm141_vm0, %v1895_v20, %v1897_v63  ;;  %v1963_v13 = vrot.slane %v1957_v58, 2 }
 0x772   :  { %v1781_v47 = vrot.slane %v5390_v7, 4 }
 0x775   :  { %1987 = vrot.lane.b32.xlu1 %v1984_v21, %s4563_s4  ;;  %v1857_v35 = vpop.permute.xlu0 %1856 }
 0x776   :  { %v1864_v49 = vadd.f32 %v1857_v35, %v1844_v42 }
 0x779   :  { %v1921_v61 = vpop.permute.xlu0 %1920 }
 0x77d   :  { %v1944_v41 = vpop.permute.xlu0 %1943 }
 0x781   :  { %v1948_v8 = vpop.permute.xlu0 %1947 }
 0x785   :  { %v1990_v4 = vpop.permute.xlu0 %1989 }
 0x789   :  { %v1992_v21 = vpop.permute.xlu0 %1991 }
 0x7d1   :  { %v1552_v27 = vpop.xlane.xlu1 %1551 }
 0x7d2   :  { %v1553_v2 = vrot.slane %v1552_v27, 4 }
 0x7d4   :  { %v1554_v5 = vadd.f32 %v1553_v2, %v1552_v27 }
 0x7d5   :  { %v1855_v50 = vpop.permute.xlu1 %1854 }
 0x7d6   :  { %v1555_v17 = vrot.slane %v1554_v5, 2  ;;  %v1863_v38 = vadd.f32 %v1855_v50, %v1843_v12 }
 0x7d8   :  { %v1556_v59 = vadd.f32 %v1555_v17, %v1554_v5  ;;  %v1965_v17 = vsel %vm211_vm1, %v1963_v13, %v1964_v10 }
 0x7d9   :  { %v1859_v28 = vpop.permute.xlu1 %1858 }
 0x7da   :  { %v1557_v22 = vrot.slane %v1556_v59, 1  ;;  %v1865_v31 = vadd.f32 %v1859_v28, %v1845_v37 }
 0x7dc   :  { %v1558_v57 = vadd.f32 %v1557_v22, %v1556_v59  ;;  %v1967_v22 = vsel %vm211_vm1, %v1964_v10, %v1966_v15 }
 0x7dd   :  { %v1875_v34 = vpop.permute.xlu1 %1874 }
 0x7de   :  { %4359 = vpush %v1558_v57  ;;  %v1883_v45 = vadd.f32 %v1875_v34, %v1863_v38  ;;  %v2013_v57 = vpop.permute.xlu0 %2012 }
 0x7e0   :  { %v1902_v53 = vadd.f32 %v1896_v19, %v1883_v45 }
 0x7e1   :  { %v1877_v40 = vpop.permute.xlu1 %1876 }
 0x7e2   :  { %v1884_v52 = vadd.f32 %v1877_v40, %v1864_v49  ;;  %v2015_v55 = vpop.permute.xlu0 %2014 }
 0x7e4   :  { %v1903_v3 = vadd.f32 %v1898_v54, %v1884_v52 }
 0x7e5   :  { %v1879_v24 = vpop.permute.xlu1 %1878 }
 0x7e6   :  { %v1885_v51 = vadd.f32 %v1879_v24, %v1865_v31  ;;  %v1928_v5 = vadd.f32 %v1921_v61, %v1903_v3  ;;  %v2017_v61 = vpop.permute.xlu0 %2016  ;;  %v1782_v31 = vadd.f32 %v1781_v47, %v5390_v7 }
 0x7e8   :  { %v1904_v11 = vadd.f32 %v1897_v63, %v1885_v51  ;;  %v1783_v49 = vrot.slane %v1782_v31, 2  ;;  %v1575_v51 = vstv %s4173_s16  ;;  %s4258_s16 = sld [smem:[#allocation2 + $0x68]] }
 0x7e9   :  { %v1919_v56 = vpop.permute.xlu1 %1918 }
 0x7ea   :  { %v1927_v1 = vadd.f32 %v1919_v56, %v1902_v53  ;;  %v1784_v20 = vadd.f32 %v1783_v49, %v1782_v31 }
 0x7ec   :  { %v1952_v27 = vadd.f32 %v1944_v41, %v1927_v1  ;;  %v1785_v63 = vrot.slane %v1784_v20, 1 }
 0x7ed   :  { %v1923_v23 = vpop.permute.xlu1 %1922 }
 0x7ee   :  { %v1929_v2 = vadd.f32 %v1923_v23, %v1904_v11  ;;  %v1971_v36 = vadd.f32 %v1965_v17, %v1952_v27  ;;  %v1786_v6 = vadd.f32 %v1785_v63, %v1784_v20  ;;  %v2097_v27 = vstv %s4209_s26  ;;  %s4230_s26 = sld [smem:[#allocation2 + $0x58]] }
 0x7ef   :  { %v2100_v17 = vmul.f32 %v5188_v25, %v2097_v27  ;;  %v2250_v20 = vstv %s4216_s30  ;;  %s4229_s30 = sld [smem:[#allocation2 + $0x57]] }
 0x7f0   :  { %v1954_v59 = vadd.f32 %v1948_v8, %v1929_v2  ;;  %v1570_v8 = vstv %s4172_s15  ;;  %v2098_v2 = vmul.f32 %v5185_v18, %v2097_v27 }
 0x7f1   :  { %v1946_v50 = vpop.permute.xlu1 %1945 }
 0x7f2   :  { %v1973_v28 = vadd.f32 %v1966_v15, %v1954_v59  ;;  %v1953_v35 = vadd.f32 %v1946_v50, %v1928_v5  ;;  %v2099_v5 = vmul.f32 %v5182_v16, %v2097_v27  ;;  %v2156_v59 = vstv %s4212_s27  ;;  %v5457_v50 = vld [vmem:[#allocation10 + $0x8] sm:$0xff]  ;;  %s4231_s27 = sld [smem:[#allocation2 + $0x59]] }
 0x7f3   :  { %v2088_v27 = vstv %s4208_s8 }
 0x7f4   :  { %v1972_v29 = vadd.f32 %v1967_v22, %v1953_v35  ;;  %v1998_v33 = vadd.f32 %v1992_v21, %v1973_v28  ;;  %v2181_v22 = vstv %s4213_s2  ;;  %v2159_v28 = vmul.f32 %v5188_v25, %v2156_v59  ;;  %v5461_v35 = vld [vmem:[#allocation10] sm:$0xff]  ;;  %v5469_v25 = vld [vmem:[#allocation10 + $0x10] sm:$0xff]  ;;  %s4222_s2 = sld [smem:[#allocation6 + $0x9]] }
 0x7f5   :  { %v1988_v32 = vpop.permute.xlu1 %1987  ;;  %v2182_v18 = vmul.f32 %v5461_v35, %v2181_v22  ;;  %v2183_v16 = vmul.f32 %v5457_v50, %v2181_v22  ;;  %v2157_v31 = vmul.f32 %v5461_v35, %v2156_v59 }
 0x7f6   :  { %v1996_v34 = vadd.f32 %v1988_v32, %v1971_v36  ;;  %v1997_v12 = vadd.f32 %v1990_v4, %v1972_v29  ;;  %v5413_v39 = vadd.f32 %v2017_v61, %v1998_v33  ;;  %v2117_v36 = vstv %s4210_s28  ;;  %s4223_s28 = sld [smem:[#allocation2 + $0x51]] }
 0x7f7   :  { %v2166_v32 = vrot.slane %v2159_v28, 1  ;;  %v2189_v33 = vrot.slane %v2183_v16, 1  ;;  %v2120_v63 = vmul.f32 %v5469_v25, %v2117_v36  ;;  %v2137_v16 = vstv %s4211_s9 }
 0x7f8   :  { %v5405_v37 = vadd.f32 %v2013_v57, %v1996_v34  ;;  %v5407_v42 = vadd.f32 %v2015_v55, %v1997_v12  ;;  %v2027_v40 = vsel %vm277_vm3, %v5413_v39, 0.0  ;;  %v2158_v57 = vmul.f32 %v5457_v50, %v2156_v59 }
 0x7f9   :  { %v2188_v55 = vrot.slane %v2182_v18, 1  ;;  %v2225_v34 = vstv %s4215_s29  ;;  %v2118_v12 = vmul.f32 %v5461_v35, %v2117_v36  ;;  %v2090_v59 = vmul.f32 %v5457_v50, %v2088_v27  ;;  %s4226_s29 = sld [smem:[#allocation2 + $0x54]] }
 0x7fa   :  { %v2024_v43 = vsel %vm273_vm2, %v5405_v37, 0.0  ;;  %v2025_v38 = vsel %vm273_vm2, %v5407_v42, 0.0  ;;  %v2164_v29 = vrot.slane %v2158_v57, 1 }
 0x7fb   :  { %v2026_v26 = vadd.f32 %v2025_v38, %v2024_v43  ;;  %v2184_v43 = vmul.f32 %v5469_v25, %v2181_v22  ;;  %v2190_v38 = vsel %vm141_vm0, %v2188_v55, %v2189_v33  ;;  %v2140_v55 = vmul.f32 %v5469_v25, %v2137_v16 }
 0x7fc   :  { %v2167_v61 = vsel %vm141_vm0, %v2164_v29, %v2166_v32 }
 0x7fd   :  { %v2028_v41 = vadd.f32 %v2027_v40, %v2026_v26  ;;  %v2227_v26 = vmul.f32 %v5457_v50, %v2225_v34  ;;  %v2228_v40 = vmul.f32 %v5469_v25, %v2225_v34  ;;  %v2191_v47 = vrot.slane %v2184_v43, 1 }
 0x7ff   :  { %2029 = vadd.xlane.f32.xlu0 %v2028_v41  ;;  %v2119_v41 = vmul.f32 %v5457_v50, %v2117_v36  ;;  %v2233_v49 = vrot.slane %v2227_v26, 2 }
 0x80f   :  { %s4360_s0 = spop %4359 }
 0x810   :  { %s1560_s1 = smul.f32 0.0011961722, %s4360_s0  ;;  %s4188_s0 = sld [smem:[#allocation9 + $0x6]] }
 0x812   :  { %s1561_s3 = sadd.f32 1e-05, %s1560_s1 }
 0x814   :  { %v1562_v45 = vstv %s1561_s3 }
 0x815   :  { %4442 = vrsqrt.f32 %v1562_v45  ;;  %2106 = vrot.lane.b32.xlu0 %v2099_v5, %s4563_s4  ;;  %v2235_v45 = vrot.slane %v2228_v40, 2  ;;  %v2089_v5 = vmul.f32 %v5461_v35, %v2088_v27  ;;  %v2147_v40 = vrot.slane %v2140_v55, 1 }
 0x819   :  { %2170 = vrot.lane.b32.xlu0 %v2167_v61, %s4563_s4 }
 0x81d   :  { %2193 = vrot.lane.b32.xlu0 %v2190_v38, %s4564_s7 }
 0x81f   :  { %v4443_v46 = vpop.eup %4442 }
 0x820   :  { %4361 = vpush %v4443_v46  ;;  %v2163_v46 = vrot.slane %v2157_v31, 1 }
 0x821   :  { %4363 = vpush %v1786_v6  ;;  %2197 = vrot.lane.b32.xlu0 %v2191_v47, %s4564_s7  ;;  %v2236_v6 = vsel %vm211_vm1, %v2233_v49, %v2235_v45 }
 0x825   :  { %2239 = vrot.lane.b32.xlu0 %v2236_v6, %s4563_s4 }
 0x829   :  { %2241 = vrot.lane.b32.xlu0 %v2235_v45, %s4563_s4 }
 0x851   :  { %s4362_s17 = spop %4361 }
 0x852   :  { %v1565_v24 = vstv %s4362_s17  ;;  %s4364_s18 = spop %4363  ;;  %s4255_s17 = sld [smem:[#allocation2 + $0x65]] }
 0x853   :  { %v1566_v7 = vmul.f32 %v1565_v24, %v5317_v0  ;;  %v1567_v19 = vmul.f32 %v1565_v24, %v5320_v14  ;;  %v1568_v52 = vmul.f32 %v1565_v24, %v5323_v30  ;;  %s1788_s19 = smul.f32 0.0011961722, %s4364_s18  ;;  %v2251_v24 = vmul.f32 %v5461_v35, %v2250_v20  ;;  %s4239_s18 = sld [smem:[#allocation2 + $0x5b]] }
 0x855   :  { %v1571_v53 = vmul.f32 %v1570_v8, %v1566_v7  ;;  %v1572_v54 = vmul.f32 %v1570_v8, %v1567_v19  ;;  %v1573_v62 = vmul.f32 %v1570_v8, %v1568_v52  ;;  %v1789_v58 = vstv %s1788_s19  ;;  %s4242_s19 = sld [smem:[#allocation2 + $0x5e]] }
 0x856   :  { %v5423_v56 = vsub.f32 %v5299_v44, %v1789_v58  ;;  %v5426_v4 = vsub.f32 %v5301_v48, %v1789_v58  ;;  %v5429_v9 = vsub.f32 %v5307_v60, %v1789_v58  ;;  %v2252_v8 = vmul.f32 %v5457_v50, %v2250_v20 }
 0x857   :  { %v1576_v0 = vadd.f32 %v1575_v51, %v1571_v53  ;;  %v1577_v3 = vadd.f32 %v1575_v51, %v1572_v54  ;;  %v1578_v14 = vadd.f32 %v1575_v51, %v1573_v62  ;;  %v2165_v7 = vsel %vm141_vm0, %v2163_v46, %v2164_v29 }
 0x858   :  { %v1793_v30 = vmul.f32 %v5423_v56, %v5423_v56  ;;  %v1794_v1 = vmul.f32 %v5426_v4, %v5426_v4  ;;  %v1795_v11 = vmul.f32 %v5429_v9, %v5429_v9  ;;  %v2257_v19 = vrot.slane %v2251_v24, 2 }
 0x859   :  { %v1579_v44 = vmax.f32 %v1576_v0, 0.0  ;;  %v1580_v10 = vmax.f32 %v1577_v3, 0.0  ;;  %v1581_v13 = vmax.f32 %v1578_v14, 0.0  ;;  %v2258_v52 = vrot.slane %v2252_v8, 2 }
 0x85a   :  { %v1796_v48 = vsel %vm273_vm2, %v1793_v30, 0.0  ;;  %v1797_v60 = vsel %vm273_vm2, %v1794_v1, 0.0  ;;  %v1799_v15 = vsel %vm277_vm3, %v1795_v11, 0.0  ;;  %v2253_v51 = vmul.f32 %v5469_v25, %v2250_v20 }
 0x85b   :  { %4174 = vst.msk [vmem:[%s6340_s5 + $0x78] sm:$0xff] %vm273_vm2, %v1579_v44  ;;  %4175 = vst.msk [vmem:[%s6340_s5 + $0x80] sm:$0xff] %vm273_vm2, %v1580_v10  ;;  %v1798_v23 = vadd.f32 %v1797_v60, %v1796_v48  ;;  %v2226_v53 = vmul.f32 %v5461_v35, %v2225_v34  ;;  %v2259_v54 = vsel %vm211_vm1, %v2257_v19, %v2258_v52 }
 0x85c   :  { %4176 = vst.msk [vmem:[%s6340_s5 + $0x88] sm:$0x3f] %vm277_vm3, %v1581_v13  ;;  %v2260_v62 = vrot.slane %v2253_v51, 2  ;;  %v2192_v58 = vsel %vm141_vm0, %v2189_v33, %v2191_v47  ;;  %2262 = vrot.lane.b32.xlu0 %v2259_v54, %s4564_s7  ;;  %v2206_v47 = vstv %s4214_s10  ;;  %s4202_s10 = sld [smem:[#allocation7 + $0x7]] }
 0x85d   :  { %v1800_v21 = vadd.f32 %v1799_v15, %v1798_v23  ;;  %v2232_v0 = vrot.slane %v2226_v53, 2  ;;  %v2208_v24 = vmul.f32 %v5457_v50, %v2206_v47  ;;  %v2207_v8 = vmul.f32 %v5461_v35, %v2206_v47 }
 0x85e   :  { %v2261_v3 = vsel %vm211_vm1, %v2258_v52, %v2260_v62  ;;  %v2209_v52 = vmul.f32 %v5469_v25, %v2206_v47 }
 0x85f   :  { %1801 = vadd.xlane.f32.xlu1 %v1800_v21  ;;  %v2234_v14 = vsel %vm211_vm1, %v2232_v0, %v2233_v49 }
 0x860   :  { %2264 = vrot.lane.b32.xlu0 %v2261_v3, %s4564_s7  ;;  %v2216_v3 = vrot.slane %v2209_v52, 2 }
 0x864   :  { %2266 = vrot.lane.b32.xlu0 %v2260_v62, %s4564_s7  ;;  %v2214_v62 = vrot.slane %v2208_v24, 2 }
 0x870   :  { %2104 = vrot.lane.b32.xlu1 %v2098_v2, %s4563_s4  ;;  %v2092_v2 = vstv %s4207_s6 }
 0x871   :  { %v2093_v28 = vadd.f32 %v2092_v2, %v2089_v5  ;;  %v2094_v36 = vadd.f32 %v2092_v2, %v2090_v59 }
 0x874   :  { %2108 = vrot.lane.b32.xlu1 %v2100_v17, %s4563_s4  ;;  %v2091_v17 = vmul.f32 %v5469_v25, %v2088_v27 }
 0x876   :  { %v2095_v18 = vadd.f32 %v2092_v2, %v2091_v17 }
 0x878   :  { %2124 = vrot.lane.b32.xlu1 %v2118_v12, %s4564_s7  ;;  %v2138_v12 = vmul.f32 %v5461_v35, %v2137_v16 }
 0x87c   :  { %2126 = vrot.lane.b32.xlu1 %v2119_v41, %s4564_s7  ;;  %v2144_v41 = vrot.slane %v2138_v12, 1 }
 0x880   :  { %2128 = vrot.lane.b32.xlu1 %v2120_v63, %s4564_s7 }
 0x884   :  { %2168 = vrot.lane.b32.xlu1 %v2165_v7, %s4563_s4 }
 0x888   :  { %2172 = vrot.lane.b32.xlu1 %v2166_v32, %s4563_s4  ;;  %v2139_v32 = vmul.f32 %v5457_v50, %v2137_v16 }
 0x88a   :  { %v2145_v26 = vrot.slane %v2139_v32, 1 }
 0x88c   :  { %2195 = vrot.lane.b32.xlu1 %v2192_v58, %s4564_s7  ;;  %v5502_v48 = vpop.xlane.xlu0 %2029  ;;  %v2146_v45 = vsel %vm141_vm0, %v2144_v41, %v2145_v26  ;;  %v2148_v6 = vsel %vm141_vm0, %v2145_v26, %v2147_v40  ;;  %v2213_v58 = vrot.slane %v2207_v8, 2 }
 0x88d   :  { %v2031_v12 = vrot.slane %v5502_v48, 4 }
 0x890   :  { %2237 = vrot.lane.b32.xlu1 %v2234_v14, %s4563_s4  ;;  %v2107_v21 = vpop.permute.xlu0 %2106 }
 0x891   :  { %v2114_v43 = vadd.f32 %v2107_v21, %v2094_v36 }
 0x894   :  { %v2171_v57 = vpop.permute.xlu0 %2170 }
 0x898   :  { %v2194_v34 = vpop.permute.xlu0 %2193 }
 0x89c   :  { %v2198_v49 = vpop.permute.xlu0 %2197 }
 0x8a0   :  { %v2240_v19 = vpop.permute.xlu0 %2239 }
 0x8a4   :  { %v2242_v14 = vpop.permute.xlu0 %2241 }
 0x8ec   :  { %v1802_v30 = vpop.xlane.xlu1 %1801 }
 0x8ed   :  { %v1803_v1 = vrot.slane %v1802_v30, 4 }
 0x8ef   :  { %v1804_v11 = vadd.f32 %v1803_v1, %v1802_v30 }
 0x8f0   :  { %v2105_v60 = vpop.permute.xlu1 %2104 }
 0x8f1   :  { %v1805_v44 = vrot.slane %v1804_v11, 2  ;;  %v2113_v29 = vadd.f32 %v2105_v60, %v2093_v28 }
 0x8f3   :  { %v1806_v10 = vadd.f32 %v1805_v44, %v1804_v11  ;;  %v2215_v44 = vsel %vm211_vm1, %v2213_v58, %v2214_v62 }
 0x8f4   :  { %v2109_v15 = vpop.permute.xlu1 %2108 }
 0x8f5   :  { %v1807_v13 = vrot.slane %v1806_v10, 1  ;;  %v2115_v61 = vadd.f32 %v2109_v15, %v2095_v18 }
 0x8f7   :  { %v1808_v23 = vadd.f32 %v1807_v13, %v1806_v10  ;;  %v2217_v13 = vsel %vm211_vm1, %v2214_v62, %v2216_v3 }
 0x8f8   :  { %v2125_v22 = vpop.permute.xlu1 %2124 }
 0x8f9   :  { %4365 = vpush %v1808_v23  ;;  %v2133_v38 = vadd.f32 %v2125_v22, %v2113_v29  ;;  %v2263_v23 = vpop.permute.xlu0 %2262 }
 0x8fb   :  { %v2152_v46 = vadd.f32 %v2146_v45, %v2133_v38 }
 0x8fc   :  { %v2127_v33 = vpop.permute.xlu1 %2126 }
 0x8fd   :  { %v2134_v20 = vadd.f32 %v2127_v33, %v2114_v43  ;;  %v2265_v17 = vpop.permute.xlu0 %2264 }
 0x8ff   :  { %v2153_v51 = vadd.f32 %v2148_v6, %v2134_v20 }
 0x900   :  { %v2129_v31 = vpop.permute.xlu1 %2128 }
 0x901   :  { %v2135_v63 = vadd.f32 %v2129_v31, %v2115_v61  ;;  %v2178_v11 = vadd.f32 %v2171_v57, %v2153_v51  ;;  %v2267_v57 = vpop.permute.xlu0 %2266  ;;  %v2032_v61 = vadd.f32 %v2031_v12, %v5502_v48 }
 0x903   :  { %v2154_v54 = vadd.f32 %v2147_v40, %v2135_v63  ;;  %v2033_v43 = vrot.slane %v2032_v61, 2  ;;  %v1825_v63 = vstv %s4188_s0  ;;  %s4273_s0 = sld [smem:[#allocation2 + $0x71]] }
 0x904   :  { %v2169_v7 = vpop.permute.xlu1 %2168 }
 0x905   :  { %v2177_v53 = vadd.f32 %v2169_v7, %v2152_v46  ;;  %v2034_v26 = vadd.f32 %v2033_v43, %v2032_v61 }
 0x907   :  { %v2202_v30 = vadd.f32 %v2194_v34, %v2177_v53  ;;  %v2035_v40 = vrot.slane %v2034_v26, 1 }
 0x908   :  { %v2173_v0 = vpop.permute.xlu1 %2172 }
 0x909   :  { %v2179_v1 = vadd.f32 %v2173_v0, %v2154_v54  ;;  %v2221_v27 = vadd.f32 %v2215_v44, %v2202_v30  ;;  %v2036_v47 = vadd.f32 %v2035_v40, %v2034_v26  ;;  %v2347_v30 = vstv %s4224_s22  ;;  %s4245_s22 = sld [smem:[#allocation2 + $0x61]] }
 0x90a   :  { %v2350_v44 = vmul.f32 %v5469_v25, %v2347_v30  ;;  %v2500_v26 = vstv %s4231_s27  ;;  %s4244_s27 = sld [smem:[#allocation2 + $0x60]] }
 0x90b   :  { %v2204_v10 = vadd.f32 %v2198_v49, %v2179_v1  ;;  %v1820_v49 = vstv %s4187_s14  ;;  %v2348_v1 = vmul.f32 %v5461_v35, %v2347_v30 }
 0x90c   :  { %v2196_v60 = vpop.permute.xlu1 %2195 }
 0x90d   :  { %v2223_v15 = vadd.f32 %v2216_v3, %v2204_v10  ;;  %v2203_v21 = vadd.f32 %v2196_v60, %v2178_v11  ;;  %v2349_v11 = vmul.f32 %v5457_v50, %v2347_v30  ;;  %v2406_v10 = vstv %s4227_s23  ;;  %s4246_s23 = sld [smem:[#allocation2 + $0x62]] }
 0x90e   :  { %v2408_v60 = vmul.f32 %v5457_v50, %v2406_v10  ;;  %v2407_v61 = vmul.f32 %v5461_v35, %v2406_v10  ;;  %v2338_v30 = vstv %s4223_s28 }
 0x90f   :  { %v2222_v2 = vadd.f32 %v2217_v13, %v2203_v21  ;;  %v2248_v59 = vadd.f32 %v2242_v14, %v2223_v15  ;;  %v2431_v13 = vstv %s4228_s24  ;;  %v2367_v21 = vstv %s4225_s25  ;;  %s4237_s24 = sld [smem:[#allocation6 + $0xa]] }
 0x910   :  { %v2238_v5 = vpop.permute.xlu1 %2237  ;;  %v2432_v15 = vmul.f32 %v5461_v35, %v2431_v13  ;;  %v2370_v40 = vmul.f32 %v5469_v25, %v2367_v21  ;;  %s4238_s25 = sld [smem:[#allocation2 + $0x5a]] }
 0x911   :  { %v2246_v22 = vadd.f32 %v2238_v5, %v2221_v27  ;;  %v2247_v28 = vadd.f32 %v2240_v19, %v2222_v2  ;;  %v5525_v32 = vadd.f32 %v2267_v57, %v2248_v59  ;;  %v2433_v27 = vmul.f32 %v5457_v50, %v2431_v13 }
 0x912   :  { %v2414_v2 = vrot.slane %v2408_v60, 1 }
 0x913   :  { %v5517_v18 = vadd.f32 %v2263_v23, %v2246_v22  ;;  %v5519_v36 = vadd.f32 %v2265_v17, %v2247_v28  ;;  %v2277_v33 = vsel %vm277_vm3, %v5525_v32, 0.0  ;;  %v2409_v23 = vmul.f32 %v5469_v25, %v2406_v10 }
 0x914   :  { %v2438_v17 = vrot.slane %v2432_v15, 1  ;;  %v2439_v59 = vrot.slane %v2433_v27, 1  ;;  %v2475_v22 = vstv %s4230_s26  ;;  %v2368_v28 = vmul.f32 %v5461_v35, %v2367_v21  ;;  %s4241_s26 = sld [smem:[#allocation2 + $0x5d]] }
 0x915   :  { %v2274_v16 = vsel %vm273_vm2, %v5517_v18, 0.0  ;;  %v2275_v29 = vsel %vm273_vm2, %v5519_v36, 0.0  ;;  %v2416_v5 = vrot.slane %v2409_v23, 1  ;;  %v2340_v10 = vmul.f32 %v5457_v50, %v2338_v30 }
 0x916   :  { %v2276_v55 = vadd.f32 %v2275_v29, %v2274_v16  ;;  %v2434_v16 = vmul.f32 %v5469_v25, %v2431_v13  ;;  %v2440_v29 = vsel %vm141_vm0, %v2438_v17, %v2439_v59  ;;  %v2387_v27 = vstv %s4226_s29 }
 0x917   :  { %v2417_v57 = vsel %vm141_vm0, %v2414_v2, %v2416_v5  ;;  %v2390_v17 = vmul.f32 %v5469_v25, %v2387_v27 }
 0x918   :  { %v2278_v34 = vadd.f32 %v2277_v33, %v2276_v55  ;;  %v2477_v55 = vmul.f32 %v5457_v50, %v2475_v22  ;;  %v2478_v33 = vmul.f32 %v5469_v25, %v2475_v22  ;;  %v2441_v12 = vrot.slane %v2434_v16, 1 }
 0x91a   :  { %2279 = vadd.xlane.f32.xlu0 %v2278_v34  ;;  %v2369_v34 = vmul.f32 %v5457_v50, %v2367_v21  ;;  %v2483_v43 = vrot.slane %v2477_v55, 2 }
 0x92a   :  { %s4366_s11 = spop %4365 }
 0x92b   :  { %s1810_s12 = smul.f32 0.0011961722, %s4366_s11  ;;  %s4203_s11 = sld [smem:[#allocation9 + $0x7]] }
 0x92d   :  { %s1811_s13 = sadd.f32 1e-05, %s1810_s12 }
 0x92f   :  { %v1812_v38 = vstv %s1811_s13 }
 0x930   :  { %4444 = vrsqrt.f32 %v1812_v38  ;;  %2356 = vrot.lane.b32.xlu0 %v2349_v11, %s4563_s4  ;;  %v2485_v38 = vrot.slane %v2478_v33, 2  ;;  %v2339_v11 = vmul.f32 %v5461_v35, %v2338_v30  ;;  %v2397_v33 = vrot.slane %v2390_v17, 1 }
 0x934   :  { %2420 = vrot.lane.b32.xlu0 %v2417_v57, %s4563_s4 }
 0x938   :  { %2443 = vrot.lane.b32.xlu0 %v2440_v29, %s4564_s7 }
 0x93a   :  { %v4445_v41 = vpop.eup %4444 }
 0x93b   :  { %4367 = vpush %v4445_v41  ;;  %v2413_v41 = vrot.slane %v2407_v61, 1 }
 0x93c   :  { %4369 = vpush %v2036_v47  ;;  %2447 = vrot.lane.b32.xlu0 %v2441_v12, %s4564_s7  ;;  %v2486_v47 = vsel %vm211_vm1, %v2483_v43, %v2485_v38 }
 0x940   :  { %2489 = vrot.lane.b32.xlu0 %v2486_v47, %s4563_s4 }
 0x944   :  { %2491 = vrot.lane.b32.xlu0 %v2485_v38, %s4563_s4 }
 0x96c   :  { %s4368_s1 = spop %4367 }
 0x96d   :  { %v1815_v31 = vstv %s4368_s1  ;;  %s4370_s3 = spop %4369  ;;  %s4270_s1 = sld [smem:[#allocation2 + $0x6e]] }
 0x96e   :  { %v1816_v48 = vmul.f32 %v1815_v31, %v5423_v56  ;;  %v1817_v45 = vmul.f32 %v1815_v31, %v5426_v4  ;;  %v1818_v20 = vmul.f32 %v1815_v31, %v5429_v9  ;;  %s2038_s15 = smul.f32 0.0011961722, %s4370_s3  ;;  %v2501_v31 = vmul.f32 %v5461_v35, %v2500_v26  ;;  %s4254_s3 = sld [smem:[#allocation2 + $0x64]] }
 0x970   :  { %v1821_v46 = vmul.f32 %v1820_v49, %v1816_v48  ;;  %v1822_v6 = vmul.f32 %v1820_v49, %v1817_v45  ;;  %v1823_v24 = vmul.f32 %v1820_v49, %v1818_v20  ;;  %v2039_v8 = vstv %s2038_s15  ;;  %s4257_s15 = sld [smem:[#allocation2 + $0x67]] }
 0x971   :  { %v5535_v7 = vsub.f32 %v5405_v37, %v2039_v8  ;;  %v5538_v19 = vsub.f32 %v5407_v42, %v2039_v8  ;;  %v5541_v52 = vsub.f32 %v5413_v39, %v2039_v8  ;;  %v2502_v49 = vmul.f32 %v5457_v50, %v2500_v26 }
 0x972   :  { %v1826_v56 = vadd.f32 %v1825_v63, %v1821_v46  ;;  %v1827_v51 = vadd.f32 %v1825_v63, %v1822_v6  ;;  %v1828_v4 = vadd.f32 %v1825_v63, %v1823_v24  ;;  %v2415_v48 = vsel %vm141_vm0, %v2413_v41, %v2414_v2 }
 0x973   :  { %v2043_v9 = vmul.f32 %v5535_v7, %v5535_v7  ;;  %v2044_v53 = vmul.f32 %v5538_v19, %v5538_v19  ;;  %v2045_v54 = vmul.f32 %v5541_v52, %v5541_v52  ;;  %v2507_v45 = vrot.slane %v2501_v31, 2 }
 0x974   :  { %v1829_v37 = vmax.f32 %v1826_v56, 0.0  ;;  %v1830_v62 = vmax.f32 %v1827_v51, 0.0  ;;  %v1831_v58 = vmax.f32 %v1828_v4, 0.0  ;;  %v2508_v20 = vrot.slane %v2502_v49, 2 }
 0x975   :  { %v2046_v42 = vsel %vm273_vm2, %v2043_v9, 0.0  ;;  %v2047_v39 = vsel %vm273_vm2, %v2044_v53, 0.0  ;;  %v2049_v3 = vsel %vm277_vm3, %v2045_v54, 0.0  ;;  %v2503_v63 = vmul.f32 %v5469_v25, %v2500_v26 }
 0x976   :  { %4189 = vst.msk [vmem:[%s6340_s5 + $0x90] sm:$0xff] %vm273_vm2, %v1829_v37  ;;  %4190 = vst.msk [vmem:[%s6340_s5 + $0x98] sm:$0xff] %vm273_vm2, %v1830_v62  ;;  %v2048_v0 = vadd.f32 %v2047_v39, %v2046_v42  ;;  %v2476_v46 = vmul.f32 %v5461_v35, %v2475_v22  ;;  %v2509_v6 = vsel %vm211_vm1, %v2507_v45, %v2508_v20 }
 0x977   :  { %4191 = vst.msk [vmem:[%s6340_s5 + $0xa0] sm:$0x3f] %vm277_vm3, %v1831_v58  ;;  %v2510_v24 = vrot.slane %v2503_v63, 2  ;;  %v2442_v8 = vsel %vm141_vm0, %v2439_v59, %v2441_v12  ;;  %2512 = vrot.lane.b32.xlu0 %v2509_v6, %s4564_s7  ;;  %v2456_v12 = vstv %s4229_s30  ;;  %s4217_s30 = sld [smem:[#allocation7 + $0x8]] }
 0x978   :  { %v2050_v14 = vadd.f32 %v2049_v3, %v2048_v0  ;;  %v2482_v56 = vrot.slane %v2476_v46, 2  ;;  %v2458_v31 = vmul.f32 %v5457_v50, %v2456_v12  ;;  %v2457_v49 = vmul.f32 %v5461_v35, %v2456_v12 }
 0x979   :  { %v2511_v51 = vsel %vm211_vm1, %v2508_v20, %v2510_v24  ;;  %v2459_v20 = vmul.f32 %v5469_v25, %v2456_v12 }
 0x97a   :  { %2051 = vadd.xlane.f32.xlu1 %v2050_v14  ;;  %v2484_v4 = vsel %vm211_vm1, %v2482_v56, %v2483_v43 }
 0x97b   :  { %2514 = vrot.lane.b32.xlu0 %v2511_v51, %s4564_s7  ;;  %v2466_v51 = vrot.slane %v2459_v20, 2 }
 0x97f   :  { %2516 = vrot.lane.b32.xlu0 %v2510_v24, %s4564_s7  ;;  %v2464_v24 = vrot.slane %v2458_v31, 2 }
 0x98b   :  { %2354 = vrot.lane.b32.xlu1 %v2348_v1, %s4563_s4  ;;  %v2342_v1 = vstv %s4222_s2 }
 0x98c   :  { %v2343_v23 = vadd.f32 %v2342_v1, %v2339_v11  ;;  %v2344_v21 = vadd.f32 %v2342_v1, %v2340_v10 }
 0x98f   :  { %2358 = vrot.lane.b32.xlu1 %v2350_v44, %s4563_s4  ;;  %v2341_v44 = vmul.f32 %v5469_v25, %v2338_v30 }
 0x991   :  { %v2345_v15 = vadd.f32 %v2342_v1, %v2341_v44 }
 0x993   :  { %2374 = vrot.lane.b32.xlu1 %v2368_v28, %s4564_s7  ;;  %v2388_v28 = vmul.f32 %v5461_v35, %v2387_v27 }
 0x997   :  { %2376 = vrot.lane.b32.xlu1 %v2369_v34, %s4564_s7  ;;  %v2394_v34 = vrot.slane %v2388_v28, 1 }
 0x99b   :  { %2378 = vrot.lane.b32.xlu1 %v2370_v40, %s4564_s7 }
 0x99f   :  { %2418 = vrot.lane.b32.xlu1 %v2415_v48, %s4563_s4 }
 0x9a3   :  { %2422 = vrot.lane.b32.xlu1 %v2416_v5, %s4563_s4  ;;  %v2389_v5 = vmul.f32 %v5457_v50, %v2387_v27 }
 0x9a5   :  { %v2395_v55 = vrot.slane %v2389_v5, 1 }
 0x9a7   :  { %2445 = vrot.lane.b32.xlu1 %v2442_v8, %s4564_s7  ;;  %v5608_v42 = vpop.xlane.xlu0 %2279  ;;  %v2396_v38 = vsel %vm141_vm0, %v2394_v34, %v2395_v55  ;;  %v2398_v47 = vsel %vm141_vm0, %v2395_v55, %v2397_v33  ;;  %v2463_v8 = vrot.slane %v2457_v49, 2 }
 0x9a8   :  { %v2281_v28 = vrot.slane %v5608_v42, 4 }
 0x9ab   :  { %2487 = vrot.lane.b32.xlu1 %v2484_v4, %s4563_s4  ;;  %v2357_v14 = vpop.permute.xlu0 %2356 }
 0x9ac   :  { %v2364_v16 = vadd.f32 %v2357_v14, %v2344_v21 }
 0x9af   :  { %v2421_v60 = vpop.permute.xlu0 %2420 }
 0x9b3   :  { %v2444_v22 = vpop.permute.xlu0 %2443 }
 0x9b7   :  { %v2448_v43 = vpop.permute.xlu0 %2447 }
 0x9bb   :  { %v2490_v45 = vpop.permute.xlu0 %2489 }
 0x9bf   :  { %v2492_v4 = vpop.permute.xlu0 %2491 }
 0xa07   :  { %v2052_v9 = vpop.xlane.xlu1 %2051 }
 0xa08   :  { %v2053_v53 = vrot.slane %v2052_v9, 4 }
 0xa0a   :  { %v2054_v54 = vadd.f32 %v2053_v53, %v2052_v9 }
 0xa0b   :  { %v2355_v39 = vpop.permute.xlu1 %2354 }
 0xa0c   :  { %v2055_v37 = vrot.slane %v2054_v54, 2  ;;  %v2363_v2 = vadd.f32 %v2355_v39, %v2343_v23 }
 0xa0e   :  { %v2056_v62 = vadd.f32 %v2055_v37, %v2054_v54  ;;  %v2465_v37 = vsel %vm211_vm1, %v2463_v8, %v2464_v24 }
 0xa0f   :  { %v2359_v3 = vpop.permute.xlu1 %2358 }
 0xa10   :  { %v2057_v58 = vrot.slane %v2056_v62, 1  ;;  %v2365_v57 = vadd.f32 %v2359_v3, %v2345_v15 }
 0xa12   :  { %v2058_v0 = vadd.f32 %v2057_v58, %v2056_v62  ;;  %v2467_v58 = vsel %vm211_vm1, %v2464_v24, %v2466_v51 }
 0xa13   :  { %v2375_v13 = vpop.permute.xlu1 %2374 }
 0xa14   :  { %4371 = vpush %v2058_v0  ;;  %v2383_v29 = vadd.f32 %v2375_v13, %v2363_v2  ;;  %v2513_v0 = vpop.permute.xlu0 %2512 }
 0xa16   :  { %v2402_v41 = vadd.f32 %v2396_v38, %v2383_v29 }
 0xa17   :  { %v2377_v59 = vpop.permute.xlu1 %2376 }
 0xa18   :  { %v2384_v26 = vadd.f32 %v2377_v59, %v2364_v16  ;;  %v2515_v44 = vpop.permute.xlu0 %2514 }
 0xa1a   :  { %v2403_v63 = vadd.f32 %v2398_v47, %v2384_v26 }
 0xa1b   :  { %v2379_v61 = vpop.permute.xlu1 %2378 }
 0xa1c   :  { %v2385_v40 = vadd.f32 %v2379_v61, %v2365_v57  ;;  %v2428_v54 = vadd.f32 %v2421_v60, %v2403_v63  ;;  %v2517_v60 = vpop.permute.xlu0 %2516  ;;  %v2282_v57 = vadd.f32 %v2281_v28, %v5608_v42 }
 0xa1e   :  { %v2404_v6 = vadd.f32 %v2397_v33, %v2385_v40  ;;  %v2283_v16 = vrot.slane %v2282_v57, 2  ;;  %v2075_v40 = vstv %s4203_s11  ;;  %s4288_s11 = sld [smem:[#allocation2 + $0x7a]] }
 0xa1f   :  { %v2419_v48 = vpop.permute.xlu1 %2418 }
 0xa20   :  { %v2427_v46 = vadd.f32 %v2419_v48, %v2402_v41  ;;  %v2284_v55 = vadd.f32 %v2283_v16, %v2282_v57 }
 0xa22   :  { %v2452_v9 = vadd.f32 %v2444_v22, %v2427_v46  ;;  %v2285_v33 = vrot.slane %v2284_v55, 1 }
 0xa23   :  { %v2423_v56 = vpop.permute.xlu1 %2422 }
 0xa24   :  { %v2429_v53 = vadd.f32 %v2423_v56, %v2404_v6  ;;  %v2471_v30 = vadd.f32 %v2465_v37, %v2452_v9  ;;  %v2286_v12 = vadd.f32 %v2285_v33, %v2284_v55  ;;  %v2597_v9 = vstv %s4239_s18  ;;  %s4260_s18 = sld [smem:[#allocation2 + $0x6a]] }
 0xa25   :  { %v2600_v37 = vmul.f32 %v5469_v25, %v2597_v9  ;;  %v2750_v55 = vstv %s4246_s23  ;;  %s4259_s23 = sld [smem:[#allocation2 + $0x69]] }
 0xa26   :  { %v2454_v62 = vadd.f32 %v2448_v43, %v2429_v53  ;;  %v2070_v43 = vstv %s4202_s10  ;;  %v2598_v53 = vmul.f32 %v5461_v35, %v2597_v9 }
 0xa27   :  { %v2446_v39 = vpop.permute.xlu1 %2445 }
 0xa28   :  { %v2473_v3 = vadd.f32 %v2466_v51, %v2454_v62  ;;  %v2453_v14 = vadd.f32 %v2446_v39, %v2428_v54  ;;  %v2599_v54 = vmul.f32 %v5457_v50, %v2597_v9  ;;  %v2656_v62 = vstv %s4242_s19  ;;  %s4261_s19 = sld [smem:[#allocation2 + $0x6b]] }
 0xa29   :  { %v2658_v39 = vmul.f32 %v5457_v50, %v2656_v62  ;;  %v2657_v57 = vmul.f32 %v5461_v35, %v2656_v62  ;;  %v2588_v9 = vstv %s4238_s25 }
 0xa2a   :  { %v2472_v1 = vadd.f32 %v2467_v58, %v2453_v14  ;;  %v2498_v10 = vadd.f32 %v2492_v4, %v2473_v3  ;;  %v2681_v58 = vstv %s4243_s20  ;;  %v2617_v14 = vstv %s4240_s21  ;;  %s4252_s20 = sld [smem:[#allocation6 + $0xb]] }
 0xa2b   :  { %v2488_v11 = vpop.permute.xlu1 %2487  ;;  %v2682_v3 = vmul.f32 %v5461_v35, %v2681_v58  ;;  %v2620_v33 = vmul.f32 %v5469_v25, %v2617_v14  ;;  %s4253_s21 = sld [smem:[#allocation2 + $0x63]] }
 0xa2c   :  { %v2496_v13 = vadd.f32 %v2488_v11, %v2471_v30  ;;  %v2497_v23 = vadd.f32 %v2490_v45, %v2472_v1  ;;  %v5631_v5 = vadd.f32 %v2517_v60, %v2498_v10  ;;  %v2683_v30 = vmul.f32 %v5457_v50, %v2681_v58 }
 0xa2d   :  { %v2664_v1 = vrot.slane %v2658_v39, 1 }
 0xa2e   :  { %v5623_v15 = vadd.f32 %v2513_v0, %v2496_v13  ;;  %v5625_v21 = vadd.f32 %v2515_v44, %v2497_v23  ;;  %v2527_v59 = vsel %vm277_vm3, %v5631_v5, 0.0  ;;  %v2659_v0 = vmul.f32 %v5469_v25, %v2656_v62 }
 0xa2f   :  { %v2688_v44 = vrot.slane %v2682_v3, 1  ;;  %v2689_v10 = vrot.slane %v2683_v30, 1  ;;  %v2725_v13 = vstv %s4245_s22  ;;  %v2618_v23 = vmul.f32 %v5461_v35, %v2617_v14  ;;  %s4256_s22 = sld [smem:[#allocation2 + $0x66]] }
 0xa30   :  { %v2524_v27 = vsel %vm273_vm2, %v5623_v15, 0.0  ;;  %v2525_v2 = vsel %vm273_vm2, %v5625_v21, 0.0  ;;  %v2666_v11 = vrot.slane %v2659_v0, 1  ;;  %v2590_v62 = vmul.f32 %v5457_v50, %v2588_v9 }
 0xa31   :  { %v2526_v17 = vadd.f32 %v2525_v2, %v2524_v27  ;;  %v2684_v27 = vmul.f32 %v5469_v25, %v2681_v58  ;;  %v2690_v2 = vsel %vm141_vm0, %v2688_v44, %v2689_v10  ;;  %v2637_v30 = vstv %s4241_s26 }
 0xa32   :  { %v2667_v60 = vsel %vm141_vm0, %v2664_v1, %v2666_v11  ;;  %v2640_v44 = vmul.f32 %v5469_v25, %v2637_v30 }
 0xa33   :  { %v2528_v22 = vadd.f32 %v2527_v59, %v2526_v17  ;;  %v2727_v17 = vmul.f32 %v5457_v50, %v2725_v13  ;;  %v2728_v59 = vmul.f32 %v5469_v25, %v2725_v13  ;;  %v2691_v28 = vrot.slane %v2684_v27, 1 }
 0xa35   :  { %2529 = vadd.xlane.f32.xlu0 %v2528_v22  ;;  %v2619_v22 = vmul.f32 %v5457_v50, %v2617_v14  ;;  %v2733_v16 = vrot.slane %v2727_v17, 2 }
 0xa45   :  { %s4372_s6 = spop %4371 }
 0xa46   :  { %s2060_s8 = smul.f32 0.0011961722, %s4372_s6  ;;  %s4218_s6 = sld [smem:[#allocation9 + $0x8]] }
 0xa48   :  { %s2061_s9 = sadd.f32 1e-05, %s2060_s8 }
 0xa4a   :  { %v2062_v29 = vstv %s2061_s9 }
 0xa4b   :  { %4446 = vrsqrt.f32 %v2062_v29  ;;  %2606 = vrot.lane.b32.xlu0 %v2599_v54, %s4563_s4  ;;  %v2735_v29 = vrot.slane %v2728_v59, 2  ;;  %v2589_v54 = vmul.f32 %v5461_v35, %v2588_v9  ;;  %v2647_v59 = vrot.slane %v2640_v44, 1 }
 0xa4f   :  { %2670 = vrot.lane.b32.xlu0 %v2667_v60, %s4563_s4 }
 0xa53   :  { %2693 = vrot.lane.b32.xlu0 %v2690_v2, %s4564_s7 }
 0xa55   :  { %v4447_v34 = vpop.eup %4446 }
 0xa56   :  { %4373 = vpush %v4447_v34  ;;  %v2663_v34 = vrot.slane %v2657_v57, 1 }
 0xa57   :  { %4375 = vpush %v2286_v12  ;;  %2697 = vrot.lane.b32.xlu0 %v2691_v28, %s4564_s7  ;;  %v2736_v12 = vsel %vm211_vm1, %v2733_v16, %v2735_v29 }
 0xa5b   :  { %2739 = vrot.lane.b32.xlu0 %v2736_v12, %s4563_s4  ;;  %v5724_v12 = vld [vmem:[#allocation10 + $0x8] sm:$0xff] }
 0xa5f   :  { %2741 = vrot.lane.b32.xlu0 %v2735_v29, %s4563_s4 }
 0xa87   :  { %s4374_s12 = spop %4373 }
 0xa88   :  { %v2065_v61 = vstv %s4374_s12  ;;  %s4376_s13 = spop %4375  ;;  %s4285_s12 = sld [smem:[#allocation2 + $0x77]] }
 0xa89   :  { %v2066_v42 = vmul.f32 %v2065_v61, %v5535_v7  ;;  %v2067_v38 = vmul.f32 %v2065_v61, %v5538_v19  ;;  %v2068_v26 = vmul.f32 %v2065_v61, %v5541_v52  ;;  %s2288_s14 = smul.f32 0.0011961722, %s4376_s13  ;;  %v2751_v61 = vmul.f32 %v5461_v35, %v2750_v55  ;;  %s4269_s13 = sld [smem:[#allocation2 + $0x6d]] }
 0xa8b   :  { %v2071_v41 = vmul.f32 %v2070_v43, %v2066_v42  ;;  %v2072_v47 = vmul.f32 %v2070_v43, %v2067_v38  ;;  %v2073_v31 = vmul.f32 %v2070_v43, %v2068_v26  ;;  %v2289_v49 = vstv %s2288_s14  ;;  %s4272_s14 = sld [smem:[#allocation2 + $0x70]] }
 0xa8c   :  { %v5641_v48 = vsub.f32 %v5517_v18, %v2289_v49  ;;  %v5644_v45 = vsub.f32 %v5519_v36, %v2289_v49  ;;  %v5647_v20 = vsub.f32 %v5525_v32, %v2289_v49  ;;  %v2752_v43 = vmul.f32 %v5457_v50, %v2750_v55 }
 0xa8d   :  { %v2076_v7 = vadd.f32 %v2075_v40, %v2071_v41  ;;  %v2077_v63 = vadd.f32 %v2075_v40, %v2072_v47  ;;  %v2078_v19 = vadd.f32 %v2075_v40, %v2073_v31  ;;  %v2665_v42 = vsel %vm141_vm0, %v2663_v34, %v2664_v1 }
 0xa8e   :  { %v2293_v52 = vmul.f32 %v5641_v48, %v5641_v48  ;;  %v2294_v46 = vmul.f32 %v5644_v45, %v5644_v45  ;;  %v2295_v6 = vmul.f32 %v5647_v20, %v5647_v20  ;;  %v2757_v38 = vrot.slane %v2751_v61, 2 }
 0xa8f   :  { %v2079_v18 = vmax.f32 %v2076_v7, 0.0  ;;  %v2080_v24 = vmax.f32 %v2077_v63, 0.0  ;;  %v2081_v8 = vmax.f32 %v2078_v19, 0.0  ;;  %v2758_v26 = vrot.slane %v2752_v43, 2 }
 0xa90   :  { %v2296_v36 = vsel %vm273_vm2, %v2293_v52, 0.0  ;;  %v2297_v32 = vsel %vm273_vm2, %v2294_v46, 0.0  ;;  %v2299_v51 = vsel %vm277_vm3, %v2295_v6, 0.0  ;;  %v2753_v40 = vmul.f32 %v5469_v25, %v2750_v55 }
 0xa91   :  { %4204 = vst.msk [vmem:[%s6340_s5 + $0xa8] sm:$0xff] %vm273_vm2, %v2079_v18  ;;  %4205 = vst.msk [vmem:[%s6340_s5 + $0xb0] sm:$0xff] %vm273_vm2, %v2080_v24  ;;  %v2298_v56 = vadd.f32 %v2297_v32, %v2296_v36  ;;  %v2726_v41 = vmul.f32 %v5461_v35, %v2725_v13  ;;  %v2759_v47 = vsel %vm211_vm1, %v2757_v38, %v2758_v26 }
 0xa92   :  { %4206 = vst.msk [vmem:[%s6340_s5 + $0xb8] sm:$0x3f] %vm277_vm3, %v2081_v8  ;;  %v2760_v31 = vrot.slane %v2753_v40, 2  ;;  %v2692_v49 = vsel %vm141_vm0, %v2689_v10, %v2691_v28  ;;  %2762 = vrot.lane.b32.xlu0 %v2759_v47, %s4564_s7  ;;  %v2706_v28 = vstv %s4244_s27  ;;  %s4232_s27 = sld [smem:[#allocation7 + $0x9]] }
 0xa93   :  { %v2300_v4 = vadd.f32 %v2299_v51, %v2298_v56  ;;  %v2732_v7 = vrot.slane %v2726_v41, 2  ;;  %v2708_v61 = vmul.f32 %v5724_v12, %v2706_v28  ;;  %v2707_v43 = vmul.f32 %v5461_v35, %v2706_v28 }
 0xa94   :  { %v2761_v63 = vsel %vm211_vm1, %v2758_v26, %v2760_v31  ;;  %v2709_v26 = vmul.f32 %v5469_v25, %v2706_v28  ;;  %v2320_v28 = vstv %s4217_s30 }
 0xa95   :  { %2301 = vadd.xlane.f32.xlu1 %v2300_v4  ;;  %v2734_v19 = vsel %vm211_vm1, %v2732_v7, %v2733_v16 }
 0xa96   :  { %2764 = vrot.lane.b32.xlu0 %v2761_v63, %s4564_s7  ;;  %v2716_v63 = vrot.slane %v2709_v26, 2 }
 0xa9a   :  { %2766 = vrot.lane.b32.xlu0 %v2760_v31, %s4564_s7  ;;  %v2714_v31 = vrot.slane %v2708_v61, 2 }
 0xaa6   :  { %2604 = vrot.lane.b32.xlu1 %v2598_v53, %s4563_s4  ;;  %v2592_v53 = vstv %s4237_s24 }
 0xaa7   :  { %v2593_v0 = vadd.f32 %v2592_v53, %v2589_v54  ;;  %v2594_v14 = vadd.f32 %v2592_v53, %v2590_v62 }
 0xaaa   :  { %2608 = vrot.lane.b32.xlu1 %v2600_v37, %s4563_s4  ;;  %v2591_v37 = vmul.f32 %v5469_v25, %v2588_v9 }
 0xaac   :  { %v2595_v3 = vadd.f32 %v2592_v53, %v2591_v37 }
 0xaae   :  { %2624 = vrot.lane.b32.xlu1 %v2618_v23, %s4564_s7  ;;  %v2638_v23 = vmul.f32 %v5461_v35, %v2637_v30  ;;  %v2717_v35 = vsel %vm211_vm1, %v2714_v31, %v2716_v63 }
 0xab2   :  { %2626 = vrot.lane.b32.xlu1 %v2619_v22, %s4564_s7  ;;  %v2644_v22 = vrot.slane %v2638_v23, 1 }
 0xab6   :  { %2628 = vrot.lane.b32.xlu1 %v2620_v33, %s4564_s7 }
 0xaba   :  { %2668 = vrot.lane.b32.xlu1 %v2665_v42, %s4563_s4 }
 0xabe   :  { %2672 = vrot.lane.b32.xlu1 %v2666_v11, %s4563_s4  ;;  %v2639_v11 = vmul.f32 %v5457_v50, %v2637_v30 }
 0xac0   :  { %v2645_v17 = vrot.slane %v2639_v11, 1 }
 0xac2   :  { %2695 = vrot.lane.b32.xlu1 %v2692_v49, %s4564_s7  ;;  %v5714_v36 = vpop.xlane.xlu0 %2529  ;;  %v2646_v29 = vsel %vm141_vm0, %v2644_v22, %v2645_v17  ;;  %v2648_v34 = vsel %vm141_vm0, %v2645_v17, %v2647_v59  ;;  %v2713_v49 = vrot.slane %v2707_v43, 2 }
 0xac6   :  { %2737 = vrot.lane.b32.xlu1 %v2734_v19, %s4563_s4  ;;  %v2607_v4 = vpop.permute.xlu0 %2606 }
 0xac7   :  { %v2614_v27 = vadd.f32 %v2607_v4, %v2594_v14 }
 0xaca   :  { %v2671_v39 = vpop.permute.xlu0 %2670 }
 0xace   :  { %v2694_v13 = vpop.permute.xlu0 %2693 }
 0xad2   :  { %v2698_v16 = vpop.permute.xlu0 %2697 }
 0xad6   :  { %v2740_v38 = vpop.permute.xlu0 %2739 }
 0xada   :  { %v2742_v19 = vpop.permute.xlu0 %2741 }
 0xb22   :  { %v2302_v52 = vpop.xlane.xlu1 %2301 }
 0xb23   :  { %v2303_v46 = vrot.slane %v2302_v52, 4 }
 0xb25   :  { %v2304_v6 = vadd.f32 %v2303_v46, %v2302_v52 }
 0xb26   :  { %v2605_v32 = vpop.permute.xlu1 %2604 }
 0xb27   :  { %v2305_v18 = vrot.slane %v2304_v6, 2  ;;  %v2613_v1 = vadd.f32 %v2605_v32, %v2593_v0  ;;  %v2763_v32 = vpop.permute.xlu0 %2762 }
 0xb29   :  { %v2306_v24 = vadd.f32 %v2305_v18, %v2304_v6  ;;  %v2715_v18 = vsel %vm211_vm1, %v2713_v49, %v2714_v31 }
 0xb2a   :  { %v2609_v51 = vpop.permute.xlu1 %2608 }
 0xb2b   :  { %v2307_v8 = vrot.slane %v2306_v24, 1  ;;  %v2615_v60 = vadd.f32 %v2609_v51, %v2595_v3  ;;  %v2765_v53 = vpop.permute.xlu0 %2764 }
 0xb2d   :  { %v2308_v56 = vadd.f32 %v2307_v8, %v2306_v24 }
 0xb2e   :  { %v2625_v58 = vpop.permute.xlu1 %2624 }
 0xb2f   :  { %4377 = vpush %v2308_v56  ;;  %v2633_v2 = vadd.f32 %v2625_v58, %v2613_v1 }
 0xb31   :  { %v2652_v50 = vadd.f32 %v2646_v29, %v2633_v2  ;;  %v2325_v29 = vstv %s4218_s6  ;;  %s4303_s6 = sld [smem:[#allocation2 + $0x83]] }
 0xb32   :  { %v2627_v10 = vpop.permute.xlu1 %2626 }
 0xb33   :  { %v2634_v55 = vadd.f32 %v2627_v10, %v2614_v27  ;;  %v2531_v10 = vrot.slane %v5714_v36, 4 }
 0xb35   :  { %v2653_v40 = vadd.f32 %v2648_v34, %v2634_v55 }
 0xb36   :  { %v2629_v57 = vpop.permute.xlu1 %2628 }
 0xb37   :  { %v2635_v33 = vadd.f32 %v2629_v57, %v2615_v60  ;;  %v2678_v6 = vadd.f32 %v2671_v39, %v2653_v40  ;;  %v2767_v39 = vpop.permute.xlu0 %2766 }
 0xb39   :  { %v2654_v47 = vadd.f32 %v2647_v59, %v2635_v33 }
 0xb3a   :  { %v2669_v42 = vpop.permute.xlu1 %2668 }
 0xb3b   :  { %v2677_v41 = vadd.f32 %v2669_v42, %v2652_v50 }
 0xb3d   :  { %v2702_v52 = vadd.f32 %v2694_v13, %v2677_v41  ;;  %v2532_v13 = vadd.f32 %v2531_v10, %v5714_v36 }
 0xb3e   :  { %v2673_v7 = vpop.permute.xlu1 %2672 }
 0xb3f   :  { %v2679_v46 = vadd.f32 %v2673_v7, %v2654_v47  ;;  %v2721_v51 = vadd.f32 %v2715_v18, %v2702_v52  ;;  %v2533_v23 = vrot.slane %v2532_v13, 2 }
 0xb41   :  { %v2704_v24 = vadd.f32 %v2698_v16, %v2679_v46  ;;  %v2534_v27 = vadd.f32 %v2533_v23, %v2532_v13 }
 0xb42   :  { %v2696_v8 = vpop.permute.xlu1 %2695 }
 0xb43   :  { %v2723_v56 = vadd.f32 %v2716_v63, %v2704_v24  ;;  %v2703_v25 = vadd.f32 %v2696_v8, %v2678_v6  ;;  %v2535_v2 = vrot.slane %v2534_v27, 1  ;;  %v2847_v63 = vstv %s4254_s3  ;;  %v5782_v6 = vld [vmem:[#allocation10 + $0x10] sm:$0xff]  ;;  %s4275_s3 = sld [smem:[#allocation2 + $0x73]] }
 0xb44   :  { %v2849_v46 = vmul.f32 %v5724_v12, %v2847_v63  ;;  %v2850_v18 = vmul.f32 %v5782_v6, %v2847_v63  ;;  %v2906_v24 = vstv %s4257_s15  ;;  %s4276_s15 = sld [smem:[#allocation2 + $0x74]] }
 0xb45   :  { %v2722_v4 = vadd.f32 %v2717_v35, %v2703_v25  ;;  %v2748_v54 = vadd.f32 %v2742_v19, %v2723_v56  ;;  %v2536_v59 = vadd.f32 %v2535_v2, %v2534_v27  ;;  %v5778_v19 = vld [vmem:[#allocation10] sm:$0xff]  ;;  %v2931_v35 = vstv %s4258_s16  ;;  %s4267_s16 = sld [smem:[#allocation6 + $0xc]] }
 0xb46   :  { %v2738_v9 = vpop.permute.xlu1 %2737  ;;  %v2848_v52 = vmul.f32 %v5778_v19, %v2847_v63  ;;  %v2908_v8 = vmul.f32 %v5724_v12, %v2906_v24  ;;  %v2932_v56 = vmul.f32 %v5778_v19, %v2931_v35  ;;  %v2867_v25 = vstv %s4255_s17  ;;  %s4268_s17 = sld [smem:[#allocation2 + $0x6c]] }
 0xb47   :  { %v2746_v37 = vadd.f32 %v2738_v9, %v2721_v51  ;;  %v2747_v62 = vadd.f32 %v2740_v38, %v2722_v4  ;;  %v5739_v30 = vadd.f32 %v2767_v39, %v2748_v54  ;;  %v2933_v51 = vmul.f32 %v5724_v12, %v2931_v35 }
 0xb48   :  { %v2914_v4 = vrot.slane %v2908_v8, 1  ;;  %v2907_v13 = vmul.f32 %v5778_v19, %v2906_v24  ;;  %v3000_v27 = vstv %s4261_s19  ;;  %v2870_v2 = vmul.f32 %v5782_v6, %v2867_v25  ;;  %s4274_s19 = sld [smem:[#allocation2 + $0x72]] }
 0xb49   :  { %v5731_v58 = vadd.f32 %v2763_v32, %v2746_v37  ;;  %v5733_v0 = vadd.f32 %v2765_v53, %v2747_v62  ;;  %v2777_v11 = vsel %vm277_vm3, %v5739_v30, 0.0  ;;  %v2909_v32 = vmul.f32 %v5782_v6, %v2906_v24 }
 0xb4a   :  { %v2938_v53 = vrot.slane %v2932_v56, 1  ;;  %v2939_v54 = vrot.slane %v2933_v51, 1  ;;  %v2975_v37 = vstv %s4260_s18  ;;  %v2868_v62 = vmul.f32 %v5778_v19, %v2867_v25  ;;  %s4271_s18 = sld [smem:[#allocation2 + $0x6f]] }
 0xb4b   :  { %v2774_v3 = vsel %vm273_vm2, %v5731_v58, 0.0  ;;  %v2775_v14 = vsel %vm273_vm2, %v5733_v0, 0.0  ;;  %v2916_v9 = vrot.slane %v2909_v32, 1  ;;  %v2838_v63 = vstv %s4253_s21 }
 0xb4c   :  { %v2776_v1 = vadd.f32 %v2775_v14, %v2774_v3  ;;  %v2934_v3 = vmul.f32 %v5782_v6, %v2931_v35  ;;  %v2940_v14 = vsel %vm141_vm0, %v2938_v53, %v2939_v54  ;;  %v2840_v24 = vmul.f32 %v5724_v12, %v2838_v63 }
 0xb4d   :  { %v2917_v39 = vsel %vm141_vm0, %v2914_v4, %v2916_v9  ;;  %v2887_v51 = vstv %s4256_s22 }
 0xb4e   :  { %v2778_v44 = vadd.f32 %v2777_v11, %v2776_v1  ;;  %v2977_v1 = vmul.f32 %v5724_v12, %v2975_v37  ;;  %v2978_v11 = vmul.f32 %v5782_v6, %v2975_v37  ;;  %v2941_v10 = vrot.slane %v2934_v3, 1 }
 0xb4f   :  { %v2890_v53 = vmul.f32 %v5782_v6, %v2887_v51 }
 0xb50   :  { %2779 = vadd.xlane.f32.xlu0 %v2778_v44  ;;  %v2869_v44 = vmul.f32 %v5724_v12, %v2867_v25  ;;  %v2983_v23 = vrot.slane %v2977_v1, 2 }
 0xb60   :  { %s4378_s2 = spop %4377 }
 0xb61   :  { %s2310_s28 = smul.f32 0.0011961722, %s4378_s2  ;;  %s4233_s2 = sld [smem:[#allocation9 + $0x9]] }
 0xb63   :  { %s2311_s29 = sadd.f32 1e-05, %s2310_s28 }
 0xb65   :  { %v2312_v60 = vstv %s2311_s29 }
 0xb66   :  { %4448 = vrsqrt.f32 %v2312_v60  ;;  %2856 = vrot.lane.b32.xlu0 %v2849_v46, %s4563_s4  ;;  %v2985_v60 = vrot.slane %v2978_v11, 2  ;;  %v2839_v46 = vmul.f32 %v5778_v19, %v2838_v63  ;;  %v2897_v11 = vrot.slane %v2890_v53, 1 }
 0xb6a   :  { %2920 = vrot.lane.b32.xlu0 %v2917_v39, %s4563_s4 }
 0xb6e   :  { %2943 = vrot.lane.b32.xlu0 %v2940_v14, %s4564_s7 }
 0xb70   :  { %v4449_v17 = vpop.eup %4448 }
 0xb71   :  { %4379 = vpush %v4449_v17  ;;  %v2913_v17 = vrot.slane %v2907_v13, 1 }
 0xb72   :  { %4381 = vpush %v2536_v59  ;;  %2947 = vrot.lane.b32.xlu0 %v2941_v10, %s4564_s7  ;;  %v2986_v59 = vsel %vm211_vm1, %v2983_v23, %v2985_v60 }
 0xb76   :  { %2989 = vrot.lane.b32.xlu0 %v2986_v59, %s4563_s4 }
 0xb7a   :  { %2991 = vrot.lane.b32.xlu0 %v2985_v60, %s4563_s4 }
 0xba2   :  { %s4380_s8 = spop %4379 }
 0xba3   :  { %v2315_v22 = vstv %s4380_s8  ;;  %s4382_s9 = spop %4381  ;;  %s4300_s8 = sld [smem:[#allocation2 + $0x80]] }
 0xba4   :  { %v2316_v36 = vmul.f32 %v2315_v22, %v5641_v48  ;;  %v2317_v57 = vmul.f32 %v2315_v22, %v5644_v45  ;;  %v2318_v16 = vmul.f32 %v2315_v22, %v5647_v20  ;;  %s2538_s10 = smul.f32 0.0011961722, %s4382_s9  ;;  %v3001_v22 = vmul.f32 %v5778_v19, %v3000_v27  ;;  %s4284_s9 = sld [smem:[#allocation2 + $0x76]] }
 0xba6   :  { %v2321_v55 = vmul.f32 %v2320_v28, %v2316_v36  ;;  %v2322_v33 = vmul.f32 %v2320_v28, %v2317_v57  ;;  %v2323_v50 = vmul.f32 %v2320_v28, %v2318_v16  ;;  %v2539_v34 = vstv %s2538_s10  ;;  %s4287_s10 = sld [smem:[#allocation2 + $0x79]] }
 0xba7   :  { %v5749_v61 = vsub.f32 %v5623_v15, %v2539_v34  ;;  %v5752_v43 = vsub.f32 %v5625_v21, %v2539_v34  ;;  %v5755_v42 = vsub.f32 %v5631_v5, %v2539_v34  ;;  %v3002_v28 = vmul.f32 %v5724_v12, %v3000_v27 }
 0xba8   :  { %v2326_v48 = vadd.f32 %v2325_v29, %v2321_v55  ;;  %v2327_v38 = vadd.f32 %v2325_v29, %v2322_v33  ;;  %v2328_v45 = vadd.f32 %v2325_v29, %v2323_v50  ;;  %v2915_v36 = vsel %vm141_vm0, %v2913_v17, %v2914_v4 }
 0xba9   :  { %v2543_v20 = vmul.f32 %v5749_v61, %v5749_v61  ;;  %v2544_v26 = vmul.f32 %v5752_v43, %v5752_v43  ;;  %v2545_v40 = vmul.f32 %v5755_v42, %v5755_v42  ;;  %v3007_v57 = vrot.slane %v3001_v22, 2 }
 0xbaa   :  { %v2329_v15 = vmax.f32 %v2326_v48, 0.0  ;;  %v2330_v41 = vmax.f32 %v2327_v38, 0.0  ;;  %v2331_v47 = vmax.f32 %v2328_v45, 0.0  ;;  %v3008_v16 = vrot.slane %v3002_v28, 2 }
 0xbab   :  { %v2546_v21 = vsel %vm273_vm2, %v2543_v20, 0.0  ;;  %v2547_v5 = vsel %vm273_vm2, %v2544_v26, 0.0  ;;  %v2549_v49 = vsel %vm277_vm3, %v2545_v40, 0.0  ;;  %v3003_v29 = vmul.f32 %v5782_v6, %v3000_v27 }
 0xbac   :  { %4219 = vst.msk [vmem:[%s6340_s5 + $0xc0] sm:$0xff] %vm273_vm2, %v2329_v15  ;;  %4220 = vst.msk [vmem:[%s6340_s5 + $0xc8] sm:$0xff] %vm273_vm2, %v2330_v41  ;;  %v2548_v31 = vadd.f32 %v2547_v5, %v2546_v21  ;;  %v2976_v55 = vmul.f32 %v5778_v19, %v2975_v37  ;;  %v3009_v33 = vsel %vm211_vm1, %v3007_v57, %v3008_v16 }
 0xbad   :  { %4221 = vst.msk [vmem:[%s6340_s5 + $0xd0] sm:$0x3f] %vm277_vm3, %v2331_v47  ;;  %v3010_v50 = vrot.slane %v3003_v29, 2  ;;  %v2942_v34 = vsel %vm141_vm0, %v2939_v54, %v2941_v10  ;;  %3012 = vrot.lane.b32.xlu0 %v3009_v33, %s4564_s7  ;;  %v2956_v10 = vstv %s4259_s23  ;;  %s4247_s23 = sld [smem:[#allocation7 + $0xa]] }
 0xbae   :  { %v2550_v7 = vadd.f32 %v2549_v49, %v2548_v31  ;;  %v2982_v48 = vrot.slane %v2976_v55, 2  ;;  %v2958_v22 = vmul.f32 %v5724_v12, %v2956_v10  ;;  %v2957_v28 = vmul.f32 %v5778_v19, %v2956_v10 }
 0xbaf   :  { %v3011_v38 = vsel %vm211_vm1, %v3008_v16, %v3010_v50  ;;  %v2959_v16 = vmul.f32 %v5782_v6, %v2956_v10 }
 0xbb0   :  { %2551 = vadd.xlane.f32.xlu1 %v2550_v7  ;;  %v2984_v45 = vsel %vm211_vm1, %v2982_v48, %v2983_v23 }
 0xbb1   :  { %3014 = vrot.lane.b32.xlu0 %v3011_v38, %s4564_s7  ;;  %v2966_v38 = vrot.slane %v2959_v16, 2 }
 0xbb5   :  { %3016 = vrot.lane.b32.xlu0 %v3010_v50, %s4564_s7  ;;  %v2964_v50 = vrot.slane %v2958_v22, 2 }
 0xbc1   :  { %2854 = vrot.lane.b32.xlu1 %v2848_v52, %s4563_s4  ;;  %v2842_v52 = vstv %s4252_s20 }
 0xbc2   :  { %v2843_v32 = vadd.f32 %v2842_v52, %v2839_v46  ;;  %v2844_v25 = vadd.f32 %v2842_v52, %v2840_v24 }
 0xbc5   :  { %2858 = vrot.lane.b32.xlu1 %v2850_v18, %s4563_s4  ;;  %v2841_v18 = vmul.f32 %v5782_v6, %v2838_v63 }
 0xbc7   :  { %v2845_v56 = vadd.f32 %v2842_v52, %v2841_v18 }
 0xbc9   :  { %2874 = vrot.lane.b32.xlu1 %v2868_v62, %s4564_s7  ;;  %v2888_v62 = vmul.f32 %v5778_v19, %v2887_v51 }
 0xbcd   :  { %2876 = vrot.lane.b32.xlu1 %v2869_v44, %s4564_s7  ;;  %v2894_v44 = vrot.slane %v2888_v62, 1 }
 0xbd1   :  { %2878 = vrot.lane.b32.xlu1 %v2870_v2, %s4564_s7 }
 0xbd5   :  { %2918 = vrot.lane.b32.xlu1 %v2915_v36, %s4563_s4 }
 0xbd9   :  { %2922 = vrot.lane.b32.xlu1 %v2916_v9, %s4563_s4  ;;  %v2889_v9 = vmul.f32 %v5724_v12, %v2887_v51 }
 0xbdb   :  { %v2895_v1 = vrot.slane %v2889_v9, 1 }
 0xbdd   :  { %2945 = vrot.lane.b32.xlu1 %v2942_v34, %s4564_s7  ;;  %v5826_v21 = vpop.xlane.xlu0 %2779  ;;  %v2896_v60 = vsel %vm141_vm0, %v2894_v44, %v2895_v1  ;;  %v2898_v59 = vsel %vm141_vm0, %v2895_v1, %v2897_v11  ;;  %v2963_v34 = vrot.slane %v2957_v28, 2 }
 0xbde   :  { %v2781_v62 = vrot.slane %v5826_v21, 4 }
 0xbe1   :  { %2987 = vrot.lane.b32.xlu1 %v2984_v45, %s4563_s4  ;;  %v2857_v7 = vpop.permute.xlu0 %2856 }
 0xbe2   :  { %v2864_v3 = vadd.f32 %v2857_v7, %v2844_v25 }
 0xbe5   :  { %v2921_v8 = vpop.permute.xlu0 %2920 }
 0xbe9   :  { %v2944_v37 = vpop.permute.xlu0 %2943 }
 0xbed   :  { %v2948_v23 = vpop.permute.xlu0 %2947 }
 0xbf1   :  { %v2990_v57 = vpop.permute.xlu0 %2989 }
 0xbf5   :  { %v2992_v45 = vpop.permute.xlu0 %2991 }
 0xc3d   :  { %v2552_v20 = vpop.xlane.xlu1 %2551 }
 0xc3e   :  { %v2553_v26 = vrot.slane %v2552_v20, 4 }
 0xc40   :  { %v2554_v40 = vadd.f32 %v2553_v26, %v2552_v20 }
 0xc41   :  { %v2855_v5 = vpop.permute.xlu1 %2854 }
 0xc42   :  { %v2555_v15 = vrot.slane %v2554_v40, 2  ;;  %v2863_v4 = vadd.f32 %v2855_v5, %v2843_v32 }
 0xc44   :  { %v2556_v41 = vadd.f32 %v2555_v15, %v2554_v40  ;;  %v2965_v15 = vsel %vm211_vm1, %v2963_v34, %v2964_v50 }
 0xc45   :  { %v2859_v49 = vpop.permute.xlu1 %2858 }
 0xc46   :  { %v2557_v47 = vrot.slane %v2556_v41, 1  ;;  %v2865_v39 = vadd.f32 %v2859_v49, %v2845_v56 }
 0xc48   :  { %v2558_v31 = vadd.f32 %v2557_v47, %v2556_v41  ;;  %v2967_v47 = vsel %vm211_vm1, %v2964_v50, %v2966_v38 }
 0xc49   :  { %v2875_v35 = vpop.permute.xlu1 %2874 }
 0xc4a   :  { %4383 = vpush %v2558_v31  ;;  %v2883_v14 = vadd.f32 %v2875_v35, %v2863_v4  ;;  %v3013_v31 = vpop.permute.xlu0 %3012 }
 0xc4c   :  { %v2902_v17 = vadd.f32 %v2896_v60, %v2883_v14 }
 0xc4d   :  { %v2877_v54 = vpop.permute.xlu1 %2876 }
 0xc4e   :  { %v2884_v27 = vadd.f32 %v2877_v54, %v2864_v3  ;;  %v3015_v18 = vpop.permute.xlu0 %3014 }
 0xc50   :  { %v2903_v29 = vadd.f32 %v2898_v59, %v2884_v27 }
 0xc51   :  { %v2879_v13 = vpop.permute.xlu1 %2878 }
 0xc52   :  { %v2885_v2 = vadd.f32 %v2879_v13, %v2865_v39  ;;  %v2928_v40 = vadd.f32 %v2921_v8, %v2903_v29  ;;  %v3017_v8 = vpop.permute.xlu0 %3016  ;;  %v2782_v39 = vadd.f32 %v2781_v62, %v5826_v21 }
 0xc54   :  { %v2904_v33 = vadd.f32 %v2897_v11, %v2885_v2  ;;  %v2783_v3 = vrot.slane %v2782_v39, 2  ;;  %v2575_v2 = vstv %s4233_s2  ;;  %s4318_s2 = sld [smem:[#allocation2 + $0x8c]] }
 0xc55   :  { %v2919_v36 = vpop.permute.xlu1 %2918 }
 0xc56   :  { %v2927_v55 = vadd.f32 %v2919_v36, %v2902_v17  ;;  %v2784_v1 = vadd.f32 %v2783_v3, %v2782_v39 }
 0xc58   :  { %v2952_v20 = vadd.f32 %v2944_v37, %v2927_v55  ;;  %v2785_v11 = vrot.slane %v2784_v1, 1 }
 0xc59   :  { %v2923_v48 = vpop.permute.xlu1 %2922 }
 0xc5a   :  { %v2929_v26 = vadd.f32 %v2923_v48, %v2904_v33  ;;  %v2971_v63 = vadd.f32 %v2965_v15, %v2952_v20  ;;  %v2786_v10 = vadd.f32 %v2785_v11, %v2784_v1  ;;  %v3097_v20 = vstv %s4269_s13  ;;  %s4290_s13 = sld [smem:[#allocation2 + $0x7c]] }
 0xc5b   :  { %v3100_v15 = vmul.f32 %v5782_v6, %v3097_v20  ;;  %v3250_v1 = vstv %s4276_s15  ;;  %s4289_s15 = sld [smem:[#allocation2 + $0x7b]] }
 0xc5c   :  { %v2954_v41 = vadd.f32 %v2948_v23, %v2929_v26  ;;  %v2570_v23 = vstv %s4232_s27  ;;  %v3098_v26 = vmul.f32 %v5778_v19, %v3097_v20 }
 0xc5d   :  { %v2946_v5 = vpop.permute.xlu1 %2945 }
 0xc5e   :  { %v2973_v49 = vadd.f32 %v2966_v38, %v2954_v41  ;;  %v2953_v7 = vadd.f32 %v2946_v5, %v2928_v40  ;;  %v3099_v40 = vmul.f32 %v5724_v12, %v3097_v20  ;;  %v3156_v41 = vstv %s4272_s14  ;;  %s4291_s14 = sld [smem:[#allocation2 + $0x7d]] }
 0xc5f   :  { %v3158_v5 = vmul.f32 %v5724_v12, %v3156_v41  ;;  %v3157_v39 = vmul.f32 %v5778_v19, %v3156_v41  ;;  %v3088_v20 = vstv %s4268_s17 }
 0xc60   :  { %v2972_v52 = vadd.f32 %v2967_v47, %v2953_v7  ;;  %v2998_v24 = vadd.f32 %v2992_v45, %v2973_v49  ;;  %v3181_v47 = vstv %s4273_s0  ;;  %v3117_v7 = vstv %s4270_s1  ;;  %s4282_s0 = sld [smem:[#allocation6 + $0xd]] }
 0xc61   :  { %v2988_v46 = vpop.permute.xlu1 %2987  ;;  %v3182_v49 = vmul.f32 %v5778_v19, %v3181_v47  ;;  %v3120_v11 = vmul.f32 %v5782_v6, %v3117_v7  ;;  %s4283_s1 = sld [smem:[#allocation2 + $0x75]] }
 0xc62   :  { %v2996_v35 = vadd.f32 %v2988_v46, %v2971_v63  ;;  %v2997_v32 = vadd.f32 %v2990_v57, %v2972_v52  ;;  %v5849_v9 = vadd.f32 %v3017_v8, %v2998_v24  ;;  %v3183_v63 = vmul.f32 %v5724_v12, %v3181_v47 }
 0xc63   :  { %v3164_v52 = vrot.slane %v3158_v5, 1 }
 0xc64   :  { %v5841_v56 = vadd.f32 %v3013_v31, %v2996_v35  ;;  %v5843_v25 = vadd.f32 %v3015_v18, %v2997_v32  ;;  %v3027_v54 = vsel %vm277_vm3, %v5849_v9, 0.0  ;;  %v3159_v31 = vmul.f32 %v5782_v6, %v3156_v41 }
 0xc65   :  { %v3188_v18 = vrot.slane %v3182_v49, 1  ;;  %v3189_v24 = vrot.slane %v3183_v63, 1  ;;  %v3225_v35 = vstv %s4275_s3  ;;  %v3118_v32 = vmul.f32 %v5778_v19, %v3117_v7  ;;  %s4286_s3 = sld [smem:[#allocation2 + $0x78]] }
 0xc66   :  { %v3024_v51 = vsel %vm273_vm2, %v5841_v56, 0.0  ;;  %v3025_v4 = vsel %vm273_vm2, %v5843_v25, 0.0  ;;  %v3166_v46 = vrot.slane %v3159_v31, 1  ;;  %v3090_v41 = vmul.f32 %v5724_v12, %v3088_v20 }
 0xc67   :  { %v3026_v53 = vadd.f32 %v3025_v4, %v3024_v51  ;;  %v3184_v51 = vmul.f32 %v5782_v6, %v3181_v47  ;;  %v3190_v4 = vsel %vm141_vm0, %v3188_v18, %v3189_v24  ;;  %v3137_v63 = vstv %s4271_s18 }
 0xc68   :  { %v3167_v8 = vsel %vm141_vm0, %v3164_v52, %v3166_v46  ;;  %v3140_v18 = vmul.f32 %v5782_v6, %v3137_v63 }
 0xc69   :  { %v3028_v37 = vadd.f32 %v3027_v54, %v3026_v53  ;;  %v3227_v53 = vmul.f32 %v5724_v12, %v3225_v35  ;;  %v3228_v54 = vmul.f32 %v5782_v6, %v3225_v35  ;;  %v3191_v62 = vrot.slane %v3184_v51, 1 }
 0xc6b   :  { %3029 = vadd.xlane.f32.xlu0 %v3028_v37  ;;  %v3119_v37 = vmul.f32 %v5724_v12, %v3117_v7  ;;  %v3233_v3 = vrot.slane %v3227_v53, 2 }
 0xc7b   :  { %s4384_s24 = spop %4383 }
 0xc7c   :  { %s2560_s25 = smul.f32 0.0011961722, %s4384_s24  ;;  %s4248_s24 = sld [smem:[#allocation9 + $0xa]] }
 0xc7e   :  { %s2561_s26 = sadd.f32 1e-05, %s2560_s25 }
 0xc80   :  { %v2562_v14 = vstv %s2561_s26 }
 0xc81   :  { %4450 = vrsqrt.f32 %v2562_v14  ;;  %3106 = vrot.lane.b32.xlu0 %v3099_v40, %s4563_s4  ;;  %v3235_v14 = vrot.slane %v3228_v54, 2  ;;  %v3089_v40 = vmul.f32 %v5778_v19, %v3088_v20  ;;  %v3147_v54 = vrot.slane %v3140_v18, 1 }
 0xc85   :  { %3170 = vrot.lane.b32.xlu0 %v3167_v8, %s4563_s4 }
 0xc89   :  { %3193 = vrot.lane.b32.xlu0 %v3190_v4, %s4564_s7 }
 0xc8b   :  { %v4451_v44 = vpop.eup %4450 }
 0xc8c   :  { %4385 = vpush %v4451_v44  ;;  %v3163_v44 = vrot.slane %v3157_v39, 1 }
 0xc8d   :  { %4387 = vpush %v2786_v10  ;;  %3197 = vrot.lane.b32.xlu0 %v3191_v62, %s4564_s7  ;;  %v3236_v10 = vsel %vm211_vm1, %v3233_v3, %v3235_v14 }
 0xc91   :  { %3239 = vrot.lane.b32.xlu0 %v3236_v10, %s4563_s4 }
 0xc95   :  { %3241 = vrot.lane.b32.xlu0 %v3235_v14, %s4563_s4 }
 0xcbd   :  { %s4386_s28 = spop %4385 }
 0xcbe   :  { %v2565_v13 = vstv %s4386_s28  ;;  %s4388_s29 = spop %4387  ;;  %s4315_s28 = sld [smem:[#allocation2 + $0x89]] }
 0xcbf   :  { %v2566_v21 = vmul.f32 %v2565_v13, %v5749_v61  ;;  %v2567_v60 = vmul.f32 %v2565_v13, %v5752_v43  ;;  %v2568_v27 = vmul.f32 %v2565_v13, %v5755_v42  ;;  %s2788_s30 = smul.f32 0.0011961722, %s4388_s29  ;;  %v3251_v13 = vmul.f32 %v5778_v19, %v3250_v1  ;;  %s4299_s29 = sld [smem:[#allocation2 + $0x7f]] }
 0xcc1   :  { %v2571_v17 = vmul.f32 %v2570_v23, %v2566_v21  ;;  %v2572_v59 = vmul.f32 %v2570_v23, %v2567_v60  ;;  %v2573_v22 = vmul.f32 %v2570_v23, %v2568_v27  ;;  %v2789_v28 = vstv %s2788_s30  ;;  %s4302_s30 = sld [smem:[#allocation2 + $0x82]] }
 0xcc2   :  { %v5859_v36 = vsub.f32 %v5731_v58, %v2789_v28  ;;  %v5862_v57 = vsub.f32 %v5733_v0, %v2789_v28  ;;  %v5865_v16 = vsub.f32 %v5739_v30, %v2789_v28  ;;  %v3252_v23 = vmul.f32 %v5724_v12, %v3250_v1 }
 0xcc3   :  { %v2576_v61 = vadd.f32 %v2575_v2, %v2571_v17  ;;  %v2577_v29 = vadd.f32 %v2575_v2, %v2572_v59  ;;  %v2578_v43 = vadd.f32 %v2575_v2, %v2573_v22  ;;  %v3165_v21 = vsel %vm141_vm0, %v3163_v44, %v3164_v52 }
 0xcc4   :  { %v2793_v42 = vmul.f32 %v5859_v36, %v5859_v36  ;;  %v2794_v55 = vmul.f32 %v5862_v57, %v5862_v57  ;;  %v2795_v33 = vmul.f32 %v5865_v16, %v5865_v16  ;;  %v3257_v60 = vrot.slane %v3251_v13, 2 }
 0xcc5   :  { %v2579_v58 = vmax.f32 %v2576_v61, 0.0  ;;  %v2580_v50 = vmax.f32 %v2577_v29, 0.0  ;;  %v2581_v34 = vmax.f32 %v2578_v43, 0.0  ;;  %v3258_v27 = vrot.slane %v3252_v23, 2 }
 0xcc6   :  { %v2796_v0 = vsel %vm273_vm2, %v2793_v42, 0.0  ;;  %v2797_v30 = vsel %vm273_vm2, %v2794_v55, 0.0  ;;  %v2799_v38 = vsel %vm277_vm3, %v2795_v33, 0.0  ;;  %v3253_v2 = vmul.f32 %v5782_v6, %v3250_v1 }
 0xcc7   :  { %4234 = vst.msk [vmem:[%s6340_s5 + $0xd8] sm:$0xff] %vm273_vm2, %v2579_v58  ;;  %4235 = vst.msk [vmem:[%s6340_s5 + $0xe0] sm:$0xff] %vm273_vm2, %v2580_v50  ;;  %v2798_v48 = vadd.f32 %v2797_v30, %v2796_v0  ;;  %v3226_v17 = vmul.f32 %v5778_v19, %v3225_v35  ;;  %v3259_v59 = vsel %vm211_vm1, %v3257_v60, %v3258_v27 }
 0xcc8   :  { %4236 = vst.msk [vmem:[%s6340_s5 + $0xe8] sm:$0x3f] %vm277_vm3, %v2581_v34  ;;  %v3260_v22 = vrot.slane %v3253_v2, 2  ;;  %v3192_v28 = vsel %vm141_vm0, %v3189_v24, %v3191_v62  ;;  %3262 = vrot.lane.b32.xlu0 %v3259_v59, %s4564_s7  ;;  %v3206_v62 = vstv %s4274_s19  ;;  %s4262_s19 = sld [smem:[#allocation7 + $0xb]] }
 0xcc9   :  { %v2800_v45 = vadd.f32 %v2799_v38, %v2798_v48  ;;  %v3232_v61 = vrot.slane %v3226_v17, 2  ;;  %v3208_v13 = vmul.f32 %v5724_v12, %v3206_v62  ;;  %v3207_v23 = vmul.f32 %v5778_v19, %v3206_v62 }
 0xcca   :  { %v3261_v29 = vsel %vm211_vm1, %v3258_v27, %v3260_v22  ;;  %v3209_v27 = vmul.f32 %v5782_v6, %v3206_v62 }
 0xccb   :  { %2801 = vadd.xlane.f32.xlu1 %v2800_v45  ;;  %v3234_v43 = vsel %vm211_vm1, %v3232_v61, %v3233_v3 }
 0xccc   :  { %3264 = vrot.lane.b32.xlu0 %v3261_v29, %s4564_s7  ;;  %v3216_v29 = vrot.slane %v3209_v27, 2 }
 0xcd0   :  { %3266 = vrot.lane.b32.xlu0 %v3260_v22, %s4564_s7  ;;  %v3214_v22 = vrot.slane %v3208_v13, 2 }
 0xcdc   :  { %3104 = vrot.lane.b32.xlu1 %v3098_v26, %s4563_s4  ;;  %v3092_v26 = vstv %s4267_s16 }
 0xcdd   :  { %v3093_v31 = vadd.f32 %v3092_v26, %v3089_v40  ;;  %v3094_v7 = vadd.f32 %v3092_v26, %v3090_v41 }
 0xce0   :  { %3108 = vrot.lane.b32.xlu1 %v3100_v15, %s4563_s4  ;;  %v3091_v15 = vmul.f32 %v5782_v6, %v3088_v20 }
 0xce2   :  { %v3095_v49 = vadd.f32 %v3092_v26, %v3091_v15 }
 0xce4   :  { %3124 = vrot.lane.b32.xlu1 %v3118_v32, %s4564_s7  ;;  %v3138_v32 = vmul.f32 %v5778_v19, %v3137_v63 }
 0xce8   :  { %3126 = vrot.lane.b32.xlu1 %v3119_v37, %s4564_s7  ;;  %v3144_v37 = vrot.slane %v3138_v32, 1 }
 0xcec   :  { %3128 = vrot.lane.b32.xlu1 %v3120_v11, %s4564_s7 }
 0xcf0   :  { %3168 = vrot.lane.b32.xlu1 %v3165_v21, %s4563_s4 }
 0xcf4   :  { %3172 = vrot.lane.b32.xlu1 %v3166_v46, %s4563_s4  ;;  %v3139_v46 = vmul.f32 %v5724_v12, %v3137_v63 }
 0xcf6   :  { %v3145_v53 = vrot.slane %v3139_v46, 1 }
 0xcf8   :  { %3195 = vrot.lane.b32.xlu1 %v3192_v28, %s4564_s7  ;;  %v5932_v0 = vpop.xlane.xlu0 %3029  ;;  %v3146_v14 = vsel %vm141_vm0, %v3144_v37, %v3145_v53  ;;  %v3148_v10 = vsel %vm141_vm0, %v3145_v53, %v3147_v54  ;;  %v3213_v28 = vrot.slane %v3207_v23, 2 }
 0xcf9   :  { %v3031_v32 = vrot.slane %v5932_v0, 4 }
 0xcfc   :  { %3237 = vrot.lane.b32.xlu1 %v3234_v43, %s4563_s4  ;;  %v3107_v45 = vpop.permute.xlu0 %3106 }
 0xcfd   :  { %v3114_v51 = vadd.f32 %v3107_v45, %v3094_v7 }
 0xd00   :  { %v3171_v5 = vpop.permute.xlu0 %3170 }
 0xd04   :  { %v3194_v35 = vpop.permute.xlu0 %3193 }
 0xd08   :  { %v3198_v3 = vpop.permute.xlu0 %3197 }
 0xd0c   :  { %v3240_v60 = vpop.permute.xlu0 %3239 }
 0xd10   :  { %v3242_v43 = vpop.permute.xlu0 %3241 }
 0xd58   :  { %v2802_v42 = vpop.xlane.xlu1 %2801 }
 0xd59   :  { %v2803_v55 = vrot.slane %v2802_v42, 4 }
 0xd5b   :  { %v2804_v33 = vadd.f32 %v2803_v55, %v2802_v42 }
 0xd5c   :  { %v3105_v30 = vpop.permute.xlu1 %3104 }
 0xd5d   :  { %v2805_v58 = vrot.slane %v2804_v33, 2  ;;  %v3113_v52 = vadd.f32 %v3105_v30, %v3093_v31 }
 0xd5f   :  { %v2806_v50 = vadd.f32 %v2805_v58, %v2804_v33  ;;  %v3215_v58 = vsel %vm211_vm1, %v3213_v28, %v3214_v22 }
 0xd60   :  { %v3109_v38 = vpop.permute.xlu1 %3108 }
 0xd61   :  { %v2807_v34 = vrot.slane %v2806_v50, 1  ;;  %v3115_v8 = vadd.f32 %v3109_v38, %v3095_v49 }
 0xd63   :  { %v2808_v48 = vadd.f32 %v2807_v34, %v2806_v50  ;;  %v3217_v34 = vsel %vm211_vm1, %v3214_v22, %v3216_v29 }
 0xd64   :  { %v3125_v47 = vpop.permute.xlu1 %3124 }
 0xd65   :  { %4389 = vpush %v2808_v48  ;;  %v3133_v4 = vadd.f32 %v3125_v47, %v3113_v52  ;;  %v3263_v48 = vpop.permute.xlu0 %3262 }
 0xd67   :  { %v3152_v44 = vadd.f32 %v3146_v14, %v3133_v4 }
 0xd68   :  { %v3127_v24 = vpop.permute.xlu1 %3126 }
 0xd69   :  { %v3134_v1 = vadd.f32 %v3127_v24, %v3114_v51  ;;  %v3265_v15 = vpop.permute.xlu0 %3264 }
 0xd6b   :  { %v3153_v2 = vadd.f32 %v3148_v10, %v3134_v1 }
 0xd6c   :  { %v3129_v39 = vpop.permute.xlu1 %3128 }
 0xd6d   :  { %v3135_v11 = vadd.f32 %v3129_v39, %v3115_v8  ;;  %v3178_v33 = vadd.f32 %v3171_v5, %v3153_v2  ;;  %v3267_v5 = vpop.permute.xlu0 %3266  ;;  %v3032_v8 = vadd.f32 %v3031_v32, %v5932_v0 }
 0xd6f   :  { %v3154_v59 = vadd.f32 %v3147_v54, %v3135_v11  ;;  %v3033_v51 = vrot.slane %v3032_v8, 2  ;;  %v2825_v11 = vstv %s4248_s24  ;;  %s4308_s24 = sld [smem:[#allocation9 + $0xe]] }
 0xd70   :  { %v3169_v21 = vpop.permute.xlu1 %3168 }
 0xd71   :  { %v3177_v17 = vadd.f32 %v3169_v21, %v3152_v44  ;;  %v3034_v53 = vadd.f32 %v3033_v51, %v3032_v8 }
 0xd73   :  { %v3202_v42 = vadd.f32 %v3194_v35, %v3177_v17  ;;  %v3035_v54 = vrot.slane %v3034_v53, 1 }
 0xd74   :  { %v3173_v61 = vpop.permute.xlu1 %3172 }
 0xd75   :  { %v3179_v55 = vadd.f32 %v3173_v61, %v3154_v59  ;;  %v3221_v20 = vadd.f32 %v3215_v58, %v3202_v42  ;;  %v3036_v62 = vadd.f32 %v3035_v54, %v3034_v53  ;;  %v3347_v42 = vstv %s4284_s9  ;;  %s4305_s9 = sld [smem:[#allocation2 + $0x85]] }
 0xd76   :  { %v3350_v58 = vmul.f32 %v5782_v6, %v3347_v42  ;;  %v3500_v53 = vstv %s4291_s14  ;;  %s4304_s14 = sld [smem:[#allocation2 + $0x84]] }
 0xd77   :  { %v3204_v50 = vadd.f32 %v3198_v3, %v3179_v55  ;;  %v2820_v3 = vstv %s4247_s23  ;;  %v3348_v55 = vmul.f32 %v5778_v19, %v3347_v42 }
 0xd78   :  { %v3196_v30 = vpop.permute.xlu1 %3195 }
 0xd79   :  { %v3223_v38 = vadd.f32 %v3216_v29, %v3204_v50  ;;  %v3203_v45 = vadd.f32 %v3196_v30, %v3178_v33  ;;  %v3349_v33 = vmul.f32 %v5724_v12, %v3347_v42  ;;  %v3406_v50 = vstv %s4287_s10  ;;  %v5999_v30 = vld [vmem:[#allocation10 + $0x8] sm:$0xff]  ;;  %s4306_s10 = sld [smem:[#allocation2 + $0x86]] }
 0xd7a   :  { %v3407_v8 = vmul.f32 %v5778_v19, %v3406_v50  ;;  %v3338_v42 = vstv %s4283_s1 }
 0xd7b   :  { %v3222_v26 = vadd.f32 %v3217_v34, %v3203_v45  ;;  %v3248_v41 = vadd.f32 %v3242_v43, %v3223_v38  ;;  %v3431_v34 = vstv %s4288_s11  ;;  %v3409_v38 = vmul.f32 %v5782_v6, %v3406_v50  ;;  %s4297_s11 = sld [smem:[#allocation6 + $0xe]] }
 0xd7c   :  { %v3238_v40 = vpop.permute.xlu1 %3237  ;;  %v3432_v45 = vmul.f32 %v5778_v19, %v3431_v34 }
 0xd7d   :  { %v3246_v47 = vadd.f32 %v3238_v40, %v3221_v20  ;;  %v3247_v31 = vadd.f32 %v3240_v60, %v3222_v26  ;;  %v5955_v46 = vadd.f32 %v3267_v5, %v3248_v41  ;;  %v3367_v20 = vstv %s4285_s12  ;;  %s4298_s12 = sld [smem:[#allocation2 + $0x7e]] }
 0xd7e   :  { %v3433_v26 = vmul.f32 %v5999_v30, %v3431_v34  ;;  %v3416_v40 = vrot.slane %v3409_v38, 1  ;;  %v3370_v54 = vmul.f32 %v5782_v6, %v3367_v20 }
 0xd7f   :  { %v5947_v49 = vadd.f32 %v3263_v48, %v3246_v47  ;;  %v5949_v7 = vadd.f32 %v3265_v15, %v3247_v31  ;;  %v3277_v24 = vsel %vm277_vm3, %v5955_v46, 0.0  ;;  %v3408_v48 = vmul.f32 %v5999_v30, %v3406_v50 }
 0xd80   :  { %v3438_v15 = vrot.slane %v3432_v45, 1  ;;  %v3439_v41 = vrot.slane %v3433_v26, 1  ;;  %v3475_v47 = vstv %s4290_s13  ;;  %v3368_v31 = vmul.f32 %v5778_v19, %v3367_v20  ;;  %s4301_s13 = sld [smem:[#allocation2 + $0x81]] }
 0xd81   :  { %v3274_v63 = vsel %vm273_vm2, %v5947_v49, 0.0  ;;  %v3275_v52 = vsel %vm273_vm2, %v5949_v7, 0.0  ;;  %v3414_v12 = vrot.slane %v3408_v48, 1  ;;  %v3340_v50 = vmul.f32 %v5999_v30, %v3338_v42 }
 0xd82   :  { %v3276_v18 = vadd.f32 %v3275_v52, %v3274_v63  ;;  %v3434_v63 = vmul.f32 %v5782_v6, %v3431_v34  ;;  %v3440_v52 = vsel %vm141_vm0, %v3438_v15, %v3439_v41  ;;  %v3387_v26 = vstv %s4286_s3 }
 0xd83   :  { %v3417_v5 = vsel %vm141_vm0, %v3414_v12, %v3416_v40  ;;  %v3390_v15 = vmul.f32 %v5782_v6, %v3387_v26 }
 0xd84   :  { %v3278_v35 = vadd.f32 %v3277_v24, %v3276_v18  ;;  %v3477_v18 = vmul.f32 %v5999_v30, %v3475_v47  ;;  %v3478_v24 = vmul.f32 %v5782_v6, %v3475_v47  ;;  %v3441_v32 = vrot.slane %v3434_v63, 1 }
 0xd86   :  { %3279 = vadd.xlane.f32.xlu0 %v3278_v35  ;;  %v3369_v35 = vmul.f32 %v5999_v30, %v3367_v20  ;;  %v3483_v51 = vrot.slane %v3477_v18, 2 }
 0xd96   :  { %s4390_s20 = spop %4389 }
 0xd97   :  { %s2810_s21 = smul.f32 0.0011961722, %s4390_s20  ;;  %s4263_s20 = sld [smem:[#allocation9 + $0xb]] }
 0xd99   :  { %s2811_s22 = sadd.f32 1e-05, %s2810_s21 }
 0xd9b   :  { %v2812_v4 = vstv %s2811_s22 }
 0xd9c   :  { %4452 = vrsqrt.f32 %v2812_v4  ;;  %3356 = vrot.lane.b32.xlu0 %v3349_v33, %s4563_s4  ;;  %v3485_v4 = vrot.slane %v3478_v24, 2  ;;  %v3339_v33 = vmul.f32 %v5778_v19, %v3338_v42  ;;  %v3397_v24 = vrot.slane %v3390_v15, 1 }
 0xda0   :  { %3420 = vrot.lane.b32.xlu0 %v3417_v5, %s4563_s4 }
 0xda4   :  { %3443 = vrot.lane.b32.xlu0 %v3440_v52, %s4564_s7 }
 0xda6   :  { %v4453_v37 = vpop.eup %4452 }
 0xda7   :  { %4391 = vpush %v4453_v37  ;;  %v3413_v37 = vrot.slane %v3407_v8, 1 }
 0xda8   :  { %4393 = vpush %v3036_v62  ;;  %3447 = vrot.lane.b32.xlu0 %v3441_v32, %s4564_s7  ;;  %v3486_v62 = vsel %vm211_vm1, %v3483_v51, %v3485_v4 }
 0xdac   :  { %3489 = vrot.lane.b32.xlu0 %v3486_v62, %s4563_s4 }
 0xdb0   :  { %3491 = vrot.lane.b32.xlu0 %v3485_v4, %s4563_s4 }
 0xdd8   :  { %s4392_s25 = spop %4391 }
 0xdd9   :  { %v2815_v39 = vstv %s4392_s25  ;;  %s4394_s26 = spop %4393 }
 0xdda   :  { %v2816_v0 = vmul.f32 %v2815_v39, %v5859_v36  ;;  %v2817_v14 = vmul.f32 %v2815_v39, %v5862_v57  ;;  %v2818_v1 = vmul.f32 %v2815_v39, %v5865_v16  ;;  %s3038_s27 = smul.f32 0.0011961722, %s4394_s26  ;;  %v3501_v39 = vmul.f32 %v5778_v19, %v3500_v53  ;;  %s4314_s26 = sld [smem:[#allocation2 + $0x88]] }
 0xddc   :  { %v2821_v44 = vmul.f32 %v2820_v3, %v2816_v0  ;;  %v2822_v10 = vmul.f32 %v2820_v3, %v2817_v14  ;;  %v2823_v13 = vmul.f32 %v2820_v3, %v2818_v1  ;;  %v3039_v23 = vstv %s3038_s27  ;;  %s4317_s27 = sld [smem:[#allocation2 + $0x8b]] }
 0xddd   :  { %v5965_v21 = vsub.f32 %v5841_v56, %v3039_v23  ;;  %v5968_v60 = vsub.f32 %v5843_v25, %v3039_v23  ;;  %v5971_v27 = vsub.f32 %v5849_v9, %v3039_v23  ;;  %v3502_v3 = vmul.f32 %v5999_v30, %v3500_v53 }
 0xdde   :  { %v2826_v36 = vadd.f32 %v2825_v11, %v2821_v44  ;;  %v2827_v2 = vadd.f32 %v2825_v11, %v2822_v10  ;;  %v2828_v57 = vadd.f32 %v2825_v11, %v2823_v13  ;;  %v3415_v0 = vsel %vm141_vm0, %v3413_v37, %v3414_v12 }
 0xddf   :  { %v3043_v16 = vmul.f32 %v5965_v21, %v5965_v21  ;;  %v3044_v17 = vmul.f32 %v5968_v60, %v5968_v60  ;;  %v3045_v59 = vmul.f32 %v5971_v27, %v5971_v27  ;;  %v3507_v14 = vrot.slane %v3501_v39, 2  ;;  %v6051_v39 = vld [vmem:[#allocation10] sm:$0xff] }
 0xde0   :  { %v2829_v56 = vmax.f32 %v2826_v36, 0.0  ;;  %v2830_v22 = vmax.f32 %v2827_v2, 0.0  ;;  %v2831_v28 = vmax.f32 %v2828_v57, 0.0  ;;  %v3508_v1 = vrot.slane %v3502_v3, 2 }
 0xde1   :  { %v3046_v25 = vsel %vm273_vm2, %v3043_v16, 0.0  ;;  %v3047_v9 = vsel %vm273_vm2, %v3044_v17, 0.0  ;;  %v3049_v29 = vsel %vm277_vm3, %v3045_v59, 0.0  ;;  %v3503_v11 = vmul.f32 %v5782_v6, %v3500_v53 }
 0xde2   :  { %4249 = vst.msk [vmem:[%s6340_s5 + $0xf0] sm:$0xff] %vm273_vm2, %v2829_v56  ;;  %4250 = vst.msk [vmem:[%s6340_s5 + $0xf8] sm:$0xff] %vm273_vm2, %v2830_v22  ;;  %v3048_v61 = vadd.f32 %v3047_v9, %v3046_v25  ;;  %v3476_v44 = vmul.f32 %v5778_v19, %v3475_v47  ;;  %v3509_v10 = vsel %vm211_vm1, %v3507_v14, %v3508_v1  ;;  %v6054_v14 = vld [vmem:[#allocation10 + $0x10] sm:$0xff] }
 0xde3   :  { %4251 = vst.msk [vmem:[%s6340_s5 + $0x100] sm:$0x3f] %vm277_vm3, %v2831_v28  ;;  %v3510_v13 = vrot.slane %v3503_v11, 2  ;;  %v3442_v23 = vsel %vm141_vm0, %v3439_v41, %v3441_v32  ;;  %3512 = vrot.lane.b32.xlu0 %v3509_v10, %s4564_s7  ;;  %v3456_v32 = vstv %s4289_s15  ;;  %s4277_s15 = sld [smem:[#allocation7 + $0xc]] }
 0xde4   :  { %v3050_v43 = vadd.f32 %v3049_v29, %v3048_v61  ;;  %v3482_v36 = vrot.slane %v3476_v44, 2  ;;  %v3458_v62 = vmul.f32 %v5999_v30, %v3456_v32 }
 0xde5   :  { %v3511_v2 = vsel %vm211_vm1, %v3508_v1, %v3510_v13  ;;  %v3459_v1 = vmul.f32 %v6054_v14, %v3456_v32 }
 0xde6   :  { %3051 = vadd.xlane.f32.xlu1 %v3050_v43  ;;  %v3484_v57 = vsel %vm211_vm1, %v3482_v36, %v3483_v51 }
 0xde7   :  { %3514 = vrot.lane.b32.xlu0 %v3511_v2, %s4564_s7  ;;  %v3466_v2 = vrot.slane %v3459_v1, 2 }
 0xdeb   :  { %3516 = vrot.lane.b32.xlu0 %v3510_v13, %s4564_s7  ;;  %v3464_v13 = vrot.slane %v3458_v62, 2 }
 0xdf7   :  { %3354 = vrot.lane.b32.xlu1 %v3348_v55, %s4563_s4  ;;  %v3342_v55 = vstv %s4282_s0 }
 0xdf8   :  { %v3343_v38 = vadd.f32 %v3342_v55, %v3339_v33  ;;  %v3344_v20 = vadd.f32 %v3342_v55, %v3340_v50 }
 0xdfb   :  { %3358 = vrot.lane.b32.xlu1 %v3350_v58, %s4563_s4  ;;  %v3341_v58 = vmul.f32 %v5782_v6, %v3338_v42 }
 0xdfd   :  { %v3345_v45 = vadd.f32 %v3342_v55, %v3341_v58 }
 0xdff   :  { %3374 = vrot.lane.b32.xlu1 %v3368_v31, %s4564_s7  ;;  %v3388_v31 = vmul.f32 %v5778_v19, %v3387_v26  ;;  %v3457_v19 = vmul.f32 %v6051_v39, %v3456_v32 }
 0xe03   :  { %3376 = vrot.lane.b32.xlu1 %v3369_v35, %s4564_s7  ;;  %v3394_v35 = vrot.slane %v3388_v31, 1 }
 0xe07   :  { %3378 = vrot.lane.b32.xlu1 %v3370_v54, %s4564_s7 }
 0xe0b   :  { %3418 = vrot.lane.b32.xlu1 %v3415_v0, %s4563_s4 }
 0xe0f   :  { %3422 = vrot.lane.b32.xlu1 %v3416_v40, %s4563_s4  ;;  %v3389_v40 = vmul.f32 %v5999_v30, %v3387_v26 }
 0xe11   :  { %v3395_v18 = vrot.slane %v3389_v40, 1 }
 0xe13   :  { %3445 = vrot.lane.b32.xlu1 %v3442_v23, %s4564_s7  ;;  %v6040_v25 = vpop.xlane.xlu0 %3279  ;;  %v3396_v4 = vsel %vm141_vm0, %v3394_v35, %v3395_v18  ;;  %v3398_v6 = vsel %vm141_vm0, %v3395_v18, %v3397_v24  ;;  %v3463_v23 = vrot.slane %v3457_v19, 2 }
 0xe14   :  { %v3281_v31 = vrot.slane %v6040_v25, 4 }
 0xe17   :  { %3487 = vrot.lane.b32.xlu1 %v3484_v57, %s4563_s4  ;;  %v3357_v43 = vpop.permute.xlu0 %3356 }
 0xe18   :  { %v3364_v63 = vadd.f32 %v3357_v43, %v3344_v20 }
 0xe1b   :  { %v3421_v48 = vpop.permute.xlu0 %3420 }
 0xe1f   :  { %v3444_v47 = vpop.permute.xlu0 %3443 }
 0xe23   :  { %v3448_v51 = vpop.permute.xlu0 %3447 }
 0xe27   :  { %v3490_v0 = vpop.permute.xlu0 %3489 }
 0xe2b   :  { %v3492_v57 = vpop.permute.xlu0 %3491 }
 0xe73   :  { %v3052_v16 = vpop.xlane.xlu1 %3051 }
 0xe74   :  { %v3053_v17 = vrot.slane %v3052_v16, 4 }
 0xe76   :  { %v3054_v59 = vadd.f32 %v3053_v17, %v3052_v16 }
 0xe77   :  { %v3355_v9 = vpop.permute.xlu1 %3354 }
 0xe78   :  { %v3055_v56 = vrot.slane %v3054_v59, 2  ;;  %v3363_v12 = vadd.f32 %v3355_v9, %v3343_v38 }
 0xe7a   :  { %v3056_v22 = vadd.f32 %v3055_v56, %v3054_v59  ;;  %v3465_v56 = vsel %vm211_vm1, %v3463_v23, %v3464_v13 }
 0xe7b   :  { %v3359_v29 = vpop.permute.xlu1 %3358 }
 0xe7c   :  { %v3057_v28 = vrot.slane %v3056_v22, 1  ;;  %v3365_v5 = vadd.f32 %v3359_v29, %v3345_v45 }
 0xe7e   :  { %v3058_v61 = vadd.f32 %v3057_v28, %v3056_v22  ;;  %v3467_v28 = vsel %vm211_vm1, %v3464_v13, %v3466_v2 }
 0xe7f   :  { %v3375_v34 = vpop.permute.xlu1 %3374 }
 0xe80   :  { %4395 = vpush %v3058_v61  ;;  %v3383_v52 = vadd.f32 %v3375_v34, %v3363_v12  ;;  %v3513_v61 = vpop.permute.xlu0 %3512 }
 0xe82   :  { %v3402_v37 = vadd.f32 %v3396_v4, %v3383_v52 }
 0xe83   :  { %v3377_v41 = vpop.permute.xlu1 %3376 }
 0xe84   :  { %v3384_v53 = vadd.f32 %v3377_v41, %v3364_v63  ;;  %v3515_v58 = vpop.permute.xlu0 %3514 }
 0xe86   :  { %v3403_v11 = vadd.f32 %v3398_v6, %v3384_v53 }
 0xe87   :  { %v3379_v8 = vpop.permute.xlu1 %3378 }
 0xe88   :  { %v3385_v54 = vadd.f32 %v3379_v8, %v3365_v5  ;;  %v3428_v59 = vadd.f32 %v3421_v48, %v3403_v11  ;;  %v3517_v48 = vpop.permute.xlu0 %3516  ;;  %v3282_v5 = vadd.f32 %v3281_v31, %v6040_v25 }
 0xe8a   :  { %v3404_v10 = vadd.f32 %v3397_v24, %v3385_v54  ;;  %v3283_v63 = vrot.slane %v3282_v5, 2  ;;  %v3075_v54 = vstv %s4263_s20 }
 0xe8b   :  { %v3419_v3 = vpop.permute.xlu1 %3418 }
 0xe8c   :  { %v3427_v44 = vadd.f32 %v3419_v3, %v3402_v37  ;;  %v3284_v18 = vadd.f32 %v3283_v63, %v3282_v5 }
 0xe8e   :  { %v3452_v16 = vadd.f32 %v3444_v47, %v3427_v44  ;;  %v3285_v24 = vrot.slane %v3284_v18, 1 }
 0xe8f   :  { %v3423_v36 = vpop.permute.xlu1 %3422 }
 0xe90   :  { %v3429_v17 = vadd.f32 %v3423_v36, %v3404_v10  ;;  %v3471_v42 = vadd.f32 %v3465_v56, %v3452_v16  ;;  %v3286_v32 = vadd.f32 %v3285_v24, %v3284_v18  ;;  %v3597_v16 = vstv %s4299_s29  ;;  %s4320_s29 = sld [smem:[#allocation2 + $0x8e]] }
 0xe91   :  { %v3600_v56 = vmul.f32 %v6054_v14, %v3597_v16  ;;  %v3750_v18 = vstv %s4306_s10 }
 0xe92   :  { %v3454_v22 = vadd.f32 %v3448_v51, %v3429_v17  ;;  %v3070_v51 = vstv %s4262_s19  ;;  %v3598_v17 = vmul.f32 %v6051_v39, %v3597_v16 }
 0xe93   :  { %v3446_v9 = vpop.permute.xlu1 %3445 }
 0xe94   :  { %v3473_v29 = vadd.f32 %v3466_v2, %v3454_v22  ;;  %v3453_v43 = vadd.f32 %v3446_v9, %v3428_v59  ;;  %v3599_v59 = vmul.f32 %v5999_v30, %v3597_v16  ;;  %v3656_v22 = vstv %s4302_s30  ;;  %s4321_s30 = sld [smem:[#allocation2 + $0x8f]] }
 0xe95   :  { %v3658_v9 = vmul.f32 %v5999_v30, %v3656_v22  ;;  %v3657_v5 = vmul.f32 %v6051_v39, %v3656_v22  ;;  %v3588_v16 = vstv %s4298_s12  ;;  %s4292_s12 = sld [smem:[#allocation7 + $0xd]] }
 0xe96   :  { %v3472_v55 = vadd.f32 %v3467_v28, %v3453_v43  ;;  %v3498_v50 = vadd.f32 %v3492_v57, %v3473_v29  ;;  %v3681_v28 = vstv %s4303_s6  ;;  %v3617_v43 = vstv %s4300_s8  ;;  %s4312_s6 = sld [smem:[#allocation6 + $0xf]] }
 0xe97   :  { %v3488_v33 = vpop.permute.xlu1 %3487  ;;  %v3682_v29 = vmul.f32 %v6051_v39, %v3681_v28  ;;  %v3620_v24 = vmul.f32 %v6054_v14, %v3617_v43  ;;  %s4313_s8 = sld [smem:[#allocation2 + $0x87]] }
 0xe98   :  { %v3496_v34 = vadd.f32 %v3488_v33, %v3471_v42  ;;  %v3497_v38 = vadd.f32 %v3490_v0, %v3472_v55  ;;  %v6067_v40 = vadd.f32 %v3517_v48, %v3498_v50  ;;  %v3683_v42 = vmul.f32 %v5999_v30, %v3681_v28 }
 0xe99   :  { %v3664_v55 = vrot.slane %v3658_v9, 1 }
 0xe9a   :  { %v6059_v45 = vadd.f32 %v3513_v61, %v3496_v34  ;;  %v6061_v20 = vadd.f32 %v3515_v58, %v3497_v38  ;;  %v3527_v41 = vsel %vm277_vm3, %v6067_v40, 0.0  ;;  %v3659_v61 = vmul.f32 %v6054_v14, %v3656_v22 }
 0xe9b   :  { %v3688_v58 = vrot.slane %v3682_v29, 1  ;;  %v3689_v50 = vrot.slane %v3683_v42, 1  ;;  %v3725_v34 = vstv %s4305_s9  ;;  %v3618_v38 = vmul.f32 %v6051_v39, %v3617_v43  ;;  %s4316_s9 = sld [smem:[#allocation2 + $0x8a]] }
 0xe9c   :  { %v3524_v26 = vsel %vm273_vm2, %v6059_v45, 0.0  ;;  %v3525_v12 = vsel %vm273_vm2, %v6061_v20, 0.0  ;;  %v3666_v33 = vrot.slane %v3659_v61, 1  ;;  %v3590_v22 = vmul.f32 %v5999_v30, %v3588_v16 }
 0xe9d   :  { %v3526_v15 = vadd.f32 %v3525_v12, %v3524_v26  ;;  %v3684_v26 = vmul.f32 %v6054_v14, %v3681_v28  ;;  %v3690_v12 = vsel %vm141_vm0, %v3688_v58, %v3689_v50  ;;  %v3637_v42 = vstv %s4301_s13  ;;  %s4293_s13 = sld [smem:[#allocation9 + $0xd]] }
 0xe9e   :  { %v3667_v48 = vsel %vm141_vm0, %v3664_v55, %v3666_v33  ;;  %v3640_v58 = vmul.f32 %v6054_v14, %v3637_v42 }
 0xe9f   :  { %v3528_v47 = vadd.f32 %v3527_v41, %v3526_v15  ;;  %v3727_v15 = vmul.f32 %v5999_v30, %v3725_v34  ;;  %v3728_v41 = vmul.f32 %v6054_v14, %v3725_v34  ;;  %v3691_v31 = vrot.slane %v3684_v26, 1 }
 0xea1   :  { %3529 = vadd.xlane.f32.xlu0 %v3528_v47  ;;  %v3619_v47 = vmul.f32 %v5999_v30, %v3617_v43  ;;  %v3733_v63 = vrot.slane %v3727_v15, 2 }
 0xeb1   :  { %s4396_s16 = spop %4395 }
 0xeb2   :  { %s3060_s17 = smul.f32 0.0011961722, %s4396_s16  ;;  %s4278_s16 = sld [smem:[#allocation9 + $0xc]] }
 0xeb4   :  { %s3061_s18 = sadd.f32 1e-05, %s3060_s17 }
 0xeb6   :  { %v3062_v52 = vstv %s3061_s18 }
 0xeb7   :  { %4454 = vrsqrt.f32 %v3062_v52  ;;  %3606 = vrot.lane.b32.xlu0 %v3599_v59, %s4563_s4  ;;  %v3735_v52 = vrot.slane %v3728_v41, 2  ;;  %v3589_v59 = vmul.f32 %v6051_v39, %v3588_v16  ;;  %v3647_v41 = vrot.slane %v3640_v58, 1 }
 0xebb   :  { %3670 = vrot.lane.b32.xlu0 %v3667_v48, %s4563_s4 }
 0xebf   :  { %3693 = vrot.lane.b32.xlu0 %v3690_v12, %s4564_s7 }
 0xec1   :  { %v4455_v35 = vpop.eup %4454 }
 0xec2   :  { %4397 = vpush %v4455_v35  ;;  %v3663_v35 = vrot.slane %v3657_v5, 1 }
 0xec3   :  { %4399 = vpush %v3286_v32  ;;  %3697 = vrot.lane.b32.xlu0 %v3691_v31, %s4564_s7  ;;  %v3736_v32 = vsel %vm211_vm1, %v3733_v63, %v3735_v52 }
 0xec7   :  { %3739 = vrot.lane.b32.xlu0 %v3736_v32, %s4563_s4 }
 0xecb   :  { %3741 = vrot.lane.b32.xlu0 %v3735_v52, %s4563_s4 }
 0xef3   :  { %s4398_s21 = spop %4397 }
 0xef4   :  { %v3065_v8 = vstv %s4398_s21  ;;  %s4400_s22 = spop %4399 }
 0xef5   :  { %v3066_v25 = vmul.f32 %v3065_v8, %v5965_v21  ;;  %v3067_v4 = vmul.f32 %v3065_v8, %v5968_v60  ;;  %v3068_v53 = vmul.f32 %v3065_v8, %v5971_v27  ;;  %s3288_s23 = smul.f32 0.0011961722, %s4400_s22  ;;  %v3751_v8 = vmul.f32 %v6051_v39, %v3750_v18 }
 0xef7   :  { %v3071_v37 = vmul.f32 %v3070_v51, %v3066_v25  ;;  %v3072_v6 = vmul.f32 %v3070_v51, %v3067_v4  ;;  %v3073_v62 = vmul.f32 %v3070_v51, %v3068_v53  ;;  %v3289_v19 = vstv %s3288_s23  ;;  %s4307_s23 = sld [smem:[#allocation7 + $0xe]] }
 0xef8   :  { %v6077_v3 = vsub.f32 %v5947_v49, %v3289_v19  ;;  %v6080_v0 = vsub.f32 %v5949_v7, %v3289_v19  ;;  %v6083_v1 = vsub.f32 %v5955_v46, %v3289_v19  ;;  %v3752_v51 = vmul.f32 %v5999_v30, %v3750_v18 }
 0xef9   :  { %v3076_v21 = vadd.f32 %v3075_v54, %v3071_v37  ;;  %v3077_v11 = vadd.f32 %v3075_v54, %v3072_v6  ;;  %v3078_v60 = vadd.f32 %v3075_v54, %v3073_v62  ;;  %v3665_v25 = vsel %vm141_vm0, %v3663_v35, %v3664_v55 }
 0xefa   :  { %v3293_v27 = vmul.f32 %v6077_v3, %v6077_v3  ;;  %v3294_v44 = vmul.f32 %v6080_v0, %v6080_v0  ;;  %v3295_v10 = vmul.f32 %v6083_v1, %v6083_v1  ;;  %v3757_v4 = vrot.slane %v3751_v8, 2 }
 0xefb   :  { %v3079_v49 = vmax.f32 %v3076_v21, 0.0  ;;  %v3080_v13 = vmax.f32 %v3077_v11, 0.0  ;;  %v3081_v23 = vmax.f32 %v3078_v60, 0.0  ;;  %v3758_v53 = vrot.slane %v3752_v51, 2 }
 0xefc   :  { %v3296_v7 = vsel %vm273_vm2, %v3293_v27, 0.0  ;;  %v3297_v46 = vsel %vm273_vm2, %v3294_v44, 0.0  ;;  %v3299_v2 = vsel %vm277_vm3, %v3295_v10, 0.0  ;;  %v3753_v54 = vmul.f32 %v6054_v14, %v3750_v18 }
 0xefd   :  { %4264 = vst.msk [vmem:[%s6340_s5 + $0x108] sm:$0xff] %vm273_vm2, %v3079_v49  ;;  %4265 = vst.msk [vmem:[%s6340_s5 + $0x110] sm:$0xff] %vm273_vm2, %v3080_v13  ;;  %v3298_v36 = vadd.f32 %v3297_v46, %v3296_v7  ;;  %v3726_v37 = vmul.f32 %v6051_v39, %v3725_v34  ;;  %v3759_v6 = vsel %vm211_vm1, %v3757_v4, %v3758_v53 }
 0xefe   :  { %4266 = vst.msk [vmem:[%s6340_s5 + $0x118] sm:$0x3f] %vm277_vm3, %v3081_v23  ;;  %v3760_v62 = vrot.slane %v3753_v54, 2  ;;  %v3692_v19 = vsel %vm141_vm0, %v3689_v50, %v3691_v31  ;;  %3762 = vrot.lane.b32.xlu0 %v3759_v6, %s4564_s7  ;;  %v3706_v31 = vstv %s4304_s14 }
 0xeff   :  { %v3300_v57 = vadd.f32 %v3299_v2, %v3298_v36  ;;  %v3732_v21 = vrot.slane %v3726_v37, 2  ;;  %v3708_v8 = vmul.f32 %v5999_v30, %v3706_v31  ;;  %v3707_v51 = vmul.f32 %v6051_v39, %v3706_v31 }
 0xf00   :  { %v3761_v11 = vsel %vm211_vm1, %v3758_v53, %v3760_v62  ;;  %v3709_v53 = vmul.f32 %v6054_v14, %v3706_v31 }
 0xf01   :  { %3301 = vadd.xlane.f32.xlu1 %v3300_v57  ;;  %v3734_v60 = vsel %vm211_vm1, %v3732_v21, %v3733_v63 }
 0xf02   :  { %3764 = vrot.lane.b32.xlu0 %v3761_v11, %s4564_s7  ;;  %v3716_v11 = vrot.slane %v3709_v53, 2 }
 0xf06   :  { %3766 = vrot.lane.b32.xlu0 %v3760_v62, %s4564_s7  ;;  %v3714_v62 = vrot.slane %v3708_v8, 2 }
 0xf12   :  { %3604 = vrot.lane.b32.xlu1 %v3598_v17, %s4563_s4  ;;  %v3592_v17 = vstv %s4297_s11 }
 0xf13   :  { %v3593_v61 = vadd.f32 %v3592_v17, %v3589_v59  ;;  %v3594_v43 = vadd.f32 %v3592_v17, %v3590_v22 }
 0xf16   :  { %3608 = vrot.lane.b32.xlu1 %v3600_v56, %s4563_s4  ;;  %v3591_v56 = vmul.f32 %v6054_v14, %v3588_v16 }
 0xf18   :  { %v3595_v29 = vadd.f32 %v3592_v17, %v3591_v56 }
 0xf1a   :  { %3624 = vrot.lane.b32.xlu1 %v3618_v38, %s4564_s7  ;;  %v3638_v38 = vmul.f32 %v6051_v39, %v3637_v42 }
 0xf1e   :  { %3626 = vrot.lane.b32.xlu1 %v3619_v47, %s4564_s7  ;;  %v3644_v47 = vrot.slane %v3638_v38, 1 }
 0xf22   :  { %3628 = vrot.lane.b32.xlu1 %v3620_v24, %s4564_s7 }
 0xf26   :  { %3668 = vrot.lane.b32.xlu1 %v3665_v25, %s4563_s4 }
 0xf2a   :  { %3672 = vrot.lane.b32.xlu1 %v3666_v33, %s4563_s4  ;;  %v3639_v33 = vmul.f32 %v5999_v30, %v3637_v42 }
 0xf2c   :  { %v3645_v15 = vrot.slane %v3639_v33, 1 }
 0xf2e   :  { %3695 = vrot.lane.b32.xlu1 %v3692_v19, %s4564_s7  ;;  %v6150_v7 = vpop.xlane.xlu0 %3529  ;;  %v3646_v52 = vsel %vm141_vm0, %v3644_v47, %v3645_v15  ;;  %v3648_v32 = vsel %vm141_vm0, %v3645_v15, %v3647_v41  ;;  %v3713_v19 = vrot.slane %v3707_v51, 2 }
 0xf2f   :  { %v3531_v38 = vrot.slane %v6150_v7, 4 }
 0xf32   :  { %3737 = vrot.lane.b32.xlu1 %v3734_v60, %s4563_s4  ;;  %v3607_v57 = vpop.permute.xlu0 %3606 }
 0xf33   :  { %v3614_v26 = vadd.f32 %v3607_v57, %v3594_v43 }
 0xf36   :  { %v3671_v9 = vpop.permute.xlu0 %3670 }
 0xf3a   :  { %v3694_v34 = vpop.permute.xlu0 %3693 }
 0xf3e   :  { %v3698_v63 = vpop.permute.xlu0 %3697 }
 0xf42   :  { %v3740_v4 = vpop.permute.xlu0 %3739 }
 0xf46   :  { %v3742_v60 = vpop.permute.xlu0 %3741 }
 0xf8e   :  { %v3302_v27 = vpop.xlane.xlu1 %3301 }
 0xf8f   :  { %v3303_v44 = vrot.slane %v3302_v27, 4 }
 0xf91   :  { %v3304_v10 = vadd.f32 %v3303_v44, %v3302_v27 }
 0xf92   :  { %v3605_v46 = vpop.permute.xlu1 %3604 }
 0xf93   :  { %v3305_v49 = vrot.slane %v3304_v10, 2  ;;  %v3613_v55 = vadd.f32 %v3605_v46, %v3593_v61 }
 0xf95   :  { %v3306_v13 = vadd.f32 %v3305_v49, %v3304_v10  ;;  %v3715_v49 = vsel %vm211_vm1, %v3713_v19, %v3714_v62 }
 0xf96   :  { %v3609_v2 = vpop.permute.xlu1 %3608 }
 0xf97   :  { %v3307_v23 = vrot.slane %v3306_v13, 1  ;;  %v3615_v48 = vadd.f32 %v3609_v2, %v3595_v29 }
 0xf99   :  { %v3308_v36 = vadd.f32 %v3307_v23, %v3306_v13  ;;  %v3717_v23 = vsel %vm211_vm1, %v3714_v62, %v3716_v11 }
 0xf9a   :  { %v3625_v28 = vpop.permute.xlu1 %3624 }
 0xf9b   :  { %4401 = vpush %v3308_v36  ;;  %v3633_v12 = vadd.f32 %v3625_v28, %v3613_v55  ;;  %v3763_v36 = vpop.permute.xlu0 %3762 }
 0xf9d   :  { %v3652_v35 = vadd.f32 %v3646_v52, %v3633_v12 }
 0xf9e   :  { %v3627_v50 = vpop.permute.xlu1 %3626 }
 0xf9f   :  { %v3634_v18 = vadd.f32 %v3627_v50, %v3614_v26  ;;  %v3765_v56 = vpop.permute.xlu0 %3764 }
 0xfa1   :  { %v3653_v54 = vadd.f32 %v3648_v32, %v3634_v18 }
 0xfa2   :  { %v3629_v5 = vpop.permute.xlu1 %3628 }
 0xfa3   :  { %v3635_v24 = vadd.f32 %v3629_v5, %v3615_v48  ;;  %v3678_v10 = vadd.f32 %v3671_v9, %v3653_v54  ;;  %v3767_v9 = vpop.permute.xlu0 %3766  ;;  %v3532_v48 = vadd.f32 %v3531_v38, %v6150_v7 }
 0xfa5   :  { %v3654_v6 = vadd.f32 %v3647_v41, %v3635_v24  ;;  %v3533_v26 = vrot.slane %v3532_v48, 2  ;;  %v3325_v24 = vstv %s4278_s16 }
 0xfa6   :  { %v3669_v25 = vpop.permute.xlu1 %3668 }
 0xfa7   :  { %v3677_v37 = vadd.f32 %v3669_v25, %v3652_v35  ;;  %v3534_v15 = vadd.f32 %v3533_v26, %v3532_v48 }
 0xfa9   :  { %v3702_v27 = vadd.f32 %v3694_v34, %v3677_v37  ;;  %v3535_v41 = vrot.slane %v3534_v15, 1 }
 0xfaa   :  { %v3673_v21 = vpop.permute.xlu1 %3672 }
 0xfab   :  { %v3679_v44 = vadd.f32 %v3673_v21, %v3654_v6  ;;  %v3721_v16 = vadd.f32 %v3715_v49, %v3702_v27  ;;  %v3536_v31 = vadd.f32 %v3535_v41, %v3534_v15  ;;  %v3847_v27 = vstv %s4314_s26 }
 0xfac   :  { %v3850_v49 = vmul.f32 %v6054_v14, %v3847_v27  ;;  %v4000_v15 = vstv %s4321_s30 }
 0xfad   :  { %v3704_v13 = vadd.f32 %v3698_v63, %v3679_v44  ;;  %v3320_v63 = vstv %s4277_s15  ;;  %v3848_v44 = vmul.f32 %v6051_v39, %v3847_v27 }
 0xfae   :  { %v3696_v46 = vpop.permute.xlu1 %3695 }
 0xfaf   :  { %v3723_v2 = vadd.f32 %v3716_v11, %v3704_v13  ;;  %v3703_v57 = vadd.f32 %v3696_v46, %v3678_v10  ;;  %v3849_v10 = vmul.f32 %v5999_v30, %v3847_v27  ;;  %v3906_v13 = vstv %s4317_s27 }
 0xfb0   :  { %v3908_v46 = vmul.f32 %v5999_v30, %v3906_v13  ;;  %v3907_v48 = vmul.f32 %v6051_v39, %v3906_v13  ;;  %v3838_v27 = vstv %s4313_s8 }
 0xfb1   :  { %v3722_v17 = vadd.f32 %v3717_v23, %v3703_v57  ;;  %v3748_v22 = vadd.f32 %v3742_v60, %v3723_v2  ;;  %v3931_v23 = vstv %s4318_s2  ;;  %v3867_v57 = vstv %s4315_s28 }
 0xfb2   :  { %v3738_v59 = vpop.permute.xlu1 %3737  ;;  %v3932_v2 = vmul.f32 %v6051_v39, %v3931_v23  ;;  %v3870_v41 = vmul.f32 %v6054_v14, %v3867_v57 }
 0xfb3   :  { %v3746_v28 = vadd.f32 %v3738_v59, %v3721_v16  ;;  %v3747_v61 = vadd.f32 %v3740_v4, %v3722_v17  ;;  %v6173_v33 = vadd.f32 %v3767_v9, %v3748_v22  ;;  %v3933_v16 = vmul.f32 %v5999_v30, %v3931_v23 }
 0xfb4   :  { %v3914_v17 = vrot.slane %v3908_v46, 1 }
 0xfb5   :  { %v6165_v29 = vadd.f32 %v3763_v36, %v3746_v28  ;;  %v6167_v43 = vadd.f32 %v3765_v56, %v3747_v61  ;;  %v3777_v50 = vsel %vm277_vm3, %v6173_v33, 0.0  ;;  %v3909_v36 = vmul.f32 %v6054_v14, %v3906_v13 }
 0xfb6   :  { %v3938_v56 = vrot.slane %v3932_v2, 1  ;;  %v3939_v22 = vrot.slane %v3933_v16, 1  ;;  %v3975_v28 = vstv %s4320_s29  ;;  %v3868_v61 = vmul.f32 %v6051_v39, %v3867_v57 }
 0xfb7   :  { %v3774_v42 = vsel %vm273_vm2, %v6165_v29, 0.0  ;;  %v3775_v55 = vsel %vm273_vm2, %v6167_v43, 0.0  ;;  %v3916_v59 = vrot.slane %v3909_v36, 1  ;;  %v3840_v13 = vmul.f32 %v5999_v30, %v3838_v27 }
 0xfb8   :  { %v3776_v58 = vadd.f32 %v3775_v55, %v3774_v42  ;;  %v3934_v42 = vmul.f32 %v6054_v14, %v3931_v23  ;;  %v3940_v55 = vsel %vm141_vm0, %v3938_v56, %v3939_v22  ;;  %v3887_v16 = vstv %s4316_s9 }
 0xfb9   :  { %v3917_v9 = vsel %vm141_vm0, %v3914_v17, %v3916_v59  ;;  %v3890_v56 = vmul.f32 %v6054_v14, %v3887_v16 }
 0xfba   :  { %v3778_v34 = vadd.f32 %v3777_v50, %v3776_v58  ;;  %v3977_v58 = vmul.f32 %v5999_v30, %v3975_v28  ;;  %v3978_v50 = vmul.f32 %v6054_v14, %v3975_v28  ;;  %v3941_v38 = vrot.slane %v3934_v42, 1 }
 0xfbc   :  { %3779 = vadd.xlane.f32.xlu0 %v3778_v34  ;;  %v3869_v34 = vmul.f32 %v5999_v30, %v3867_v57  ;;  %v3983_v26 = vrot.slane %v3977_v58, 2 }
 0xfcc   :  { %s4402_s0 = spop %4401 }
 0xfcd   :  { %s3310_s1 = smul.f32 0.0011961722, %s4402_s0 }
 0xfcf   :  { %s3311_s3 = sadd.f32 1e-05, %s3310_s1 }
 0xfd1   :  { %v3312_v12 = vstv %s3311_s3 }
 0xfd2   :  { %4456 = vrsqrt.f32 %v3312_v12  ;;  %3856 = vrot.lane.b32.xlu0 %v3849_v10, %s4563_s4  ;;  %v3985_v12 = vrot.slane %v3978_v50, 2  ;;  %v3839_v10 = vmul.f32 %v6051_v39, %v3838_v27  ;;  %v3897_v50 = vrot.slane %v3890_v56, 1 }
 0xfd6   :  { %3920 = vrot.lane.b32.xlu0 %v3917_v9, %s4563_s4 }
 0xfda   :  { %3943 = vrot.lane.b32.xlu0 %v3940_v55, %s4564_s7 }
 0xfdc   :  { %v4457_v47 = vpop.eup %4456 }
 0xfdd   :  { %4403 = vpush %v4457_v47  ;;  %v3913_v47 = vrot.slane %v3907_v48, 1 }
 0xfde   :  { %4405 = vpush %v3536_v31  ;;  %3947 = vrot.lane.b32.xlu0 %v3941_v38, %s4564_s7  ;;  %v3986_v31 = vsel %vm211_vm1, %v3983_v26, %v3985_v12 }
 0xfe2   :  { %3989 = vrot.lane.b32.xlu0 %v3986_v31, %s4563_s4  ;;  %v4479_v31 = vld [vmem:[#allocation10 + $0x8] sm:$0xff] }
 0xfe6   :  { %3991 = vrot.lane.b32.xlu0 %v3985_v12, %s4563_s4 }
0x100e   :  { %s4404_s17 = spop %4403 }
0x100f   :  { %v3315_v5 = vstv %s4404_s17  ;;  %s4406_s18 = spop %4405 }
0x1010   :  { %v3316_v7 = vmul.f32 %v3315_v5, %v6077_v3  ;;  %v3317_v52 = vmul.f32 %v3315_v5, %v6080_v0  ;;  %v3318_v18 = vmul.f32 %v3315_v5, %v6083_v1  ;;  %s3538_s19 = smul.f32 0.0011961722, %s4406_s18  ;;  %v4001_v5 = vmul.f32 %v6051_v39, %v4000_v15 }
0x1012   :  { %v3321_v35 = vmul.f32 %v3320_v63, %v3316_v7  ;;  %v3322_v32 = vmul.f32 %v3320_v63, %v3317_v52  ;;  %v3323_v8 = vmul.f32 %v3320_v63, %v3318_v18  ;;  %v3539_v51 = vstv %s3538_s19 }
0x1013   :  { %v6183_v25 = vsub.f32 %v6059_v45, %v3539_v51  ;;  %v6186_v4 = vsub.f32 %v6061_v20, %v3539_v51  ;;  %v6189_v53 = vsub.f32 %v6067_v40, %v3539_v51  ;;  %v4002_v63 = vmul.f32 %v5999_v30, %v4000_v15 }
0x1014   :  { %v3326_v3 = vadd.f32 %v3325_v24, %v3321_v35  ;;  %v3327_v54 = vadd.f32 %v3325_v24, %v3322_v32  ;;  %v3328_v0 = vadd.f32 %v3325_v24, %v3323_v8  ;;  %v3915_v7 = vsel %vm141_vm0, %v3913_v47, %v3914_v17 }
0x1015   :  { %v3543_v1 = vmul.f32 %v6183_v25, %v6183_v25  ;;  %v3544_v37 = vmul.f32 %v6186_v4, %v6186_v4  ;;  %v3545_v6 = vmul.f32 %v6189_v53, %v6189_v53  ;;  %v4007_v52 = vrot.slane %v4001_v5, 2 }
0x1016   :  { %v3329_v45 = vmax.f32 %v3326_v3, 0.0  ;;  %v3330_v62 = vmax.f32 %v3327_v54, 0.0  ;;  %v3331_v19 = vmax.f32 %v3328_v0, 0.0  ;;  %v4008_v18 = vrot.slane %v4002_v63, 2 }
0x1017   :  { %v3546_v20 = vsel %vm273_vm2, %v3543_v1, 0.0  ;;  %v3547_v40 = vsel %vm273_vm2, %v3544_v37, 0.0  ;;  %v3549_v11 = vsel %vm277_vm3, %v3545_v6, 0.0  ;;  %v4003_v24 = vmul.f32 %v6054_v14, %v4000_v15 }
0x1018   :  { %4279 = vst.msk [vmem:[%s6340_s5 + $0x120] sm:$0xff] %vm273_vm2, %v3329_v45  ;;  %4280 = vst.msk [vmem:[%s6340_s5 + $0x128] sm:$0xff] %vm273_vm2, %v3330_v62  ;;  %v3548_v21 = vadd.f32 %v3547_v40, %v3546_v20  ;;  %v3976_v35 = vmul.f32 %v6051_v39, %v3975_v28  ;;  %v4009_v32 = vsel %vm211_vm1, %v4007_v52, %v4008_v18 }
0x1019   :  { %4281 = vst.msk [vmem:[%s6340_s5 + $0x130] sm:$0x3f] %vm277_vm3, %v3331_v19  ;;  %v4010_v8 = vrot.slane %v4003_v24, 2  ;;  %v3942_v51 = vsel %vm141_vm0, %v3939_v22, %v3941_v38  ;;  %4012 = vrot.lane.b32.xlu0 %v4009_v32, %s4564_s7 }
0x101a   :  { %v3550_v60 = vadd.f32 %v3549_v11, %v3548_v21  ;;  %v3982_v3 = vrot.slane %v3976_v35, 2 }
0x101b   :  { %v4011_v54 = vsel %vm211_vm1, %v4008_v18, %v4010_v8 }
0x101c   :  { %3551 = vadd.xlane.f32.xlu1 %v3550_v60  ;;  %v3984_v0 = vsel %vm211_vm1, %v3982_v3, %v3983_v26 }
0x101d   :  { %4014 = vrot.lane.b32.xlu0 %v4011_v54, %s4564_s7 }
0x1021   :  { %4016 = vrot.lane.b32.xlu0 %v4010_v8, %s4564_s7 }
0x102d   :  { %3854 = vrot.lane.b32.xlu1 %v3848_v44, %s4563_s4  ;;  %v3842_v44 = vstv %s4312_s6 }
0x102e   :  { %v3843_v36 = vadd.f32 %v3842_v44, %v3839_v10  ;;  %v3844_v57 = vadd.f32 %v3842_v44, %v3840_v13 }
0x1031   :  { %3858 = vrot.lane.b32.xlu1 %v3850_v49, %s4563_s4  ;;  %v3841_v49 = vmul.f32 %v6054_v14, %v3838_v27 }
0x1033   :  { %v3845_v2 = vadd.f32 %v3842_v44, %v3841_v49 }
0x1035   :  { %3874 = vrot.lane.b32.xlu1 %v3868_v61, %s4564_s7  ;;  %v3888_v61 = vmul.f32 %v6051_v39, %v3887_v16 }
0x1039   :  { %3876 = vrot.lane.b32.xlu1 %v3869_v34, %s4564_s7  ;;  %v3894_v34 = vrot.slane %v3888_v61, 1 }
0x103d   :  { %3878 = vrot.lane.b32.xlu1 %v3870_v41, %s4564_s7 }
0x1041   :  { %3918 = vrot.lane.b32.xlu1 %v3915_v7, %s4563_s4 }
0x1045   :  { %3922 = vrot.lane.b32.xlu1 %v3916_v59, %s4563_s4  ;;  %v3889_v59 = vmul.f32 %v5999_v30, %v3887_v16 }
0x1047   :  { %v3895_v58 = vrot.slane %v3889_v59, 1 }
0x1049   :  { %3945 = vrot.lane.b32.xlu1 %v3942_v51, %s4564_s7  ;;  %v6256_v20 = vpop.xlane.xlu0 %3779  ;;  %v3896_v12 = vsel %vm141_vm0, %v3894_v34, %v3895_v58  ;;  %v3898_v47 = vsel %vm141_vm0, %v3895_v58, %v3897_v50 }
0x104d   :  { %3987 = vrot.lane.b32.xlu1 %v3984_v0, %s4563_s4  ;;  %v3857_v60 = vpop.permute.xlu0 %3856  ;;  %s4319_s4 = sld [smem:[#allocation2 + $0x8d]] }
0x104e   :  { %v3864_v42 = vadd.f32 %v3857_v60, %v3844_v57 }
0x1051   :  { %v3921_v46 = vpop.permute.xlu0 %3920 }
0x1053   :  { %v3956_v38 = vstv %s4319_s4 }
0x1054   :  { %v3958_v5 = vmul.f32 %v4479_v31, %v3956_v38  ;;  %v3957_v63 = vmul.f32 %v6051_v39, %v3956_v38  ;;  %v3959_v18 = vmul.f32 %v6054_v14, %v3956_v38  ;;  %v3570_v38 = vstv %s4292_s12 }
0x1055   :  { %v3944_v28 = vpop.permute.xlu0 %3943 }
0x1056   :  { %v3964_v8 = vrot.slane %v3958_v5, 2  ;;  %v3963_v51 = vrot.slane %v3957_v63, 2  ;;  %v3966_v54 = vrot.slane %v3959_v18, 2 }
0x1058   :  { %v3967_v39 = vsel %vm211_vm1, %v3964_v8, %v3966_v54 }
0x1059   :  { %v3948_v26 = vpop.permute.xlu0 %3947 }
0x105d   :  { %v3990_v52 = vpop.permute.xlu0 %3989 }
0x1061   :  { %v3992_v0 = vpop.permute.xlu0 %3991 }
0x10a9   :  { %v3552_v1 = vpop.xlane.xlu1 %3551 }
0x10aa   :  { %v3553_v37 = vrot.slane %v3552_v1, 4 }
0x10ac   :  { %v3554_v6 = vadd.f32 %v3553_v37, %v3552_v1 }
0x10ad   :  { %v3855_v40 = vpop.permute.xlu1 %3854 }
0x10ae   :  { %v3555_v45 = vrot.slane %v3554_v6, 2  ;;  %v3863_v17 = vadd.f32 %v3855_v40, %v3843_v36  ;;  %v4013_v40 = vpop.permute.xlu0 %4012 }
0x10b0   :  { %v3556_v62 = vadd.f32 %v3555_v45, %v3554_v6  ;;  %v3965_v45 = vsel %vm211_vm1, %v3963_v51, %v3964_v8 }
0x10b1   :  { %v3859_v11 = vpop.permute.xlu1 %3858 }
0x10b2   :  { %v3557_v19 = vrot.slane %v3556_v62, 1  ;;  %v3865_v9 = vadd.f32 %v3859_v11, %v3845_v2  ;;  %v4015_v44 = vpop.permute.xlu0 %4014 }
0x10b4   :  { %v3558_v21 = vadd.f32 %v3557_v19, %v3556_v62 }
0x10b5   :  { %v3875_v23 = vpop.permute.xlu1 %3874 }
0x10b6   :  { %4407 = vpush %v3558_v21  ;;  %v3883_v55 = vadd.f32 %v3875_v23, %v3863_v17 }
0x10b8   :  { %v3902_v30 = vadd.f32 %v3896_v12, %v3883_v55  ;;  %v3575_v12 = vstv %s4293_s13 }
0x10b9   :  { %v3877_v22 = vpop.permute.xlu1 %3876 }
0x10ba   :  { %v3884_v15 = vadd.f32 %v3877_v22, %v3864_v42  ;;  %v3781_v22 = vrot.slane %v6256_v20, 4 }
0x10bc   :  { %v3903_v24 = vadd.f32 %v3898_v47, %v3884_v15 }
0x10bd   :  { %v3879_v48 = vpop.permute.xlu1 %3878 }
0x10be   :  { %v3885_v41 = vadd.f32 %v3879_v48, %v3865_v9  ;;  %v3928_v6 = vadd.f32 %v3921_v46, %v3903_v24  ;;  %v4017_v46 = vpop.permute.xlu0 %4016 }
0x10c0   :  { %v3904_v32 = vadd.f32 %v3897_v50, %v3885_v41 }
0x10c1   :  { %v3919_v7 = vpop.permute.xlu1 %3918 }
0x10c2   :  { %v3927_v35 = vadd.f32 %v3919_v7, %v3902_v30 }
0x10c4   :  { %v3952_v1 = vadd.f32 %v3944_v28, %v3927_v35  ;;  %v3782_v28 = vadd.f32 %v3781_v22, %v6256_v20 }
0x10c5   :  { %v3923_v3 = vpop.permute.xlu1 %3922 }
0x10c6   :  { %v3929_v37 = vadd.f32 %v3923_v3, %v3904_v32  ;;  %v3971_v11 = vadd.f32 %v3965_v45, %v3952_v1  ;;  %v3783_v61 = vrot.slane %v3782_v28, 2 }
0x10c8   :  { %v3954_v62 = vadd.f32 %v3948_v26, %v3929_v37  ;;  %v3784_v42 = vadd.f32 %v3783_v61, %v3782_v28 }
0x10c9   :  { %v3946_v19 = vpop.permute.xlu1 %3945 }
0x10ca   :  { %v3973_v21 = vadd.f32 %v3966_v54, %v3954_v62  ;;  %v3953_v14 = vadd.f32 %v3946_v19, %v3928_v6  ;;  %v3785_v55 = vrot.slane %v3784_v42, 1 }
0x10cc   :  { %v3972_v60 = vadd.f32 %v3967_v39, %v3953_v14  ;;  %v3998_v10 = vadd.f32 %v3992_v0, %v3973_v21  ;;  %v3786_v50 = vadd.f32 %v3785_v55, %v3784_v42 }
0x10cd   :  { %v3988_v27 = vpop.permute.xlu1 %3987 }
0x10ce   :  { %v3996_v49 = vadd.f32 %v3988_v27, %v3971_v11  ;;  %v3997_v13 = vadd.f32 %v3990_v52, %v3972_v60  ;;  %v6278_v16 = vadd.f32 %v4017_v46, %v3998_v10  ;;  %v3820_v10 = vstv %s4307_s23 }
0x10d0   :  { %v6270_v23 = vadd.f32 %v4013_v40, %v3996_v49  ;;  %v6272_v36 = vadd.f32 %v4015_v44, %v3997_v13  ;;  %v4027_v59 = vsel %vm277_vm3, %v6278_v16, 0.0 }
0x10d2   :  { %v4024_v2 = vsel %vm273_vm2, %v6270_v23, 0.0  ;;  %v4025_v57 = vsel %vm273_vm2, %v6272_v36, 0.0 }
0x10d3   :  { %v4026_v17 = vadd.f32 %v4025_v57, %v4024_v2  ;;  %v3825_v2 = vstv %s4308_s24 }
0x10d5   :  { %v4028_v56 = vadd.f32 %v4027_v59, %v4026_v17 }
0x10d7   :  { %4029 = vadd.xlane.f32.xlu0 %v4028_v56 }
0x10e7   :  { %s4408_s7 = spop %4407 }
0x10e8   :  { %s3560_s10 = smul.f32 0.0011961722, %s4408_s7 }
0x10ea   :  { %s3561_s11 = sadd.f32 1e-05, %s3560_s10  ;;  %s4322_s10 = sld [smem:[#allocation7 + $0xf]] }
0x10ec   :  { %v3562_v9 = vstv %s3561_s11  ;;  %s4323_s11 = sld [smem:[#allocation9 + $0xf]] }
0x10ed   :  { %4458 = vrsqrt.f32 %v3562_v9 }
0x10f7   :  { %v4459_v58 = vpop.eup %4458 }
0x10f8   :  { %4409 = vpush %v4459_v58 }
0x10f9   :  { %4411 = vpush %v3786_v50 }
0x1129   :  { %s4410_s14 = spop %4409 }
0x112a   :  { %v3565_v34 = vstv %s4410_s14  ;;  %s4412_s0 = spop %4411 }
0x112b   :  { %v3566_v20 = vmul.f32 %v3565_v34, %v6183_v25  ;;  %v3567_v48 = vmul.f32 %v3565_v34, %v6186_v4  ;;  %v3568_v26 = vmul.f32 %v3565_v34, %v6189_v53  ;;  %s3788_s1 = smul.f32 0.0011961722, %s4412_s0 }
0x112d   :  { %v3571_v15 = vmul.f32 %v3570_v38, %v3566_v20  ;;  %v3572_v41 = vmul.f32 %v3570_v38, %v3567_v48  ;;  %v3573_v30 = vmul.f32 %v3570_v38, %v3568_v26  ;;  %v3789_v47 = vstv %s3788_s1 }
0x112e   :  { %v3790_v31 = vsub.f32 %v6165_v29, %v3789_v47  ;;  %v3791_v5 = vsub.f32 %v6167_v43, %v3789_v47  ;;  %v3792_v63 = vsub.f32 %v6173_v33, %v3789_v47 }
0x112f   :  { %v3576_v7 = vadd.f32 %v3575_v12, %v3571_v15  ;;  %v3577_v52 = vadd.f32 %v3575_v12, %v3572_v41  ;;  %v3578_v18 = vadd.f32 %v3575_v12, %v3573_v30 }
0x1130   :  { %v3793_v25 = vmul.f32 %v3790_v31, %v3790_v31  ;;  %v3794_v24 = vmul.f32 %v3791_v5, %v3791_v5  ;;  %v3795_v4 = vmul.f32 %v3792_v63, %v3792_v63 }
0x1131   :  { %v3579_v35 = vmax.f32 %v3576_v7, 0.0  ;;  %v3580_v53 = vmax.f32 %v3577_v52, 0.0  ;;  %v3581_v32 = vmax.f32 %v3578_v18, 0.0 }
0x1132   :  { %v3796_v8 = vsel %vm273_vm2, %v3793_v25, 0.0  ;;  %v3797_v51 = vsel %vm273_vm2, %v3794_v24, 0.0  ;;  %v3799_v43 = vsel %vm277_vm3, %v3795_v4, 0.0  ;;  %v4070_v25 = vstv %s4322_s10 }
0x1133   :  { %4294 = vst.msk [vmem:[%s6340_s5 + $0x138] sm:$0xff] %vm273_vm2, %v3579_v35  ;;  %4295 = vst.msk [vmem:[%s6340_s5 + $0x140] sm:$0xff] %vm273_vm2, %v3580_v53  ;;  %v3798_v29 = vadd.f32 %v3797_v51, %v3796_v8  ;;  %v4075_v53 = vstv %s4323_s11 }
0x1134   :  { %4296 = vst.msk [vmem:[%s6340_s5 + $0x148] sm:$0x3f] %vm277_vm3, %v3581_v32 }
0x1135   :  { %v3800_v33 = vadd.f32 %v3799_v43, %v3798_v29 }
0x1137   :  { %3801 = vadd.xlane.f32.xlu1 %v3800_v33 }
0x1164   :  { %v4030_v62 = vpop.xlane.xlu0 %4029 }
0x1165   :  { %v4031_v39 = vrot.slane %v4030_v62, 4 }
0x1167   :  { %v4032_v19 = vadd.f32 %v4031_v39, %v4030_v62 }
0x1169   :  { %v4033_v40 = vrot.slane %v4032_v19, 2 }
0x116b   :  { %v4034_v14 = vadd.f32 %v4033_v40, %v4032_v19 }
0x116d   :  { %v4035_v11 = vrot.slane %v4034_v14, 1 }
0x116f   :  { %v4036_v27 = vadd.f32 %v4035_v11, %v4034_v14 }
0x11c4   :  { %v3802_v3 = vpop.xlane.xlu1 %3801 }
0x11c5   :  { %v3803_v54 = vrot.slane %v3802_v3, 4 }
0x11c7   :  { %v3804_v0 = vadd.f32 %v3803_v54, %v3802_v3 }
0x11c9   :  { %v3805_v1 = vrot.slane %v3804_v0, 2 }
0x11cb   :  { %v3806_v37 = vadd.f32 %v3805_v1, %v3804_v0 }
0x11cd   :  { %v3807_v6 = vrot.slane %v3806_v37, 1 }
0x11cf   :  { %v3808_v45 = vadd.f32 %v3807_v6, %v3806_v37 }
0x11d1   :  { %4413 = vpush %v3808_v45 }
0x1202   :  { %s4414_s20 = spop %4413 }
0x1203   :  { %s3810_s21 = smul.f32 0.0011961722, %s4414_s20 }
0x1205   :  { %s3811_s22 = sadd.f32 1e-05, %s3810_s21 }
0x1207   :  { %v3812_v21 = vstv %s3811_s22 }
0x1208   :  { %4460 = vrsqrt.f32 %v3812_v21 }
0x1212   :  { %v4461_v60 = vpop.eup %4460 }
0x1213   :  { %4415 = vpush %v4461_v60 }
0x1214   :  { %4417 = vpush %v4036_v27 }
0x1244   :  { %s4416_s25 = spop %4415 }
0x1245   :  { %v3815_v44 = vstv %s4416_s25  ;;  %s4418_s26 = spop %4417 }
0x1246   :  { %v3816_v49 = vmul.f32 %v3815_v44, %v3790_v31  ;;  %v3817_v13 = vmul.f32 %v3815_v44, %v3791_v5  ;;  %v3818_v46 = vmul.f32 %v3815_v44, %v3792_v63  ;;  %s4038_s27 = smul.f32 0.0011961722, %s4418_s26 }
0x1248   :  { %v3821_v57 = vmul.f32 %v3820_v10, %v3816_v49  ;;  %v3822_v17 = vmul.f32 %v3820_v10, %v3817_v13  ;;  %v3823_v59 = vmul.f32 %v3820_v10, %v3818_v46  ;;  %v4039_v56 = vstv %s4038_s27 }
0x1249   :  { %v4040_v22 = vsub.f32 %v6270_v23, %v4039_v56  ;;  %v4041_v28 = vsub.f32 %v6272_v36, %v4039_v56  ;;  %v4042_v61 = vsub.f32 %v6278_v16, %v4039_v56 }
0x124a   :  { %v3826_v9 = vadd.f32 %v3825_v2, %v3821_v57  ;;  %v3827_v42 = vadd.f32 %v3825_v2, %v3822_v17  ;;  %v3828_v55 = vadd.f32 %v3825_v2, %v3823_v59 }
0x124b   :  { %v4043_v58 = vmul.f32 %v4040_v22, %v4040_v22  ;;  %v4044_v50 = vmul.f32 %v4041_v28, %v4041_v28  ;;  %v4045_v34 = vmul.f32 %v4042_v61, %v4042_v61 }
0x124c   :  { %v3829_v38 = vmax.f32 %v3826_v9, 0.0  ;;  %v3830_v20 = vmax.f32 %v3827_v42, 0.0  ;;  %v3831_v48 = vmax.f32 %v3828_v55, 0.0 }
0x124d   :  { %v4046_v26 = vsel %vm273_vm2, %v4043_v58, 0.0  ;;  %v4047_v12 = vsel %vm273_vm2, %v4044_v50, 0.0  ;;  %v4049_v36 = vsel %vm277_vm3, %v4045_v34, 0.0 }
0x124e   :  { %4309 = vst.msk [vmem:[%s6340_s5 + $0x150] sm:$0xff] %vm273_vm2, %v3829_v38  ;;  %4310 = vst.msk [vmem:[%s6340_s5 + $0x158] sm:$0xff] %vm273_vm2, %v3830_v20  ;;  %v4048_v23 = vadd.f32 %v4047_v12, %v4046_v26 }
0x124f   :  { %4311 = vst.msk [vmem:[%s6340_s5 + $0x160] sm:$0x3f] %vm277_vm3, %v3831_v48 }
0x1250   :  { %v4050_v16 = vadd.f32 %v4049_v36, %v4048_v23 }
0x1252   :  { %4051 = vadd.xlane.f32.xlu1 %v4050_v16 }
0x12df   :  { %v4052_v15 = vpop.xlane.xlu1 %4051 }
0x12e0   :  { %v4053_v41 = vrot.slane %v4052_v15, 4 }
0x12e2   :  { %v4054_v30 = vadd.f32 %v4053_v41, %v4052_v15 }
0x12e4   :  { %v4055_v47 = vrot.slane %v4054_v30, 2 }
0x12e6   :  { %v4056_v31 = vadd.f32 %v4055_v47, %v4054_v30 }
0x12e8   :  { %v4057_v5 = vrot.slane %v4056_v31, 1 }
0x12ea   :  { %v4058_v63 = vadd.f32 %v4057_v5, %v4056_v31 }
0x12ec   :  { %4419 = vpush %v4058_v63 }
0x131d   :  { %s4420_s9 = spop %4419 }
0x131e   :  { %s4060_s4 = smul.f32 0.0011961722, %s4420_s9 }
0x1320   :  { %s4061_s7 = sadd.f32 1e-05, %s4060_s4 }
0x1322   :  { %v4062_v7 = vstv %s4061_s7 }
0x1323   :  { %4462 = vrsqrt.f32 %v4062_v7 }
0x132d   :  { %v4463_v52 = vpop.eup %4462 }
0x132e   :  { %4421 = vpush %v4463_v52 }
0x135f   :  { %s4422_s12 = spop %4421 }
0x1360   :  { %v4065_v18 = vstv %s4422_s12 }
0x1361   :  { %v4066_v24 = vmul.f32 %v4065_v18, %v4040_v22  ;;  %v4067_v4 = vmul.f32 %v4065_v18, %v4041_v28  ;;  %v4068_v35 = vmul.f32 %v4065_v18, %v4042_v61 }
0x1363   :  { %v4071_v32 = vmul.f32 %v4070_v25, %v4066_v24  ;;  %v4072_v8 = vmul.f32 %v4070_v25, %v4067_v4  ;;  %v4073_v51 = vmul.f32 %v4070_v25, %v4068_v35 }
0x1365   :  { %v4076_v29 = vadd.f32 %v4075_v53, %v4071_v32  ;;  %v4077_v43 = vadd.f32 %v4075_v53, %v4072_v8  ;;  %v4078_v33 = vadd.f32 %v4075_v53, %v4073_v51 }
0x1367   :  { %v4079_v3 = vmax.f32 %v4076_v29, 0.0  ;;  %v4080_v54 = vmax.f32 %v4077_v43, 0.0  ;;  %v4081_v0 = vmax.f32 %v4078_v33, 0.0 }
0x1369   :  { %4324 = vst.msk [vmem:[%s6340_s5 + $0x168] sm:$0xff] %vm273_vm2, %v4079_v3  ;;  %4325 = vst.msk [vmem:[%s6340_s5 + $0x170] sm:$0xff] %vm273_vm2, %v4080_v54 }
0x136a   :  { %4326 = vst.msk [vmem:[%s6340_s5 + $0x178] sm:$0x3f] %vm277_vm3, %v4081_v0 }
0x136b   :  { %4090 = vsyncpa [#allocation3], 1 }
0x136c   :  { %4091 = vsyncpa [#allocation4], 1 }
0x136d   :  { %4092 = vsyncpa [#allocation5], 1 }
0x136e   :  { %4093 = vsyncpa [#allocation8], 1 }

</bundles_post_ra>
